<compile_context>
chip_gen: v7x
topology: tpu7x:2x2x1
jax: 0.10.0
libtpu: 0.0.40
codegen_flags: <defaults>
</compile_context>

<pallas_src>
import functools

import jax
import jax.numpy as jnp
import numpy as np
from jax.experimental import pallas as pl
from jax.experimental.pallas import tpu as pltpu

GATE_PASS_A = 3           # gate index for "a" (pass-through) used by residual_init
_VMEM_LIMIT = 32 << 20    # explicit scoped-VMEM limit; safe on v5e/v6e/v7x

# Each of the 16 gates expressed as coefficients of [1, a, b, a*b].
_GATE_AFFINE = jnp.array(
    [  # 1    a    b   ab
        [0.,  0.,  0.,  0.],   # 0  FALSE
        [0.,  0.,  0.,  1.],   # 1  a AND b
        [0.,  1.,  0., -1.],   # 2  a AND NOT b
        [0.,  1.,  0.,  0.],   # 3  a
        [0.,  0.,  1., -1.],   # 4  NOT a AND b
        [0.,  0.,  1.,  0.],   # 5  b
        [0.,  1.,  1., -2.],   # 6  XOR
        [0.,  1.,  1., -1.],   # 7  OR
        [1., -1., -1.,  1.],   # 8  NOR
        [1., -1., -1.,  2.],   # 9  XNOR
        [1.,  0., -1.,  0.],   # 10 NOT b
        [1.,  0., -1.,  1.],   # 11 a OR NOT b
        [1., -1.,  0.,  0.],   # 12 NOT a
        [1., -1.,  0.,  1.],   # 13 NOT a OR b
        [1.,  0.,  0., -1.],   # 14 NAND
        [1.,  0.,  0.,  0.],   # 15 TRUE
    ],
    dtype=jnp.float32)


def _round_up(x, m):
    return ((x + m - 1) // m) * m


def _pick_lane_tile(full_dim, bytes_per_lane, budget_bytes=6 << 20, min_grid=2):
    """Largest lane tile (multiple of 128) within a VMEM budget, capped so the
    'parallel' grid has >= min_grid steps (shards across v7x's two TCs)."""
    t = max(128, (budget_bytes // max(1, bytes_per_lane)) // 128 * 128)
    cap = max(128, _round_up(pl.cdiv(full_dim, min_grid), 128))
    t = min(t, cap)
    if t >= full_dim:
        return full_dim, 1
    return t, pl.cdiv(full_dim, t)


def _pick_row_tile(rows, bytes_per_row, budget_bytes=6 << 20, min_grid=2):
    """Row (sublane) tile, multiple of 8, VMEM-budgeted, grid >= min_grid if possible."""
    t = max(8, (budget_bytes // max(1, bytes_per_row)) // 8 * 8)
    cap = max(8, _round_up(pl.cdiv(rows, min_grid), 8))
    t = min(t, cap)
    if t >= rows:
        return rows, 1
    return t, pl.cdiv(rows, t)


def gate_coefficients(w):
    """Collapse the softmax 16-gate mixture to affine coeffs. w: (n,16) -> (n,4)."""
    return jax.nn.softmax(w, axis=-1) @ _GATE_AFFINE


def conv_coefficients(cw):
    """(Co, 12) affine coefficients for the conv gate tree (g1 | g2 | g3)."""
    return jnp.concatenate(
        [gate_coefficients(cw[k]) for k in ("w1", "w2", "w3")], axis=1)


# ---------------------------------------------------------------------------
# Pallas kernel: fused conv gate tree (g1, g2, g3) + 2x2 stride-2 OR/max pool.
# Layout: channels on sublanes, (pooled-spatial * batch) on lanes.
#   lv_ref : (16, C, TM) bf16 -- [tap*4 + pool_pos, channel, ho2*wo2*b]
#   c_ref  : (C, 12)     f32  -- per-channel affine coeffs for gates 1/2/3
#   o_ref  : (C, TM)     f32
# ---------------------------------------------------------------------------
def _conv_gate_pool_kernel(lv_ref, c_ref, o_ref):
    c = c_ref[...]                                           # (C, 12)
    # Hoist the 12 coefficient slices out of the pool loop (JAX does not CSE
    # broadcast_in_dim; re-slicing per pool position wastes VALU slots on v7x).
    cs = [c[:, j:j + 1] for j in range(12)]

    acc = None
    for p in range(4):                                       # 4 positions of 2x2 pool
        a1 = lv_ref[0 * 4 + p].astype(jnp.float32)
        b1 = lv_ref[1 * 4 + p].astype(jnp.float32)
        a2 = lv_ref[2 * 4 + p].astype(jnp.float32)
        b2 = lv_ref[3 * 4 + p].astype(jnp.float32)
        g1 = cs[0] + cs[1] * a1 + cs[2] * b1 + cs[3] * (a1 * b1)
        g2 = cs[4] + cs[5] * a2 + cs[6] * b2 + cs[7] * (a2 * b2)
        g3 = cs[8] + cs[9] * g1 + cs[10] * g2 + cs[11] * (g1 * g2)
        acc = g3 if acc is None else jnp.maximum(acc, g3)    # OR-pool relaxation
    o_ref[...] = acc


def conv_gate_pool(leaves, coef):
    """leaves: (16, C, M) bf16 ; coef: (C, 12) f32 -> (C, M) f32 pooled output."""
    _, C, M = leaves.shape
    bytes_per_lane = 16 * _round_up(C, 16) * 2 + _round_up(C, 8) * 4
    TM, grid = _pick_lane_tile(M, bytes_per_lane)
    return pl.pallas_call(
        _conv_gate_pool_kernel,
        out_shape=jax.ShapeDtypeStruct((C, M), jnp.float32),
        grid=(grid,),
        in_specs=[
            pl.BlockSpec((16, C, TM), lambda i: (0, 0, i)),
            pl.BlockSpec((C, 12), lambda i: (0, 0)),
        ],
        out_specs=pl.BlockSpec((C, TM), lambda i: (0, i)),
        compiler_params=pltpu.CompilerParams(
            dimension_semantics=("parallel",),
            vmem_limit_bytes=_VMEM_LIMIT),
    )(leaves, coef)


# ---------------------------------------------------------------------------
# Pallas kernel: affine soft gate for LogicLayer.  (B, N) with N on lanes.
# a/b stored bf16, compute f32.
# ---------------------------------------------------------------------------
def _fc_gate_kernel(a_ref, b_ref, c_ref, o_ref):
    a = a_ref[...].astype(jnp.float32)
    b = b_ref[...].astype(jnp.float32)
    c = c_ref[...]                                           # (4, TN)
    o_ref[...] = c[0:1] + c[1:2] * a + c[2:3] * b + c[3:4] * (a * b)


def fc_gate(a, b, coef):
    """a, b: (B, N) bf16 ; coef: (4, N) f32 -> (B, N) f32."""
    B, N = a.shape
    bytes_per_lane = 2 * _round_up(B, 16) * 2 + _round_up(B, 8) * 4
    TN, grid = _pick_lane_tile(N, bytes_per_lane)
    return pl.pallas_call(
        _fc_gate_kernel,
        out_shape=jax.ShapeDtypeStruct((B, N), jnp.float32),
        grid=(grid,),
        in_specs=[
            pl.BlockSpec((B, TN), lambda i: (0, i)),
            pl.BlockSpec((B, TN), lambda i: (0, i)),
            pl.BlockSpec((4, TN), lambda i: (0, i)),
        ],
        out_specs=pl.BlockSpec((B, TN), lambda i: (0, i)),
        compiler_params=pltpu.CompilerParams(
            dimension_semantics=("parallel",),
            vmem_limit_bytes=_VMEM_LIMIT),
    )(a, b, coef)


# ---------------------------------------------------------------------------
# Pallas kernel: final LogicLayer fused with GroupSum(k, tau).
# ---------------------------------------------------------------------------
def _fc_gate_gsum_kernel(a_ref, b_ref, c_ref, gm_ref, o_ref, *, inv_tau):
    a = a_ref[...].astype(jnp.float32)
    b = b_ref[...].astype(jnp.float32)
    c = c_ref[...]                                           # (4, N)
    y = c[0:1] + c[1:2] * a + c[2:3] * b + c[3:4] * (a * b)  # (TB, N) f32
    o_ref[...] = jnp.dot(y, gm_ref[...],
                         preferred_element_type=jnp.float32) * inv_tau


def fc_gate_group_sum(a, b, coef, k, tau):
    """Fused final LogicLayer + GroupSum: a, b (B, N) bf16, coef (4, N) -> (B, k)."""
    B, N = a.shape
    Bp = _round_up(B, 8)
    if Bp != B:                       # tiny row pad so the MXU matmul is aligned
        a = jnp.pad(a, ((0, Bp - B), (0, 0)))
        b = jnp.pad(b, ((0, Bp - B), (0, 0)))
    gmat = jnp.repeat(jnp.eye(k, dtype=jnp.float32), N // k, axis=0)   # (N, k)
    bytes_per_row = 2 * N * 2 + _round_up(k, 128) * 4
    TB, grid = _pick_row_tile(Bp, bytes_per_row)
    out = pl.pallas_call(
        functools.partial(_fc_gate_gsum_kernel, inv_tau=1.0 / tau),
        out_shape=jax.ShapeDtypeStruct((Bp, k), jnp.float32),
        grid=(grid,),
        in_specs=[
            pl.BlockSpec((TB, N), lambda i: (i, 0)),
            pl.BlockSpec((TB, N), lambda i: (i, 0)),
            pl.BlockSpec((4, N), lambda i: (0, 0)),
            pl.BlockSpec((N, k), lambda i: (0, 0)),
        ],
        out_specs=pl.BlockSpec((TB, k), lambda i: (i, 0)),
        compiler_params=pltpu.CompilerParams(
            dimension_semantics=("parallel",),
            vmem_limit_bytes=_VMEM_LIMIT),
    )(a, b, coef, gmat)
    return out[:B]


# ---------------------------------------------------------------------------
# Parameter construction: trainable gate weights (jnp, jit args) and static
# wiring (numpy, closed over the jit -> compile-time constants).
# ---------------------------------------------------------------------------
def init_gate_weights(key, n, residual_init=True):
    w = 0.1 * jax.random.normal(key, (n, 16), dtype=jnp.float32)
    if residual_init:
        w = w.at[:, GATE_PASS_A].add(5.0)
    return w


def init_model(key, input_channels=1, k_param=4, wiring_seed=0):
    c1, c2, c3 = k_param, 3 * k_param, 9 * k_param
    keys = jax.random.split(key, 6)
    rng = np.random.default_rng(wiring_seed)

    def conv_w(k, co):
        k1, k2, k3 = jax.random.split(k, 3)
        return dict(w1=init_gate_weights(k1, co), w2=init_gate_weights(k2, co),
                    w3=init_gate_weights(k3, co))

    weights = dict(
        conv1=conv_w(keys[0], c1),
        conv2=conv_w(keys[1], c2),
        conv3=conv_w(keys[2], c3),
        fc1=init_gate_weights(keys[3], 1280 * k_param),
        fc2=init_gate_weights(keys[4], 640 * k_param),
        fc3=init_gate_weights(keys[5], 320 * k_param),
    )

    def conv_wiring(ci, co, kern):
        return dict(leaf_idx=rng.integers(0, ci * kern * kern,
                                          size=(4, co)).astype(np.int32))

    def fc_wiring(n_in, n_out):
        return dict(a_idx=rng.integers(0, n_in, size=(n_out,)).astype(np.int32),
                    b_idx=rng.integers(0, n_in, size=(n_out,)).astype(np.int32))

    wiring = dict(
        conv1=conv_wiring(input_channels, c1, 5),
        conv2=conv_wiring(c1, c2, 3),
        conv3=conv_wiring(c2, c3, 3),
        fc1=fc_wiring(81 * k_param, 1280 * k_param),
        fc2=fc_wiring(1280 * k_param, 640 * k_param),
        fc3=fc_wiring(640 * k_param, 320 * k_param),
    )
    return weights, wiring


# ---------------------------------------------------------------------------
# Layer forward passes (index plumbing in plain JAX / numpy constants,
# gates / pool / group-sum in Pallas).
# ---------------------------------------------------------------------------
def conv_logic_layer(x, leaf_idx, coef, *, kernel, padding):
    """x: (Ci, H, W, B) -> (Co, Ho//2, Wo//2, B); gate tree + 2x2 OR-pool fused."""
    Ci, H, W, B = x.shape
    Co = coef.shape[0]
    if padding:
        x = jnp.pad(x, ((0, 0), (padding, padding), (padding, padding), (0, 0)))
    Hp, Wp = H + 2 * padding, W + 2 * padding
    Ho, Wo = Hp - kernel + 1, Wp - kernel + 1
    Ho2, Wo2 = Ho // 2, Wo // 2

    # Static (numpy) receptive-field decode: flat rf index = (ky*k+kx)*Ci + ci.
    # Becomes an XLA constant -> static gather, no per-step index arithmetic.
    leaf = np.asarray(leaf_idx)                               # (4, Co)
    ci = leaf % Ci
    kx = (leaf // Ci) % kernel
    ky = leaf // (Ci * kernel)
    py = np.array([0, 0, 1, 1])
    px = np.array([0, 1, 0, 1])
    ho = 2 * np.arange(Ho2)
    wo = 2 * np.arange(Wo2)
    row = (ky[:, None, :, None, None] + py[None, :, None, None, None]
           + ho[None, None, None, :, None])                  # (4,4,Co,Ho2,1)
    col = (kx[:, None, :, None, None] + px[None, :, None, None, None]
           + wo[None, None, None, None, :])                  # (4,4,Co,1,Wo2)
    flat = (ci[:, None, :, None, None] * (Hp * Wp) + row * Wp + col)
    flat = flat.reshape(-1).astype(np.int32)                 # (16*Co*Ho2*Wo2,)

    # Gather directly in (feature-major, batch-innermost) layout so the result
    # is already the kernel's (16, Co, Ho2*Wo2*B) layout -- no transpose of the
    # 16x-expanded leaves tensor.  Store leaves in bf16 (values in [0,1]).
    xt = x.reshape(Ci * Hp * Wp, B).astype(jnp.bfloat16)
    leaves = jnp.take(xt, flat, axis=0).reshape(16, Co, Ho2 * Wo2 * B)

    out = conv_gate_pool(leaves, coef)                        # (Co, Ho2*Wo2*B) f32
    return out.reshape(Co, Ho2, Wo2, B)


def logic_layer(x, wiring, w):
    # TODO(synk): longer term, fuse this wiring gather into the Pallas gate
    # kernel (scalar-prefetch row gather on a features-major layout) so the
    # (B, N) a/b slabs are never written to HBM; kept in XLA for robustness.
    xb = x.astype(jnp.bfloat16)
    a = jnp.take(xb, wiring["a_idx"], axis=1)                 # (B, N) bf16
    b = jnp.take(xb, wiring["b_idx"], axis=1)
    return fc_gate(a, b, gate_coefficients(w).T)


def conv_logic_mnist_model(x, weights, *, wiring, tau=6.5):
    """x: (B, Ci, H, W) NCHW -> (B, 10) logits."""
    x = jnp.transpose(x, (1, 2, 3, 0))                        # CHWB through conv stack
    x = conv_logic_layer(x, wiring["conv1"]["leaf_idx"],
                         conv_coefficients(weights["conv1"]), kernel=5, padding=0)
    x = conv_logic_layer(x, wiring["conv2"]["leaf_idx"],
                         conv_coefficients(weights["conv2"]), kernel=3, padding=1)
    x = conv_logic_layer(x, wiring["conv3"]["leaf_idx"],
                         conv_coefficients(weights["conv3"]), kernel=3, padding=1)
    Co, Hc, Wc, B = x.shape
    x = x.reshape(Co * Hc * Wc, B).T                          # == nn.Flatten() on NCHW
    x = logic_layer(x, wiring["fc1"], weights["fc1"])
    x = logic_layer(x, wiring["fc2"], weights["fc2"])
    # final LogicLayer fused with GroupSum(k=10, tau)
    xb = x.astype(jnp.bfloat16)
    a = jnp.take(xb, wiring["fc3"]["a_idx"], axis=1)
    b = jnp.take(xb, wiring["fc3"]["b_idx"], axis=1)
    return fc_gate_group_sum(a, b, gate_coefficients(weights["fc3"]).T, k=10, tau=tau)


if __name__ == "__main__":
    key = jax.random.PRNGKey(0)
    pkey, xkey = jax.random.split(key)

    k_param = 4                              # small width (reference default is 32)
    weights, wiring = init_model(pkey, input_channels=1, k_param=k_param)

    # MNIST-like input in [0, 1], NCHW.
    x = jax.random.uniform(xkey, (2, 1, 28, 28), dtype=jnp.float32)

    fwd = jax.jit(functools.partial(conv_logic_mnist_model, wiring=wiring, tau=6.5))
    out = jax.block_until_ready(fwd(x, weights))

    assert out.shape == (2, 10), out.shape
    assert bool(jnp.all(jnp.isfinite(out)))
    print("KERNEL_OK")
</pallas_src>

<mosaic_0001>
module attributes {stable_mosaic.version = 11 : i64} {
  func.func @_conv_gate_pool_kernel(%arg0: i32, %arg1: memref<16x4x256xbf16, #tpu.memory_space<vmem>>, %arg2: memref<4x12xf32, #tpu.memory_space<vmem>>, %arg3: memref<4x256xf32, #tpu.memory_space<vmem>>) attributes {dimension_semantics = [#tpu.dimension_semantics<parallel>], iteration_bounds = array<i64: 2>, scalar_prefetch = 0 : i64, scratch_operands = 0 : i64, tpu.core_type = #tpu.core_type<tc>, window_params = [{transform_indices = @transform_0, window_bounds = array<i64: 16, 4, 256>}, {pipeline_mode = #tpu.pipeline_mode<synchronous>, transform_indices = @transform_1, window_bounds = array<i64: 4, 12>}, {transform_indices = @transform_2, window_bounds = array<i64: 4, 256>}]} {
    %c0 = arith.constant 0 : index
    %c0_0 = arith.constant 0 : index
    %0 = vector.load %arg2[%c0, %c0_0] : memref<4x12xf32, #tpu.memory_space<vmem>>, vector<4x12xf32>
    %1 = vector.extract_strided_slice %0 {offsets = [0, 0], sizes = [4, 1], strides = [1, 1]} : vector<4x12xf32> to vector<4x1xf32>
    %2 = vector.extract_strided_slice %0 {offsets = [0, 1], sizes = [4, 1], strides = [1, 1]} : vector<4x12xf32> to vector<4x1xf32>
    %3 = vector.extract_strided_slice %0 {offsets = [0, 2], sizes = [4, 1], strides = [1, 1]} : vector<4x12xf32> to vector<4x1xf32>
    %4 = vector.extract_strided_slice %0 {offsets = [0, 3], sizes = [4, 1], strides = [1, 1]} : vector<4x12xf32> to vector<4x1xf32>
    %5 = vector.extract_strided_slice %0 {offsets = [0, 4], sizes = [4, 1], strides = [1, 1]} : vector<4x12xf32> to vector<4x1xf32>
    %6 = vector.extract_strided_slice %0 {offsets = [0, 5], sizes = [4, 1], strides = [1, 1]} : vector<4x12xf32> to vector<4x1xf32>
    %7 = vector.extract_strided_slice %0 {offsets = [0, 6], sizes = [4, 1], strides = [1, 1]} : vector<4x12xf32> to vector<4x1xf32>
    %8 = vector.extract_strided_slice %0 {offsets = [0, 7], sizes = [4, 1], strides = [1, 1]} : vector<4x12xf32> to vector<4x1xf32>
    %9 = vector.extract_strided_slice %0 {offsets = [0, 8], sizes = [4, 1], strides = [1, 1]} : vector<4x12xf32> to vector<4x1xf32>
    %10 = vector.extract_strided_slice %0 {offsets = [0, 9], sizes = [4, 1], strides = [1, 1]} : vector<4x12xf32> to vector<4x1xf32>
    %11 = vector.extract_strided_slice %0 {offsets = [0, 10], sizes = [4, 1], strides = [1, 1]} : vector<4x12xf32> to vector<4x1xf32>
    %12 = vector.extract_strided_slice %0 {offsets = [0, 11], sizes = [4, 1], strides = [1, 1]} : vector<4x12xf32> to vector<4x1xf32>
    %c0_1 = arith.constant 0 : index
    %c0_2 = arith.constant 0 : index
    %c0_3 = arith.constant 0 : index
    %13 = vector.load %arg1[%c0_1, %c0_2, %c0_3] : memref<16x4x256xbf16, #tpu.memory_space<vmem>>, vector<1x4x256xbf16>
    %14 = vector.shape_cast %13 : vector<1x4x256xbf16> to vector<4x256xbf16>
    %15 = arith.extf %14 : vector<4x256xbf16> to vector<4x256xf32>
    %c4 = arith.constant 4 : index
    %c0_4 = arith.constant 0 : index
    %c0_5 = arith.constant 0 : index
    %16 = vector.load %arg1[%c4, %c0_4, %c0_5] : memref<16x4x256xbf16, #tpu.memory_space<vmem>>, vector<1x4x256xbf16>
    %17 = vector.shape_cast %16 : vector<1x4x256xbf16> to vector<4x256xbf16>
    %18 = arith.extf %17 : vector<4x256xbf16> to vector<4x256xf32>
    %c8 = arith.constant 8 : index
    %c0_6 = arith.constant 0 : index
    %c0_7 = arith.constant 0 : index
    %19 = vector.load %arg1[%c8, %c0_6, %c0_7] : memref<16x4x256xbf16, #tpu.memory_space<vmem>>, vector<1x4x256xbf16>
    %20 = vector.shape_cast %19 : vector<1x4x256xbf16> to vector<4x256xbf16>
    %21 = arith.extf %20 : vector<4x256xbf16> to vector<4x256xf32>
    %c12 = arith.constant 12 : index
    %c0_8 = arith.constant 0 : index
    %c0_9 = arith.constant 0 : index
    %22 = vector.load %arg1[%c12, %c0_8, %c0_9] : memref<16x4x256xbf16, #tpu.memory_space<vmem>>, vector<1x4x256xbf16>
    %23 = vector.shape_cast %22 : vector<1x4x256xbf16> to vector<4x256xbf16>
    %24 = arith.extf %23 : vector<4x256xbf16> to vector<4x256xf32>
    %25 = vector.broadcast %2 : vector<4x1xf32> to vector<4x256xf32>
    %26 = arith.mulf %25, %15 : vector<4x256xf32>
    %27 = vector.broadcast %1 : vector<4x1xf32> to vector<4x256xf32>
    %28 = arith.addf %27, %26 : vector<4x256xf32>
    %29 = vector.broadcast %3 : vector<4x1xf32> to vector<4x256xf32>
    %30 = arith.mulf %29, %18 : vector<4x256xf32>
    %31 = arith.addf %28, %30 : vector<4x256xf32>
    %32 = arith.mulf %15, %18 : vector<4x256xf32>
    %33 = vector.broadcast %4 : vector<4x1xf32> to vector<4x256xf32>
    %34 = arith.mulf %33, %32 : vector<4x256xf32>
    %35 = arith.addf %31, %34 : vector<4x256xf32>
    %36 = vector.broadcast %6 : vector<4x1xf32> to vector<4x256xf32>
    %37 = arith.mulf %36, %21 : vector<4x256xf32>
    %38 = vector.broadcast %5 : vector<4x1xf32> to vector<4x256xf32>
    %39 = arith.addf %38, %37 : vector<4x256xf32>
    %40 = vector.broadcast %7 : vector<4x1xf32> to vector<4x256xf32>
    %41 = arith.mulf %40, %24 : vector<4x256xf32>
    %42 = arith.addf %39, %41 : vector<4x256xf32>
    %43 = arith.mulf %21, %24 : vector<4x256xf32>
    %44 = vector.broadcast %8 : vector<4x1xf32> to vector<4x256xf32>
    %45 = arith.mulf %44, %43 : vector<4x256xf32>
    %46 = arith.addf %42, %45 : vector<4x256xf32>
    %47 = vector.broadcast %10 : vector<4x1xf32> to vector<4x256xf32>
    %48 = arith.mulf %47, %35 : vector<4x256xf32>
    %49 = vector.broadcast %9 : vector<4x1xf32> to vector<4x256xf32>
    %50 = arith.addf %49, %48 : vector<4x256xf32>
    %51 = vector.broadcast %11 : vector<4x1xf32> to vector<4x256xf32>
    %52 = arith.mulf %51, %46 : vector<4x256xf32>
    %53 = arith.addf %50, %52 : vector<4x256xf32>
    %54 = arith.mulf %35, %46 : vector<4x256xf32>
    %55 = vector.broadcast %12 : vector<4x1xf32> to vector<4x256xf32>
    %56 = arith.mulf %55, %54 : vector<4x256xf32>
    %57 = arith.addf %53, %56 : vector<4x256xf32>
    %c1 = arith.constant 1 : index
    %c0_10 = arith.constant 0 : index
    %c0_11 = arith.constant 0 : index
    %58 = vector.load %arg1[%c1, %c0_10, %c0_11] : memref<16x4x256xbf16, #tpu.memory_space<vmem>>, vector<1x4x256xbf16>
    %59 = vector.shape_cast %58 : vector<1x4x256xbf16> to vector<4x256xbf16>
    %60 = arith.extf %59 : vector<4x256xbf16> to vector<4x256xf32>
    %c5 = arith.constant 5 : index
    %c0_12 = arith.constant 0 : index
    %c0_13 = arith.constant 0 : index
    %61 = vector.load %arg1[%c5, %c0_12, %c0_13] : memref<16x4x256xbf16, #tpu.memory_space<vmem>>, vector<1x4x256xbf16>
    %62 = vector.shape_cast %61 : vector<1x4x256xbf16> to vector<4x256xbf16>
    %63 = arith.extf %62 : vector<4x256xbf16> to vector<4x256xf32>
    %c9 = arith.constant 9 : index
    %c0_14 = arith.constant 0 : index
    %c0_15 = arith.constant 0 : index
    %64 = vector.load %arg1[%c9, %c0_14, %c0_15] : memref<16x4x256xbf16, #tpu.memory_space<vmem>>, vector<1x4x256xbf16>
    %65 = vector.shape_cast %64 : vector<1x4x256xbf16> to vector<4x256xbf16>
    %66 = arith.extf %65 : vector<4x256xbf16> to vector<4x256xf32>
    %c13 = arith.constant 13 : index
    %c0_16 = arith.constant 0 : index
    %c0_17 = arith.constant 0 : index
    %67 = vector.load %arg1[%c13, %c0_16, %c0_17] : memref<16x4x256xbf16, #tpu.memory_space<vmem>>, vector<1x4x256xbf16>
    %68 = vector.shape_cast %67 : vector<1x4x256xbf16> to vector<4x256xbf16>
    %69 = arith.extf %68 : vector<4x256xbf16> to vector<4x256xf32>
    %70 = vector.broadcast %2 : vector<4x1xf32> to vector<4x256xf32>
    %71 = arith.mulf %70, %60 : vector<4x256xf32>
    %72 = vector.broadcast %1 : vector<4x1xf32> to vector<4x256xf32>
    %73 = arith.addf %72, %71 : vector<4x256xf32>
    %74 = vector.broadcast %3 : vector<4x1xf32> to vector<4x256xf32>
    %75 = arith.mulf %74, %63 : vector<4x256xf32>
    %76 = arith.addf %73, %75 : vector<4x256xf32>
    %77 = arith.mulf %60, %63 : vector<4x256xf32>
    %78 = vector.broadcast %4 : vector<4x1xf32> to vector<4x256xf32>
    %79 = arith.mulf %78, %77 : vector<4x256xf32>
    %80 = arith.addf %76, %79 : vector<4x256xf32>
    %81 = vector.broadcast %6 : vector<4x1xf32> to vector<4x256xf32>
    %82 = arith.mulf %81, %66 : vector<4x256xf32>
    %83 = vector.broadcast %5 : vector<4x1xf32> to vector<4x256xf32>
    %84 = arith.addf %83, %82 : vector<4x256xf32>
    %85 = vector.broadcast %7 : vector<4x1xf32> to vector<4x256xf32>
    %86 = arith.mulf %85, %69 : vector<4x256xf32>
    %87 = arith.addf %84, %86 : vector<4x256xf32>
    %88 = arith.mulf %66, %69 : vector<4x256xf32>
    %89 = vector.broadcast %8 : vector<4x1xf32> to vector<4x256xf32>
    %90 = arith.mulf %89, %88 : vector<4x256xf32>
    %91 = arith.addf %87, %90 : vector<4x256xf32>
    %92 = vector.broadcast %10 : vector<4x1xf32> to vector<4x256xf32>
    %93 = arith.mulf %92, %80 : vector<4x256xf32>
    %94 = vector.broadcast %9 : vector<4x1xf32> to vector<4x256xf32>
    %95 = arith.addf %94, %93 : vector<4x256xf32>
    %96 = vector.broadcast %11 : vector<4x1xf32> to vector<4x256xf32>
    %97 = arith.mulf %96, %91 : vector<4x256xf32>
    %98 = arith.addf %95, %97 : vector<4x256xf32>
    %99 = arith.mulf %80, %91 : vector<4x256xf32>
    %100 = vector.broadcast %12 : vector<4x1xf32> to vector<4x256xf32>
    %101 = arith.mulf %100, %99 : vector<4x256xf32>
    %102 = arith.addf %98, %101 : vector<4x256xf32>
    %103 = arith.maximumf %57, %102 : vector<4x256xf32>
    %c2 = arith.constant 2 : index
    %c0_18 = arith.constant 0 : index
    %c0_19 = arith.constant 0 : index
    %104 = vector.load %arg1[%c2, %c0_18, %c0_19] : memref<16x4x256xbf16, #tpu.memory_space<vmem>>, vector<1x4x256xbf16>
    %105 = vector.shape_cast %104 : vector<1x4x256xbf16> to vector<4x256xbf16>
    %106 = arith.extf %105 : vector<4x256xbf16> to vector<4x256xf32>
    %c6 = arith.constant 6 : index
    %c0_20 = arith.constant 0 : index
    %c0_21 = arith.constant 0 : index
    %107 = vector.load %arg1[%c6, %c0_20, %c0_21] : memref<16x4x256xbf16, #tpu.memory_space<vmem>>, vector<1x4x256xbf16>
    %108 = vector.shape_cast %107 : vector<1x4x256xbf16> to vector<4x256xbf16>
    %109 = arith.extf %108 : vector<4x256xbf16> to vector<4x256xf32>
    %c10 = arith.constant 10 : index
    %c0_22 = arith.constant 0 : index
    %c0_23 = arith.constant 0 : index
    %110 = vector.load %arg1[%c10, %c0_22, %c0_23] : memref<16x4x256xbf16, #tpu.memory_space<vmem>>, vector<1x4x256xbf16>
    %111 = vector.shape_cast %110 : vector<1x4x256xbf16> to vector<4x256xbf16>
    %112 = arith.extf %111 : vector<4x256xbf16> to vector<4x256xf32>
    %c14 = arith.constant 14 : index
    %c0_24 = arith.constant 0 : index
    %c0_25 = arith.constant 0 : index
    %113 = vector.load %arg1[%c14, %c0_24, %c0_25] : memref<16x4x256xbf16, #tpu.memory_space<vmem>>, vector<1x4x256xbf16>
    %114 = vector.shape_cast %113 : vector<1x4x256xbf16> to vector<4x256xbf16>
    %115 = arith.extf %114 : vector<4x256xbf16> to vector<4x256xf32>
    %116 = vector.broadcast %2 : vector<4x1xf32> to vector<4x256xf32>
    %117 = arith.mulf %116, %106 : vector<4x256xf32>
    %118 = vector.broadcast %1 : vector<4x1xf32> to vector<4x256xf32>
    %119 = arith.addf %118, %117 : vector<4x256xf32>
    %120 = vector.broadcast %3 : vector<4x1xf32> to vector<4x256xf32>
    %121 = arith.mulf %120, %109 : vector<4x256xf32>
    %122 = arith.addf %119, %121 : vector<4x256xf32>
    %123 = arith.mulf %106, %109 : vector<4x256xf32>
    %124 = vector.broadcast %4 : vector<4x1xf32> to vector<4x256xf32>
    %125 = arith.mulf %124, %123 : vector<4x256xf32>
    %126 = arith.addf %122, %125 : vector<4x256xf32>
    %127 = vector.broadcast %6 : vector<4x1xf32> to vector<4x256xf32>
    %128 = arith.mulf %127, %112 : vector<4x256xf32>
    %129 = vector.broadcast %5 : vector<4x1xf32> to vector<4x256xf32>
    %130 = arith.addf %129, %128 : vector<4x256xf32>
    %131 = vector.broadcast %7 : vector<4x1xf32> to vector<4x256xf32>
    %132 = arith.mulf %131, %115 : vector<4x256xf32>
    %133 = arith.addf %130, %132 : vector<4x256xf32>
    %134 = arith.mulf %112, %115 : vector<4x256xf32>
    %135 = vector.broadcast %8 : vector<4x1xf32> to vector<4x256xf32>
    %136 = arith.mulf %135, %134 : vector<4x256xf32>
    %137 = arith.addf %133, %136 : vector<4x256xf32>
    %138 = vector.broadcast %10 : vector<4x1xf32> to vector<4x256xf32>
    %139 = arith.mulf %138, %126 : vector<4x256xf32>
    %140 = vector.broadcast %9 : vector<4x1xf32> to vector<4x256xf32>
    %141 = arith.addf %140, %139 : vector<4x256xf32>
    %142 = vector.broadcast %11 : vector<4x1xf32> to vector<4x256xf32>
    %143 = arith.mulf %142, %137 : vector<4x256xf32>
    %144 = arith.addf %141, %143 : vector<4x256xf32>
    %145 = arith.mulf %126, %137 : vector<4x256xf32>
    %146 = vector.broadcast %12 : vector<4x1xf32> to vector<4x256xf32>
    %147 = arith.mulf %146, %145 : vector<4x256xf32>
    %148 = arith.addf %144, %147 : vector<4x256xf32>
    %149 = arith.maximumf %103, %148 : vector<4x256xf32>
    %c3 = arith.constant 3 : index
    %c0_26 = arith.constant 0 : index
    %c0_27 = arith.constant 0 : index
    %150 = vector.load %arg1[%c3, %c0_26, %c0_27] : memref<16x4x256xbf16, #tpu.memory_space<vmem>>, vector<1x4x256xbf16>
    %151 = vector.shape_cast %150 : vector<1x4x256xbf16> to vector<4x256xbf16>
    %152 = arith.extf %151 : vector<4x256xbf16> to vector<4x256xf32>
    %c7 = arith.constant 7 : index
    %c0_28 = arith.constant 0 : index
    %c0_29 = arith.constant 0 : index
    %153 = vector.load %arg1[%c7, %c0_28, %c0_29] : memref<16x4x256xbf16, #tpu.memory_space<vmem>>, vector<1x4x256xbf16>
    %154 = vector.shape_cast %153 : vector<1x4x256xbf16> to vector<4x256xbf16>
    %155 = arith.extf %154 : vector<4x256xbf16> to vector<4x256xf32>
    %c11 = arith.constant 11 : index
    %c0_30 = arith.constant 0 : index
    %c0_31 = arith.constant 0 : index
    %156 = vector.load %arg1[%c11, %c0_30, %c0_31] : memref<16x4x256xbf16, #tpu.memory_space<vmem>>, vector<1x4x256xbf16>
    %157 = vector.shape_cast %156 : vector<1x4x256xbf16> to vector<4x256xbf16>
    %158 = arith.extf %157 : vector<4x256xbf16> to vector<4x256xf32>
    %c15 = arith.constant 15 : index
    %c0_32 = arith.constant 0 : index
    %c0_33 = arith.constant 0 : index
    %159 = vector.load %arg1[%c15, %c0_32, %c0_33] : memref<16x4x256xbf16, #tpu.memory_space<vmem>>, vector<1x4x256xbf16>
    %160 = vector.shape_cast %159 : vector<1x4x256xbf16> to vector<4x256xbf16>
    %161 = arith.extf %160 : vector<4x256xbf16> to vector<4x256xf32>
    %162 = vector.broadcast %2 : vector<4x1xf32> to vector<4x256xf32>
    %163 = arith.mulf %162, %152 : vector<4x256xf32>
    %164 = vector.broadcast %1 : vector<4x1xf32> to vector<4x256xf32>
    %165 = arith.addf %164, %163 : vector<4x256xf32>
    %166 = vector.broadcast %3 : vector<4x1xf32> to vector<4x256xf32>
    %167 = arith.mulf %166, %155 : vector<4x256xf32>
    %168 = arith.addf %165, %167 : vector<4x256xf32>
    %169 = arith.mulf %152, %155 : vector<4x256xf32>
    %170 = vector.broadcast %4 : vector<4x1xf32> to vector<4x256xf32>
    %171 = arith.mulf %170, %169 : vector<4x256xf32>
    %172 = arith.addf %168, %171 : vector<4x256xf32>
    %173 = vector.broadcast %6 : vector<4x1xf32> to vector<4x256xf32>
    %174 = arith.mulf %173, %158 : vector<4x256xf32>
    %175 = vector.broadcast %5 : vector<4x1xf32> to vector<4x256xf32>
    %176 = arith.addf %175, %174 : vector<4x256xf32>
    %177 = vector.broadcast %7 : vector<4x1xf32> to vector<4x256xf32>
    %178 = arith.mulf %177, %161 : vector<4x256xf32>
    %179 = arith.addf %176, %178 : vector<4x256xf32>
    %180 = arith.mulf %158, %161 : vector<4x256xf32>
    %181 = vector.broadcast %8 : vector<4x1xf32> to vector<4x256xf32>
    %182 = arith.mulf %181, %180 : vector<4x256xf32>
    %183 = arith.addf %179, %182 : vector<4x256xf32>
    %184 = vector.broadcast %10 : vector<4x1xf32> to vector<4x256xf32>
    %185 = arith.mulf %184, %172 : vector<4x256xf32>
    %186 = vector.broadcast %9 : vector<4x1xf32> to vector<4x256xf32>
    %187 = arith.addf %186, %185 : vector<4x256xf32>
    %188 = vector.broadcast %11 : vector<4x1xf32> to vector<4x256xf32>
    %189 = arith.mulf %188, %183 : vector<4x256xf32>
    %190 = arith.addf %187, %189 : vector<4x256xf32>
    %191 = arith.mulf %172, %183 : vector<4x256xf32>
    %192 = vector.broadcast %12 : vector<4x1xf32> to vector<4x256xf32>
    %193 = arith.mulf %192, %191 : vector<4x256xf32>
    %194 = arith.addf %190, %193 : vector<4x256xf32>
    %195 = arith.maximumf %149, %194 : vector<4x256xf32>
    %c0_34 = arith.constant 0 : index
    %c0_35 = arith.constant 0 : index
    %196 = vector.load %arg3[%c0_34, %c0_35] : memref<4x256xf32, #tpu.memory_space<vmem>>, vector<4x256xf32>
    tpu.vector_store %arg3[%c0_34, %c0_35], %195 {strides = array<i32>} : memref<4x256xf32, #tpu.memory_space<vmem>>, vector<4x256xf32>,
    return
  }
  func.func @transform_0(%arg0: i32) -> (i32, i32, i32) {
    %c0_i32 = arith.constant 0 : i32
    %c0_i32_0 = arith.constant 0 : i32
    %c0_i32_1 = arith.constant 0 : i32
    return %c0_i32, %c0_i32_0, %arg0 : i32, i32, i32
  }
  func.func @transform_1(%arg0: i32) -> (i32, i32) {
    %c0_i32 = arith.constant 0 : i32
    %c0_i32_0 = arith.constant 0 : i32
    %c0_i32_1 = arith.constant 0 : i32
    return %c0_i32, %c0_i32_0 : i32, i32
  }
  func.func @transform_2(%arg0: i32) -> (i32, i32) {
    %c0_i32 = arith.constant 0 : i32
    %c0_i32_0 = arith.constant 0 : i32
    return %c0_i32, %arg0 : i32, i32
  }
}

module attributes {stable_mosaic.version = 11 : i64} {
  func.func @_conv_gate_pool_kernel(%arg0: i32, %arg1: memref<16x12x72xbf16, #tpu.memory_space<vmem>>, %arg2: memref<12x12xf32, #tpu.memory_space<vmem>>, %arg3: memref<12x72xf32, #tpu.memory_space<vmem>>) attributes {dimension_semantics = [#tpu.dimension_semantics<parallel>], iteration_bounds = array<i64: 1>, scalar_prefetch = 0 : i64, scratch_operands = 0 : i64, tpu.core_type = #tpu.core_type<tc>, window_params = [{transform_indices = @transform_0, window_bounds = array<i64: 16, 12, 72>}, {pipeline_mode = #tpu.pipeline_mode<synchronous>, transform_indices = @transform_1, window_bounds = array<i64: 12, 12>}, {transform_indices = @transform_2, window_bounds = array<i64: 12, 72>}]} {
    %c0 = arith.constant 0 : index
    %c0_0 = arith.constant 0 : index
    %0 = vector.load %arg2[%c0, %c0_0] : memref<12x12xf32, #tpu.memory_space<vmem>>, vector<12x12xf32>
    %1 = vector.extract_strided_slice %0 {offsets = [0, 0], sizes = [12, 1], strides = [1, 1]} : vector<12x12xf32> to vector<12x1xf32>
    %2 = vector.extract_strided_slice %0 {offsets = [0, 1], sizes = [12, 1], strides = [1, 1]} : vector<12x12xf32> to vector<12x1xf32>
    %3 = vector.extract_strided_slice %0 {offsets = [0, 2], sizes = [12, 1], strides = [1, 1]} : vector<12x12xf32> to vector<12x1xf32>
    %4 = vector.extract_strided_slice %0 {offsets = [0, 3], sizes = [12, 1], strides = [1, 1]} : vector<12x12xf32> to vector<12x1xf32>
    %5 = vector.extract_strided_slice %0 {offsets = [0, 4], sizes = [12, 1], strides = [1, 1]} : vector<12x12xf32> to vector<12x1xf32>
    %6 = vector.extract_strided_slice %0 {offsets = [0, 5], sizes = [12, 1], strides = [1, 1]} : vector<12x12xf32> to vector<12x1xf32>
    %7 = vector.extract_strided_slice %0 {offsets = [0, 6], sizes = [12, 1], strides = [1, 1]} : vector<12x12xf32> to vector<12x1xf32>
    %8 = vector.extract_strided_slice %0 {offsets = [0, 7], sizes = [12, 1], strides = [1, 1]} : vector<12x12xf32> to vector<12x1xf32>
    %9 = vector.extract_strided_slice %0 {offsets = [0, 8], sizes = [12, 1], strides = [1, 1]} : vector<12x12xf32> to vector<12x1xf32>
    %10 = vector.extract_strided_slice %0 {offsets = [0, 9], sizes = [12, 1], strides = [1, 1]} : vector<12x12xf32> to vector<12x1xf32>
    %11 = vector.extract_strided_slice %0 {offsets = [0, 10], sizes = [12, 1], strides = [1, 1]} : vector<12x12xf32> to vector<12x1xf32>
    %12 = vector.extract_strided_slice %0 {offsets = [0, 11], sizes = [12, 1], strides = [1, 1]} : vector<12x12xf32> to vector<12x1xf32>
    %c0_1 = arith.constant 0 : index
    %c0_2 = arith.constant 0 : index
    %c0_3 = arith.constant 0 : index
    %13 = vector.load %arg1[%c0_1, %c0_2, %c0_3] : memref<16x12x72xbf16, #tpu.memory_space<vmem>>, vector<1x12x72xbf16>
    %14 = vector.shape_cast %13 : vector<1x12x72xbf16> to vector<12x72xbf16>
    %15 = arith.extf %14 : vector<12x72xbf16> to vector<12x72xf32>
    %c4 = arith.constant 4 : index
    %c0_4 = arith.constant 0 : index
    %c0_5 = arith.constant 0 : index
    %16 = vector.load %arg1[%c4, %c0_4, %c0_5] : memref<16x12x72xbf16, #tpu.memory_space<vmem>>, vector<1x12x72xbf16>
    %17 = vector.shape_cast %16 : vector<1x12x72xbf16> to vector<12x72xbf16>
    %18 = arith.extf %17 : vector<12x72xbf16> to vector<12x72xf32>
    %c8 = arith.constant 8 : index
    %c0_6 = arith.constant 0 : index
    %c0_7 = arith.constant 0 : index
    %19 = vector.load %arg1[%c8, %c0_6, %c0_7] : memref<16x12x72xbf16, #tpu.memory_space<vmem>>, vector<1x12x72xbf16>
    %20 = vector.shape_cast %19 : vector<1x12x72xbf16> to vector<12x72xbf16>
    %21 = arith.extf %20 : vector<12x72xbf16> to vector<12x72xf32>
    %c12 = arith.constant 12 : index
    %c0_8 = arith.constant 0 : index
    %c0_9 = arith.constant 0 : index
    %22 = vector.load %arg1[%c12, %c0_8, %c0_9] : memref<16x12x72xbf16, #tpu.memory_space<vmem>>, vector<1x12x72xbf16>
    %23 = vector.shape_cast %22 : vector<1x12x72xbf16> to vector<12x72xbf16>
    %24 = arith.extf %23 : vector<12x72xbf16> to vector<12x72xf32>
    %25 = vector.broadcast %2 : vector<12x1xf32> to vector<12x72xf32>
    %26 = arith.mulf %25, %15 : vector<12x72xf32>
    %27 = vector.broadcast %1 : vector<12x1xf32> to vector<12x72xf32>
    %28 = arith.addf %27, %26 : vector<12x72xf32>
    %29 = vector.broadcast %3 : vector<12x1xf32> to vector<12x72xf32>
    %30 = arith.mulf %29, %18 : vector<12x72xf32>
    %31 = arith.addf %28, %30 : vector<12x72xf32>
    %32 = arith.mulf %15, %18 : vector<12x72xf32>
    %33 = vector.broadcast %4 : vector<12x1xf32> to vector<12x72xf32>
    %34 = arith.mulf %33, %32 : vector<12x72xf32>
    %35 = arith.addf %31, %34 : vector<12x72xf32>
    %36 = vector.broadcast %6 : vector<12x1xf32> to vector<12x72xf32>
    %37 = arith.mulf %36, %21 : vector<12x72xf32>
    %38 = vector.broadcast %5 : vector<12x1xf32> to vector<12x72xf32>
    %39 = arith.addf %38, %37 : vector<12x72xf32>
    %40 = vector.broadcast %7 : vector<12x1xf32> to vector<12x72xf32>
    %41 = arith.mulf %40, %24 : vector<12x72xf32>
    %42 = arith.addf %39, %41 : vector<12x72xf32>
    %43 = arith.mulf %21, %24 : vector<12x72xf32>
    %44 = vector.broadcast %8 : vector<12x1xf32> to vector<12x72xf32>
    %45 = arith.mulf %44, %43 : vector<12x72xf32>
    %46 = arith.addf %42, %45 : vector<12x72xf32>
    %47 = vector.broadcast %10 : vector<12x1xf32> to vector<12x72xf32>
    %48 = arith.mulf %47, %35 : vector<12x72xf32>
    %49 = vector.broadcast %9 : vector<12x1xf32> to vector<12x72xf32>
    %50 = arith.addf %49, %48 : vector<12x72xf32>
    %51 = vector.broadcast %11 : vector<12x1xf32> to vector<12x72xf32>
    %52 = arith.mulf %51, %46 : vector<12x72xf32>
    %53 = arith.addf %50, %52 : vector<12x72xf32>
    %54 = arith.mulf %35, %46 : vector<12x72xf32>
    %55 = vector.broadcast %12 : vector<12x1xf32> to vector<12x72xf32>
    %56 = arith.mulf %55, %54 : vector<12x72xf32>
    %57 = arith.addf %53, %56 : vector<12x72xf32>
    %c1 = arith.constant 1 : index
    %c0_10 = arith.constant 0 : index
    %c0_11 = arith.constant 0 : index
    %58 = vector.load %arg1[%c1, %c0_10, %c0_11] : memref<16x12x72xbf16, #tpu.memory_space<vmem>>, vector<1x12x72xbf16>
    %59 = vector.shape_cast %58 : vector<1x12x72xbf16> to vector<12x72xbf16>
    %60 = arith.extf %59 : vector<12x72xbf16> to vector<12x72xf32>
    %c5 = arith.constant 5 : index
    %c0_12 = arith.constant 0 : index
    %c0_13 = arith.constant 0 : index
    %61 = vector.load %arg1[%c5, %c0_12, %c0_13] : memref<16x12x72xbf16, #tpu.memory_space<vmem>>, vector<1x12x72xbf16>
    %62 = vector.shape_cast %61 : vector<1x12x72xbf16> to vector<12x72xbf16>
    %63 = arith.extf %62 : vector<12x72xbf16> to vector<12x72xf32>
    %c9 = arith.constant 9 : index
    %c0_14 = arith.constant 0 : index
    %c0_15 = arith.constant 0 : index
    %64 = vector.load %arg1[%c9, %c0_14, %c0_15] : memref<16x12x72xbf16, #tpu.memory_space<vmem>>, vector<1x12x72xbf16>
    %65 = vector.shape_cast %64 : vector<1x12x72xbf16> to vector<12x72xbf16>
    %66 = arith.extf %65 : vector<12x72xbf16> to vector<12x72xf32>
    %c13 = arith.constant 13 : index
    %c0_16 = arith.constant 0 : index
    %c0_17 = arith.constant 0 : index
    %67 = vector.load %arg1[%c13, %c0_16, %c0_17] : memref<16x12x72xbf16, #tpu.memory_space<vmem>>, vector<1x12x72xbf16>
    %68 = vector.shape_cast %67 : vector<1x12x72xbf16> to vector<12x72xbf16>
    %69 = arith.extf %68 : vector<12x72xbf16> to vector<12x72xf32>
    %70 = vector.broadcast %2 : vector<12x1xf32> to vector<12x72xf32>
    %71 = arith.mulf %70, %60 : vector<12x72xf32>
    %72 = vector.broadcast %1 : vector<12x1xf32> to vector<12x72xf32>
    %73 = arith.addf %72, %71 : vector<12x72xf32>
    %74 = vector.broadcast %3 : vector<12x1xf32> to vector<12x72xf32>
    %75 = arith.mulf %74, %63 : vector<12x72xf32>
    %76 = arith.addf %73, %75 : vector<12x72xf32>
    %77 = arith.mulf %60, %63 : vector<12x72xf32>
    %78 = vector.broadcast %4 : vector<12x1xf32> to vector<12x72xf32>
    %79 = arith.mulf %78, %77 : vector<12x72xf32>
    %80 = arith.addf %76, %79 : vector<12x72xf32>
    %81 = vector.broadcast %6 : vector<12x1xf32> to vector<12x72xf32>
    %82 = arith.mulf %81, %66 : vector<12x72xf32>
    %83 = vector.broadcast %5 : vector<12x1xf32> to vector<12x72xf32>
    %84 = arith.addf %83, %82 : vector<12x72xf32>
    %85 = vector.broadcast %7 : vector<12x1xf32> to vector<12x72xf32>
    %86 = arith.mulf %85, %69 : vector<12x72xf32>
    %87 = arith.addf %84, %86 : vector<12x72xf32>
    %88 = arith.mulf %66, %69 : vector<12x72xf32>
    %89 = vector.broadcast %8 : vector<12x1xf32> to vector<12x72xf32>
    %90 = arith.mulf %89, %88 : vector<12x72xf32>
    %91 = arith.addf %87, %90 : vector<12x72xf32>
    %92 = vector.broadcast %10 : vector<12x1xf32> to vector<12x72xf32>
    %93 = arith.mulf %92, %80 : vector<12x72xf32>
    %94 = vector.broadcast %9 : vector<12x1xf32> to vector<12x72xf32>
    %95 = arith.addf %94, %93 : vector<12x72xf32>
    %96 = vector.broadcast %11 : vector<12x1xf32> to vector<12x72xf32>
    %97 = arith.mulf %96, %91 : vector<12x72xf32>
    %98 = arith.addf %95, %97 : vector<12x72xf32>
    %99 = arith.mulf %80, %91 : vector<12x72xf32>
    %100 = vector.broadcast %12 : vector<12x1xf32> to vector<12x72xf32>
    %101 = arith.mulf %100, %99 : vector<12x72xf32>
    %102 = arith.addf %98, %101 : vector<12x72xf32>
    %103 = arith.maximumf %57, %102 : vector<12x72xf32>
    %c2 = arith.constant 2 : index
    %c0_18 = arith.constant 0 : index
    %c0_19 = arith.constant 0 : index
    %104 = vector.load %arg1[%c2, %c0_18, %c0_19] : memref<16x12x72xbf16, #tpu.memory_space<vmem>>, vector<1x12x72xbf16>
    %105 = vector.shape_cast %104 : vector<1x12x72xbf16> to vector<12x72xbf16>
    %106 = arith.extf %105 : vector<12x72xbf16> to vector<12x72xf32>
    %c6 = arith.constant 6 : index
    %c0_20 = arith.constant 0 : index
    %c0_21 = arith.constant 0 : index
    %107 = vector.load %arg1[%c6, %c0_20, %c0_21] : memref<16x12x72xbf16, #tpu.memory_space<vmem>>, vector<1x12x72xbf16>
    %108 = vector.shape_cast %107 : vector<1x12x72xbf16> to vector<12x72xbf16>
    %109 = arith.extf %108 : vector<12x72xbf16> to vector<12x72xf32>
    %c10 = arith.constant 10 : index
    %c0_22 = arith.constant 0 : index
    %c0_23 = arith.constant 0 : index
    %110 = vector.load %arg1[%c10, %c0_22, %c0_23] : memref<16x12x72xbf16, #tpu.memory_space<vmem>>, vector<1x12x72xbf16>
    %111 = vector.shape_cast %110 : vector<1x12x72xbf16> to vector<12x72xbf16>
    %112 = arith.extf %111 : vector<12x72xbf16> to vector<12x72xf32>
    %c14 = arith.constant 14 : index
    %c0_24 = arith.constant 0 : index
    %c0_25 = arith.constant 0 : index
    %113 = vector.load %arg1[%c14, %c0_24, %c0_25] : memref<16x12x72xbf16, #tpu.memory_space<vmem>>, vector<1x12x72xbf16>
    %114 = vector.shape_cast %113 : vector<1x12x72xbf16> to vector<12x72xbf16>
    %115 = arith.extf %114 : vector<12x72xbf16> to vector<12x72xf32>
    %116 = vector.broadcast %2 : vector<12x1xf32> to vector<12x72xf32>
    %117 = arith.mulf %116, %106 : vector<12x72xf32>
    %118 = vector.broadcast %1 : vector<12x1xf32> to vector<12x72xf32>
    %119 = arith.addf %118, %117 : vector<12x72xf32>
    %120 = vector.broadcast %3 : vector<12x1xf32> to vector<12x72xf32>
    %121 = arith.mulf %120, %109 : vector<12x72xf32>
    %122 = arith.addf %119, %121 : vector<12x72xf32>
    %123 = arith.mulf %106, %109 : vector<12x72xf32>
    %124 = vector.broadcast %4 : vector<12x1xf32> to vector<12x72xf32>
    %125 = arith.mulf %124, %123 : vector<12x72xf32>
    %126 = arith.addf %122, %125 : vector<12x72xf32>
    %127 = vector.broadcast %6 : vector<12x1xf32> to vector<12x72xf32>
    %128 = arith.mulf %127, %112 : vector<12x72xf32>
    %129 = vector.broadcast %5 : vector<12x1xf32> to vector<12x72xf32>
    %130 = arith.addf %129, %128 : vector<12x72xf32>
    %131 = vector.broadcast %7 : vector<12x1xf32> to vector<12x72xf32>
    %132 = arith.mulf %131, %115 : vector<12x72xf32>
    %133 = arith.addf %130, %132 : vector<12x72xf32>
    %134 = arith.mulf %112, %115 : vector<12x72xf32>
    %135 = vector.broadcast %8 : vector<12x1xf32> to vector<12x72xf32>
    %136 = arith.mulf %135, %134 : vector<12x72xf32>
    %137 = arith.addf %133, %136 : vector<12x72xf32>
    %138 = vector.broadcast %10 : vector<12x1xf32> to vector<12x72xf32>
    %139 = arith.mulf %138, %126 : vector<12x72xf32>
    %140 = vector.broadcast %9 : vector<12x1xf32> to vector<12x72xf32>
    %141 = arith.addf %140, %139 : vector<12x72xf32>
    %142 = vector.broadcast %11 : vector<12x1xf32> to vector<12x72xf32>
    %143 = arith.mulf %142, %137 : vector<12x72xf32>
    %144 = arith.addf %141, %143 : vector<12x72xf32>
    %145 = arith.mulf %126, %137 : vector<12x72xf32>
    %146 = vector.broadcast %12 : vector<12x1xf32> to vector<12x72xf32>
    %147 = arith.mulf %146, %145 : vector<12x72xf32>
    %148 = arith.addf %144, %147 : vector<12x72xf32>
    %149 = arith.maximumf %103, %148 : vector<12x72xf32>
    %c3 = arith.constant 3 : index
    %c0_26 = arith.constant 0 : index
    %c0_27 = arith.constant 0 : index
    %150 = vector.load %arg1[%c3, %c0_26, %c0_27] : memref<16x12x72xbf16, #tpu.memory_space<vmem>>, vector<1x12x72xbf16>
    %151 = vector.shape_cast %150 : vector<1x12x72xbf16> to vector<12x72xbf16>
    %152 = arith.extf %151 : vector<12x72xbf16> to vector<12x72xf32>
    %c7 = arith.constant 7 : index
    %c0_28 = arith.constant 0 : index
    %c0_29 = arith.constant 0 : index
    %153 = vector.load %arg1[%c7, %c0_28, %c0_29] : memref<16x12x72xbf16, #tpu.memory_space<vmem>>, vector<1x12x72xbf16>
    %154 = vector.shape_cast %153 : vector<1x12x72xbf16> to vector<12x72xbf16>
    %155 = arith.extf %154 : vector<12x72xbf16> to vector<12x72xf32>
    %c11 = arith.constant 11 : index
    %c0_30 = arith.constant 0 : index
    %c0_31 = arith.constant 0 : index
    %156 = vector.load %arg1[%c11, %c0_30, %c0_31] : memref<16x12x72xbf16, #tpu.memory_space<vmem>>, vector<1x12x72xbf16>
    %157 = vector.shape_cast %156 : vector<1x12x72xbf16> to vector<12x72xbf16>
    %158 = arith.extf %157 : vector<12x72xbf16> to vector<12x72xf32>
    %c15 = arith.constant 15 : index
    %c0_32 = arith.constant 0 : index
    %c0_33 = arith.constant 0 : index
    %159 = vector.load %arg1[%c15, %c0_32, %c0_33] : memref<16x12x72xbf16, #tpu.memory_space<vmem>>, vector<1x12x72xbf16>
    %160 = vector.shape_cast %159 : vector<1x12x72xbf16> to vector<12x72xbf16>
    %161 = arith.extf %160 : vector<12x72xbf16> to vector<12x72xf32>
    %162 = vector.broadcast %2 : vector<12x1xf32> to vector<12x72xf32>
    %163 = arith.mulf %162, %152 : vector<12x72xf32>
    %164 = vector.broadcast %1 : vector<12x1xf32> to vector<12x72xf32>
    %165 = arith.addf %164, %163 : vector<12x72xf32>
    %166 = vector.broadcast %3 : vector<12x1xf32> to vector<12x72xf32>
    %167 = arith.mulf %166, %155 : vector<12x72xf32>
    %168 = arith.addf %165, %167 : vector<12x72xf32>
    %169 = arith.mulf %152, %155 : vector<12x72xf32>
    %170 = vector.broadcast %4 : vector<12x1xf32> to vector<12x72xf32>
    %171 = arith.mulf %170, %169 : vector<12x72xf32>
    %172 = arith.addf %168, %171 : vector<12x72xf32>
    %173 = vector.broadcast %6 : vector<12x1xf32> to vector<12x72xf32>
    %174 = arith.mulf %173, %158 : vector<12x72xf32>
    %175 = vector.broadcast %5 : vector<12x1xf32> to vector<12x72xf32>
    %176 = arith.addf %175, %174 : vector<12x72xf32>
    %177 = vector.broadcast %7 : vector<12x1xf32> to vector<12x72xf32>
    %178 = arith.mulf %177, %161 : vector<12x72xf32>
    %179 = arith.addf %176, %178 : vector<12x72xf32>
    %180 = arith.mulf %158, %161 : vector<12x72xf32>
    %181 = vector.broadcast %8 : vector<12x1xf32> to vector<12x72xf32>
    %182 = arith.mulf %181, %180 : vector<12x72xf32>
    %183 = arith.addf %179, %182 : vector<12x72xf32>
    %184 = vector.broadcast %10 : vector<12x1xf32> to vector<12x72xf32>
    %185 = arith.mulf %184, %172 : vector<12x72xf32>
    %186 = vector.broadcast %9 : vector<12x1xf32> to vector<12x72xf32>
    %187 = arith.addf %186, %185 : vector<12x72xf32>
    %188 = vector.broadcast %11 : vector<12x1xf32> to vector<12x72xf32>
    %189 = arith.mulf %188, %183 : vector<12x72xf32>
    %190 = arith.addf %187, %189 : vector<12x72xf32>
    %191 = arith.mulf %172, %183 : vector<12x72xf32>
    %192 = vector.broadcast %12 : vector<12x1xf32> to vector<12x72xf32>
    %193 = arith.mulf %192, %191 : vector<12x72xf32>
    %194 = arith.addf %190, %193 : vector<12x72xf32>
    %195 = arith.maximumf %149, %194 : vector<12x72xf32>
    %c0_34 = arith.constant 0 : index
    %c0_35 = arith.constant 0 : index
    %196 = vector.load %arg3[%c0_34, %c0_35] : memref<12x72xf32, #tpu.memory_space<vmem>>, vector<12x72xf32>
    tpu.vector_store %arg3[%c0_34, %c0_35], %195 {strides = array<i32>} : memref<12x72xf32, #tpu.memory_space<vmem>>, vector<12x72xf32>,
    return
  }
  func.func @transform_0(%arg0: i32) -> (i32, i32, i32) {
    %c0_i32 = arith.constant 0 : i32
    %c0_i32_0 = arith.constant 0 : i32
    %c0_i32_1 = arith.constant 0 : i32
    return %c0_i32, %c0_i32_0, %arg0 : i32, i32, i32
  }
  func.func @transform_1(%arg0: i32) -> (i32, i32) {
    %c0_i32 = arith.constant 0 : i32
    %c0_i32_0 = arith.constant 0 : i32
    %c0_i32_1 = arith.constant 0 : i32
    return %c0_i32, %c0_i32_0 : i32, i32
  }
  func.func @transform_2(%arg0: i32) -> (i32, i32) {
    %c0_i32 = arith.constant 0 : i32
    %c0_i32_0 = arith.constant 0 : i32
    return %c0_i32, %arg0 : i32, i32
  }
}

module attributes {stable_mosaic.version = 11 : i64} {
  func.func @_conv_gate_pool_kernel(%arg0: i32, %arg1: memref<16x36x18xbf16, #tpu.memory_space<vmem>>, %arg2: memref<36x12xf32, #tpu.memory_space<vmem>>, %arg3: memref<36x18xf32, #tpu.memory_space<vmem>>) attributes {dimension_semantics = [#tpu.dimension_semantics<parallel>], iteration_bounds = array<i64: 1>, scalar_prefetch = 0 : i64, scratch_operands = 0 : i64, tpu.core_type = #tpu.core_type<tc>, window_params = [{transform_indices = @transform_0, window_bounds = array<i64: 16, 36, 18>}, {pipeline_mode = #tpu.pipeline_mode<synchronous>, transform_indices = @transform_1, window_bounds = array<i64: 36, 12>}, {transform_indices = @transform_2, window_bounds = array<i64: 36, 18>}]} {
    %c0 = arith.constant 0 : index
    %c0_0 = arith.constant 0 : index
    %0 = vector.load %arg2[%c0, %c0_0] : memref<36x12xf32, #tpu.memory_space<vmem>>, vector<36x12xf32>
    %1 = vector.extract_strided_slice %0 {offsets = [0, 0], sizes = [36, 1], strides = [1, 1]} : vector<36x12xf32> to vector<36x1xf32>
    %2 = vector.extract_strided_slice %0 {offsets = [0, 1], sizes = [36, 1], strides = [1, 1]} : vector<36x12xf32> to vector<36x1xf32>
    %3 = vector.extract_strided_slice %0 {offsets = [0, 2], sizes = [36, 1], strides = [1, 1]} : vector<36x12xf32> to vector<36x1xf32>
    %4 = vector.extract_strided_slice %0 {offsets = [0, 3], sizes = [36, 1], strides = [1, 1]} : vector<36x12xf32> to vector<36x1xf32>
    %5 = vector.extract_strided_slice %0 {offsets = [0, 4], sizes = [36, 1], strides = [1, 1]} : vector<36x12xf32> to vector<36x1xf32>
    %6 = vector.extract_strided_slice %0 {offsets = [0, 5], sizes = [36, 1], strides = [1, 1]} : vector<36x12xf32> to vector<36x1xf32>
    %7 = vector.extract_strided_slice %0 {offsets = [0, 6], sizes = [36, 1], strides = [1, 1]} : vector<36x12xf32> to vector<36x1xf32>
    %8 = vector.extract_strided_slice %0 {offsets = [0, 7], sizes = [36, 1], strides = [1, 1]} : vector<36x12xf32> to vector<36x1xf32>
    %9 = vector.extract_strided_slice %0 {offsets = [0, 8], sizes = [36, 1], strides = [1, 1]} : vector<36x12xf32> to vector<36x1xf32>
    %10 = vector.extract_strided_slice %0 {offsets = [0, 9], sizes = [36, 1], strides = [1, 1]} : vector<36x12xf32> to vector<36x1xf32>
    %11 = vector.extract_strided_slice %0 {offsets = [0, 10], sizes = [36, 1], strides = [1, 1]} : vector<36x12xf32> to vector<36x1xf32>
    %12 = vector.extract_strided_slice %0 {offsets = [0, 11], sizes = [36, 1], strides = [1, 1]} : vector<36x12xf32> to vector<36x1xf32>
    %c0_1 = arith.constant 0 : index
    %c0_2 = arith.constant 0 : index
    %c0_3 = arith.constant 0 : index
    %13 = vector.load %arg1[%c0_1, %c0_2, %c0_3] : memref<16x36x18xbf16, #tpu.memory_space<vmem>>, vector<1x36x18xbf16>
    %14 = vector.shape_cast %13 : vector<1x36x18xbf16> to vector<36x18xbf16>
    %15 = arith.extf %14 : vector<36x18xbf16> to vector<36x18xf32>
    %c4 = arith.constant 4 : index
    %c0_4 = arith.constant 0 : index
    %c0_5 = arith.constant 0 : index
    %16 = vector.load %arg1[%c4, %c0_4, %c0_5] : memref<16x36x18xbf16, #tpu.memory_space<vmem>>, vector<1x36x18xbf16>
    %17 = vector.shape_cast %16 : vector<1x36x18xbf16> to vector<36x18xbf16>
    %18 = arith.extf %17 : vector<36x18xbf16> to vector<36x18xf32>
    %c8 = arith.constant 8 : index
    %c0_6 = arith.constant 0 : index
    %c0_7 = arith.constant 0 : index
    %19 = vector.load %arg1[%c8, %c0_6, %c0_7] : memref<16x36x18xbf16, #tpu.memory_space<vmem>>, vector<1x36x18xbf16>
    %20 = vector.shape_cast %19 : vector<1x36x18xbf16> to vector<36x18xbf16>
    %21 = arith.extf %20 : vector<36x18xbf16> to vector<36x18xf32>
    %c12 = arith.constant 12 : index
    %c0_8 = arith.constant 0 : index
    %c0_9 = arith.constant 0 : index
    %22 = vector.load %arg1[%c12, %c0_8, %c0_9] : memref<16x36x18xbf16, #tpu.memory_space<vmem>>, vector<1x36x18xbf16>
    %23 = vector.shape_cast %22 : vector<1x36x18xbf16> to vector<36x18xbf16>
    %24 = arith.extf %23 : vector<36x18xbf16> to vector<36x18xf32>
    %25 = vector.broadcast %2 : vector<36x1xf32> to vector<36x18xf32>
    %26 = arith.mulf %25, %15 : vector<36x18xf32>
    %27 = vector.broadcast %1 : vector<36x1xf32> to vector<36x18xf32>
    %28 = arith.addf %27, %26 : vector<36x18xf32>
    %29 = vector.broadcast %3 : vector<36x1xf32> to vector<36x18xf32>
    %30 = arith.mulf %29, %18 : vector<36x18xf32>
    %31 = arith.addf %28, %30 : vector<36x18xf32>
    %32 = arith.mulf %15, %18 : vector<36x18xf32>
    %33 = vector.broadcast %4 : vector<36x1xf32> to vector<36x18xf32>
    %34 = arith.mulf %33, %32 : vector<36x18xf32>
    %35 = arith.addf %31, %34 : vector<36x18xf32>
    %36 = vector.broadcast %6 : vector<36x1xf32> to vector<36x18xf32>
    %37 = arith.mulf %36, %21 : vector<36x18xf32>
    %38 = vector.broadcast %5 : vector<36x1xf32> to vector<36x18xf32>
    %39 = arith.addf %38, %37 : vector<36x18xf32>
    %40 = vector.broadcast %7 : vector<36x1xf32> to vector<36x18xf32>
    %41 = arith.mulf %40, %24 : vector<36x18xf32>
    %42 = arith.addf %39, %41 : vector<36x18xf32>
    %43 = arith.mulf %21, %24 : vector<36x18xf32>
    %44 = vector.broadcast %8 : vector<36x1xf32> to vector<36x18xf32>
    %45 = arith.mulf %44, %43 : vector<36x18xf32>
    %46 = arith.addf %42, %45 : vector<36x18xf32>
    %47 = vector.broadcast %10 : vector<36x1xf32> to vector<36x18xf32>
    %48 = arith.mulf %47, %35 : vector<36x18xf32>
    %49 = vector.broadcast %9 : vector<36x1xf32> to vector<36x18xf32>
    %50 = arith.addf %49, %48 : vector<36x18xf32>
    %51 = vector.broadcast %11 : vector<36x1xf32> to vector<36x18xf32>
    %52 = arith.mulf %51, %46 : vector<36x18xf32>
    %53 = arith.addf %50, %52 : vector<36x18xf32>
    %54 = arith.mulf %35, %46 : vector<36x18xf32>
    %55 = vector.broadcast %12 : vector<36x1xf32> to vector<36x18xf32>
    %56 = arith.mulf %55, %54 : vector<36x18xf32>
    %57 = arith.addf %53, %56 : vector<36x18xf32>
    %c1 = arith.constant 1 : index
    %c0_10 = arith.constant 0 : index
    %c0_11 = arith.constant 0 : index
    %58 = vector.load %arg1[%c1, %c0_10, %c0_11] : memref<16x36x18xbf16, #tpu.memory_space<vmem>>, vector<1x36x18xbf16>
    %59 = vector.shape_cast %58 : vector<1x36x18xbf16> to vector<36x18xbf16>
    %60 = arith.extf %59 : vector<36x18xbf16> to vector<36x18xf32>
    %c5 = arith.constant 5 : index
    %c0_12 = arith.constant 0 : index
    %c0_13 = arith.constant 0 : index
    %61 = vector.load %arg1[%c5, %c0_12, %c0_13] : memref<16x36x18xbf16, #tpu.memory_space<vmem>>, vector<1x36x18xbf16>
    %62 = vector.shape_cast %61 : vector<1x36x18xbf16> to vector<36x18xbf16>
    %63 = arith.extf %62 : vector<36x18xbf16> to vector<36x18xf32>
    %c9 = arith.constant 9 : index
    %c0_14 = arith.constant 0 : index
    %c0_15 = arith.constant 0 : index
    %64 = vector.load %arg1[%c9, %c0_14, %c0_15] : memref<16x36x18xbf16, #tpu.memory_space<vmem>>, vector<1x36x18xbf16>
    %65 = vector.shape_cast %64 : vector<1x36x18xbf16> to vector<36x18xbf16>
    %66 = arith.extf %65 : vector<36x18xbf16> to vector<36x18xf32>
    %c13 = arith.constant 13 : index
    %c0_16 = arith.constant 0 : index
    %c0_17 = arith.constant 0 : index
    %67 = vector.load %arg1[%c13, %c0_16, %c0_17] : memref<16x36x18xbf16, #tpu.memory_space<vmem>>, vector<1x36x18xbf16>
    %68 = vector.shape_cast %67 : vector<1x36x18xbf16> to vector<36x18xbf16>
    %69 = arith.extf %68 : vector<36x18xbf16> to vector<36x18xf32>
    %70 = vector.broadcast %2 : vector<36x1xf32> to vector<36x18xf32>
    %71 = arith.mulf %70, %60 : vector<36x18xf32>
    %72 = vector.broadcast %1 : vector<36x1xf32> to vector<36x18xf32>
    %73 = arith.addf %72, %71 : vector<36x18xf32>
    %74 = vector.broadcast %3 : vector<36x1xf32> to vector<36x18xf32>
    %75 = arith.mulf %74, %63 : vector<36x18xf32>
    %76 = arith.addf %73, %75 : vector<36x18xf32>
    %77 = arith.mulf %60, %63 : vector<36x18xf32>
    %78 = vector.broadcast %4 : vector<36x1xf32> to vector<36x18xf32>
    %79 = arith.mulf %78, %77 : vector<36x18xf32>
    %80 = arith.addf %76, %79 : vector<36x18xf32>
    %81 = vector.broadcast %6 : vector<36x1xf32> to vector<36x18xf32>
    %82 = arith.mulf %81, %66 : vector<36x18xf32>
    %83 = vector.broadcast %5 : vector<36x1xf32> to vector<36x18xf32>
    %84 = arith.addf %83, %82 : vector<36x18xf32>
    %85 = vector.broadcast %7 : vector<36x1xf32> to vector<36x18xf32>
    %86 = arith.mulf %85, %69 : vector<36x18xf32>
    %87 = arith.addf %84, %86 : vector<36x18xf32>
    %88 = arith.mulf %66, %69 : vector<36x18xf32>
    %89 = vector.broadcast %8 : vector<36x1xf32> to vector<36x18xf32>
    %90 = arith.mulf %89, %88 : vector<36x18xf32>
    %91 = arith.addf %87, %90 : vector<36x18xf32>
    %92 = vector.broadcast %10 : vector<36x1xf32> to vector<36x18xf32>
    %93 = arith.mulf %92, %80 : vector<36x18xf32>
    %94 = vector.broadcast %9 : vector<36x1xf32> to vector<36x18xf32>
    %95 = arith.addf %94, %93 : vector<36x18xf32>
    %96 = vector.broadcast %11 : vector<36x1xf32> to vector<36x18xf32>
    %97 = arith.mulf %96, %91 : vector<36x18xf32>
    %98 = arith.addf %95, %97 : vector<36x18xf32>
    %99 = arith.mulf %80, %91 : vector<36x18xf32>
    %100 = vector.broadcast %12 : vector<36x1xf32> to vector<36x18xf32>
    %101 = arith.mulf %100, %99 : vector<36x18xf32>
    %102 = arith.addf %98, %101 : vector<36x18xf32>
    %103 = arith.maximumf %57, %102 : vector<36x18xf32>
    %c2 = arith.constant 2 : index
    %c0_18 = arith.constant 0 : index
    %c0_19 = arith.constant 0 : index
    %104 = vector.load %arg1[%c2, %c0_18, %c0_19] : memref<16x36x18xbf16, #tpu.memory_space<vmem>>, vector<1x36x18xbf16>
    %105 = vector.shape_cast %104 : vector<1x36x18xbf16> to vector<36x18xbf16>
    %106 = arith.extf %105 : vector<36x18xbf16> to vector<36x18xf32>
    %c6 = arith.constant 6 : index
    %c0_20 = arith.constant 0 : index
    %c0_21 = arith.constant 0 : index
    %107 = vector.load %arg1[%c6, %c0_20, %c0_21] : memref<16x36x18xbf16, #tpu.memory_space<vmem>>, vector<1x36x18xbf16>
    %108 = vector.shape_cast %107 : vector<1x36x18xbf16> to vector<36x18xbf16>
    %109 = arith.extf %108 : vector<36x18xbf16> to vector<36x18xf32>
    %c10 = arith.constant 10 : index
    %c0_22 = arith.constant 0 : index
    %c0_23 = arith.constant 0 : index
    %110 = vector.load %arg1[%c10, %c0_22, %c0_23] : memref<16x36x18xbf16, #tpu.memory_space<vmem>>, vector<1x36x18xbf16>
    %111 = vector.shape_cast %110 : vector<1x36x18xbf16> to vector<36x18xbf16>
    %112 = arith.extf %111 : vector<36x18xbf16> to vector<36x18xf32>
    %c14 = arith.constant 14 : index
    %c0_24 = arith.constant 0 : index
    %c0_25 = arith.constant 0 : index
    %113 = vector.load %arg1[%c14, %c0_24, %c0_25] : memref<16x36x18xbf16, #tpu.memory_space<vmem>>, vector<1x36x18xbf16>
    %114 = vector.shape_cast %113 : vector<1x36x18xbf16> to vector<36x18xbf16>
    %115 = arith.extf %114 : vector<36x18xbf16> to vector<36x18xf32>
    %116 = vector.broadcast %2 : vector<36x1xf32> to vector<36x18xf32>
    %117 = arith.mulf %116, %106 : vector<36x18xf32>
    %118 = vector.broadcast %1 : vector<36x1xf32> to vector<36x18xf32>
    %119 = arith.addf %118, %117 : vector<36x18xf32>
    %120 = vector.broadcast %3 : vector<36x1xf32> to vector<36x18xf32>
    %121 = arith.mulf %120, %109 : vector<36x18xf32>
    %122 = arith.addf %119, %121 : vector<36x18xf32>
    %123 = arith.mulf %106, %109 : vector<36x18xf32>
    %124 = vector.broadcast %4 : vector<36x1xf32> to vector<36x18xf32>
    %125 = arith.mulf %124, %123 : vector<36x18xf32>
    %126 = arith.addf %122, %125 : vector<36x18xf32>
    %127 = vector.broadcast %6 : vector<36x1xf32> to vector<36x18xf32>
    %128 = arith.mulf %127, %112 : vector<36x18xf32>
    %129 = vector.broadcast %5 : vector<36x1xf32> to vector<36x18xf32>
    %130 = arith.addf %129, %128 : vector<36x18xf32>
    %131 = vector.broadcast %7 : vector<36x1xf32> to vector<36x18xf32>
    %132 = arith.mulf %131, %115 : vector<36x18xf32>
    %133 = arith.addf %130, %132 : vector<36x18xf32>
    %134 = arith.mulf %112, %115 : vector<36x18xf32>
    %135 = vector.broadcast %8 : vector<36x1xf32> to vector<36x18xf32>
    %136 = arith.mulf %135, %134 : vector<36x18xf32>
    %137 = arith.addf %133, %136 : vector<36x18xf32>
    %138 = vector.broadcast %10 : vector<36x1xf32> to vector<36x18xf32>
    %139 = arith.mulf %138, %126 : vector<36x18xf32>
    %140 = vector.broadcast %9 : vector<36x1xf32> to vector<36x18xf32>
    %141 = arith.addf %140, %139 : vector<36x18xf32>
    %142 = vector.broadcast %11 : vector<36x1xf32> to vector<36x18xf32>
    %143 = arith.mulf %142, %137 : vector<36x18xf32>
    %144 = arith.addf %141, %143 : vector<36x18xf32>
    %145 = arith.mulf %126, %137 : vector<36x18xf32>
    %146 = vector.broadcast %12 : vector<36x1xf32> to vector<36x18xf32>
    %147 = arith.mulf %146, %145 : vector<36x18xf32>
    %148 = arith.addf %144, %147 : vector<36x18xf32>
    %149 = arith.maximumf %103, %148 : vector<36x18xf32>
    %c3 = arith.constant 3 : index
    %c0_26 = arith.constant 0 : index
    %c0_27 = arith.constant 0 : index
    %150 = vector.load %arg1[%c3, %c0_26, %c0_27] : memref<16x36x18xbf16, #tpu.memory_space<vmem>>, vector<1x36x18xbf16>
    %151 = vector.shape_cast %150 : vector<1x36x18xbf16> to vector<36x18xbf16>
    %152 = arith.extf %151 : vector<36x18xbf16> to vector<36x18xf32>
    %c7 = arith.constant 7 : index
    %c0_28 = arith.constant 0 : index
    %c0_29 = arith.constant 0 : index
    %153 = vector.load %arg1[%c7, %c0_28, %c0_29] : memref<16x36x18xbf16, #tpu.memory_space<vmem>>, vector<1x36x18xbf16>
    %154 = vector.shape_cast %153 : vector<1x36x18xbf16> to vector<36x18xbf16>
    %155 = arith.extf %154 : vector<36x18xbf16> to vector<36x18xf32>
    %c11 = arith.constant 11 : index
    %c0_30 = arith.constant 0 : index
    %c0_31 = arith.constant 0 : index
    %156 = vector.load %arg1[%c11, %c0_30, %c0_31] : memref<16x36x18xbf16, #tpu.memory_space<vmem>>, vector<1x36x18xbf16>
    %157 = vector.shape_cast %156 : vector<1x36x18xbf16> to vector<36x18xbf16>
    %158 = arith.extf %157 : vector<36x18xbf16> to vector<36x18xf32>
    %c15 = arith.constant 15 : index
    %c0_32 = arith.constant 0 : index
    %c0_33 = arith.constant 0 : index
    %159 = vector.load %arg1[%c15, %c0_32, %c0_33] : memref<16x36x18xbf16, #tpu.memory_space<vmem>>, vector<1x36x18xbf16>
    %160 = vector.shape_cast %159 : vector<1x36x18xbf16> to vector<36x18xbf16>
    %161 = arith.extf %160 : vector<36x18xbf16> to vector<36x18xf32>
    %162 = vector.broadcast %2 : vector<36x1xf32> to vector<36x18xf32>
    %163 = arith.mulf %162, %152 : vector<36x18xf32>
    %164 = vector.broadcast %1 : vector<36x1xf32> to vector<36x18xf32>
    %165 = arith.addf %164, %163 : vector<36x18xf32>
    %166 = vector.broadcast %3 : vector<36x1xf32> to vector<36x18xf32>
    %167 = arith.mulf %166, %155 : vector<36x18xf32>
    %168 = arith.addf %165, %167 : vector<36x18xf32>
    %169 = arith.mulf %152, %155 : vector<36x18xf32>
    %170 = vector.broadcast %4 : vector<36x1xf32> to vector<36x18xf32>
    %171 = arith.mulf %170, %169 : vector<36x18xf32>
    %172 = arith.addf %168, %171 : vector<36x18xf32>
    %173 = vector.broadcast %6 : vector<36x1xf32> to vector<36x18xf32>
    %174 = arith.mulf %173, %158 : vector<36x18xf32>
    %175 = vector.broadcast %5 : vector<36x1xf32> to vector<36x18xf32>
    %176 = arith.addf %175, %174 : vector<36x18xf32>
    %177 = vector.broadcast %7 : vector<36x1xf32> to vector<36x18xf32>
    %178 = arith.mulf %177, %161 : vector<36x18xf32>
    %179 = arith.addf %176, %178 : vector<36x18xf32>
    %180 = arith.mulf %158, %161 : vector<36x18xf32>
    %181 = vector.broadcast %8 : vector<36x1xf32> to vector<36x18xf32>
    %182 = arith.mulf %181, %180 : vector<36x18xf32>
    %183 = arith.addf %179, %182 : vector<36x18xf32>
    %184 = vector.broadcast %10 : vector<36x1xf32> to vector<36x18xf32>
    %185 = arith.mulf %184, %172 : vector<36x18xf32>
    %186 = vector.broadcast %9 : vector<36x1xf32> to vector<36x18xf32>
    %187 = arith.addf %186, %185 : vector<36x18xf32>
    %188 = vector.broadcast %11 : vector<36x1xf32> to vector<36x18xf32>
    %189 = arith.mulf %188, %183 : vector<36x18xf32>
    %190 = arith.addf %187, %189 : vector<36x18xf32>
    %191 = arith.mulf %172, %183 : vector<36x18xf32>
    %192 = vector.broadcast %12 : vector<36x1xf32> to vector<36x18xf32>
    %193 = arith.mulf %192, %191 : vector<36x18xf32>
    %194 = arith.addf %190, %193 : vector<36x18xf32>
    %195 = arith.maximumf %149, %194 : vector<36x18xf32>
    %c0_34 = arith.constant 0 : index
    %c0_35 = arith.constant 0 : index
    %196 = vector.load %arg3[%c0_34, %c0_35] : memref<36x18xf32, #tpu.memory_space<vmem>>, vector<36x18xf32>
    tpu.vector_store %arg3[%c0_34, %c0_35], %195 {strides = array<i32>} : memref<36x18xf32, #tpu.memory_space<vmem>>, vector<36x18xf32>,
    return
  }
  func.func @transform_0(%arg0: i32) -> (i32, i32, i32) {
    %c0_i32 = arith.constant 0 : i32
    %c0_i32_0 = arith.constant 0 : i32
    %c0_i32_1 = arith.constant 0 : i32
    return %c0_i32, %c0_i32_0, %arg0 : i32, i32, i32
  }
  func.func @transform_1(%arg0: i32) -> (i32, i32) {
    %c0_i32 = arith.constant 0 : i32
    %c0_i32_0 = arith.constant 0 : i32
    %c0_i32_1 = arith.constant 0 : i32
    return %c0_i32, %c0_i32_0 : i32, i32
  }
  func.func @transform_2(%arg0: i32) -> (i32, i32) {
    %c0_i32 = arith.constant 0 : i32
    %c0_i32_0 = arith.constant 0 : i32
    return %c0_i32, %arg0 : i32, i32
  }
}

module attributes {stable_mosaic.version = 11 : i64} {
  func.func @_fc_gate_kernel(%arg0: i32, %arg1: memref<2x2560xbf16, #tpu.memory_space<vmem>>, %arg2: memref<2x2560xbf16, #tpu.memory_space<vmem>>, %arg3: memref<4x2560xf32, #tpu.memory_space<vmem>>, %arg4: memref<2x2560xf32, #tpu.memory_space<vmem>>) attributes {dimension_semantics = [#tpu.dimension_semantics<parallel>], iteration_bounds = array<i64: 2>, scalar_prefetch = 0 : i64, scratch_operands = 0 : i64, tpu.core_type = #tpu.core_type<tc>, window_params = [{transform_indices = @transform_0, window_bounds = array<i64: 2, 2560>}, {transform_indices = @transform_1, window_bounds = array<i64: 2, 2560>}, {transform_indices = @transform_2, window_bounds = array<i64: 4, 2560>}, {transform_indices = @transform_3, window_bounds = array<i64: 2, 2560>}]} {
    %c0 = arith.constant 0 : index
    %c0_0 = arith.constant 0 : index
    %0 = vector.load %arg1[%c0, %c0_0] : memref<2x2560xbf16, #tpu.memory_space<vmem>>, vector<2x2560xbf16>
    %1 = arith.extf %0 : vector<2x2560xbf16> to vector<2x2560xf32>
    %c0_1 = arith.constant 0 : index
    %c0_2 = arith.constant 0 : index
    %2 = vector.load %arg2[%c0_1, %c0_2] : memref<2x2560xbf16, #tpu.memory_space<vmem>>, vector<2x2560xbf16>
    %3 = arith.extf %2 : vector<2x2560xbf16> to vector<2x2560xf32>
    %c0_3 = arith.constant 0 : index
    %c0_4 = arith.constant 0 : index
    %4 = vector.load %arg3[%c0_3, %c0_4] : memref<4x2560xf32, #tpu.memory_space<vmem>>, vector<4x2560xf32>
    %5 = vector.extract_strided_slice %4 {offsets = [0, 0], sizes = [1, 2560], strides = [1, 1]} : vector<4x2560xf32> to vector<1x2560xf32>
    %6 = vector.extract_strided_slice %4 {offsets = [1, 0], sizes = [1, 2560], strides = [1, 1]} : vector<4x2560xf32> to vector<1x2560xf32>
    %7 = vector.broadcast %6 : vector<1x2560xf32> to vector<2x2560xf32>
    %8 = arith.mulf %7, %1 : vector<2x2560xf32>
    %9 = vector.broadcast %5 : vector<1x2560xf32> to vector<2x2560xf32>
    %10 = arith.addf %9, %8 : vector<2x2560xf32>
    %11 = vector.extract_strided_slice %4 {offsets = [2, 0], sizes = [1, 2560], strides = [1, 1]} : vector<4x2560xf32> to vector<1x2560xf32>
    %12 = vector.broadcast %11 : vector<1x2560xf32> to vector<2x2560xf32>
    %13 = arith.mulf %12, %3 : vector<2x2560xf32>
    %14 = arith.addf %10, %13 : vector<2x2560xf32>
    %15 = vector.extract_strided_slice %4 {offsets = [3, 0], sizes = [1, 2560], strides = [1, 1]} : vector<4x2560xf32> to vector<1x2560xf32>
    %16 = arith.mulf %1, %3 : vector<2x2560xf32>
    %17 = vector.broadcast %15 : vector<1x2560xf32> to vector<2x2560xf32>
    %18 = arith.mulf %17, %16 : vector<2x2560xf32>
    %19 = arith.addf %14, %18 : vector<2x2560xf32>
    %c0_5 = arith.constant 0 : index
    %c0_6 = arith.constant 0 : index
    %20 = vector.load %arg4[%c0_5, %c0_6] : memref<2x2560xf32, #tpu.memory_space<vmem>>, vector<2x2560xf32>
    tpu.vector_store %arg4[%c0_5, %c0_6], %19 {strides = array<i32>} : memref<2x2560xf32, #tpu.memory_space<vmem>>, vector<2x2560xf32>,
    return
  }
  func.func @transform_0(%arg0: i32) -> (i32, i32) {
    %c0_i32 = arith.constant 0 : i32
    %c0_i32_0 = arith.constant 0 : i32
    return %c0_i32, %arg0 : i32, i32
  }
  func.func @transform_1(%arg0: i32) -> (i32, i32) {
    %c0_i32 = arith.constant 0 : i32
    %c0_i32_0 = arith.constant 0 : i32
    return %c0_i32, %arg0 : i32, i32
  }
  func.func @transform_2(%arg0: i32) -> (i32, i32) {
    %c0_i32 = arith.constant 0 : i32
    %c0_i32_0 = arith.constant 0 : i32
    return %c0_i32, %arg0 : i32, i32
  }
  func.func @transform_3(%arg0: i32) -> (i32, i32) {
    %c0_i32 = arith.constant 0 : i32
    %c0_i32_0 = arith.constant 0 : i32
    return %c0_i32, %arg0 : i32, i32
  }
}

module attributes {stable_mosaic.version = 11 : i64} {
  func.func @_fc_gate_kernel(%arg0: i32, %arg1: memref<2x1280xbf16, #tpu.memory_space<vmem>>, %arg2: memref<2x1280xbf16, #tpu.memory_space<vmem>>, %arg3: memref<4x1280xf32, #tpu.memory_space<vmem>>, %arg4: memref<2x1280xf32, #tpu.memory_space<vmem>>) attributes {dimension_semantics = [#tpu.dimension_semantics<parallel>], iteration_bounds = array<i64: 2>, scalar_prefetch = 0 : i64, scratch_operands = 0 : i64, tpu.core_type = #tpu.core_type<tc>, window_params = [{transform_indices = @transform_0, window_bounds = array<i64: 2, 1280>}, {transform_indices = @transform_1, window_bounds = array<i64: 2, 1280>}, {transform_indices = @transform_2, window_bounds = array<i64: 4, 1280>}, {transform_indices = @transform_3, window_bounds = array<i64: 2, 1280>}]} {
    %c0 = arith.constant 0 : index
    %c0_0 = arith.constant 0 : index
    %0 = vector.load %arg1[%c0, %c0_0] : memref<2x1280xbf16, #tpu.memory_space<vmem>>, vector<2x1280xbf16>
    %1 = arith.extf %0 : vector<2x1280xbf16> to vector<2x1280xf32>
    %c0_1 = arith.constant 0 : index
    %c0_2 = arith.constant 0 : index
    %2 = vector.load %arg2[%c0_1, %c0_2] : memref<2x1280xbf16, #tpu.memory_space<vmem>>, vector<2x1280xbf16>
    %3 = arith.extf %2 : vector<2x1280xbf16> to vector<2x1280xf32>
    %c0_3 = arith.constant 0 : index
    %c0_4 = arith.constant 0 : index
    %4 = vector.load %arg3[%c0_3, %c0_4] : memref<4x1280xf32, #tpu.memory_space<vmem>>, vector<4x1280xf32>
    %5 = vector.extract_strided_slice %4 {offsets = [0, 0], sizes = [1, 1280], strides = [1, 1]} : vector<4x1280xf32> to vector<1x1280xf32>
    %6 = vector.extract_strided_slice %4 {offsets = [1, 0], sizes = [1, 1280], strides = [1, 1]} : vector<4x1280xf32> to vector<1x1280xf32>
    %7 = vector.broadcast %6 : vector<1x1280xf32> to vector<2x1280xf32>
    %8 = arith.mulf %7, %1 : vector<2x1280xf32>
    %9 = vector.broadcast %5 : vector<1x1280xf32> to vector<2x1280xf32>
    %10 = arith.addf %9, %8 : vector<2x1280xf32>
    %11 = vector.extract_strided_slice %4 {offsets = [2, 0], sizes = [1, 1280], strides = [1, 1]} : vector<4x1280xf32> to vector<1x1280xf32>
    %12 = vector.broadcast %11 : vector<1x1280xf32> to vector<2x1280xf32>
    %13 = arith.mulf %12, %3 : vector<2x1280xf32>
    %14 = arith.addf %10, %13 : vector<2x1280xf32>
    %15 = vector.extract_strided_slice %4 {offsets = [3, 0], sizes = [1, 1280], strides = [1, 1]} : vector<4x1280xf32> to vector<1x1280xf32>
    %16 = arith.mulf %1, %3 : vector<2x1280xf32>
    %17 = vector.broadcast %15 : vector<1x1280xf32> to vector<2x1280xf32>
    %18 = arith.mulf %17, %16 : vector<2x1280xf32>
    %19 = arith.addf %14, %18 : vector<2x1280xf32>
    %c0_5 = arith.constant 0 : index
    %c0_6 = arith.constant 0 : index
    %20 = vector.load %arg4[%c0_5, %c0_6] : memref<2x1280xf32, #tpu.memory_space<vmem>>, vector<2x1280xf32>
    tpu.vector_store %arg4[%c0_5, %c0_6], %19 {strides = array<i32>} : memref<2x1280xf32, #tpu.memory_space<vmem>>, vector<2x1280xf32>,
    return
  }
  func.func @transform_0(%arg0: i32) -> (i32, i32) {
    %c0_i32 = arith.constant 0 : i32
    %c0_i32_0 = arith.constant 0 : i32
    return %c0_i32, %arg0 : i32, i32
  }
  func.func @transform_1(%arg0: i32) -> (i32, i32) {
    %c0_i32 = arith.constant 0 : i32
    %c0_i32_0 = arith.constant 0 : i32
    return %c0_i32, %arg0 : i32, i32
  }
  func.func @transform_2(%arg0: i32) -> (i32, i32) {
    %c0_i32 = arith.constant 0 : i32
    %c0_i32_0 = arith.constant 0 : i32
    return %c0_i32, %arg0 : i32, i32
  }
  func.func @transform_3(%arg0: i32) -> (i32, i32) {
    %c0_i32 = arith.constant 0 : i32
    %c0_i32_0 = arith.constant 0 : i32
    return %c0_i32, %arg0 : i32, i32
  }
}

module attributes {stable_mosaic.version = 11 : i64} {
  func.func @_fc_gate_gsum_kernel(%arg0: i32, %arg1: memref<8x1280xbf16, #tpu.memory_space<vmem>>, %arg2: memref<8x1280xbf16, #tpu.memory_space<vmem>>, %arg3: memref<4x1280xf32, #tpu.memory_space<vmem>>, %arg4: memref<1280x10xf32, #tpu.memory_space<vmem>>, %arg5: memref<8x10xf32, #tpu.memory_space<vmem>>) attributes {dimension_semantics = [#tpu.dimension_semantics<parallel>], iteration_bounds = array<i64: 1>, scalar_prefetch = 0 : i64, scratch_operands = 0 : i64, tpu.core_type = #tpu.core_type<tc>, window_params = [{transform_indices = @transform_0, window_bounds = array<i64: 8, 1280>}, {transform_indices = @transform_1, window_bounds = array<i64: 8, 1280>}, {pipeline_mode = #tpu.pipeline_mode<synchronous>, transform_indices = @transform_2, window_bounds = array<i64: 4, 1280>}, {pipeline_mode = #tpu.pipeline_mode<synchronous>, transform_indices = @transform_3, window_bounds = array<i64: 1280, 10>}, {transform_indices = @transform_4, window_bounds = array<i64: 8, 10>}]} {
    %c0 = arith.constant 0 : index
    %c0_0 = arith.constant 0 : index
    %0 = vector.load %arg1[%c0, %c0_0] : memref<8x1280xbf16, #tpu.memory_space<vmem>>, vector<8x1280xbf16>
    %1 = arith.extf %0 : vector<8x1280xbf16> to vector<8x1280xf32>
    %c0_1 = arith.constant 0 : index
    %c0_2 = arith.constant 0 : index
    %2 = vector.load %arg2[%c0_1, %c0_2] : memref<8x1280xbf16, #tpu.memory_space<vmem>>, vector<8x1280xbf16>
    %3 = arith.extf %2 : vector<8x1280xbf16> to vector<8x1280xf32>
    %c0_3 = arith.constant 0 : index
    %c0_4 = arith.constant 0 : index
    %4 = vector.load %arg3[%c0_3, %c0_4] : memref<4x1280xf32, #tpu.memory_space<vmem>>, vector<4x1280xf32>
    %5 = vector.extract_strided_slice %4 {offsets = [0, 0], sizes = [1, 1280], strides = [1, 1]} : vector<4x1280xf32> to vector<1x1280xf32>
    %6 = vector.extract_strided_slice %4 {offsets = [1, 0], sizes = [1, 1280], strides = [1, 1]} : vector<4x1280xf32> to vector<1x1280xf32>
    %7 = vector.broadcast %6 : vector<1x1280xf32> to vector<8x1280xf32>
    %8 = arith.mulf %7, %1 : vector<8x1280xf32>
    %9 = vector.broadcast %5 : vector<1x1280xf32> to vector<8x1280xf32>
    %10 = arith.addf %9, %8 : vector<8x1280xf32>
    %11 = vector.extract_strided_slice %4 {offsets = [2, 0], sizes = [1, 1280], strides = [1, 1]} : vector<4x1280xf32> to vector<1x1280xf32>
    %12 = vector.broadcast %11 : vector<1x1280xf32> to vector<8x1280xf32>
    %13 = arith.mulf %12, %3 : vector<8x1280xf32>
    %14 = arith.addf %10, %13 : vector<8x1280xf32>
    %15 = vector.extract_strided_slice %4 {offsets = [3, 0], sizes = [1, 1280], strides = [1, 1]} : vector<4x1280xf32> to vector<1x1280xf32>
    %16 = arith.mulf %1, %3 : vector<8x1280xf32>
    %17 = vector.broadcast %15 : vector<1x1280xf32> to vector<8x1280xf32>
    %18 = arith.mulf %17, %16 : vector<8x1280xf32>
    %19 = arith.addf %14, %18 : vector<8x1280xf32>
    %c0_5 = arith.constant 0 : index
    %c0_6 = arith.constant 0 : index
    %20 = vector.load %arg4[%c0_5, %c0_6] : memref<1280x10xf32, #tpu.memory_space<vmem>>, vector<1280x10xf32>
    %cst = arith.constant dense<0.000000e+00> : vector<8x10xf32>
    %21 = tpu.matmul %19, %20, %cst {dimension_numbers = #tpu.dot_dimension_numbers<[1], [0], [0], [1], [0, 0, 1, 1], [], []>} : vector<8x1280xf32>, vector<1280x10xf32>, vector<8x10xf32> -> vector<8x10xf32>
    %cst_7 = arith.constant 0.15384616 : f32
    %22 = vector.broadcast %cst_7 : f32 to vector<8x10xf32>
    %23 = arith.mulf %21, %22 : vector<8x10xf32>
    %c0_8 = arith.constant 0 : index
    %c0_9 = arith.constant 0 : index
    %24 = vector.load %arg5[%c0_8, %c0_9] : memref<8x10xf32, #tpu.memory_space<vmem>>, vector<8x10xf32>
    tpu.vector_store %arg5[%c0_8, %c0_9], %23 {strides = array<i32>} : memref<8x10xf32, #tpu.memory_space<vmem>>, vector<8x10xf32>,
    return
  }
  func.func @transform_0(%arg0: i32) -> (i32, i32) {
    %c0_i32 = arith.constant 0 : i32
    %c0_i32_0 = arith.constant 0 : i32
    return %arg0, %c0_i32 : i32, i32
  }
  func.func @transform_1(%arg0: i32) -> (i32, i32) {
    %c0_i32 = arith.constant 0 : i32
    %c0_i32_0 = arith.constant 0 : i32
    return %arg0, %c0_i32 : i32, i32
  }
  func.func @transform_2(%arg0: i32) -> (i32, i32) {
    %c0_i32 = arith.constant 0 : i32
    %c0_i32_0 = arith.constant 0 : i32
    %c0_i32_1 = arith.constant 0 : i32
    return %c0_i32, %c0_i32_0 : i32, i32
  }
  func.func @transform_3(%arg0: i32) -> (i32, i32) {
    %c0_i32 = arith.constant 0 : i32
    %c0_i32_0 = arith.constant 0 : i32
    %c0_i32_1 = arith.constant 0 : i32
    return %c0_i32, %c0_i32_0 : i32, i32
  }
  func.func @transform_4(%arg0: i32) -> (i32, i32) {
    %c0_i32 = arith.constant 0 : i32
    %c0_i32_0 = arith.constant 0 : i32
    return %arg0, %c0_i32 : i32, i32
  }
}

</mosaic_0001>

<bundles_post_ra>
// kernel: conv_logic_mnist_model.6
= control target key start
LH: loop header
LB: loop body
LE: loop exit
PB: predicated region body
PF: predicated region fallthrough
CT: control target
= control target key end

     0   :  { %s2360_s9 = smov 0   ;;  %s2362_s10 = smov 0   ;;  %s3624_s0 = inlined_call_operand.vmem [shape: bf16[16,4,288], index: 0, kind: input, shape index: {}]   ;;  %s3625_s1 = inlined_call_operand.vmem [shape: f32[4,12], index: 1, kind: input, shape index: {}]   ;;  %s3626_s2 = inlined_call_operand.vmem [shape: f32[4,288], index: 2, kind: output, shape index: {}]  }
   0x1   :  { %s2364_s11 = smov 0  }
   0x2 LB: > { %s2376_s12 = sadd.s32 4294967295, %s2199_s11   ;;  %s2379_s13 = sadd.s32 1, %s2199_s11   ;;  %s2199_s11 = sphi %s2364_s11, %s3666_s11   ;;  %s2195_s10 = sphi %s2362_s10, %s3665_s10   ;;  %s2191_s9 = sphi %s2360_s9, %s3664_s9  }
   0x3   : > { %s16_s14 = ssub.s32 %s2199_s11, %s2379_s13  ;;  %s19_s15 = sadd.s32 1, %s2195_s10 }
   0x4   : > { %p17_p0 = scmp.eq.s32.totalorder %s16_s14, 0  ;;  %p26_p1 = scmp.ne.s32.totalorder %s2195_s10, %s2191_s9 }
   0x5   : > { %p27_p2 = scmp.eq.s32.totalorder %s2199_s11, 0  ;;  %p77_p3 = scmp.eq.s32.totalorder %s2376_s12, 1 }
   0x6   : > { %s2389_s16 = scalar_select %p17_p0, %s2195_s10, %s19_s15  }
   0x7   : > { %p28_p4 = por %p27_p2, %p26_p1  ;;  %p2391_p5 = por %p77_p3, %p26_p1 }
   0x8   : > { %p1656_p6 = scmp.ge.s32.totalorder %s2199_s11, 2 }
   0xa   : > { %102 = sbr.rel (%p1656_p6) target bundleno = 229 (0xe5), region = 20 }
  0x11   : > { %105 = sbr.rel (!%p28_p4) target bundleno = 229 (0xe5), region = 24  ;;  %s107_s18 = sand.u32 (%p28_p4), 1, %s2195_s10  }
  0x12   : > { %s1658_s19 = sshll.u32 (%p28_p4), %s2199_s11, 1  ;;  %s1657_s20 = sshll.u32 (%p28_p4), %s107_s18, 6 }
  0x13   : > { %s111_s21 = ssub.s32 (%p28_p4), 3, %s1658_s19  ;;  %s1731_s22 = sshll.u32 (%p28_p4), %s2199_s11, 2 }
  0x14   : > { %p112_p7 = scmp.lt.s32.totalorder (%p28_p4), %s111_s21, 2  ;;  %s2402_s25 = scalar_lea.vmem (%p28_p4), %s3624_s0, %s1731_s22  }
  0x15   : > { %s2406_s28 = scalar_lea.vmem (%p28_p4), [#allocation2], %s1657_s20  }
  0x18   : > { %s3668_s21 = smov (!%p112_p7, %s111_s21), 2 }
  0x19   : > { %s1659_s26 = sshll.u32 %s3668_s21, 9  ;;  %s2404_s27 = sshll.u32 %s3668_s21, 1 }
  0x1a   : > { %p1663_p8 = scmp.eq.s32.totalorder %s1659_s26, 0 }
  0x1b   : > { %p122_p9 = scmp.lt.u32.totalorder (!%p1663_p8), %s2404_s27, 8 }
  0x1c   : > { %121 = sbr.rel (%p1663_p8) target bundleno = 229 (0xe5), region = 28 }
  0x23   : > { %125 = sbr.rel (%p122_p9) target bundleno = 209 (0xd1), region = 32  ;;  %s2410_s29 = sand.u32 (!%p122_p9), 7, %s2404_s27  }
  0x24   : > { %p171_p10 = scmp.eq.s32.totalorder (!%p122_p9), %s2410_s29, 0  ;;  %p1664_p11 = scmp.ne.s32.totalorder (!%p122_p9), %s2410_s29, 0 }
  0x2a   : > { %174 = sbr.rel (%p1664_p11) target bundleno = 116 (0x74), region = 47  ;;  %s175_s30 = sshrl.u32 (!%p1664_p11), %s2404_s27, 3 }
  0x2b   : > { %s2417_s3 = sshrl.u32 (!%p1664_p11), %s175_s30, 2 }
  0x2c   : > { %p1665_p12 = scmp.le.s32.totalorder (!%p1664_p11), %s2417_s3, 0 }
  0x31   : > { %1526 = sbr.rel (%p1665_p12) target bundleno = 89 (0x59), region = 240  ;;  %s3628_s4 = smov (!%p1665_p12), %s2406_s28 }
  0x32   : > { %s3629_s5 = smov (!%p1665_p12), %s2402_s25  ;;  %s2426_s6 = smov (!%p1665_p12), 0  }
  0x33   : > { %s2428_s7 = smov (!%p1665_p12), 0  }
  0x38 LB: >> { %v188_v0 = vld [vmem:[%s2207_s5] sm:$0xff]  ;;  %v190_v1 = vld [vmem:[%s2207_s5 + $0x8] sm:$0xff]  ;;  %v192_v2 = vld [vmem:[%s2207_s5 + $0x10] sm:$0xff]  ;;  %s316_s8 = sadd.s32 1, %s2211_s6  ;;  %s182_s7 = sadd.s32 1, %s2215_s7   ;;  %s2215_s7 = sphi %s2428_s7, %s182_s7   ;;  %s2211_s6 = sphi %s2426_s6, %s3632_s6   ;;  %s2207_s5 = sphi %s3629_s5, %s3631_s5   ;;  %s2203_s4 = sphi %s3628_s4, %s3630_s4  }
  0x39   : >> { %189 = vst [vmem:[%s2203_s4] sm:$0xff] %v188_v0  ;;  %191 = vst [vmem:[%s2203_s4 + $0x8] sm:$0xff] %v190_v1  ;;  %v194_v3 = vld [vmem:[%s2207_s5 + $0x18] sm:$0xff]  ;;  %v196_v4 = vld [vmem:[%s2207_s5 + $0x6] sm:$0xff]  ;;  %p317_p13 = scmp.ge.s32.totalorder %s316_s8, %s2417_s3  ;;  %p181_p0 = scmp.ge.s32.totalorder %s182_s7, %s2417_s3 }
  0x3a   : >> { %193 = vst [vmem:[%s2203_s4 + $0x10] sm:$0xff] %v192_v2  ;;  %v198_v5 = vld [vmem:[%s2207_s5 + $0xe] sm:$0xff]  ;;  %195 = vst [vmem:[%s2203_s4 + $0x18] sm:$0xff] %v194_v3  ;;  %v200_v6 = vld [vmem:[%s2207_s5 + $0x16] sm:$0xff] }
  0x3b   : >> { %197 = vst [vmem:[%s2203_s4 + $0x4] sm:$0xff] %v196_v4  ;;  %199 = vst [vmem:[%s2203_s4 + $0xc] sm:$0xff] %v198_v5  ;;  %v202_v7 = vld [vmem:[%s2207_s5 + $0x1e] sm:$0xff]  ;;  %v204_v8 = vld [vmem:[%s2207_s5 + $0xc] sm:$0xff]  ;;  %s3670_s8 = smov (%p317_p13, %s316_s8), 0 }
  0x3c   : >> { %201 = vst [vmem:[%s2203_s4 + $0x14] sm:$0xff] %v200_v6  ;;  %203 = vst [vmem:[%s2203_s4 + $0x1c] sm:$0xff] %v202_v7  ;;  %v206_v9 = vld [vmem:[%s2207_s5 + $0x14] sm:$0xff]  ;;  %v208_v10 = vld [vmem:[%s2207_s5 + $0x1c] sm:$0xff]  ;;  %s1666_s14 = sshll.u32 %s3670_s8, 5  ;;  %s3632_s6 = smov %s3670_s8 }
  0x3d   : >> { %205 = vst [vmem:[%s2203_s4 + $0x8] sm:$0xff] %v204_v8  ;;  %v210_v11 = vld [vmem:[%s2207_s5 + $0x24] sm:$0xff]  ;;  %207 = vst [vmem:[%s2203_s4 + $0x10] sm:$0xff] %v206_v9  ;;  %v212_v12 = vld [vmem:[%s2207_s5 + $0x12] sm:$0xff]  ;;  %s2484_s15 = scalar_lea.vmem %s2402_s25, %s1666_s14   ;;  %s2487_s18 = scalar_lea.vmem %s2406_s28, %s1666_s14 [#allocation2]  }
  0x3e   : >> { %209 = vst [vmem:[%s2203_s4 + $0x18] sm:$0xff] %v208_v10  ;;  %211 = vst [vmem:[%s2203_s4 + $0x20] sm:$0xff] %v210_v11  ;;  %v214_v13 = vld [vmem:[%s2207_s5 + $0x1a] sm:$0xff]  ;;  %v216_v14 = vld [vmem:[%s2207_s5 + $0x22] sm:$0xff] }
  0x3f   : >> { %213 = vst [vmem:[%s2203_s4 + $0xc] sm:$0xff] %v212_v12  ;;  %215 = vst [vmem:[%s2203_s4 + $0x14] sm:$0xff] %v214_v13  ;;  %v218_v15 = vld [vmem:[%s2207_s5 + $0x2a] sm:$0xff]  ;;  %v222_v16 = vld [vmem:[%s2207_s5 + $0x20] sm:$0xff] }
  0x40   : >> { %217 = vst [vmem:[%s2203_s4 + $0x1c] sm:$0xff] %v216_v14  ;;  %v224_v17 = vld [vmem:[%s2207_s5 + $0x28] sm:$0xff]  ;;  %219 = vst [vmem:[%s2203_s4 + $0x24] sm:$0xff] %v218_v15  ;;  %v226_v18 = vld [vmem:[%s2207_s5 + $0x30] sm:$0xff] }
  0x41   : >> { %221 = vst [vmem:[%s2203_s4 + $0x10] sm:$0xff] %v194_v3  ;;  %223 = vst [vmem:[%s2203_s4 + $0x18] sm:$0xff] %v222_v16  ;;  %v230_v19 = vld [vmem:[%s2207_s5 + $0x26] sm:$0xff]  ;;  %v232_v20 = vld [vmem:[%s2207_s5 + $0x2e] sm:$0xff] }
  0x42   : >> { %225 = vst [vmem:[%s2203_s4 + $0x20] sm:$0xff] %v224_v17  ;;  %227 = vst [vmem:[%s2203_s4 + $0x28] sm:$0xff] %v226_v18  ;;  %v234_v21 = vld [vmem:[%s2207_s5 + $0x36] sm:$0xff]  ;;  %v238_v22 = vld [vmem:[%s2207_s5 + $0x2c] sm:$0xff] }
  0x43   : >> { %229 = vst [vmem:[%s2203_s4 + $0x14] sm:$0xff] %v202_v7  ;;  %v240_v23 = vld [vmem:[%s2207_s5 + $0x34] sm:$0xff]  ;;  %231 = vst [vmem:[%s2203_s4 + $0x1c] sm:$0xff] %v230_v19  ;;  %v242_v24 = vld [vmem:[%s2207_s5 + $0x3c] sm:$0xff] }
  0x44   : >> { %233 = vst [vmem:[%s2203_s4 + $0x24] sm:$0xff] %v232_v20  ;;  %235 = vst [vmem:[%s2203_s4 + $0x2c] sm:$0xff] %v234_v21  ;;  %v246_v25 = vld [vmem:[%s2207_s5 + $0x32] sm:$0xff]  ;;  %v248_v26 = vld [vmem:[%s2207_s5 + $0x3a] sm:$0xff] }
  0x45   : >> { %237 = vst [vmem:[%s2203_s4 + $0x18] sm:$0xff] %v210_v11  ;;  %239 = vst [vmem:[%s2203_s4 + $0x20] sm:$0xff] %v238_v22  ;;  %v250_v27 = vld [vmem:[%s2207_s5 + $0x42] sm:$0xff]  ;;  %v254_v28 = vld [vmem:[%s2207_s5 + $0x38] sm:$0xff] }
  0x46   : >> { %241 = vst [vmem:[%s2203_s4 + $0x28] sm:$0xff] %v240_v23  ;;  %243 = vst [vmem:[%s2203_s4 + $0x30] sm:$0xff] %v242_v24  ;;  %v256_v29 = vld [vmem:[%s2207_s5 + $0x40] sm:$0xff]  ;;  %v258_v30 = vld [vmem:[%s2207_s5 + $0x48] sm:$0xff] }
  0x47   : >> { %245 = vst [vmem:[%s2203_s4 + $0x1c] sm:$0xff] %v218_v15  ;;  %247 = vst [vmem:[%s2203_s4 + $0x24] sm:$0xff] %v246_v25  ;;  %v262_v31 = vld [vmem:[%s2207_s5 + $0x3e] sm:$0xff]  ;;  %v264_v32 = vld [vmem:[%s2207_s5 + $0x46] sm:$0xff] }
  0x48   : >> { %249 = vst [vmem:[%s2203_s4 + $0x2c] sm:$0xff] %v248_v26  ;;  %251 = vst [vmem:[%s2203_s4 + $0x34] sm:$0xff] %v250_v27  ;;  %v266_v33 = vld [vmem:[%s2207_s5 + $0x4e] sm:$0xff]  ;;  %v270_v34 = vld [vmem:[%s2207_s5 + $0x44] sm:$0xff] }
  0x49   : >> { %253 = vst [vmem:[%s2203_s4 + $0x20] sm:$0xff] %v226_v18  ;;  %255 = vst [vmem:[%s2203_s4 + $0x28] sm:$0xff] %v254_v28  ;;  %v272_v35 = vld [vmem:[%s2207_s5 + $0x4c] sm:$0xff]  ;;  %v274_v36 = vld [vmem:[%s2207_s5 + $0x54] sm:$0xff] }
  0x4a   : >> { %257 = vst [vmem:[%s2203_s4 + $0x30] sm:$0xff] %v256_v29  ;;  %259 = vst [vmem:[%s2203_s4 + $0x38] sm:$0xff] %v258_v30  ;;  %v278_v37 = vld [vmem:[%s2207_s5 + $0x4a] sm:$0xff]  ;;  %v280_v38 = vld [vmem:[%s2207_s5 + $0x52] sm:$0xff] }
  0x4b   : >> { %261 = vst [vmem:[%s2203_s4 + $0x24] sm:$0xff] %v234_v21  ;;  %263 = vst [vmem:[%s2203_s4 + $0x2c] sm:$0xff] %v262_v31  ;;  %v282_v39 = vld [vmem:[%s2207_s5 + $0x5a] sm:$0xff]  ;;  %v286_v40 = vld [vmem:[%s2207_s5 + $0x50] sm:$0xff] }
  0x4c   : >> { %265 = vst [vmem:[%s2203_s4 + $0x34] sm:$0xff] %v264_v32  ;;  %267 = vst [vmem:[%s2203_s4 + $0x3c] sm:$0xff] %v266_v33  ;;  %v288_v41 = vld [vmem:[%s2207_s5 + $0x58] sm:$0xff]  ;;  %v290_v42 = vld [vmem:[%s2207_s5 + $0x60] sm:$0xff] }
  0x4d   : >> { %269 = vst [vmem:[%s2203_s4 + $0x28] sm:$0xff] %v242_v24  ;;  %271 = vst [vmem:[%s2203_s4 + $0x30] sm:$0xff] %v270_v34  ;;  %v294_v43 = vld [vmem:[%s2207_s5 + $0x56] sm:$0xff]  ;;  %v296_v44 = vld [vmem:[%s2207_s5 + $0x5e] sm:$0xff] }
  0x4e   : >> { %273 = vst [vmem:[%s2203_s4 + $0x38] sm:$0xff] %v272_v35  ;;  %275 = vst [vmem:[%s2203_s4 + $0x40] sm:$0xff] %v274_v36  ;;  %v298_v45 = vld [vmem:[%s2207_s5 + $0x66] sm:$0xff]  ;;  %v302_v46 = vld [vmem:[%s2207_s5 + $0x5c] sm:$0xff] }
  0x4f   : >> { %277 = vst [vmem:[%s2203_s4 + $0x2c] sm:$0xff] %v250_v27  ;;  %279 = vst [vmem:[%s2203_s4 + $0x34] sm:$0xff] %v278_v37  ;;  %v304_v47 = vld [vmem:[%s2207_s5 + $0x64] sm:$0xff]  ;;  %v306_v48 = vld [vmem:[%s2207_s5 + $0x6c] sm:$0xff] }
  0x50   : >> { %281 = vst [vmem:[%s2203_s4 + $0x3c] sm:$0xff] %v280_v38  ;;  %283 = vst [vmem:[%s2203_s4 + $0x44] sm:$0xff] %v282_v39  ;;  %v310_v49 = vld [vmem:[%s2207_s5 + $0x62] sm:$0xff]  ;;  %v312_v50 = vld [vmem:[%s2207_s5 + $0x6a] sm:$0xff] }
  0x51   : >> { %285 = vst [vmem:[%s2203_s4 + $0x30] sm:$0xff] %v258_v30  ;;  %287 = vst [vmem:[%s2203_s4 + $0x38] sm:$0xff] %v286_v40  ;;  %v314_v51 = vld [vmem:[%s2207_s5 + $0x72] sm:$0xff]  ;;  %s3631_s5 = smov %s2484_s15 }
  0x52   : >> { %289 = vst [vmem:[%s2203_s4 + $0x40] sm:$0xff] %v288_v41  ;;  %291 = vst [vmem:[%s2203_s4 + $0x48] sm:$0xff] %v290_v42  ;;  %184 = sbr.rel (!%p181_p0) target bundleno = 56 (0x38), region = 246 }
  0x53   : >> { %293 = vst [vmem:[%s2203_s4 + $0x34] sm:$0xff] %v266_v33  ;;  %295 = vst [vmem:[%s2203_s4 + $0x3c] sm:$0xff] %v294_v43 }
  0x54   : >> { %297 = vst [vmem:[%s2203_s4 + $0x44] sm:$0xff] %v296_v44  ;;  %299 = vst [vmem:[%s2203_s4 + $0x4c] sm:$0xff] %v298_v45 }
  0x55   : >> { %301 = vst [vmem:[%s2203_s4 + $0x38] sm:$0xff] %v274_v36  ;;  %303 = vst [vmem:[%s2203_s4 + $0x40] sm:$0xff] %v302_v46 }
  0x56   : >> { %305 = vst [vmem:[%s2203_s4 + $0x48] sm:$0xff] %v304_v47  ;;  %307 = vst [vmem:[%s2203_s4 + $0x50] sm:$0xff] %v306_v48 }
  0x57   : >> { %309 = vst [vmem:[%s2203_s4 + $0x3c] sm:$0xff] %v282_v39  ;;  %311 = vst [vmem:[%s2203_s4 + $0x44] sm:$0xff] %v310_v49 }
  0x58   : >> { %313 = vst [vmem:[%s2203_s4 + $0x4c] sm:$0xff] %v312_v50  ;;  %315 = vst [vmem:[%s2203_s4 + $0x54] sm:$0xff] %v314_v51  ;;  %s3630_s4 = smov %s2487_s18 }
  0x59 PF: > { %s2581_s19 = sand.u32 3, %s175_s30   ;;  %s1732_s20 = sshll.u32 %s2417_s3, 9 }
  0x5a   : > { %s327_s21 = sshra.s32 %s1732_s20, 4  ;;  %p1671_p1 = scmp.le.s32.totalorder %s2581_s19, 0 }
  0x5b   : > { %s2585_s22 = scalar_lea.vmem %s2402_s25, %s327_s21   ;;  %s2588_s23 = scalar_lea.vmem %s2406_s28, %s327_s21 [#allocation2]  }
  0x5c   : > { %1540 = sbr.rel (%p1671_p1) target bundleno = 116 (0x74), region = 251  ;;  %s3633_s24 = smov (!%p1671_p1), %s2588_s23 }
  0x5d   : > { %s3634_s26 = smov (!%p1671_p1), %s2585_s22  ;;  %s2597_s4 = smov (!%p1671_p1), 0  }
  0x5e   : > { %s2599_s5 = smov (!%p1671_p1), 0  }
  0x63 LB: >> { %v343_v52 = vld [vmem:[%s2223_s26] sm:$0xff]  ;;  %v347_v54 = vld [vmem:[%s2223_s26 + $0xc] sm:$0xff]  ;;  %s375_s30 = sadd.s32 1, %s2227_s4  ;;  %v351_v56 = vld [vmem:[%s2223_s26 + $0x18] sm:$0xff]  ;;  %s337_s5 = sadd.s32 1, %s2231_s5   ;;  %s2231_s5 = sphi %s2599_s5, %s337_s5   ;;  %s2227_s4 = sphi %s2597_s4, %s3637_s4   ;;  %s2223_s26 = sphi %s3634_s26, %s3636_s26   ;;  %s2219_s24 = sphi %s3633_s24, %s3635_s24  }
  0x64   : >> { %v345_v53 = vld [vmem:[%s2223_s26 + $0x6] sm:$0xff]  ;;  %344 = vst [vmem:[%s2219_s24] sm:$0xff] %v343_v52  ;;  %v349_v55 = vld [vmem:[%s2223_s26 + $0x12] sm:$0xff]  ;;  %p376_p2 = scmp.ge.s32.totalorder %s375_s30, %s2581_s19  ;;  %v353_v57 = vld [vmem:[%s2223_s26 + $0x1e] sm:$0xff]  ;;  %p336_p3 = scmp.ge.s32.totalorder %s337_s5, %s2581_s19 }
  0x65   : >> { %346 = vst [vmem:[%s2219_s24 + $0x4] sm:$0xff] %v345_v53  ;;  %v355_v58 = vld [vmem:[%s2223_s26 + $0x24] sm:$0xff]  ;;  %v359_v60 = vld [vmem:[%s2223_s26 + $0x30] sm:$0xff]  ;;  %v363_v62 = vld [vmem:[%s2223_s26 + $0x3c] sm:$0xff] }
  0x66   : >> { %348 = vst [vmem:[%s2219_s24 + $0x8] sm:$0xff] %v347_v54  ;;  %s3672_s30 = smov (%p376_p2, %s375_s30), 0  ;;  %v357_v59 = vld [vmem:[%s2223_s26 + $0x2a] sm:$0xff]  ;;  %v361_v61 = vld [vmem:[%s2223_s26 + $0x36] sm:$0xff]  ;;  %v365_v63 = vld [vmem:[%s2223_s26 + $0x42] sm:$0xff] }
  0x67   : >> { %350 = vst [vmem:[%s2219_s24 + $0xc] sm:$0xff] %v349_v55  ;;  %s1672_s3 = sshll.u32 %s3672_s30, 3  ;;  %v367_v0 = vld [vmem:[%s2223_s26 + $0x48] sm:$0xff]  ;;  %v371_v2 = vld [vmem:[%s2223_s26 + $0x54] sm:$0xff]  ;;  %s3637_s4 = smov %s3672_s30 }
  0x68   : >> { %352 = vst [vmem:[%s2219_s24 + $0x10] sm:$0xff] %v351_v56  ;;  %s380_s6 = scalar_lea.vmem %s2585_s22, %s1672_s3   ;;  %s381_s7 = scalar_lea.vmem %s2588_s23, %s1672_s3 [#allocation2]   ;;  %v369_v1 = vld [vmem:[%s2223_s26 + $0x4e] sm:$0xff]  ;;  %v373_v3 = vld [vmem:[%s2223_s26 + $0x5a] sm:$0xff] }
  0x69   : >> { %354 = vst [vmem:[%s2219_s24 + $0x14] sm:$0xff] %v353_v57  ;;  %s3636_s26 = smov %s380_s6 }
  0x6a   : >> { %356 = vst [vmem:[%s2219_s24 + $0x18] sm:$0xff] %v355_v58 }
  0x6b   : >> { %358 = vst [vmem:[%s2219_s24 + $0x1c] sm:$0xff] %v357_v59 }
  0x6c   : >> { %360 = vst [vmem:[%s2219_s24 + $0x20] sm:$0xff] %v359_v60 }
  0x6d   : >> { %362 = vst [vmem:[%s2219_s24 + $0x24] sm:$0xff] %v361_v61  ;;  %339 = sbr.rel (!%p336_p3) target bundleno = 99 (0x63), region = 257 }
  0x6e   : >> { %364 = vst [vmem:[%s2219_s24 + $0x28] sm:$0xff] %v363_v62 }
  0x6f   : >> { %366 = vst [vmem:[%s2219_s24 + $0x2c] sm:$0xff] %v365_v63 }
  0x70   : >> { %368 = vst [vmem:[%s2219_s24 + $0x30] sm:$0xff] %v367_v0 }
  0x71   : >> { %370 = vst [vmem:[%s2219_s24 + $0x34] sm:$0xff] %v369_v1 }
  0x72   : >> { %372 = vst [vmem:[%s2219_s24 + $0x38] sm:$0xff] %v371_v2 }
  0x73   : >> { %374 = vst [vmem:[%s2219_s24 + $0x3c] sm:$0xff] %v373_v3  ;;  %s3635_s24 = smov %s381_s7 }
  0x74 PF: > { %384 = sbr.rel (%p171_p10) target bundleno = 209 (0xd1), region = 65  ;;  %s386_s8 = ssub.s32 (!%p171_p10), %s2404_s27, %s2410_s29 }
  0x75   : > { %s390_s14 = sshrl.u32 (!%p171_p10), %s2404_s27, 3  ;;  %s2666_s15 = scalar_lea.vmem (!%p171_p10), %s2402_s25, %s386_s8 }
  0x76   : > { %s2669_s18 = scalar_lea.vmem (!%p171_p10), %s2406_s28, %s386_s8 [#allocation2]  ;;  %s2673_s20 = sshrl.u32 (!%p171_p10), %s390_s14, 2 }
  0x77   : > { %p1674_p4 = scmp.le.s32.totalorder (!%p171_p10), %s2673_s20, 0 }
  0x7b   : > { %1554 = sbr.rel (%p1674_p4) target bundleno = 163 (0xa3), region = 262  ;;  %s3638_s19 = smov (!%p1674_p4), %s2406_s28 }
  0x7c   : > { %s3639_s21 = smov (!%p1674_p4), %s2402_s25  ;;  %s2682_s22 = smov (!%p1674_p4), 0  }
  0x7d   : > { %s2684_s23 = smov (!%p1674_p4), 0  }
  0x82 LB: >> { %v403_v4 = vld [vmem:[%s2239_s21] sm:$0xff]  ;;  %v405_v5 = vld [vmem:[%s2239_s21 + $0x8] sm:$0xff]  ;;  %v407_v6 = vld [vmem:[%s2239_s21 + $0x10] sm:$0xff]  ;;  %s531_s24 = sadd.s32 1, %s2243_s22  ;;  %s397_s23 = sadd.s32 1, %s2247_s23   ;;  %s2247_s23 = sphi %s2684_s23, %s397_s23   ;;  %s2243_s22 = sphi %s2682_s22, %s3642_s22   ;;  %s2239_s21 = sphi %s3639_s21, %s3641_s21   ;;  %s2235_s19 = sphi %s3638_s19, %s3640_s19  }
  0x83   : >> { %404 = vst [vmem:[%s2235_s19] sm:$0xff] %v403_v4  ;;  %406 = vst [vmem:[%s2235_s19 + $0x8] sm:$0xff] %v405_v5  ;;  %v409_v7 = vld [vmem:[%s2239_s21 + $0x18] sm:$0xff]  ;;  %v411_v8 = vld [vmem:[%s2239_s21 + $0x6] sm:$0xff]  ;;  %p532_p6 = scmp.ge.s32.totalorder %s531_s24, %s2673_s20  ;;  %p396_p7 = scmp.ge.s32.totalorder %s397_s23, %s2673_s20 }
  0x84   : >> { %408 = vst [vmem:[%s2235_s19 + $0x10] sm:$0xff] %v407_v6  ;;  %v413_v9 = vld [vmem:[%s2239_s21 + $0xe] sm:$0xff]  ;;  %410 = vst [vmem:[%s2235_s19 + $0x18] sm:$0xff] %v409_v7  ;;  %v415_v10 = vld [vmem:[%s2239_s21 + $0x16] sm:$0xff] }
  0x85   : >> { %412 = vst [vmem:[%s2235_s19 + $0x4] sm:$0xff] %v411_v8  ;;  %414 = vst [vmem:[%s2235_s19 + $0xc] sm:$0xff] %v413_v9  ;;  %v417_v11 = vld [vmem:[%s2239_s21 + $0x1e] sm:$0xff]  ;;  %v419_v12 = vld [vmem:[%s2239_s21 + $0xc] sm:$0xff]  ;;  %s3674_s24 = smov (%p532_p6, %s531_s24), 0 }
  0x86   : >> { %416 = vst [vmem:[%s2235_s19 + $0x14] sm:$0xff] %v415_v10  ;;  %418 = vst [vmem:[%s2235_s19 + $0x1c] sm:$0xff] %v417_v11  ;;  %v421_v13 = vld [vmem:[%s2239_s21 + $0x14] sm:$0xff]  ;;  %v423_v14 = vld [vmem:[%s2239_s21 + $0x1c] sm:$0xff]  ;;  %s1675_s26 = sshll.u32 %s3674_s24, 5  ;;  %s3642_s22 = smov %s3674_s24 }
  0x87   : >> { %420 = vst [vmem:[%s2235_s19 + $0x8] sm:$0xff] %v419_v12  ;;  %v425_v15 = vld [vmem:[%s2239_s21 + $0x24] sm:$0xff]  ;;  %422 = vst [vmem:[%s2235_s19 + $0x10] sm:$0xff] %v421_v13  ;;  %v427_v16 = vld [vmem:[%s2239_s21 + $0x12] sm:$0xff]  ;;  %s2740_s4 = scalar_lea.vmem %s2402_s25, %s1675_s26   ;;  %s2743_s5 = scalar_lea.vmem %s2406_s28, %s1675_s26 [#allocation2]  }
  0x88   : >> { %424 = vst [vmem:[%s2235_s19 + $0x18] sm:$0xff] %v423_v14  ;;  %426 = vst [vmem:[%s2235_s19 + $0x20] sm:$0xff] %v425_v15  ;;  %v429_v17 = vld [vmem:[%s2239_s21 + $0x1a] sm:$0xff]  ;;  %v431_v18 = vld [vmem:[%s2239_s21 + $0x22] sm:$0xff] }
  0x89   : >> { %428 = vst [vmem:[%s2235_s19 + $0xc] sm:$0xff] %v427_v16  ;;  %430 = vst [vmem:[%s2235_s19 + $0x14] sm:$0xff] %v429_v17  ;;  %v433_v19 = vld [vmem:[%s2239_s21 + $0x2a] sm:$0xff]  ;;  %v437_v20 = vld [vmem:[%s2239_s21 + $0x20] sm:$0xff] }
  0x8a   : >> { %432 = vst [vmem:[%s2235_s19 + $0x1c] sm:$0xff] %v431_v18  ;;  %v439_v21 = vld [vmem:[%s2239_s21 + $0x28] sm:$0xff]  ;;  %434 = vst [vmem:[%s2235_s19 + $0x24] sm:$0xff] %v433_v19  ;;  %v441_v22 = vld [vmem:[%s2239_s21 + $0x30] sm:$0xff] }
  0x8b   : >> { %436 = vst [vmem:[%s2235_s19 + $0x10] sm:$0xff] %v409_v7  ;;  %438 = vst [vmem:[%s2235_s19 + $0x18] sm:$0xff] %v437_v20  ;;  %v445_v23 = vld [vmem:[%s2239_s21 + $0x26] sm:$0xff]  ;;  %v447_v24 = vld [vmem:[%s2239_s21 + $0x2e] sm:$0xff] }
  0x8c   : >> { %440 = vst [vmem:[%s2235_s19 + $0x20] sm:$0xff] %v439_v21  ;;  %442 = vst [vmem:[%s2235_s19 + $0x28] sm:$0xff] %v441_v22  ;;  %v449_v25 = vld [vmem:[%s2239_s21 + $0x36] sm:$0xff]  ;;  %v453_v26 = vld [vmem:[%s2239_s21 + $0x2c] sm:$0xff] }
  0x8d   : >> { %444 = vst [vmem:[%s2235_s19 + $0x14] sm:$0xff] %v417_v11  ;;  %v455_v27 = vld [vmem:[%s2239_s21 + $0x34] sm:$0xff]  ;;  %446 = vst [vmem:[%s2235_s19 + $0x1c] sm:$0xff] %v445_v23  ;;  %v457_v28 = vld [vmem:[%s2239_s21 + $0x3c] sm:$0xff] }
  0x8e   : >> { %448 = vst [vmem:[%s2235_s19 + $0x24] sm:$0xff] %v447_v24  ;;  %450 = vst [vmem:[%s2235_s19 + $0x2c] sm:$0xff] %v449_v25  ;;  %v461_v29 = vld [vmem:[%s2239_s21 + $0x32] sm:$0xff]  ;;  %v463_v30 = vld [vmem:[%s2239_s21 + $0x3a] sm:$0xff] }
  0x8f   : >> { %452 = vst [vmem:[%s2235_s19 + $0x18] sm:$0xff] %v425_v15  ;;  %454 = vst [vmem:[%s2235_s19 + $0x20] sm:$0xff] %v453_v26  ;;  %v465_v31 = vld [vmem:[%s2239_s21 + $0x42] sm:$0xff]  ;;  %v469_v32 = vld [vmem:[%s2239_s21 + $0x38] sm:$0xff] }
  0x90   : >> { %456 = vst [vmem:[%s2235_s19 + $0x28] sm:$0xff] %v455_v27  ;;  %458 = vst [vmem:[%s2235_s19 + $0x30] sm:$0xff] %v457_v28  ;;  %v471_v33 = vld [vmem:[%s2239_s21 + $0x40] sm:$0xff]  ;;  %v473_v34 = vld [vmem:[%s2239_s21 + $0x48] sm:$0xff] }
  0x91   : >> { %460 = vst [vmem:[%s2235_s19 + $0x1c] sm:$0xff] %v433_v19  ;;  %462 = vst [vmem:[%s2235_s19 + $0x24] sm:$0xff] %v461_v29  ;;  %v477_v35 = vld [vmem:[%s2239_s21 + $0x3e] sm:$0xff]  ;;  %v479_v36 = vld [vmem:[%s2239_s21 + $0x46] sm:$0xff] }
  0x92   : >> { %464 = vst [vmem:[%s2235_s19 + $0x2c] sm:$0xff] %v463_v30  ;;  %466 = vst [vmem:[%s2235_s19 + $0x34] sm:$0xff] %v465_v31  ;;  %v481_v37 = vld [vmem:[%s2239_s21 + $0x4e] sm:$0xff]  ;;  %v485_v38 = vld [vmem:[%s2239_s21 + $0x44] sm:$0xff] }
  0x93   : >> { %468 = vst [vmem:[%s2235_s19 + $0x20] sm:$0xff] %v441_v22  ;;  %470 = vst [vmem:[%s2235_s19 + $0x28] sm:$0xff] %v469_v32  ;;  %v487_v39 = vld [vmem:[%s2239_s21 + $0x4c] sm:$0xff]  ;;  %v489_v40 = vld [vmem:[%s2239_s21 + $0x54] sm:$0xff] }
  0x94   : >> { %472 = vst [vmem:[%s2235_s19 + $0x30] sm:$0xff] %v471_v33  ;;  %474 = vst [vmem:[%s2235_s19 + $0x38] sm:$0xff] %v473_v34  ;;  %v493_v41 = vld [vmem:[%s2239_s21 + $0x4a] sm:$0xff]  ;;  %v495_v42 = vld [vmem:[%s2239_s21 + $0x52] sm:$0xff] }
  0x95   : >> { %476 = vst [vmem:[%s2235_s19 + $0x24] sm:$0xff] %v449_v25  ;;  %478 = vst [vmem:[%s2235_s19 + $0x2c] sm:$0xff] %v477_v35  ;;  %v497_v43 = vld [vmem:[%s2239_s21 + $0x5a] sm:$0xff]  ;;  %v501_v44 = vld [vmem:[%s2239_s21 + $0x50] sm:$0xff] }
  0x96   : >> { %480 = vst [vmem:[%s2235_s19 + $0x34] sm:$0xff] %v479_v36  ;;  %482 = vst [vmem:[%s2235_s19 + $0x3c] sm:$0xff] %v481_v37  ;;  %v503_v45 = vld [vmem:[%s2239_s21 + $0x58] sm:$0xff]  ;;  %v505_v46 = vld [vmem:[%s2239_s21 + $0x60] sm:$0xff] }
  0x97   : >> { %484 = vst [vmem:[%s2235_s19 + $0x28] sm:$0xff] %v457_v28  ;;  %486 = vst [vmem:[%s2235_s19 + $0x30] sm:$0xff] %v485_v38  ;;  %v509_v47 = vld [vmem:[%s2239_s21 + $0x56] sm:$0xff]  ;;  %v511_v48 = vld [vmem:[%s2239_s21 + $0x5e] sm:$0xff] }
  0x98   : >> { %488 = vst [vmem:[%s2235_s19 + $0x38] sm:$0xff] %v487_v39  ;;  %490 = vst [vmem:[%s2235_s19 + $0x40] sm:$0xff] %v489_v40  ;;  %v513_v49 = vld [vmem:[%s2239_s21 + $0x66] sm:$0xff]  ;;  %v517_v50 = vld [vmem:[%s2239_s21 + $0x5c] sm:$0xff] }
  0x99   : >> { %492 = vst [vmem:[%s2235_s19 + $0x2c] sm:$0xff] %v465_v31  ;;  %494 = vst [vmem:[%s2235_s19 + $0x34] sm:$0xff] %v493_v41  ;;  %v519_v51 = vld [vmem:[%s2239_s21 + $0x64] sm:$0xff]  ;;  %v521_v52 = vld [vmem:[%s2239_s21 + $0x6c] sm:$0xff] }
  0x9a   : >> { %496 = vst [vmem:[%s2235_s19 + $0x3c] sm:$0xff] %v495_v42  ;;  %498 = vst [vmem:[%s2235_s19 + $0x44] sm:$0xff] %v497_v43  ;;  %v525_v53 = vld [vmem:[%s2239_s21 + $0x62] sm:$0xff]  ;;  %v527_v54 = vld [vmem:[%s2239_s21 + $0x6a] sm:$0xff] }
  0x9b   : >> { %500 = vst [vmem:[%s2235_s19 + $0x30] sm:$0xff] %v473_v34  ;;  %502 = vst [vmem:[%s2235_s19 + $0x38] sm:$0xff] %v501_v44  ;;  %v529_v55 = vld [vmem:[%s2239_s21 + $0x72] sm:$0xff]  ;;  %s3641_s21 = smov %s2740_s4 }
  0x9c   : >> { %504 = vst [vmem:[%s2235_s19 + $0x40] sm:$0xff] %v503_v45  ;;  %506 = vst [vmem:[%s2235_s19 + $0x48] sm:$0xff] %v505_v46  ;;  %399 = sbr.rel (!%p396_p7) target bundleno = 130 (0x82), region = 268 }
  0x9d   : >> { %508 = vst [vmem:[%s2235_s19 + $0x34] sm:$0xff] %v481_v37  ;;  %510 = vst [vmem:[%s2235_s19 + $0x3c] sm:$0xff] %v509_v47 }
  0x9e   : >> { %512 = vst [vmem:[%s2235_s19 + $0x44] sm:$0xff] %v511_v48  ;;  %514 = vst [vmem:[%s2235_s19 + $0x4c] sm:$0xff] %v513_v49 }
  0x9f   : >> { %516 = vst [vmem:[%s2235_s19 + $0x38] sm:$0xff] %v489_v40  ;;  %518 = vst [vmem:[%s2235_s19 + $0x40] sm:$0xff] %v517_v50 }
  0xa0   : >> { %520 = vst [vmem:[%s2235_s19 + $0x48] sm:$0xff] %v519_v51  ;;  %522 = vst [vmem:[%s2235_s19 + $0x50] sm:$0xff] %v521_v52 }
  0xa1   : >> { %524 = vst [vmem:[%s2235_s19 + $0x3c] sm:$0xff] %v497_v43  ;;  %526 = vst [vmem:[%s2235_s19 + $0x44] sm:$0xff] %v525_v53 }
  0xa2   : >> { %528 = vst [vmem:[%s2235_s19 + $0x4c] sm:$0xff] %v527_v54  ;;  %530 = vst [vmem:[%s2235_s19 + $0x54] sm:$0xff] %v529_v55  ;;  %s3640_s19 = smov %s2743_s5 }
  0xa3 PF: > { %s2837_s30 = sand.u32 3, %s390_s14   ;;  %s1734_s3 = sshll.u32 %s2673_s20, 9 }
  0xa4   : > { %s542_s6 = sshra.s32 %s1734_s3, 4  ;;  %p1680_p8 = scmp.le.s32.totalorder %s2837_s30, 0 }
  0xa5   : > { %s2841_s7 = scalar_lea.vmem %s2402_s25, %s542_s6   ;;  %s2844_s8 = scalar_lea.vmem %s2406_s28, %s542_s6 [#allocation2]  }
  0xa6   : > { %1568 = sbr.rel (%p1680_p8) target bundleno = 190 (0xbe), region = 273  ;;  %s3643_s19 = smov (!%p1680_p8), %s2844_s8 }
  0xa7   : > { %s3644_s21 = smov (!%p1680_p8), %s2841_s7  ;;  %s2853_s22 = smov (!%p1680_p8), 0  }
  0xa8   : > { %s2855_s23 = smov (!%p1680_p8), 0  }
  0xad LB: >> { %v558_v56 = vld [vmem:[%s2255_s21] sm:$0xff]  ;;  %v562_v58 = vld [vmem:[%s2255_s21 + $0xc] sm:$0xff]  ;;  %s590_s14 = sadd.s32 1, %s2259_s22  ;;  %v566_v60 = vld [vmem:[%s2255_s21 + $0x18] sm:$0xff]  ;;  %s552_s23 = sadd.s32 1, %s2263_s23   ;;  %s2263_s23 = sphi %s2855_s23, %s552_s23   ;;  %s2259_s22 = sphi %s2853_s22, %s3647_s22   ;;  %s2255_s21 = sphi %s3644_s21, %s3646_s21   ;;  %s2251_s19 = sphi %s3643_s19, %s3645_s19  }
  0xae   : >> { %v560_v57 = vld [vmem:[%s2255_s21 + $0x6] sm:$0xff]  ;;  %559 = vst [vmem:[%s2251_s19] sm:$0xff] %v558_v56  ;;  %v564_v59 = vld [vmem:[%s2255_s21 + $0x12] sm:$0xff]  ;;  %p591_p9 = scmp.ge.s32.totalorder %s590_s14, %s2837_s30  ;;  %v568_v61 = vld [vmem:[%s2255_s21 + $0x1e] sm:$0xff]  ;;  %p551_p10 = scmp.ge.s32.totalorder %s552_s23, %s2837_s30 }
  0xaf   : >> { %561 = vst [vmem:[%s2251_s19 + $0x4] sm:$0xff] %v560_v57  ;;  %v570_v62 = vld [vmem:[%s2255_s21 + $0x24] sm:$0xff]  ;;  %v574_v0 = vld [vmem:[%s2255_s21 + $0x30] sm:$0xff]  ;;  %v578_v2 = vld [vmem:[%s2255_s21 + $0x3c] sm:$0xff] }
  0xb0   : >> { %563 = vst [vmem:[%s2251_s19 + $0x8] sm:$0xff] %v562_v58  ;;  %s3676_s14 = smov (%p591_p9, %s590_s14), 0  ;;  %v572_v63 = vld [vmem:[%s2255_s21 + $0x2a] sm:$0xff]  ;;  %v576_v1 = vld [vmem:[%s2255_s21 + $0x36] sm:$0xff]  ;;  %v580_v3 = vld [vmem:[%s2255_s21 + $0x42] sm:$0xff] }
  0xb1   : >> { %565 = vst [vmem:[%s2251_s19 + $0xc] sm:$0xff] %v564_v59  ;;  %s1681_s20 = sshll.u32 %s3676_s14, 3  ;;  %v582_v4 = vld [vmem:[%s2255_s21 + $0x48] sm:$0xff]  ;;  %v586_v6 = vld [vmem:[%s2255_s21 + $0x54] sm:$0xff]  ;;  %s3647_s22 = smov %s3676_s14 }
  0xb2   : >> { %567 = vst [vmem:[%s2251_s19 + $0x10] sm:$0xff] %v566_v60  ;;  %s595_s24 = scalar_lea.vmem %s2841_s7, %s1681_s20   ;;  %s596_s26 = scalar_lea.vmem %s2844_s8, %s1681_s20 [#allocation2]   ;;  %v584_v5 = vld [vmem:[%s2255_s21 + $0x4e] sm:$0xff]  ;;  %v588_v7 = vld [vmem:[%s2255_s21 + $0x5a] sm:$0xff] }
  0xb3   : >> { %569 = vst [vmem:[%s2251_s19 + $0x14] sm:$0xff] %v568_v61  ;;  %s3646_s21 = smov %s595_s24 }
  0xb4   : >> { %571 = vst [vmem:[%s2251_s19 + $0x18] sm:$0xff] %v570_v62 }
  0xb5   : >> { %573 = vst [vmem:[%s2251_s19 + $0x1c] sm:$0xff] %v572_v63 }
  0xb6   : >> { %575 = vst [vmem:[%s2251_s19 + $0x20] sm:$0xff] %v574_v0 }
  0xb7   : >> { %577 = vst [vmem:[%s2251_s19 + $0x24] sm:$0xff] %v576_v1  ;;  %554 = sbr.rel (!%p551_p10) target bundleno = 173 (0xad), region = 279 }
  0xb8   : >> { %579 = vst [vmem:[%s2251_s19 + $0x28] sm:$0xff] %v578_v2 }
  0xb9   : >> { %581 = vst [vmem:[%s2251_s19 + $0x2c] sm:$0xff] %v580_v3 }
  0xba   : >> { %583 = vst [vmem:[%s2251_s19 + $0x30] sm:$0xff] %v582_v4 }
  0xbb   : >> { %585 = vst [vmem:[%s2251_s19 + $0x34] sm:$0xff] %v584_v5 }
  0xbc   : >> { %587 = vst [vmem:[%s2251_s19 + $0x38] sm:$0xff] %v586_v6 }
  0xbd   : >> { %589 = vst [vmem:[%s2251_s19 + $0x3c] sm:$0xff] %v588_v7  ;;  %s3645_s19 = smov %s596_s26 }
  0xbe PF: > { %s2329_s4 = smov 0  }
  0xbf   : > { %s2917_s5 = sshllo.u32 %s2329_s4, %s2410_s29 }
  0xc0   : > { %v606_v8 = vld [vmem:[%s2666_s15] sm:%s2917_s5]  ;;  %v610_v10 = vld [vmem:[%s2666_s15 + $0xc] sm:%s2917_s5] }
  0xc1   : > { %v608_v9 = vld [vmem:[%s2666_s15 + $0x6] sm:%s2917_s5]  ;;  %607 = vst [vmem:[%s2669_s18] sm:%s2917_s5] %v606_v8 }
  0xc2   : > { %v612_v11 = vld [vmem:[%s2666_s15 + $0x12] sm:%s2917_s5]  ;;  %609 = vst [vmem:[%s2669_s18 + $0x4] sm:%s2917_s5] %v608_v9 }
  0xc3   : > { %v614_v12 = vld [vmem:[%s2666_s15 + $0x18] sm:%s2917_s5]  ;;  %611 = vst [vmem:[%s2669_s18 + $0x8] sm:%s2917_s5] %v610_v10 }
  0xc4   : > { %v616_v13 = vld [vmem:[%s2666_s15 + $0x1e] sm:%s2917_s5]  ;;  %613 = vst [vmem:[%s2669_s18 + $0xc] sm:%s2917_s5] %v612_v11 }
  0xc5   : > { %v618_v14 = vld [vmem:[%s2666_s15 + $0x24] sm:%s2917_s5]  ;;  %615 = vst [vmem:[%s2669_s18 + $0x10] sm:%s2917_s5] %v614_v12 }
  0xc6   : > { %v620_v15 = vld [vmem:[%s2666_s15 + $0x2a] sm:%s2917_s5]  ;;  %617 = vst [vmem:[%s2669_s18 + $0x14] sm:%s2917_s5] %v616_v13 }
  0xc7   : > { %v622_v16 = vld [vmem:[%s2666_s15 + $0x30] sm:%s2917_s5]  ;;  %619 = vst [vmem:[%s2669_s18 + $0x18] sm:%s2917_s5] %v618_v14 }
  0xc8   : > { %v624_v17 = vld [vmem:[%s2666_s15 + $0x36] sm:%s2917_s5]  ;;  %621 = vst [vmem:[%s2669_s18 + $0x1c] sm:%s2917_s5] %v620_v15 }
  0xc9   : > { %v626_v18 = vld [vmem:[%s2666_s15 + $0x3c] sm:%s2917_s5]  ;;  %623 = vst [vmem:[%s2669_s18 + $0x20] sm:%s2917_s5] %v622_v16 }
  0xca   : > { %v628_v19 = vld [vmem:[%s2666_s15 + $0x42] sm:%s2917_s5]  ;;  %625 = vst [vmem:[%s2669_s18 + $0x24] sm:%s2917_s5] %v624_v17 }
  0xcb   : > { %v630_v20 = vld [vmem:[%s2666_s15 + $0x48] sm:%s2917_s5]  ;;  %627 = vst [vmem:[%s2669_s18 + $0x28] sm:%s2917_s5] %v626_v18 }
  0xcc   : > { %v632_v21 = vld [vmem:[%s2666_s15 + $0x4e] sm:%s2917_s5]  ;;  %629 = vst [vmem:[%s2669_s18 + $0x2c] sm:%s2917_s5] %v628_v19 }
  0xcd   : > { %v634_v22 = vld [vmem:[%s2666_s15 + $0x54] sm:%s2917_s5]  ;;  %631 = vst [vmem:[%s2669_s18 + $0x30] sm:%s2917_s5] %v630_v20 }
  0xce   : > { %v636_v23 = vld [vmem:[%s2666_s15 + $0x5a] sm:%s2917_s5]  ;;  %633 = vst [vmem:[%s2669_s18 + $0x34] sm:%s2917_s5] %v632_v21 }
  0xcf   : > { %635 = vst [vmem:[%s2669_s18 + $0x38] sm:%s2917_s5] %v634_v22 }
  0xd0   : > { %637 = vst [vmem:[%s2669_s18 + $0x3c] sm:%s2917_s5] %v636_v23 }
  0xd1 PF: > { %p1683_p11 = scmp.ge.u32.totalorder %s2404_s27, 8 }
  0xd2   : > { %s2330_s29 = smov (!%p1683_p11), 0  }
  0xd3   : > { %128 = sbr.rel (%p1683_p11) target bundleno = 229 (0xe5), region = 36  ;;  %s2985_s15 = sshllo.u32 (!%p1683_p11), %s2330_s29, %s2404_s27 }
  0xd4   : > { %v138_v24 = vld [vmem:[%s2402_s25] sm:%s2985_s15] (!%p1683_p11)  ;;  %v142_v26 = vld [vmem:[%s2402_s25 + $0xc] sm:%s2985_s15] (!%p1683_p11) }
  0xd5   : > { %v140_v25 = vld [vmem:[%s2402_s25 + $0x6] sm:%s2985_s15] (!%p1683_p11)  ;;  %139 = vst [vmem:[%s2406_s28] sm:%s2985_s15] (!%p1683_p11), %v138_v24 }
  0xd6   : > { %v144_v27 = vld [vmem:[%s2402_s25 + $0x12] sm:%s2985_s15] (!%p1683_p11)  ;;  %141 = vst [vmem:[%s2406_s28 + $0x4] sm:%s2985_s15] (!%p1683_p11), %v140_v25 }
  0xd7   : > { %v146_v28 = vld [vmem:[%s2402_s25 + $0x18] sm:%s2985_s15] (!%p1683_p11)  ;;  %143 = vst [vmem:[%s2406_s28 + $0x8] sm:%s2985_s15] (!%p1683_p11), %v142_v26 }
  0xd8   : > { %v148_v29 = vld [vmem:[%s2402_s25 + $0x1e] sm:%s2985_s15] (!%p1683_p11)  ;;  %145 = vst [vmem:[%s2406_s28 + $0xc] sm:%s2985_s15] (!%p1683_p11), %v144_v27 }
  0xd9   : > { %v150_v30 = vld [vmem:[%s2402_s25 + $0x24] sm:%s2985_s15] (!%p1683_p11)  ;;  %147 = vst [vmem:[%s2406_s28 + $0x10] sm:%s2985_s15] (!%p1683_p11), %v146_v28 }
  0xda   : > { %v152_v31 = vld [vmem:[%s2402_s25 + $0x2a] sm:%s2985_s15]  ;;  %149 = vst [vmem:[%s2406_s28 + $0x14] sm:%s2985_s15] %v148_v29 }
  0xdb   : > { %v154_v32 = vld [vmem:[%s2402_s25 + $0x30] sm:%s2985_s15]  ;;  %151 = vst [vmem:[%s2406_s28 + $0x18] sm:%s2985_s15] %v150_v30 }
  0xdc   : > { %v156_v33 = vld [vmem:[%s2402_s25 + $0x36] sm:%s2985_s15]  ;;  %153 = vst [vmem:[%s2406_s28 + $0x1c] sm:%s2985_s15] %v152_v31 }
  0xdd   : > { %v158_v34 = vld [vmem:[%s2402_s25 + $0x3c] sm:%s2985_s15]  ;;  %155 = vst [vmem:[%s2406_s28 + $0x20] sm:%s2985_s15] %v154_v32 }
  0xde   : > { %v160_v35 = vld [vmem:[%s2402_s25 + $0x42] sm:%s2985_s15]  ;;  %157 = vst [vmem:[%s2406_s28 + $0x24] sm:%s2985_s15] %v156_v33 }
  0xdf   : > { %v162_v36 = vld [vmem:[%s2402_s25 + $0x48] sm:%s2985_s15]  ;;  %159 = vst [vmem:[%s2406_s28 + $0x28] sm:%s2985_s15] %v158_v34 }
  0xe0   : > { %v164_v37 = vld [vmem:[%s2402_s25 + $0x4e] sm:%s2985_s15]  ;;  %161 = vst [vmem:[%s2406_s28 + $0x2c] sm:%s2985_s15] %v160_v35 }
  0xe1   : > { %v166_v38 = vld [vmem:[%s2402_s25 + $0x54] sm:%s2985_s15]  ;;  %163 = vst [vmem:[%s2406_s28 + $0x30] sm:%s2985_s15] %v162_v36 }
  0xe2   : > { %v168_v39 = vld [vmem:[%s2402_s25 + $0x5a] sm:%s2985_s15]  ;;  %165 = vst [vmem:[%s2406_s28 + $0x34] sm:%s2985_s15] %v164_v37 }
  0xe3   : > { %167 = vst [vmem:[%s2406_s28 + $0x38] sm:%s2985_s15] %v166_v38 }
  0xe4   : > { %169 = vst [vmem:[%s2406_s28 + $0x3c] sm:%s2985_s15] %v168_v39 }
  0xe5 PF: > { %p1684_p12 = scmp.ge.s32.totalorder %s2199_s11, 1  ;;  %p640_p13 = scmp.lt.s32.totalorder %s2199_s11, 3 }
  0xe7   : > { %p641_p0 = pnand %p1684_p12, %p640_p13 }
  0xe8   : > { %v677_v40 = vld [vmem:[%s3625_s1] sm:$0xf] (!%p641_p0)  ;;  %v2331_v41 = vmov (!%p641_p0), 2   ;;  %v2332_v42 = vmov (!%p641_p0), 1   ;;  %v2333_v43 = vmov (!%p641_p0), 5   ;;  %v2334_v44 = vmov (!%p641_p0), 0  }
  0xe9   : > { %644 = sbr.rel (%p641_p0) target bundleno = 576 (0x240), region = 90  ;;  %2039 = vset.pattern.permute.xlu1 (!%p641_p0), %v2331_v41  ;;  %2037 = vset.pattern.permute.xlu0 (!%p641_p0), %v2332_v42  ;;  %v2335_v45 = vmov (!%p641_p0), 3   ;;  %v2336_v46 = vmov (!%p641_p0), 4   ;;  %v2337_v47 = vmov (!%p641_p0), 6   ;;  %v2338_v48 = vmov (!%p641_p0), 9   ;;  %s647_s11 = sand.u32 (!%p641_p0), 1, %s2191_s9  }
  0xea   : > { %706 = vperm.xlu1 (!%p641_p0), %2039, %v677_v40   ;;  %691 = vperm.xlu0 (!%p641_p0), %2037, %v677_v40   ;;  %v2339_v49 = vmov (!%p641_p0), 7   ;;  %v2340_v50 = vmov (!%p641_p0), 11   ;;  %v2341_v51 = vmov (!%p641_p0), 8   ;;  %v2342_v52 = vmov (!%p641_p0), 10   ;;  %s1685_s25 = sshll.u32 (!%p641_p0), %s647_s11, 6  ;;  %s1686_s30 = sshll.u32 (!%p641_p0), %s647_s11, 3 }
  0xeb   : > { %s649_s28 = scalar_lea.vmem (!%p641_p0), [#allocation2], %s1685_s25  ;;  %s3199_s3 = scalar_lea.vmem (!%p641_p0), [#allocation3], %s1686_s30  }
  0xec   : > { %v1687_v53 = vld [vmem:[%s649_s28 + $0x10] sm:$0xff] (!%p641_p0)   ;;  %v1695_v54 = vld [vmem:[%s649_s28 + $0x18] sm:$0xff] (!%p641_p0)   ;;  %v678_v55 = vld [vmem:[%s649_s28] sm:$0xff] (!%p641_p0)  }
  0xed   : > { %v682_v56 = vunpack.c.l.bf16 (!%p641_p0), %v1687_v53  ;;  %v801_v57 = vunpack.c.h.bf16 (!%p641_p0), %v1687_v53  ;;  %v873_v58 = vunpack.c.l.bf16 (!%p641_p0), %v1695_v54  ;;  %v3059_v59 = vunpack.c.h.bf16 (!%p641_p0), %v1695_v54  ;;  %v1694_v61 = vld [vmem:[%s649_s28 + $0x8] sm:$0xff] (!%p641_p0)   ;;  %v1688_v63 = vld [vmem:[%s649_s28 + $0x20] sm:$0xff] (!%p641_p0)   ;;  %v1689_v5 = vld [vmem:[%s649_s28 + $0x30] sm:$0xff] (!%p641_p0)  }
  0xee   : > { %2040 = vset.pattern.permute.xlu1 (!%p641_p0), %v2333_v43  ;;  %2038 = vset.pattern.permute.xlu0 (!%p641_p0), %v2334_v44  ;;  %v679_v60 = vunpack.c.l.bf16 (!%p641_p0), %v678_v55  ;;  %v798_v62 = vunpack.c.h.bf16 (!%p641_p0), %v678_v55  ;;  %v1696_v0 = vld [vmem:[%s649_s28 + $0x28] sm:$0xff] (!%p641_p0)   ;;  %v870_v3 = vunpack.c.l.bf16 (!%p641_p0), %v1694_v61  ;;  %v942_v4 = vunpack.c.h.bf16 (!%p641_p0), %v1694_v61  ;;  %v1697_v10 = vld [vmem:[%s649_s28 + $0x38] sm:$0xff] (!%p641_p0)  }
  0xef   : > { %729 = vperm.xlu1 (!%p641_p0), %2040, %v677_v40   ;;  %700 = vperm.xlu0 (!%p641_p0), %2038, %v677_v40   ;;  %v710_v1 = vcombine.high (!%p641_p0), %v682_v56, %v682_v56  ;;  %v816_v2 = vcombine.high (!%p641_p0), %v801_v57, %v801_v57  ;;  %v888_v6 = vcombine.high (!%p641_p0), %v873_v58, %v873_v58  ;;  %v685_v9 = vunpack.c.l.bf16 (!%p641_p0), %v1688_v63 }
  0xf0   : > { %v960_v7 = vcombine.high %v3059_v59, %v3059_v59  ;;  %v695_v8 = vcombine.high %v679_v60, %v679_v60  ;;  %v809_v11 = vcombine.high %v798_v62, %v798_v62  ;;  %v804_v12 = vunpack.c.h.bf16 %v1688_v63  ;;  %s1703_s6 = sshll.u32 (%p2391_p5), %s2376_s12, 1  ;;  %s1736_s7 = sshll.u32 (%p2391_p5), %s2376_s12, 3 }
  0xf1   : > { %v876_v13 = vunpack.c.l.bf16 %v1696_v0  ;;  %v3063_v14 = vunpack.c.h.bf16 %v1696_v0  ;;  %v3065_v15 = vmul.f32 %v682_v56, %v679_v60  ;;  %v3067_v16 = vmul.f32 %v801_v57, %v798_v62  ;;  %s1025_s8 = ssub.s32 (%p2391_p5), 3, %s1703_s6  ;;  %s3209_s21 = scalar_lea.vmem (%p2391_p5), %s3626_s2, %s1736_s7  }
  0xf2   : > { %v3069_v17 = vunpack.c.l.bf16 %v1689_v5  ;;  %v3071_v18 = vunpack.c.h.bf16 %v1689_v5  ;;  %v3073_v19 = vmul.f32 %v873_v58, %v870_v3  ;;  %v3076_v20 = vmul.f32 %v3059_v59, %v942_v4  ;;  %p1026_p1 = scmp.lt.s32.totalorder (%p2391_p5), %s1025_s8, 2 }
  0xf3   : > { %2041 = vset.pattern.permute.xlu1 %v2335_v45  ;;  %2042 = vset.pattern.permute.xlu0 %v2336_v46  ;;  %v3078_v21 = vunpack.c.l.bf16 %v1697_v10  ;;  %v3080_v22 = vunpack.c.h.bf16 %v1697_v10  ;;  %v881_v23 = vcombine.high %v870_v3, %v870_v3  ;;  %v953_v24 = vcombine.high %v942_v4, %v942_v4 }
  0xf4   : > { %718 = vperm.xlu1 %2041, %v677_v40   ;;  %738 = vperm.xlu0 %2042, %v677_v40   ;;  %v3083_v25 = vmul.f32 %v3069_v17, %v685_v9  ;;  %v3086_v26 = vmul.f32 %v3071_v18, %v804_v12  ;;  %v733_v27 = vcombine.high %v685_v9, %v685_v9 }
  0xf5   : > { %v831_v28 = vcombine.high %v804_v12, %v804_v12  ;;  %v3089_v29 = vmul.f32 %v3078_v21, %v876_v13  ;;  %v3093_v30 = vmul.f32 %v3080_v22, %v3063_v14  ;;  %v903_v31 = vcombine.high %v876_v13, %v876_v13 }
  0xf6   : > { %v975_v32 = vcombine.high %v3063_v14, %v3063_v14  ;;  %v722_v33 = vcombine.high %v3065_v15, %v3065_v15  ;;  %v824_v34 = vcombine.high %v3067_v16, %v3067_v16  ;;  %v896_v37 = vcombine.high %v3073_v19, %v3073_v19 }
  0xf7   : > { %v968_v38 = vcombine.high %v3076_v20, %v3076_v20  ;;  %v748_v39 = vcombine.high %v3069_v17, %v3069_v17 }
  0xf8   : > { %2043 = vset.pattern.permute.xlu1 %v2337_v47  ;;  %2045 = vset.pattern.permute.xlu0 %v2338_v48 }
  0xf9   : > { %744 = vperm.xlu1 %2043, %v677_v40   ;;  %767 = vperm.xlu0 %2045, %v677_v40  }
  0xfd   : > { %2044 = vset.pattern.permute.xlu1 %v2339_v49  ;;  %2048 = vset.pattern.permute.xlu0 %v2340_v50 }
  0xfe   : > { %756 = vperm.xlu1 %2044, %v677_v40   ;;  %789 = vperm.xlu0 %2048, %v677_v40  }
 0x102   : > { %2046 = vset.pattern.permute.xlu1 %v2341_v51 }
 0x103   : > { %773 = vperm.xlu1 %2046, %v677_v40  }
 0x107   : > { %2047 = vset.pattern.permute.xlu1 %v2342_v52 }
 0x108   : > { %779 = vperm.xlu1 %2047, %v677_v40   ;;  %v838_v40 = vcombine.high %v3071_v18, %v3071_v18 }
 0x169   : > { %v707_v35 = vpop.permute.xlu1 %706  ;;  %v692_v36 = vpop.permute.xlu0 %691 }
 0x16a   : > { %v712_v45 = vmul.f32 %v707_v35, %v682_v56  ;;  %v713_v46 = vmul.f32 %v710_v1, %v707_v35  ;;  %v818_v49 = vmul.f32 %v801_v57, %v707_v35  ;;  %v819_v50 = vmul.f32 %v816_v2, %v707_v35 }
 0x16b   : > { %v3121_v51 = vmul.f32 %v873_v58, %v707_v35  ;;  %v3123_v52 = vmul.f32 %v888_v6, %v707_v35  ;;  %v697_v53 = vmul.f32 %v692_v36, %v679_v60  ;;  %v698_v54 = vmul.f32 %v695_v8, %v692_v36 }
 0x16c   : > { %v811_v55 = vmul.f32 %v798_v62, %v692_v36  ;;  %v812_v61 = vmul.f32 %v809_v11, %v692_v36  ;;  %v3126_v63 = vmul.f32 %v3059_v59, %v707_v35  ;;  %v3128_v56 = vmul.f32 %v960_v7, %v707_v35 }
 0x16d   : > { %v883_v0 = vmul.f32 %v870_v3, %v692_v36  ;;  %v884_v1 = vmul.f32 %v881_v23, %v692_v36  ;;  %v955_v48 = vmul.f32 %v942_v4, %v692_v36  ;;  %v956_v57 = vmul.f32 %v953_v24, %v692_v36 }
 0x16e   : > { %v730_v5 = vpop.permute.xlu1 %729  ;;  %v701_v10 = vpop.permute.xlu0 %700 }
 0x16f   : > { %v735_v2 = vmul.f32 %v730_v5, %v685_v9  ;;  %v736_v58 = vmul.f32 %v733_v27, %v730_v5  ;;  %v833_v47 = vmul.f32 %v804_v12, %v730_v5  ;;  %v834_v6 = vmul.f32 %v831_v28, %v730_v5 }
 0x170   : > { %v905_v44 = vmul.f32 %v876_v13, %v730_v5  ;;  %v906_v60 = vmul.f32 %v903_v31, %v730_v5  ;;  %v703_v8 = vadd.f32 %v701_v10, %v697_v53  ;;  %v704_v62 = vadd.f32 %v701_v10, %v698_v54 }
 0x171   : > { %v813_v11 = vadd.f32 %v811_v55, %v701_v10  ;;  %v814_v43 = vadd.f32 %v812_v61, %v701_v10  ;;  %v977_v59 = vmul.f32 %v3063_v14, %v730_v5  ;;  %v978_v7 = vmul.f32 %v975_v32, %v730_v5 }
 0x172   : > { %v885_v35 = vadd.f32 %v883_v0, %v701_v10  ;;  %v886_v3 = vadd.f32 %v884_v1, %v701_v10  ;;  %v957_v23 = vadd.f32 %v955_v48, %v701_v10  ;;  %v958_v42 = vadd.f32 %v956_v57, %v701_v10 }
 0x173   : > { %v719_v41 = vpop.permute.xlu1 %718  ;;  %v739_v4 = vpop.permute.xlu0 %738  ;;  %v714_v24 = vadd.f32 %v712_v45, %v703_v8  ;;  %v715_v9 = vadd.f32 %v713_v46, %v704_v62  ;;  %v820_v13 = vadd.f32 %v818_v49, %v813_v11  ;;  %v821_v28 = vadd.f32 %v819_v50, %v814_v43 }
 0x174   : > { %v724_v12 = vmul.f32 %v719_v41, %v3065_v15  ;;  %v725_v27 = vmul.f32 %v722_v33, %v719_v41  ;;  %v826_v31 = vmul.f32 %v3067_v16, %v719_v41  ;;  %v827_v36 = vmul.f32 %v824_v34, %v719_v41 }
 0x175   : > { %v898_v53 = vmul.f32 %v3073_v19, %v719_v41  ;;  %v899_v14 = vmul.f32 %v896_v37, %v719_v41  ;;  %v3135_v32 = vmul.f32 %v3076_v20, %v719_v41  ;;  %v3137_v48 = vmul.f32 %v968_v38, %v719_v41 }
 0x176   : > { %v741_v54 = vadd.f32 %v739_v4, %v735_v2  ;;  %v742_v55 = vadd.f32 %v739_v4, %v736_v58  ;;  %v835_v45 = vadd.f32 %v833_v47, %v739_v4  ;;  %v836_v46 = vadd.f32 %v834_v6, %v739_v4 }
 0x177   : > { %v907_v61 = vadd.f32 %v905_v44, %v739_v4  ;;  %v908_v15 = vadd.f32 %v906_v60, %v739_v4  ;;  %v979_v33 = vadd.f32 %v977_v59, %v739_v4  ;;  %v980_v49 = vadd.f32 %v978_v7, %v739_v4 }
 0x178   : > { %v745_v43 = vpop.permute.xlu1 %744  ;;  %v726_v50 = vadd.f32 %v724_v12, %v714_v24  ;;  %v727_v16 = vadd.f32 %v725_v27, %v715_v9  ;;  %v3648_v41 = vcombine.high %v3078_v21, %v3078_v21  ;;  %v828_v47 = vadd.f32 %v826_v31, %v820_v13  ;;  %v3157_v58 = vpop.permute.xlu0 %767 }
 0x179   : > { %v750_v34 = vmul.f32 %v745_v43, %v3069_v17  ;;  %v751_v19 = vmul.f32 %v748_v39, %v745_v43  ;;  %v840_v20 = vmul.f32 %v3071_v18, %v745_v43  ;;  %v841_v37 = vmul.f32 %v838_v40, %v745_v43 }
 0x17a   : > { %v912_v38 = vmul.f32 %v3078_v21, %v745_v43  ;;  %v913_v44 = vmul.f32 %v3648_v41, %v745_v43  ;;  %v829_v0 = vadd.f32 %v827_v36, %v821_v28  ;;  %v984_v1 = vmul.f32 %v3080_v22, %v745_v43 }
 0x17b   : > { %v3649_v17 = vcombine.high %v3080_v22, %v3080_v22  ;;  %v752_v5 = vadd.f32 %v750_v34, %v741_v54  ;;  %v753_v10 = vadd.f32 %v751_v19, %v742_v55  ;;  %v842_v57 = vadd.f32 %v840_v20, %v835_v45 }
 0x17c   : > { %v843_v2 = vadd.f32 %v841_v37, %v836_v46  ;;  %v892_v18 = vadd.f32 %v3121_v51, %v885_v35  ;;  %v893_v40 = vadd.f32 %v3123_v52, %v886_v3  ;;  %v914_v6 = vadd.f32 %v912_v38, %v907_v61 }
 0x17d   : > { %v985_v39 = vmul.f32 %v3649_v17, %v745_v43  ;;  %v757_v21 = vpop.permute.xlu1 %756  ;;  %v915_v60 = vadd.f32 %v913_v44, %v908_v15  ;;  %v964_v8 = vadd.f32 %v3126_v63, %v957_v23  ;;  %v965_v62 = vadd.f32 %v3128_v56, %v958_v42  ;;  %v3177_v12 = vpop.permute.xlu0 %789 }
 0x17e   : > { %v762_v22 = vmul.f32 %v757_v21, %v3083_v25  ;;  %v3650_v11 = vcombine.high %v3083_v25, %v3083_v25  ;;  %v848_v7 = vmul.f32 %v3086_v26, %v757_v21  ;;  %v3651_v51 = vcombine.high %v3086_v26, %v3086_v26 }
 0x17f   : > { %v920_v35 = vmul.f32 %v3089_v29, %v757_v21  ;;  %v3652_v3 = vcombine.high %v3089_v29, %v3089_v29  ;;  %v992_v42 = vmul.f32 %v3093_v30, %v757_v21  ;;  %v3653_v56 = vcombine.high %v3093_v30, %v3093_v30 }
 0x180   : > { %v763_v59 = vmul.f32 %v3650_v11, %v757_v21  ;;  %v849_v52 = vmul.f32 %v3651_v51, %v757_v21  ;;  %v764_v25 = vadd.f32 %v762_v22, %v752_v5  ;;  %v850_v24 = vadd.f32 %v848_v7, %v842_v57 }
 0x181   : > { %v921_v63 = vmul.f32 %v3652_v3, %v757_v21  ;;  %v993_v23 = vmul.f32 %v3653_v56, %v757_v21  ;;  %v900_v26 = vadd.f32 %v898_v53, %v892_v18  ;;  %v901_v27 = vadd.f32 %v899_v14, %v893_v40 }
 0x182   : > { %v765_v4 = vadd.f32 %v763_v59, %v753_v10  ;;  %v851_v9 = vadd.f32 %v849_v52, %v843_v2  ;;  %v922_v13 = vadd.f32 %v920_v35, %v914_v6  ;;  %v774_v31 = vpop.permute.xlu1 %773  ;;  %v786_v36 = vmul.f32 %v764_v25, %v726_v50 }
 0x183   : > { %v923_v28 = vadd.f32 %v921_v63, %v915_v60  ;;  %v860_v54 = vmul.f32 %v850_v24, %v828_v47  ;;  %v986_v61 = vadd.f32 %v984_v1, %v979_v33  ;;  %v987_v30 = vadd.f32 %v985_v39, %v980_v49 }
 0x184   : > { %v787_v29 = vmul.f32 %v765_v4, %v727_v16  ;;  %v861_v55 = vmul.f32 %v851_v9, %v829_v0  ;;  %v932_v45 = vmul.f32 %v922_v13, %v900_v26  ;;  %v792_v15 = vmul.f32 %v3177_v12, %v786_v36 }
 0x185   : > { %v933_v46 = vmul.f32 %v923_v28, %v901_v27  ;;  %v972_v34 = vadd.f32 %v3135_v32, %v964_v8  ;;  %v973_v53 = vadd.f32 %v3137_v48, %v965_v62  ;;  %v862_v14 = vmul.f32 %v860_v54, %v3177_v12 }
 0x186   : > { %v793_v43 = vmul.f32 %v3177_v12, %v787_v29  ;;  %v863_v19 = vmul.f32 %v861_v55, %v3177_v12  ;;  %v994_v20 = vadd.f32 %v992_v42, %v986_v61  ;;  %v995_v37 = vadd.f32 %v993_v23, %v987_v30 }
 0x187   : > { %v934_v38 = vmul.f32 %v932_v45, %v3177_v12  ;;  %v935_v41 = vmul.f32 %v933_v46, %v3177_v12  ;;  %v770_v33 = vmul.f32 %v3157_v58, %v726_v50  ;;  %v771_v49 = vmul.f32 %v3157_v58, %v727_v16  ;;  %v780_v17 = vpop.permute.xlu1 %779 }
 0x188   : > { %v1004_v44 = vmul.f32 %v994_v20, %v972_v34  ;;  %v1005_v1 = vmul.f32 %v995_v37, %v973_v53  ;;  %v852_v32 = vmul.f32 %v828_v47, %v3157_v58  ;;  %v853_v48 = vmul.f32 %v829_v0, %v3157_v58 }
 0x189   : > { %v776_v39 = vadd.f32 %v774_v31, %v770_v33  ;;  %v777_v5 = vadd.f32 %v774_v31, %v771_v49  ;;  %v782_v10 = vmul.f32 %v780_v17, %v764_v25  ;;  %v783_v57 = vmul.f32 %v780_v17, %v765_v4 }
 0x18a   : > { %v854_v2 = vadd.f32 %v852_v32, %v774_v31  ;;  %v855_v18 = vadd.f32 %v853_v48, %v774_v31  ;;  %v924_v40 = vmul.f32 %v900_v26, %v3157_v58  ;;  %v925_v21 = vmul.f32 %v901_v27, %v3157_v58 }
 0x18b   : > { %v784_v50 = vadd.f32 %v782_v10, %v776_v39  ;;  %v785_v6 = vadd.f32 %v783_v57, %v777_v5  ;;  %v856_v16 = vmul.f32 %v850_v24, %v780_v17  ;;  %v857_v60 = vmul.f32 %v851_v9, %v780_v17 }
 0x18c   : > { %v926_v8 = vadd.f32 %v924_v40, %v774_v31  ;;  %v927_v62 = vadd.f32 %v925_v21, %v774_v31  ;;  %v928_v22 = vmul.f32 %v922_v13, %v780_v17  ;;  %v929_v47 = vmul.f32 %v923_v28, %v780_v17 }
 0x18d   : > { %v794_v11 = vadd.f32 %v792_v15, %v784_v50  ;;  %v795_v0 = vadd.f32 %v793_v43, %v785_v6  ;;  %v858_v59 = vadd.f32 %v856_v16, %v854_v2  ;;  %v859_v7 = vadd.f32 %v857_v60, %v855_v18 }
 0x18e   : > { %v930_v51 = vadd.f32 %v928_v22, %v926_v8  ;;  %v931_v52 = vadd.f32 %v929_v47, %v927_v62  ;;  %v996_v35 = vmul.f32 %v972_v34, %v3157_v58  ;;  %v997_v3 = vmul.f32 %v973_v53, %v3157_v58 }
 0x18f   : > { %v864_v63 = vadd.f32 %v862_v14, %v858_v59  ;;  %v865_v42 = vadd.f32 %v863_v19, %v859_v7  ;;  %v1000_v56 = vmul.f32 %v994_v20, %v780_v17  ;;  %v1001_v23 = vmul.f32 %v995_v37, %v780_v17 }
 0x190   : > { %v998_v25 = vadd.f32 %v996_v35, %v774_v31  ;;  %v999_v4 = vadd.f32 %v997_v3, %v774_v31  ;;  %v936_v26 = vadd.f32 %v934_v38, %v930_v51  ;;  %v937_v27 = vadd.f32 %v935_v41, %v931_v52 }
 0x191   : > { %v866_v24 = vmax.f32 %v794_v11, %v864_v63  ;;  %v867_v9 = vmax.f32 %v795_v0, %v865_v42  ;;  %v1006_v13 = vmul.f32 %v1004_v44, %v3177_v12  ;;  %v1007_v28 = vmul.f32 %v1005_v1, %v3177_v12 }
 0x192   : > { %v1002_v36 = vadd.f32 %v1000_v56, %v998_v25  ;;  %v1003_v29 = vadd.f32 %v1001_v23, %v999_v4 }
 0x193   : > { %v938_v54 = vmax.f32 %v866_v24, %v936_v26  ;;  %v939_v55 = vmax.f32 %v867_v9, %v937_v27 }
 0x194   : > { %v1008_v58 = vadd.f32 %v1006_v13, %v1002_v36  ;;  %v1009_v45 = vadd.f32 %v1007_v28, %v1003_v29  ;;  %1023 = sbr.rel (!%p2391_p5) target bundleno = 576 (0x240), region = 98 }
 0x196   : > { %v1010_v46 = vmax.f32 %v938_v54, %v1008_v58  ;;  %v1011_v61 = vmax.f32 %v939_v55, %v1009_v45 }
 0x198   : > { %v1014_v30 = vcombine.low %v1010_v46, %v1011_v61 }
 0x19a   : > { %1016 = vst [vmem:[%s3199_s3] sm:$0xff] %v1014_v30 }
 0x19b   : > { %s3678_s8 = smov (!%p1026_p1, %s1025_s8), 2 }
 0x19c   : > { %s1704_s22 = sshll.u32 %s3678_s8, 6  ;;  %s3211_s23 = sshll.u32 %s3678_s8, 2 }
 0x19d   : > { %p1708_p2 = scmp.eq.s32.totalorder %s1704_s22, 0 }
 0x19e   : > { %p1036_p3 = scmp.lt.u32.totalorder (!%p1708_p2), %s3211_s23, 8 }
 0x19f   : > { %1035 = sbr.rel (%p1708_p2) target bundleno = 576 (0x240), region = 102 }
 0x1a6   : > { %1039 = sbr.rel (%p1036_p3) target bundleno = 567 (0x237), region = 106  ;;  %s3215_s17 = sand.u32 (!%p1036_p3), 7, %s3211_s23  }
 0x1a7   : > { %p1055_p5 = scmp.eq.s32.totalorder (!%p1036_p3), %s3215_s17, 0  ;;  %p1709_p4 = scmp.ne.s32.totalorder (!%p1036_p3), %s3215_s17, 0 }
 0x1ad   : > { %1058 = sbr.rel (%p1709_p4) target bundleno = 496 (0x1f0), region = 121  ;;  %s1059_s12 = sshrl.u32 (!%p1709_p4), %s3211_s23, 3 }
 0x1ae   : > { %s3222_s14 = sshrl.u32 (!%p1709_p4), %s1059_s12, 6 }
 0x1af   : > { %p1710_p6 = scmp.le.s32.totalorder (!%p1709_p4), %s3222_s14, 0 }
 0x1b4   : > { %1582 = sbr.rel (%p1710_p6) target bundleno = 476 (0x1dc), region = 284  ;;  %s3654_s20 = smov (!%p1710_p6), %s3209_s21 }
 0x1b5   : > { %s3655_s24 = smov (!%p1710_p6), %s3199_s3  ;;  %s3231_s26 = smov (!%p1710_p6), 0  }
 0x1b6   : > { %s3233_s4 = smov (!%p1710_p6), 0  }
 0x1bb LB: >> { %v1072_v12 = vld [vmem:[%s2271_s24] sm:$0xff]  ;;  %v1074_v31 = vld [vmem:[%s2271_s24 + $0x8] sm:$0xff]  ;;  %v1076_v15 = vld [vmem:[%s2271_s24 + $0x10] sm:$0xff]  ;;  %s1200_s5 = sadd.s32 1, %s2275_s26  ;;  %s1066_s4 = sadd.s32 1, %s2279_s4   ;;  %s2279_s4 = sphi %s3233_s4, %s1066_s4   ;;  %s2275_s26 = sphi %s3231_s26, %s3658_s26   ;;  %s2271_s24 = sphi %s3655_s24, %s3657_s24   ;;  %s2267_s20 = sphi %s3654_s20, %s3656_s20  }
 0x1bc   : >> { %1073 = vst [vmem:[%s2267_s20] sm:$0xff] %v1072_v12  ;;  %1075 = vst [vmem:[%s2267_s20 + $0x8] sm:$0xff] %v1074_v31  ;;  %v1078_v43 = vld [vmem:[%s2271_s24 + $0x18] sm:$0xff]  ;;  %v1080_v34 = vld [vmem:[%s2271_s24 + $0x20] sm:$0xff]  ;;  %p1201_p7 = scmp.ge.s32.totalorder %s1200_s5, %s3222_s14  ;;  %p1065_p8 = scmp.ge.s32.totalorder %s1066_s4, %s3222_s14 }
 0x1bd   : >> { %1077 = vst [vmem:[%s2267_s20 + $0x10] sm:$0xff] %v1076_v15  ;;  %v1082_v53 = vld [vmem:[%s2271_s24 + $0x28] sm:$0xff]  ;;  %1079 = vst [vmem:[%s2267_s20 + $0x18] sm:$0xff] %v1078_v43  ;;  %v1084_v14 = vld [vmem:[%s2271_s24 + $0x30] sm:$0xff] }
 0x1be   : >> { %1081 = vst [vmem:[%s2267_s20 + $0x20] sm:$0xff] %v1080_v34  ;;  %1083 = vst [vmem:[%s2267_s20 + $0x28] sm:$0xff] %v1082_v53  ;;  %v1086_v19 = vld [vmem:[%s2271_s24 + $0x38] sm:$0xff]  ;;  %v1088_v20 = vld [vmem:[%s2271_s24 + $0x40] sm:$0xff]  ;;  %s3680_s5 = smov (%p1201_p7, %s1200_s5), 0 }
 0x1bf   : >> { %1085 = vst [vmem:[%s2267_s20 + $0x30] sm:$0xff] %v1084_v14  ;;  %1087 = vst [vmem:[%s2267_s20 + $0x38] sm:$0xff] %v1086_v19  ;;  %v1090_v37 = vld [vmem:[%s2271_s24 + $0x48] sm:$0xff]  ;;  %v1092_v38 = vld [vmem:[%s2271_s24 + $0x50] sm:$0xff]  ;;  %s1711_s29 = sshll.u32 %s3680_s5, 9  ;;  %s3658_s26 = smov %s3680_s5 }
 0x1c0   : >> { %1089 = vst [vmem:[%s2267_s20 + $0x40] sm:$0xff] %v1088_v20  ;;  %v1094_v41 = vld [vmem:[%s2271_s24 + $0x58] sm:$0xff]  ;;  %1091 = vst [vmem:[%s2267_s20 + $0x48] sm:$0xff] %v1090_v37  ;;  %v1096_v33 = vld [vmem:[%s2271_s24 + $0x60] sm:$0xff]  ;;  %s3289_s15 = scalar_lea.vmem %s3199_s3, %s1711_s29 [#allocation3]   ;;  %s3292_s27 = scalar_lea.vmem %s3209_s21, %s1711_s29  }
 0x1c1   : >> { %1093 = vst [vmem:[%s2267_s20 + $0x50] sm:$0xff] %v1092_v38  ;;  %1095 = vst [vmem:[%s2267_s20 + $0x58] sm:$0xff] %v1094_v41  ;;  %v1098_v49 = vld [vmem:[%s2271_s24 + $0x68] sm:$0xff]  ;;  %v1100_v44 = vld [vmem:[%s2271_s24 + $0x70] sm:$0xff] }
 0x1c2   : >> { %1097 = vst [vmem:[%s2267_s20 + $0x60] sm:$0xff] %v1096_v33  ;;  %1099 = vst [vmem:[%s2267_s20 + $0x68] sm:$0xff] %v1098_v49  ;;  %v1102_v1 = vld [vmem:[%s2271_s24 + $0x78] sm:$0xff]  ;;  %v1104_v17 = vld [vmem:[%s2271_s24 + $0x80] sm:$0xff] }
 0x1c3   : >> { %1101 = vst [vmem:[%s2267_s20 + $0x70] sm:$0xff] %v1100_v44  ;;  %v1106_v32 = vld [vmem:[%s2271_s24 + $0x88] sm:$0xff]  ;;  %1103 = vst [vmem:[%s2267_s20 + $0x78] sm:$0xff] %v1102_v1  ;;  %v1108_v48 = vld [vmem:[%s2271_s24 + $0x90] sm:$0xff] }
 0x1c4   : >> { %1105 = vst [vmem:[%s2267_s20 + $0x80] sm:$0xff] %v1104_v17  ;;  %1107 = vst [vmem:[%s2267_s20 + $0x88] sm:$0xff] %v1106_v32  ;;  %v1110_v39 = vld [vmem:[%s2271_s24 + $0x98] sm:$0xff]  ;;  %v1112_v5 = vld [vmem:[%s2271_s24 + $0xa0] sm:$0xff] }
 0x1c5   : >> { %1109 = vst [vmem:[%s2267_s20 + $0x90] sm:$0xff] %v1108_v48  ;;  %1111 = vst [vmem:[%s2267_s20 + $0x98] sm:$0xff] %v1110_v39  ;;  %v1114_v10 = vld [vmem:[%s2271_s24 + $0xa8] sm:$0xff]  ;;  %v1116_v57 = vld [vmem:[%s2271_s24 + $0xb0] sm:$0xff] }
 0x1c6   : >> { %1113 = vst [vmem:[%s2267_s20 + $0xa0] sm:$0xff] %v1112_v5  ;;  %v1118_v2 = vld [vmem:[%s2271_s24 + $0xb8] sm:$0xff]  ;;  %1115 = vst [vmem:[%s2267_s20 + $0xa8] sm:$0xff] %v1114_v10  ;;  %v1120_v18 = vld [vmem:[%s2271_s24 + $0xc0] sm:$0xff] }
 0x1c7   : >> { %1117 = vst [vmem:[%s2267_s20 + $0xb0] sm:$0xff] %v1116_v57  ;;  %1119 = vst [vmem:[%s2267_s20 + $0xb8] sm:$0xff] %v1118_v2  ;;  %v1122_v40 = vld [vmem:[%s2271_s24 + $0xc8] sm:$0xff]  ;;  %v1124_v21 = vld [vmem:[%s2271_s24 + $0xd0] sm:$0xff] }
 0x1c8   : >> { %1121 = vst [vmem:[%s2267_s20 + $0xc0] sm:$0xff] %v1120_v18  ;;  %1123 = vst [vmem:[%s2267_s20 + $0xc8] sm:$0xff] %v1122_v40  ;;  %v1126_v50 = vld [vmem:[%s2271_s24 + $0xd8] sm:$0xff]  ;;  %v1128_v6 = vld [vmem:[%s2271_s24 + $0xe0] sm:$0xff] }
 0x1c9   : >> { %1125 = vst [vmem:[%s2267_s20 + $0xd0] sm:$0xff] %v1124_v21  ;;  %v1130_v16 = vld [vmem:[%s2271_s24 + $0xe8] sm:$0xff]  ;;  %1127 = vst [vmem:[%s2267_s20 + $0xd8] sm:$0xff] %v1126_v50  ;;  %v1132_v60 = vld [vmem:[%s2271_s24 + $0xf0] sm:$0xff] }
 0x1ca   : >> { %1129 = vst [vmem:[%s2267_s20 + $0xe0] sm:$0xff] %v1128_v6  ;;  %1131 = vst [vmem:[%s2267_s20 + $0xe8] sm:$0xff] %v1130_v16  ;;  %v1134_v8 = vld [vmem:[%s2271_s24 + $0xf8] sm:$0xff]  ;;  %v1136_v62 = vld [vmem:[%s2271_s24 + $0x100] sm:$0xff] }
 0x1cb   : >> { %1133 = vst [vmem:[%s2267_s20 + $0xf0] sm:$0xff] %v1132_v60  ;;  %1135 = vst [vmem:[%s2267_s20 + $0xf8] sm:$0xff] %v1134_v8  ;;  %v1138_v22 = vld [vmem:[%s2271_s24 + $0x108] sm:$0xff]  ;;  %v1140_v47 = vld [vmem:[%s2271_s24 + $0x110] sm:$0xff] }
 0x1cc   : >> { %1137 = vst [vmem:[%s2267_s20 + $0x100] sm:$0xff] %v1136_v62  ;;  %v1142_v11 = vld [vmem:[%s2271_s24 + $0x118] sm:$0xff]  ;;  %1139 = vst [vmem:[%s2267_s20 + $0x108] sm:$0xff] %v1138_v22  ;;  %v1144_v0 = vld [vmem:[%s2271_s24 + $0x120] sm:$0xff] }
 0x1cd   : >> { %1141 = vst [vmem:[%s2267_s20 + $0x110] sm:$0xff] %v1140_v47  ;;  %1143 = vst [vmem:[%s2267_s20 + $0x118] sm:$0xff] %v1142_v11  ;;  %v1146_v59 = vld [vmem:[%s2271_s24 + $0x128] sm:$0xff]  ;;  %v1148_v7 = vld [vmem:[%s2271_s24 + $0x130] sm:$0xff] }
 0x1ce   : >> { %1145 = vst [vmem:[%s2267_s20 + $0x120] sm:$0xff] %v1144_v0  ;;  %1147 = vst [vmem:[%s2267_s20 + $0x128] sm:$0xff] %v1146_v59  ;;  %v1150_v51 = vld [vmem:[%s2271_s24 + $0x138] sm:$0xff]  ;;  %v1152_v52 = vld [vmem:[%s2271_s24 + $0x140] sm:$0xff] }
 0x1cf   : >> { %1149 = vst [vmem:[%s2267_s20 + $0x130] sm:$0xff] %v1148_v7  ;;  %v1154_v35 = vld [vmem:[%s2271_s24 + $0x148] sm:$0xff]  ;;  %1151 = vst [vmem:[%s2267_s20 + $0x138] sm:$0xff] %v1150_v51  ;;  %v1156_v3 = vld [vmem:[%s2271_s24 + $0x150] sm:$0xff] }
 0x1d0   : >> { %1153 = vst [vmem:[%s2267_s20 + $0x140] sm:$0xff] %v1152_v52  ;;  %1155 = vst [vmem:[%s2267_s20 + $0x148] sm:$0xff] %v1154_v35  ;;  %v1158_v63 = vld [vmem:[%s2271_s24 + $0x158] sm:$0xff]  ;;  %v1160_v42 = vld [vmem:[%s2271_s24 + $0x160] sm:$0xff] }
 0x1d1   : >> { %1157 = vst [vmem:[%s2267_s20 + $0x150] sm:$0xff] %v1156_v3  ;;  %1159 = vst [vmem:[%s2267_s20 + $0x158] sm:$0xff] %v1158_v63  ;;  %v1162_v56 = vld [vmem:[%s2271_s24 + $0x168] sm:$0xff]  ;;  %v1164_v23 = vld [vmem:[%s2271_s24 + $0x170] sm:$0xff] }
 0x1d2   : >> { %1161 = vst [vmem:[%s2267_s20 + $0x160] sm:$0xff] %v1160_v42  ;;  %v1166_v25 = vld [vmem:[%s2271_s24 + $0x178] sm:$0xff]  ;;  %1163 = vst [vmem:[%s2267_s20 + $0x168] sm:$0xff] %v1162_v56  ;;  %v1168_v4 = vld [vmem:[%s2271_s24 + $0x180] sm:$0xff] }
 0x1d3   : >> { %1165 = vst [vmem:[%s2267_s20 + $0x170] sm:$0xff] %v1164_v23  ;;  %1167 = vst [vmem:[%s2267_s20 + $0x178] sm:$0xff] %v1166_v25  ;;  %v1170_v24 = vld [vmem:[%s2271_s24 + $0x188] sm:$0xff]  ;;  %v1172_v9 = vld [vmem:[%s2271_s24 + $0x190] sm:$0xff] }
 0x1d4   : >> { %1169 = vst [vmem:[%s2267_s20 + $0x180] sm:$0xff] %v1168_v4  ;;  %1171 = vst [vmem:[%s2267_s20 + $0x188] sm:$0xff] %v1170_v24  ;;  %v1174_v26 = vld [vmem:[%s2271_s24 + $0x198] sm:$0xff]  ;;  %v1176_v27 = vld [vmem:[%s2271_s24 + $0x1a0] sm:$0xff] }
 0x1d5   : >> { %1173 = vst [vmem:[%s2267_s20 + $0x190] sm:$0xff] %v1172_v9  ;;  %v1178_v13 = vld [vmem:[%s2271_s24 + $0x1a8] sm:$0xff]  ;;  %1175 = vst [vmem:[%s2267_s20 + $0x198] sm:$0xff] %v1174_v26  ;;  %v1180_v28 = vld [vmem:[%s2271_s24 + $0x1b0] sm:$0xff]  ;;  %1068 = sbr.rel (!%p1065_p8) target bundleno = 443 (0x1bb), region = 290 }
 0x1d6   : >> { %1177 = vst [vmem:[%s2267_s20 + $0x1a0] sm:$0xff] %v1176_v27  ;;  %1179 = vst [vmem:[%s2267_s20 + $0x1a8] sm:$0xff] %v1178_v13  ;;  %v1182_v36 = vld [vmem:[%s2271_s24 + $0x1b8] sm:$0xff]  ;;  %v1184_v29 = vld [vmem:[%s2271_s24 + $0x1c0] sm:$0xff] }
 0x1d7   : >> { %1181 = vst [vmem:[%s2267_s20 + $0x1b0] sm:$0xff] %v1180_v28  ;;  %1183 = vst [vmem:[%s2267_s20 + $0x1b8] sm:$0xff] %v1182_v36  ;;  %v1186_v54 = vld [vmem:[%s2271_s24 + $0x1c8] sm:$0xff]  ;;  %v1188_v55 = vld [vmem:[%s2271_s24 + $0x1d0] sm:$0xff] }
 0x1d8   : >> { %1185 = vst [vmem:[%s2267_s20 + $0x1c0] sm:$0xff] %v1184_v29  ;;  %v1190_v58 = vld [vmem:[%s2271_s24 + $0x1d8] sm:$0xff]  ;;  %1187 = vst [vmem:[%s2267_s20 + $0x1c8] sm:$0xff] %v1186_v54  ;;  %v1192_v45 = vld [vmem:[%s2271_s24 + $0x1e0] sm:$0xff] }
 0x1d9   : >> { %1189 = vst [vmem:[%s2267_s20 + $0x1d0] sm:$0xff] %v1188_v55  ;;  %1191 = vst [vmem:[%s2267_s20 + $0x1d8] sm:$0xff] %v1190_v58  ;;  %v1194_v46 = vld [vmem:[%s2271_s24 + $0x1e8] sm:$0xff]  ;;  %v1196_v61 = vld [vmem:[%s2271_s24 + $0x1f0] sm:$0xff] }
 0x1da   : >> { %1193 = vst [vmem:[%s2267_s20 + $0x1e0] sm:$0xff] %v1192_v45  ;;  %1195 = vst [vmem:[%s2267_s20 + $0x1e8] sm:$0xff] %v1194_v46  ;;  %v1198_v30 = vld [vmem:[%s2271_s24 + $0x1f8] sm:$0xff]  ;;  %s3657_s24 = smov %s3289_s15 }
 0x1db   : >> { %1197 = vst [vmem:[%s2267_s20 + $0x1f0] sm:$0xff] %v1196_v61  ;;  %1199 = vst [vmem:[%s2267_s20 + $0x1f8] sm:$0xff] %v1198_v30  ;;  %s3656_s20 = smov %s3292_s27 }
 0x1dc PF: > { %s3398_s18 = sand.u32 63, %s1059_s12   ;;  %s1737_s11 = sshll.u32 %s3222_s14, 13 }
 0x1dd   : > { %s1211_s25 = sshra.s32 %s1737_s11, 4  ;;  %p1716_p9 = scmp.le.s32.totalorder %s3398_s18, 0 }
 0x1de   : > { %s1212_s28 = scalar_lea.vmem %s3199_s3, %s1211_s25 [#allocation3]   ;;  %s1215_s30 = scalar_lea.vmem %s3209_s21, %s1211_s25  }
 0x1df   : > { %1596 = sbr.rel (%p1716_p9) target bundleno = 496 (0x1f0), region = 295  ;;  %s2281_s6 = smov (!%p1716_p9), %s1215_s30  }
 0x1e0   : > { %s2285_s7 = smov (!%p1716_p9), %s1212_s28   ;;  %s2289_s8 = smov (!%p1716_p9), 0  }
 0x1e1   : > { %s2293_s19 = smov (!%p1716_p9), 0  }
 0x1e6 LB: >> { %v1227_v12 = vld [vmem:[%s2287_s7] sm:$0xff]  ;;  %s1229_s9 = sadd.s32 1, %s2291_s8  ;;  %s1221_s19 = sadd.s32 1, %s2295_s19   ;;  %s2295_s19 = sphi %s2293_s19, %s1221_s19   ;;  %s2291_s8 = sphi %s2289_s8, %s2290_s8   ;;  %s2287_s7 = sphi %s2285_s7, %s1234_s7   ;;  %s2283_s6 = sphi %s2281_s6, %s1235_s6  }
 0x1e7   : >> { %1228 = vst [vmem:[%s2283_s6] sm:$0xff] %v1227_v12  ;;  %p1230_p10 = scmp.ge.s32.totalorder %s1229_s9, %s3398_s18  ;;  %p1220_p11 = scmp.ge.s32.totalorder %s1221_s19, %s3398_s18 }
 0x1e9   : >> { %s3682_s9 = smov (%p1230_p10, %s1229_s9), 0  ;;  %1223 = sbr.rel (!%p1220_p11) target bundleno = 486 (0x1e6), region = 301 }
 0x1ea   : >> { %s1717_s22 = sshll.u32 %s3682_s9, 3  ;;  %s2290_s8 = smov %s3682_s9  }
 0x1eb   : >> { %s1234_s7 = scalar_lea.vmem %s1212_s28, %s1717_s22 [#allocation3]   ;;  %s1235_s6 = scalar_lea.vmem %s1215_s30, %s1717_s22  }
 0x1f0 PF: > { %1238 = sbr.rel (%p1055_p5) target bundleno = 567 (0x237), region = 139  ;;  %s3410_s12 = ssub.s32 (!%p1055_p5), %s3211_s23, %s3215_s17 }
 0x1f1   : > { %s1244_s14 = sshrl.u32 (!%p1055_p5), %s3211_s23, 3  ;;  %s1241_s20 = scalar_lea.vmem (!%p1055_p5), %s3199_s3, %s3410_s12 [#allocation3] }
 0x1f2   : > { %s1243_s24 = scalar_lea.vmem (!%p1055_p5), %s3209_s21, %s3410_s12  ;;  %s3419_s26 = sshrl.u32 (!%p1055_p5), %s1244_s14, 6 }
 0x1f3   : > { %p1719_p12 = scmp.le.s32.totalorder (!%p1055_p5), %s3419_s26, 0 }
 0x1f7   : > { %1610 = sbr.rel (%p1719_p12) target bundleno = 543 (0x21f), region = 306  ;;  %s3659_s4 = smov (!%p1719_p12), %s3209_s21 }
 0x1f8   : > { %s3660_s5 = smov (!%p1719_p12), %s3199_s3  ;;  %s3428_s29 = smov (!%p1719_p12), 0  }
 0x1f9   : > { %s3430_s15 = smov (!%p1719_p12), 0  }
 0x1fe LB: >> { %v1257_v31 = vld [vmem:[%s2303_s5] sm:$0xff]  ;;  %v1259_v15 = vld [vmem:[%s2303_s5 + $0x8] sm:$0xff]  ;;  %v1261_v43 = vld [vmem:[%s2303_s5 + $0x10] sm:$0xff]  ;;  %s1385_s27 = sadd.s32 1, %s2307_s29  ;;  %s1251_s15 = sadd.s32 1, %s2311_s15   ;;  %s2311_s15 = sphi %s3430_s15, %s1251_s15   ;;  %s2307_s29 = sphi %s3428_s29, %s3663_s29   ;;  %s2303_s5 = sphi %s3660_s5, %s3662_s5   ;;  %s2299_s4 = sphi %s3659_s4, %s3661_s4  }
 0x1ff   : >> { %1258 = vst [vmem:[%s2299_s4] sm:$0xff] %v1257_v31  ;;  %1260 = vst [vmem:[%s2299_s4 + $0x8] sm:$0xff] %v1259_v15  ;;  %v1263_v34 = vld [vmem:[%s2303_s5 + $0x18] sm:$0xff]  ;;  %v1265_v53 = vld [vmem:[%s2303_s5 + $0x20] sm:$0xff]  ;;  %p1386_p13 = scmp.ge.s32.totalorder %s1385_s27, %s3419_s26  ;;  %p1250_p0 = scmp.ge.s32.totalorder %s1251_s15, %s3419_s26 }
 0x200   : >> { %1262 = vst [vmem:[%s2299_s4 + $0x10] sm:$0xff] %v1261_v43  ;;  %v1267_v14 = vld [vmem:[%s2303_s5 + $0x28] sm:$0xff]  ;;  %1264 = vst [vmem:[%s2299_s4 + $0x18] sm:$0xff] %v1263_v34  ;;  %v1269_v19 = vld [vmem:[%s2303_s5 + $0x30] sm:$0xff] }
 0x201   : >> { %1266 = vst [vmem:[%s2299_s4 + $0x20] sm:$0xff] %v1265_v53  ;;  %1268 = vst [vmem:[%s2299_s4 + $0x28] sm:$0xff] %v1267_v14  ;;  %v1271_v20 = vld [vmem:[%s2303_s5 + $0x38] sm:$0xff]  ;;  %v1273_v37 = vld [vmem:[%s2303_s5 + $0x40] sm:$0xff]  ;;  %s3684_s27 = smov (%p1386_p13, %s1385_s27), 0 }
 0x202   : >> { %1270 = vst [vmem:[%s2299_s4 + $0x30] sm:$0xff] %v1269_v19  ;;  %1272 = vst [vmem:[%s2299_s4 + $0x38] sm:$0xff] %v1271_v20  ;;  %v1275_v38 = vld [vmem:[%s2303_s5 + $0x48] sm:$0xff]  ;;  %v1277_v41 = vld [vmem:[%s2303_s5 + $0x50] sm:$0xff]  ;;  %s1720_s18 = sshll.u32 %s3684_s27, 9  ;;  %s3663_s29 = smov %s3684_s27 }
 0x203   : >> { %1274 = vst [vmem:[%s2299_s4 + $0x40] sm:$0xff] %v1273_v37  ;;  %v1279_v33 = vld [vmem:[%s2303_s5 + $0x58] sm:$0xff]  ;;  %1276 = vst [vmem:[%s2299_s4 + $0x48] sm:$0xff] %v1275_v38  ;;  %v1281_v49 = vld [vmem:[%s2303_s5 + $0x60] sm:$0xff]  ;;  %s3486_s11 = scalar_lea.vmem %s3199_s3, %s1720_s18 [#allocation3]   ;;  %s3489_s25 = scalar_lea.vmem %s3209_s21, %s1720_s18  }
 0x204   : >> { %1278 = vst [vmem:[%s2299_s4 + $0x50] sm:$0xff] %v1277_v41  ;;  %1280 = vst [vmem:[%s2299_s4 + $0x58] sm:$0xff] %v1279_v33  ;;  %v1283_v44 = vld [vmem:[%s2303_s5 + $0x68] sm:$0xff]  ;;  %v1285_v1 = vld [vmem:[%s2303_s5 + $0x70] sm:$0xff] }
 0x205   : >> { %1282 = vst [vmem:[%s2299_s4 + $0x60] sm:$0xff] %v1281_v49  ;;  %1284 = vst [vmem:[%s2299_s4 + $0x68] sm:$0xff] %v1283_v44  ;;  %v1287_v17 = vld [vmem:[%s2303_s5 + $0x78] sm:$0xff]  ;;  %v1289_v32 = vld [vmem:[%s2303_s5 + $0x80] sm:$0xff] }
 0x206   : >> { %1286 = vst [vmem:[%s2299_s4 + $0x70] sm:$0xff] %v1285_v1  ;;  %v1291_v48 = vld [vmem:[%s2303_s5 + $0x88] sm:$0xff]  ;;  %1288 = vst [vmem:[%s2299_s4 + $0x78] sm:$0xff] %v1287_v17  ;;  %v1293_v39 = vld [vmem:[%s2303_s5 + $0x90] sm:$0xff] }
 0x207   : >> { %1290 = vst [vmem:[%s2299_s4 + $0x80] sm:$0xff] %v1289_v32  ;;  %1292 = vst [vmem:[%s2299_s4 + $0x88] sm:$0xff] %v1291_v48  ;;  %v1295_v5 = vld [vmem:[%s2303_s5 + $0x98] sm:$0xff]  ;;  %v1297_v10 = vld [vmem:[%s2303_s5 + $0xa0] sm:$0xff] }
 0x208   : >> { %1294 = vst [vmem:[%s2299_s4 + $0x90] sm:$0xff] %v1293_v39  ;;  %1296 = vst [vmem:[%s2299_s4 + $0x98] sm:$0xff] %v1295_v5  ;;  %v1299_v57 = vld [vmem:[%s2303_s5 + $0xa8] sm:$0xff]  ;;  %v1301_v2 = vld [vmem:[%s2303_s5 + $0xb0] sm:$0xff] }
 0x209   : >> { %1298 = vst [vmem:[%s2299_s4 + $0xa0] sm:$0xff] %v1297_v10  ;;  %v1303_v18 = vld [vmem:[%s2303_s5 + $0xb8] sm:$0xff]  ;;  %1300 = vst [vmem:[%s2299_s4 + $0xa8] sm:$0xff] %v1299_v57  ;;  %v1305_v40 = vld [vmem:[%s2303_s5 + $0xc0] sm:$0xff] }
 0x20a   : >> { %1302 = vst [vmem:[%s2299_s4 + $0xb0] sm:$0xff] %v1301_v2  ;;  %1304 = vst [vmem:[%s2299_s4 + $0xb8] sm:$0xff] %v1303_v18  ;;  %v1307_v21 = vld [vmem:[%s2303_s5 + $0xc8] sm:$0xff]  ;;  %v1309_v50 = vld [vmem:[%s2303_s5 + $0xd0] sm:$0xff] }
 0x20b   : >> { %1306 = vst [vmem:[%s2299_s4 + $0xc0] sm:$0xff] %v1305_v40  ;;  %1308 = vst [vmem:[%s2299_s4 + $0xc8] sm:$0xff] %v1307_v21  ;;  %v1311_v6 = vld [vmem:[%s2303_s5 + $0xd8] sm:$0xff]  ;;  %v1313_v16 = vld [vmem:[%s2303_s5 + $0xe0] sm:$0xff] }
 0x20c   : >> { %1310 = vst [vmem:[%s2299_s4 + $0xd0] sm:$0xff] %v1309_v50  ;;  %v1315_v60 = vld [vmem:[%s2303_s5 + $0xe8] sm:$0xff]  ;;  %1312 = vst [vmem:[%s2299_s4 + $0xd8] sm:$0xff] %v1311_v6  ;;  %v1317_v8 = vld [vmem:[%s2303_s5 + $0xf0] sm:$0xff] }
 0x20d   : >> { %1314 = vst [vmem:[%s2299_s4 + $0xe0] sm:$0xff] %v1313_v16  ;;  %1316 = vst [vmem:[%s2299_s4 + $0xe8] sm:$0xff] %v1315_v60  ;;  %v1319_v62 = vld [vmem:[%s2303_s5 + $0xf8] sm:$0xff]  ;;  %v1321_v22 = vld [vmem:[%s2303_s5 + $0x100] sm:$0xff] }
 0x20e   : >> { %1318 = vst [vmem:[%s2299_s4 + $0xf0] sm:$0xff] %v1317_v8  ;;  %1320 = vst [vmem:[%s2299_s4 + $0xf8] sm:$0xff] %v1319_v62  ;;  %v1323_v47 = vld [vmem:[%s2303_s5 + $0x108] sm:$0xff]  ;;  %v1325_v11 = vld [vmem:[%s2303_s5 + $0x110] sm:$0xff] }
 0x20f   : >> { %1322 = vst [vmem:[%s2299_s4 + $0x100] sm:$0xff] %v1321_v22  ;;  %v1327_v0 = vld [vmem:[%s2303_s5 + $0x118] sm:$0xff]  ;;  %1324 = vst [vmem:[%s2299_s4 + $0x108] sm:$0xff] %v1323_v47  ;;  %v1329_v59 = vld [vmem:[%s2303_s5 + $0x120] sm:$0xff] }
 0x210   : >> { %1326 = vst [vmem:[%s2299_s4 + $0x110] sm:$0xff] %v1325_v11  ;;  %1328 = vst [vmem:[%s2299_s4 + $0x118] sm:$0xff] %v1327_v0  ;;  %v1331_v7 = vld [vmem:[%s2303_s5 + $0x128] sm:$0xff]  ;;  %v1333_v51 = vld [vmem:[%s2303_s5 + $0x130] sm:$0xff] }
 0x211   : >> { %1330 = vst [vmem:[%s2299_s4 + $0x120] sm:$0xff] %v1329_v59  ;;  %1332 = vst [vmem:[%s2299_s4 + $0x128] sm:$0xff] %v1331_v7  ;;  %v1335_v52 = vld [vmem:[%s2303_s5 + $0x138] sm:$0xff]  ;;  %v1337_v35 = vld [vmem:[%s2303_s5 + $0x140] sm:$0xff] }
 0x212   : >> { %1334 = vst [vmem:[%s2299_s4 + $0x130] sm:$0xff] %v1333_v51  ;;  %v1339_v3 = vld [vmem:[%s2303_s5 + $0x148] sm:$0xff]  ;;  %1336 = vst [vmem:[%s2299_s4 + $0x138] sm:$0xff] %v1335_v52  ;;  %v1341_v63 = vld [vmem:[%s2303_s5 + $0x150] sm:$0xff] }
 0x213   : >> { %1338 = vst [vmem:[%s2299_s4 + $0x140] sm:$0xff] %v1337_v35  ;;  %1340 = vst [vmem:[%s2299_s4 + $0x148] sm:$0xff] %v1339_v3  ;;  %v1343_v42 = vld [vmem:[%s2303_s5 + $0x158] sm:$0xff]  ;;  %v1345_v56 = vld [vmem:[%s2303_s5 + $0x160] sm:$0xff] }
 0x214   : >> { %1342 = vst [vmem:[%s2299_s4 + $0x150] sm:$0xff] %v1341_v63  ;;  %1344 = vst [vmem:[%s2299_s4 + $0x158] sm:$0xff] %v1343_v42  ;;  %v1347_v23 = vld [vmem:[%s2303_s5 + $0x168] sm:$0xff]  ;;  %v1349_v25 = vld [vmem:[%s2303_s5 + $0x170] sm:$0xff] }
 0x215   : >> { %1346 = vst [vmem:[%s2299_s4 + $0x160] sm:$0xff] %v1345_v56  ;;  %v1351_v4 = vld [vmem:[%s2303_s5 + $0x178] sm:$0xff]  ;;  %1348 = vst [vmem:[%s2299_s4 + $0x168] sm:$0xff] %v1347_v23  ;;  %v1353_v24 = vld [vmem:[%s2303_s5 + $0x180] sm:$0xff] }
 0x216   : >> { %1350 = vst [vmem:[%s2299_s4 + $0x170] sm:$0xff] %v1349_v25  ;;  %1352 = vst [vmem:[%s2299_s4 + $0x178] sm:$0xff] %v1351_v4  ;;  %v1355_v9 = vld [vmem:[%s2303_s5 + $0x188] sm:$0xff]  ;;  %v1357_v26 = vld [vmem:[%s2303_s5 + $0x190] sm:$0xff] }
 0x217   : >> { %1354 = vst [vmem:[%s2299_s4 + $0x180] sm:$0xff] %v1353_v24  ;;  %1356 = vst [vmem:[%s2299_s4 + $0x188] sm:$0xff] %v1355_v9  ;;  %v1359_v27 = vld [vmem:[%s2303_s5 + $0x198] sm:$0xff]  ;;  %v1361_v13 = vld [vmem:[%s2303_s5 + $0x1a0] sm:$0xff] }
 0x218   : >> { %1358 = vst [vmem:[%s2299_s4 + $0x190] sm:$0xff] %v1357_v26  ;;  %v1363_v28 = vld [vmem:[%s2303_s5 + $0x1a8] sm:$0xff]  ;;  %1360 = vst [vmem:[%s2299_s4 + $0x198] sm:$0xff] %v1359_v27  ;;  %v1365_v36 = vld [vmem:[%s2303_s5 + $0x1b0] sm:$0xff]  ;;  %1253 = sbr.rel (!%p1250_p0) target bundleno = 510 (0x1fe), region = 312 }
 0x219   : >> { %1362 = vst [vmem:[%s2299_s4 + $0x1a0] sm:$0xff] %v1361_v13  ;;  %1364 = vst [vmem:[%s2299_s4 + $0x1a8] sm:$0xff] %v1363_v28  ;;  %v1367_v29 = vld [vmem:[%s2303_s5 + $0x1b8] sm:$0xff]  ;;  %v1369_v54 = vld [vmem:[%s2303_s5 + $0x1c0] sm:$0xff] }
 0x21a   : >> { %1366 = vst [vmem:[%s2299_s4 + $0x1b0] sm:$0xff] %v1365_v36  ;;  %1368 = vst [vmem:[%s2299_s4 + $0x1b8] sm:$0xff] %v1367_v29  ;;  %v1371_v55 = vld [vmem:[%s2303_s5 + $0x1c8] sm:$0xff]  ;;  %v1373_v58 = vld [vmem:[%s2303_s5 + $0x1d0] sm:$0xff] }
 0x21b   : >> { %1370 = vst [vmem:[%s2299_s4 + $0x1c0] sm:$0xff] %v1369_v54  ;;  %v1375_v45 = vld [vmem:[%s2303_s5 + $0x1d8] sm:$0xff]  ;;  %1372 = vst [vmem:[%s2299_s4 + $0x1c8] sm:$0xff] %v1371_v55  ;;  %v1377_v46 = vld [vmem:[%s2303_s5 + $0x1e0] sm:$0xff] }
 0x21c   : >> { %1374 = vst [vmem:[%s2299_s4 + $0x1d0] sm:$0xff] %v1373_v58  ;;  %1376 = vst [vmem:[%s2299_s4 + $0x1d8] sm:$0xff] %v1375_v45  ;;  %v1379_v61 = vld [vmem:[%s2303_s5 + $0x1e8] sm:$0xff]  ;;  %v1381_v30 = vld [vmem:[%s2303_s5 + $0x1f0] sm:$0xff] }
 0x21d   : >> { %1378 = vst [vmem:[%s2299_s4 + $0x1e0] sm:$0xff] %v1377_v46  ;;  %1380 = vst [vmem:[%s2299_s4 + $0x1e8] sm:$0xff] %v1379_v61  ;;  %v1383_v12 = vld [vmem:[%s2303_s5 + $0x1f8] sm:$0xff]  ;;  %s3662_s5 = smov %s3486_s11 }
 0x21e   : >> { %1382 = vst [vmem:[%s2299_s4 + $0x1f0] sm:$0xff] %v1381_v30  ;;  %1384 = vst [vmem:[%s2299_s4 + $0x1f8] sm:$0xff] %v1383_v12  ;;  %s3661_s4 = smov %s3489_s25 }
 0x21f PF: > { %s3595_s28 = sand.u32 63, %s1244_s14   ;;  %s1739_s30 = sshll.u32 %s3419_s26, 13 }
 0x220   : > { %s1396_s6 = sshra.s32 %s1739_s30, 4  ;;  %p1725_p1 = scmp.le.s32.totalorder %s3595_s28, 0 }
 0x221   : > { %s1397_s7 = scalar_lea.vmem %s3199_s3, %s1396_s6 [#allocation3]   ;;  %s1400_s8 = scalar_lea.vmem %s3209_s21, %s1396_s6  }
 0x222   : > { %1624 = sbr.rel (%p1725_p1) target bundleno = 563 (0x233), region = 317  ;;  %s2313_s19 = smov (!%p1725_p1), %s1400_s8  }
 0x223   : > { %s2317_s9 = smov (!%p1725_p1), %s1397_s7   ;;  %s2321_s22 = smov (!%p1725_p1), 0  }
 0x224   : > { %s2325_s15 = smov (!%p1725_p1), 0  }
 0x229 LB: >> { %v1412_v31 = vld [vmem:[%s2319_s9] sm:$0xff]  ;;  %s1414_s14 = sadd.s32 1, %s2323_s22  ;;  %s1406_s15 = sadd.s32 1, %s2327_s15   ;;  %s2327_s15 = sphi %s2325_s15, %s1406_s15   ;;  %s2323_s22 = sphi %s2321_s22, %s2322_s22   ;;  %s2319_s9 = sphi %s2317_s9, %s1419_s9   ;;  %s2315_s19 = sphi %s2313_s19, %s1420_s19  }
 0x22a   : >> { %1413 = vst [vmem:[%s2315_s19] sm:$0xff] %v1412_v31  ;;  %p1415_p2 = scmp.ge.s32.totalorder %s1414_s14, %s3595_s28  ;;  %p1405_p3 = scmp.ge.s32.totalorder %s1406_s15, %s3595_s28 }
 0x22c   : >> { %s3686_s14 = smov (%p1415_p2, %s1414_s14), 0  ;;  %1408 = sbr.rel (!%p1405_p3) target bundleno = 553 (0x229), region = 323 }
 0x22d   : >> { %s1726_s26 = sshll.u32 %s3686_s14, 3  ;;  %s2322_s22 = smov %s3686_s14  }
 0x22e   : >> { %s1419_s9 = scalar_lea.vmem %s1397_s7, %s1726_s26 [#allocation3]   ;;  %s1420_s19 = scalar_lea.vmem %s1400_s8, %s1726_s26  }
 0x233 PF: > { %s2343_s4 = smov 0  }
 0x234   : > { %s1421_s5 = sshllo.u32 %s2343_s4, %s3215_s17 }
 0x235   : > { %v1430_v15 = vld [vmem:[%s1241_s20] sm:%s1421_s5] }
 0x236   : > { %1431 = vst [vmem:[%s1243_s24] sm:%s1421_s5] %v1430_v15 }
 0x237 PF: > { %p1728_p5 = scmp.ge.u32.totalorder %s3211_s23, 8 }
 0x238   : > { %s2344_s29 = smov (!%p1728_p5), 0  }
 0x239   : > { %1042 = sbr.rel (%p1728_p5) target bundleno = 576 (0x240), region = 110  ;;  %s1043_s27 = sshllo.u32 (!%p1728_p5), %s2344_s29, %s3211_s23 }
 0x23a   : > { %v1052_v43 = vld [vmem:[%s3199_s3] sm:%s1043_s27] (!%p1728_p5) }
 0x23b   : > { %1053 = vst [vmem:[%s3209_s21] sm:%s1043_s27] (!%p1728_p5), %v1052_v43 }
 0x240 PF: > { %p9_p4 = scmp.ge.s32.totalorder %s2379_s13, 4   ;;  %s3664_s9 = smov %s2195_s10 }
 0x241   : > { %s3665_s10 = smov %s2389_s16  ;;  %s3666_s11 = smov %s2379_s13 }
 0x242   :  { %11 = sbr.rel (!%p9_p4) target bundleno = 2 (0x2), region = 334 }

// kernel: conv_logic_mnist_model.7
= control target key start
LH: loop header
LB: loop body
LE: loop exit
PB: predicated region body
PF: predicated region fallthrough
CT: control target
= control target key end

     0   :  { %v433_v0 = vmov 0   ;;  %v434_v1 = vmov 1   ;;  %v435_v4 = vmov 2   ;;  %v436_v5 = vmov 5   ;;  %s835_s1 = inlined_call_operand.vmem [shape: f32[12,12], index: 1, kind: input, shape index: {}]   ;;  %s836_s0 = inlined_call_operand.vmem [shape: bf16[16,12,72], index: 0, kind: input, shape index: {}]   ;;  %s837_s2 = inlined_call_operand.vmem [shape: f32[12,72], index: 2, kind: output, shape index: {}]  }
   0x1   :  { %415 = vset.pattern.permute.xlu1 %v433_v0  ;;  %414 = vset.pattern.permute.xlu0 %v434_v1  ;;  %v11_v2 = vld [vmem:[%s835_s1] sm:$0xff]  ;;  %v12_v3 = vld [vmem:[%s835_s1 + $0x8] sm:$0xf]  ;;  %v437_v6 = vmov 3   ;;  %v438_v7 = vmov 4   ;;  %v439_v8 = vmov 6  }
   0x2   :  { %45 = vperm.xlu1 %415, %v11_v2   ;;  %34 = vperm.xlu0 %414, %v11_v2   ;;  %v440_v9 = vmov 9   ;;  %v441_v10 = vmov 8   ;;  %v442_v11 = vmov 7   ;;  %v443_v12 = vmov 11   ;;  %v479_v19 = vld [vmem:[%s836_s0] ss:$8 sps:$4 sm:$0xff]  }
   0x3   :  { %v444_v13 = vmov 10   ;;  %v484_v20 = vld [vmem:[%s836_s0 + $0x10] ss:$8 sps:$4 sm:$0xff]   ;;  %v489_v21 = vld [vmem:[%s836_s0 + $0x4] sm:$0x3]  ;;  %v843_v27 = vunpack.c.l.bf16 %v479_v19  ;;  %v842_v28 = vunpack.c.h.bf16 %v479_v19  ;;  %vm364_vm0 = vcmask 588800  }
   0x4   :  { %v494_v22 = vld [vmem:[%s836_s0 + $0xc] sm:$0x3]  ;;  %v499_v23 = vld [vmem:[%s836_s0 + $0x14] sm:$0x3]  ;;  %v504_v24 = vld [vmem:[%s836_s0 + $0x1c] sm:$0x3]  ;;  %v841_v33 = vunpack.c.l.bf16 %v484_v20  ;;  %v840_v34 = vunpack.c.h.bf16 %v484_v20  ;;  %v16_v36 = vunpack.c.l.bf16 %v489_v21 }
   0x5   :  { %v509_v25 = vld [vmem:[%s836_s0 + $0x24] sm:$0x3]  ;;  %v514_v26 = vld [vmem:[%s836_s0 + $0x2c] sm:$0x3]  ;;  %v521_v29 = vld [vmem:[%s836_s0 + $0x34] sm:$0x3]  ;;  %v176_v37 = vunpack.c.l.bf16 %v494_v22  ;;  %v240_v40 = vunpack.c.l.bf16 %v499_v23  ;;  %v304_v41 = vunpack.c.l.bf16 %v504_v24 }
   0x6   :  { %49 = vperm.xlu1 %415, %v12_v3   ;;  %39 = vperm.xlu0 %414, %v12_v3   ;;  %v526_v30 = vld [vmem:[%s836_s0 + $0x3c] sm:$0x3]  ;;  %v531_v31 = vld [vmem:[%s836_s0 + $0x20] ss:$8 sps:$4 sm:$0xff]   ;;  %v544_v38 = vld [vmem:[%s836_s0 + $0x30] ss:$8 sps:$4 sm:$0xff]   ;;  %v839_v42 = vunpack.c.l.bf16 %v509_v25  ;;  %v838_v43 = vunpack.c.l.bf16 %v514_v26  ;;  %v245_v47 = vunpack.c.l.bf16 %v521_v29 }
   0x7   :  { %v549_v39 = vld [vmem:[%s836_s0 + $0x40] ss:$8 sps:$4 sm:$0xff]   ;;  %v558_v44 = vld [vmem:[%s836_s0 + $0x50] ss:$8 sps:$4 sm:$0xff]   ;;  %v563_v45 = vld [vmem:[%s836_s0 + $0x44] sm:$0x3]  ;;  %v309_v48 = vunpack.c.l.bf16 %v526_v30  ;;  %v20_v49 = vunpack.c.l.bf16 %v531_v31  ;;  %v180_v50 = vunpack.c.h.bf16 %v531_v31  ;;  %v244_v53 = vunpack.c.l.bf16 %v544_v38 }
   0x8   :  { %v568_v46 = vld [vmem:[%s836_s0 + $0x4c] sm:$0x3]  ;;  %v577_v51 = vld [vmem:[%s836_s0 + $0x54] sm:$0x3]  ;;  %v582_v52 = vld [vmem:[%s836_s0 + $0x5c] sm:$0x3]  ;;  %v308_v54 = vunpack.c.h.bf16 %v544_v38  ;;  %v858_v55 = vunpack.c.l.bf16 %v549_v39  ;;  %v854_v56 = vunpack.c.h.bf16 %v549_v39  ;;  %v847_v58 = vunpack.c.l.bf16 %v558_v44 }
   0x9   :  { %v851_v59 = vunpack.c.h.bf16 %v558_v44  ;;  %v850_v60 = vunpack.c.l.bf16 %v563_v45  ;;  %v853_v61 = vunpack.c.l.bf16 %v568_v46  ;;  %v597_v62 = vld [vmem:[%s836_s0 + $0x60] ss:$8 sps:$4 sm:$0xff]   ;;  %v856_v63 = vunpack.c.l.bf16 %v577_v51 }
   0xa   :  { %417 = vset.pattern.permute.xlu1 %v435_v4  ;;  %416 = vset.pattern.permute.xlu0 %v435_v4  ;;  %v857_v0 = vunpack.c.l.bf16 %v582_v52  ;;  %v603_v1 = vmul.f32 %v20_v49, %v843_v27  ;;  %v617_v4 = vld [vmem:[%s836_s0 + $0x6c] sm:$0x3]  ;;  %v652_v21 = vmul.f32 %v309_v48, %v304_v41  ;;  %v844_v22 = vunpack.c.l.bf16 %v597_v62 }
   0xb   :  { %59 = vperm.xlu1 %417, %v12_v3   ;;  %55 = vperm.xlu0 %416, %v11_v2   ;;  %v845_v23 = vunpack.c.h.bf16 %v597_v62  ;;  %v852_v29 = vunpack.c.l.bf16 %v617_v4  ;;  %vm366_vm1 = vcmask 584704  }
   0xf   :  { %418 = vset.pattern.permute.xlu1 %v436_v5  ;;  %419 = vset.pattern.permute.xlu0 %v436_v5  ;;  %v622_v5 = vld [vmem:[%s836_s0 + $0x70] ss:$8 sps:$4 sm:$0xff]  }
  0x10   :  { %81 = vperm.xlu1 %418, %v11_v2   ;;  %85 = vperm.xlu0 %419, %v12_v3   ;;  %v846_v31 = vunpack.c.l.bf16 %v622_v5  ;;  %v848_v38 = vunpack.c.h.bf16 %v622_v5 }
  0x12   :  { %v680_v27 = vmul.f32 %v846_v31, %v847_v58 }
  0x14   :  { %420 = vset.pattern.permute.xlu1 %v437_v6  ;;  %421 = vset.pattern.permute.xlu0 %v438_v7 }
  0x15   :  { %69 = vperm.xlu1 %420, %v11_v2   ;;  %91 = vperm.xlu0 %421, %v11_v2  }
  0x19   :  { %73 = vperm.xlu1 %420, %v12_v3   ;;  %424 = vset.pattern.permute.xlu0 %v439_v8 }
  0x1a   :  { %105 = vperm.xlu0 %424, %v12_v3  }
  0x1d   :  { %422 = vset.pattern.permute.xlu1 %v438_v7  ;;  %v626_v7 = vmul.f32 %v244_v53, %v841_v33  ;;  %v674_v33 = vmul.f32 %v845_v23, %v854_v56  ;;  %v698_v23 = vmul.f32 %v852_v29, %v853_v61 }
  0x1e   :  { %95 = vperm.xlu1 %422, %v12_v3   ;;  %426 = vset.pattern.permute.xlu0 %v440_v9 }
  0x1f   :  { %127 = vperm.xlu0 %426, %v11_v2   ;;  %859 = vst [vmem:[#allocation2_spill] sm:$0xff] %v698_v23 }
  0x22   :  { %423 = vset.pattern.permute.xlu1 %v439_v8  ;;  %v630_v8 = vmul.f32 %v308_v54, %v840_v34  ;;  %v668_v34 = vmul.f32 %v844_v22, %v858_v55  ;;  %v867_v55 = vunpack.c.l.bf16 %v509_v25 }
  0x23   :  { %101 = vperm.xlu1 %423, %v11_v2   ;;  %429 = vset.pattern.permute.xlu0 %v441_v10 }
  0x24   :  { %141 = vperm.xlu0 %429, %v12_v3  }
  0x27   :  { %425 = vset.pattern.permute.xlu1 %v442_v11  ;;  %v643_v11 = vld [vmem:[%s836_s0 + $0x74] sm:$0x3] }
  0x28   :  { %115 = vperm.xlu1 %425, %v11_v2   ;;  %431 = vset.pattern.permute.xlu0 %v443_v12 }
  0x29   :  { %161 = vperm.xlu0 %431, %v11_v2  }
  0x2c   :  { %119 = vperm.xlu1 %425, %v12_v3  }
  0x30   :  { %427 = vset.pattern.permute.xlu1 %v440_v9  ;;  %v634_v9 = vmul.f32 %v839_v42, %v16_v36  ;;  %v686_v42 = vmul.f32 %v848_v38, %v851_v59  ;;  %v863_v59 = vunpack.c.l.bf16 %v479_v19 }
  0x31   :  { %131 = vperm.xlu1 %427, %v12_v3  }
  0x35   :  { %428 = vset.pattern.permute.xlu1 %v441_v10  ;;  %v638_v10 = vmul.f32 %v838_v43, %v176_v37  ;;  %v855_v43 = vunpack.c.l.bf16 %v643_v11 }
  0x36   :  { %137 = vperm.xlu1 %428, %v11_v2  }
  0x37   :  { %v706_v38 = vmul.f32 %v855_v43, %v856_v63  ;;  %v865_v43 = vunpack.c.l.bf16 %v484_v20 }
  0x39   :  { %860 = vst [vmem:[#allocation3_spill] sm:$0xff] %v706_v38 }
  0x3a   :  { %430 = vset.pattern.permute.xlu1 %v444_v13  ;;  %v650_v13 = vmul.f32 %v245_v47, %v240_v40 }
  0x3b   :  { %147 = vperm.xlu1 %430, %v11_v2   ;;  %v607_v2 = vmul.f32 %v180_v50, %v842_v28 }
  0x3f   :  { %151 = vperm.xlu1 %430, %v12_v3  }
  0x43   :  { %432 = vset.pattern.permute.xlu1 %v443_v12  ;;  %v648_v12 = vld [vmem:[%s836_s0 + $0x7c] sm:$0x3] }
  0x44   :  { %165 = vperm.xlu1 %432, %v12_v3   ;;  %v612_v3 = vld [vmem:[%s836_s0 + $0x64] sm:$0x3] }
  0x45   :  { %v849_v24 = vunpack.c.l.bf16 %v612_v3 }
  0x47   :  { %v692_v22 = vmul.f32 %v849_v24, %v850_v60  ;;  %v861_v24 = vunpack.c.l.bf16 %v648_v12 }
  0x49   :  { %v712_v60 = vmul.f32 %v861_v24, %v857_v0  ;;  %v866_v24 = vunpack.c.h.bf16 %v484_v20 }
  0x4b   :  { %862 = vst [vmem:[#allocation4_spill] sm:$0xff] %v712_v60 }
  0x81   :  { %v466_v14 = vpop.permute.xlu1 %45  ;;  %v472_v17 = vpop.permute.xlu0 %34 }
  0x82   :  { %v42_v29 = vmul.f32 %v472_v17, %v863_v59  ;;  %v256_v63 = vmul.f32 %v865_v43, %v472_v17  ;;  %v320_v0 = vmul.f32 %v866_v24, %v472_v17 }
  0x84   :  { %v52_v25 = vadd.f32 %v466_v14, %v42_v29 }
  0x85   :  { %v468_v15 = vpop.permute.xlu1 %49  ;;  %v537_v35 = vpop.permute.xlu0 %39 }
  0x86   :  { %v43_v31 = vmul.f32 %v537_v35, %v16_v36  ;;  %v193_v58 = vmul.f32 %v176_v37, %v537_v35  ;;  %v864_v36 = vunpack.c.h.bf16 %v479_v19  ;;  %v257_v61 = vmul.f32 %v240_v40, %v537_v35 }
  0x87   :  { %v321_v56 = vmul.f32 %v304_v41, %v537_v35  ;;  %v868_v19 = vunpack.c.l.bf16 %v514_v26 }
  0x88   :  { %v192_v37 = vmul.f32 %v864_v36, %v472_v17  ;;  %v53_v43 = vadd.f32 %v468_v15, %v43_v31  ;;  %v195_v20 = vadd.f32 %v193_v58, %v468_v15  ;;  %v259_v26 = vadd.f32 %v257_v61, %v468_v15 }
  0x8a   :  { %v470_v16 = vpop.permute.xlu1 %59  ;;  %v56_v6 = vpop.permute.xlu0 %55 }
  0x8b   :  { %v63_v59 = vmul.f32 %v470_v16, %v867_v55  ;;  %v197_v36 = vmul.f32 %v868_v19, %v470_v16  ;;  %v261_v40 = vmul.f32 %v245_v47, %v470_v16  ;;  %v325_v35 = vmul.f32 %v309_v48, %v470_v16 }
  0x8c   :  { %v62_v41 = vmul.f32 %v56_v6, %v20_v49  ;;  %v196_v38 = vmul.f32 %v180_v50, %v56_v6  ;;  %v260_v17 = vmul.f32 %v244_v53, %v56_v6  ;;  %v324_v24 = vmul.f32 %v308_v54, %v56_v6 }
  0x8d   :  { %v194_v55 = vadd.f32 %v192_v37, %v466_v14  ;;  %v323_v19 = vadd.f32 %v321_v56, %v468_v15  ;;  %v258_v47 = vadd.f32 %v256_v63, %v466_v14  ;;  %v322_v16 = vadd.f32 %v320_v0, %v466_v14 }
  0x8e   :  { %v65_v48 = vadd.f32 %v63_v59, %v53_v43  ;;  %v199_v49 = vadd.f32 %v197_v36, %v195_v20  ;;  %v263_v50 = vadd.f32 %v261_v40, %v259_v26  ;;  %v64_v58 = vadd.f32 %v62_v41, %v52_v25 }
  0x8f   :  { %v474_v18 = vpop.permute.xlu1 %81  ;;  %v86_v28 = vpop.permute.xlu0 %85  ;;  %v327_v31 = vadd.f32 %v325_v35, %v323_v19  ;;  %v198_v53 = vadd.f32 %v196_v38, %v194_v55  ;;  %v262_v6 = vadd.f32 %v260_v17, %v258_v47  ;;  %v326_v29 = vadd.f32 %v324_v24, %v322_v16 }
  0x90   :  { %v869_v56 = vunpack.c.l.bf16 %v549_v39  ;;  %v870_v14 = vunpack.c.h.bf16 %v549_v39  ;;  %v873_v35 = vunpack.c.l.bf16 %v563_v45  ;;  %v874_v39 = vunpack.c.l.bf16 %v568_v46 }
  0x92   :  { %v88_v61 = vmul.f32 %v474_v18, %v869_v56  ;;  %v206_v63 = vmul.f32 %v870_v14, %v474_v18  ;;  %v89_v41 = vmul.f32 %v86_v28, %v873_v35  ;;  %v207_v43 = vmul.f32 %v874_v39, %v86_v28 }
  0x94   :  { %v533_v32 = vpop.permute.xlu1 %69  ;;  %v92_v23 = vpop.permute.xlu0 %91 }
  0x95   :  { %v76_v37 = vmul.f32 %v533_v32, %v603_v1  ;;  %v202_v15 = vmul.f32 %v607_v2, %v533_v32  ;;  %v266_v0 = vmul.f32 %v626_v7, %v533_v32  ;;  %v330_v38 = vmul.f32 %v630_v8, %v533_v32 }
  0x96   :  { %v871_v1 = vunpack.c.l.bf16 %v558_v44  ;;  %v872_v2 = vunpack.c.h.bf16 %v558_v44  ;;  %v875_v7 = vunpack.c.l.bf16 %v577_v51  ;;  %v876_v32 = vunpack.c.l.bf16 %v582_v52 }
  0x97   :  { %v98_v17 = vadd.f32 %v92_v23, %v88_v61  ;;  %v208_v24 = vadd.f32 %v206_v63, %v92_v23  ;;  %v78_v19 = vadd.f32 %v76_v37, %v64_v58  ;;  %v204_v44 = vadd.f32 %v202_v15, %v198_v53 }
  0x98   :  { %v588_v57 = vpop.permute.xlu1 %73  ;;  %v270_v36 = vmul.f32 %v871_v1, %v474_v18  ;;  %v334_v40 = vmul.f32 %v872_v2, %v474_v18  ;;  %v271_v20 = vmul.f32 %v875_v7, %v86_v28  ;;  %v335_v8 = vmul.f32 %v876_v32, %v86_v28 }
  0x99   :  { %v106_v59 = vpop.permute.xlu0 %105  ;;  %v77_v18 = vmul.f32 %v588_v57, %v634_v9  ;;  %v203_v45 = vmul.f32 %v638_v10, %v588_v57  ;;  %v268_v46 = vadd.f32 %v266_v0, %v262_v6  ;;  %v332_v47 = vadd.f32 %v330_v38, %v326_v29 }
  0x9a   :  { %v272_v55 = vadd.f32 %v270_v36, %v92_v23  ;;  %v336_v26 = vadd.f32 %v334_v40, %v92_v23  ;;  %v267_v51 = vmul.f32 %v650_v13, %v588_v57  ;;  %v331_v28 = vmul.f32 %v652_v21, %v588_v57  ;;  %v885_v40 = vld [vmem:[#allocation2_spill] sm:$0xff] }
  0x9b   :  { %v877_v52 = vunpack.c.l.bf16 %v597_v62  ;;  %v878_v23 = vunpack.c.h.bf16 %v597_v62  ;;  %v879_v53 = vunpack.c.l.bf16 %v612_v3  ;;  %v880_v37 = vunpack.c.l.bf16 %v617_v4 }
  0x9c   :  { %v881_v29 = vunpack.c.l.bf16 %v622_v5  ;;  %v882_v13 = vunpack.c.h.bf16 %v622_v5  ;;  %v883_v57 = vunpack.c.l.bf16 %v643_v11  ;;  %v884_v61 = vunpack.c.l.bf16 %v648_v12 }
  0x9d   :  { %v658_v30 = vpop.permute.xlu1 %95  ;;  %v109_v9 = vmul.f32 %v106_v59, %v879_v53  ;;  %v211_v10 = vmul.f32 %v880_v37, %v106_v59  ;;  %v802_v38 = vadd.f32 %v77_v18, %v65_v48  ;;  %v804_v5 = vadd.f32 %v203_v45, %v199_v49 }
  0x9e   :  { %v128_v6 = vpop.permute.xlu0 %127  ;;  %v275_v21 = vmul.f32 %v883_v57, %v106_v59  ;;  %v339_v62 = vmul.f32 %v884_v61, %v106_v59  ;;  %v269_v12 = vadd.f32 %v267_v51, %v263_v50  ;;  %v209_v59 = vadd.f32 %v207_v43, %v658_v30 }
  0x9f   :  { %v134_v7 = vmul.f32 %v128_v6, %v78_v19  ;;  %v220_v43 = vmul.f32 %v204_v44, %v128_v6  ;;  %v284_v32 = vmul.f32 %v268_v46, %v128_v6  ;;  %v348_v18 = vmul.f32 %v332_v47, %v128_v6 }
  0xa2   :  { %v102_v60 = vpop.permute.xlu1 %101 }
  0xa3   :  { %v108_v16 = vmul.f32 %v102_v60, %v877_v52  ;;  %v210_v58 = vmul.f32 %v878_v23, %v102_v60  ;;  %v274_v15 = vmul.f32 %v881_v29, %v102_v60  ;;  %v338_v56 = vmul.f32 %v882_v13, %v102_v60  ;;  %v809_v2 = vpop.permute.xlu0 %141 }
  0xa4   :  { %v99_v60 = vadd.f32 %v658_v30, %v89_v41 }
  0xa5   :  { %v110_v11 = vadd.f32 %v108_v16, %v98_v17  ;;  %v212_v1 = vadd.f32 %v210_v58, %v208_v24  ;;  %v340_v36 = vadd.f32 %v338_v56, %v336_v26 }
  0xa6   :  { %v111_v24 = vadd.f32 %v109_v9, %v99_v60 }
  0xa7   :  { %v116_v54 = vpop.permute.xlu1 %115 }
  0xa8   :  { %v122_v14 = vmul.f32 %v116_v54, %v668_v34  ;;  %v216_v3 = vmul.f32 %v674_v33, %v116_v54  ;;  %v280_v4 = vmul.f32 %v680_v27, %v116_v54  ;;  %v344_v0 = vmul.f32 %v686_v42, %v116_v54 }
  0xa9   :  { %v273_v34 = vadd.f32 %v271_v20, %v658_v30  ;;  %v276_v33 = vadd.f32 %v274_v15, %v272_v55  ;;  %v337_v27 = vadd.f32 %v335_v8, %v658_v30  ;;  %v333_v54 = vadd.f32 %v331_v28, %v327_v31  ;;  %v886_v20 = vld [vmem:[#allocation3_spill] sm:$0xff]  ;;  %v887_v8 = vld [vmem:[#allocation4_spill] sm:$0xff] }
  0xaa   :  { %v124_v42 = vadd.f32 %v122_v14, %v110_v11  ;;  %v218_v48 = vadd.f32 %v216_v3, %v212_v1  ;;  %v346_v39 = vadd.f32 %v344_v0, %v340_v36  ;;  %v213_v55 = vadd.f32 %v211_v10, %v209_v59 }
  0xab   :  { %v120_v25 = vpop.permute.xlu1 %119  ;;  %v282_v41 = vadd.f32 %v280_v4, %v276_v33  ;;  %v277_v26 = vadd.f32 %v275_v21, %v273_v34  ;;  %v341_v30 = vadd.f32 %v339_v62, %v337_v27 }
  0xac   :  { %v123_v49 = vmul.f32 %v120_v25, %v692_v22  ;;  %v217_v35 = vmul.f32 %v885_v40, %v120_v25  ;;  %v281_v17 = vmul.f32 %v886_v20, %v120_v25  ;;  %v345_v45 = vmul.f32 %v887_v8, %v120_v25  ;;  %v162_v22 = vpop.permute.xlu0 %161 }
  0xad   :  { %v158_v31 = vmul.f32 %v124_v42, %v78_v19  ;;  %v228_v51 = vmul.f32 %v218_v48, %v204_v44  ;;  %v292_v28 = vmul.f32 %v282_v41, %v268_v46  ;;  %v356_v52 = vmul.f32 %v346_v39, %v332_v47 }
  0xae   :  { %v125_v16 = vadd.f32 %v123_v49, %v111_v24  ;;  %v219_v23 = vadd.f32 %v217_v35, %v213_v55  ;;  %v283_v15 = vadd.f32 %v281_v17, %v277_v26  ;;  %v347_v19 = vadd.f32 %v345_v45, %v341_v30 }
  0xaf   :  { %v168_v6 = vmul.f32 %v162_v22, %v158_v31  ;;  %v230_v57 = vmul.f32 %v228_v51, %v162_v22  ;;  %v294_v61 = vmul.f32 %v292_v28, %v162_v22  ;;  %v358_v62 = vmul.f32 %v356_v52, %v162_v22 }
  0xb0   :  { %v798_v63 = vpop.permute.xlu1 %131  ;;  %v159_v1 = vmul.f32 %v125_v16, %v802_v38  ;;  %v229_v33 = vmul.f32 %v219_v23, %v804_v5  ;;  %v293_v36 = vmul.f32 %v283_v15, %v269_v12 }
  0xb1   :  { %v135_v25 = vmul.f32 %v798_v63, %v802_v38  ;;  %v221_v14 = vmul.f32 %v804_v5, %v798_v63  ;;  %v285_v3 = vmul.f32 %v269_v12, %v798_v63 }
  0xb3   :  { %v145_v27 = vadd.f32 %v809_v2, %v135_v25  ;;  %v223_v40 = vadd.f32 %v221_v14, %v809_v2  ;;  %v287_v35 = vadd.f32 %v285_v3, %v809_v2 }
  0xb5   :  { %v138_v50 = vpop.permute.xlu1 %137 }
  0xb6   :  { %v144_v58 = vadd.f32 %v138_v50, %v134_v7  ;;  %v222_v53 = vadd.f32 %v220_v43, %v138_v50  ;;  %v286_v37 = vadd.f32 %v284_v32, %v138_v50  ;;  %v350_v44 = vadd.f32 %v348_v18, %v138_v50 }
  0xba   :  { %v148_v29 = vpop.permute.xlu1 %147 }
  0xbb   :  { %v154_v13 = vmul.f32 %v148_v29, %v124_v42  ;;  %v224_v9 = vmul.f32 %v218_v48, %v148_v29  ;;  %v288_v10 = vmul.f32 %v282_v41, %v148_v29  ;;  %v352_v56 = vmul.f32 %v346_v39, %v148_v29 }
  0xbc   :  { %v349_v42 = vmul.f32 %v333_v54, %v798_v63  ;;  %v357_v39 = vmul.f32 %v347_v19, %v333_v54 }
  0xbd   :  { %v156_v46 = vadd.f32 %v154_v13, %v144_v58  ;;  %v226_v47 = vadd.f32 %v224_v9, %v222_v53  ;;  %v290_v21 = vadd.f32 %v288_v10, %v286_v37  ;;  %v354_v11 = vadd.f32 %v352_v56, %v350_v44 }
  0xbe   :  { %v152_v4 = vpop.permute.xlu1 %151  ;;  %v351_v24 = vadd.f32 %v349_v42, %v809_v2 }
  0xbf   :  { %v170_v0 = vadd.f32 %v168_v6, %v156_v46  ;;  %v232_v60 = vadd.f32 %v230_v57, %v226_v47  ;;  %v155_v59 = vmul.f32 %v152_v4, %v125_v16  ;;  %v225_v34 = vmul.f32 %v219_v23, %v152_v4 }
  0xc0   :  { %v296_v49 = vadd.f32 %v294_v61, %v290_v21  ;;  %v289_v41 = vmul.f32 %v283_v15, %v152_v4  ;;  %v360_v7 = vadd.f32 %v358_v62, %v354_v11  ;;  %v353_v38 = vmul.f32 %v347_v19, %v152_v4 }
  0xc1   :  { %v234_v48 = vmax.f32 %v170_v0, %v232_v60  ;;  %v157_v32 = vadd.f32 %v155_v59, %v145_v27  ;;  %v227_v5 = vadd.f32 %v225_v34, %v223_v40 }
  0xc2   :  { %v291_v18 = vadd.f32 %v289_v41, %v287_v35  ;;  %v355_v45 = vadd.f32 %v353_v38, %v351_v24 }
  0xc3   :  { %v298_v50 = vmax.f32 %v234_v48, %v296_v49  ;;  %v166_v43 = vpop.permute.xlu1 %165 }
  0xc4   :  { %v169_v20 = vmul.f32 %v166_v43, %v159_v1  ;;  %v231_v12 = vmul.f32 %v229_v33, %v166_v43  ;;  %v295_v17 = vmul.f32 %v293_v36, %v166_v43  ;;  %v359_v30 = vmul.f32 %v357_v39, %v166_v43 }
  0xc5   :  { %v362_v63 = vmax.f32 %v298_v50, %v360_v7 }
  0xc6   :  { %v171_v55 = vadd.f32 %v169_v20, %v157_v32  ;;  %v233_v26 = vadd.f32 %v231_v12, %v227_v5  ;;  %v297_v8 = vadd.f32 %v295_v17, %v291_v18  ;;  %v361_v51 = vadd.f32 %v359_v30, %v355_v45 }
  0xc7   :  { %365 = vst.msk [vmem:[%s837_s2] sm:$0xff] %vm364_vm0, %v362_v63 }
  0xc8   :  { %v235_v54 = vmax.f32 %v171_v55, %v233_v26 }
  0xca   :  { %v299_v31 = vmax.f32 %v235_v54, %v297_v8 }
  0xcc   :  { %v363_v22 = vmax.f32 %v299_v31, %v361_v51 }
  0xce   :  { %367 = vst.msk [vmem:[%s837_s2 + $0x8] sm:$0xf] %vm366_vm1, %v363_v22 }

// kernel: conv_logic_mnist_model.8
= control target key start
LH: loop header
LB: loop body
LE: loop exit
PB: predicated region body
PF: predicated region fallthrough
CT: control target
= control target key end

     0   :  { %v1112_v0 = vmov 1   ;;  %v1113_v6 = vmov 0   ;;  %v1114_v7 = vmov 2   ;;  %v1115_v8 = vmov 3   ;;  %s2338_s1 = inlined_call_operand.vmem [shape: f32[36,12], index: 1, kind: input, shape index: {}]   ;;  %s2339_s0 = inlined_call_operand.vmem [shape: bf16[16,36,18], index: 0, kind: input, shape index: {}]   ;;  %s2340_s2 = inlined_call_operand.vmem [shape: f32[36,18], index: 2, kind: output, shape index: {}]  }
   0x1   :  { %1089 = vset.pattern.permute.xlu1 %v1112_v0  ;;  %1088 = vset.pattern.permute.xlu0 %v1112_v0  ;;  %v1142_v1 = vld [vmem:[%s2338_s1 + $0x10] sm:$0xff]  ;;  %v1147_v2 = vld [vmem:[%s2338_s1] sm:$0xff]  ;;  %v1154_v3 = vld [vmem:[%s2338_s1 + $0x18] sm:$0xff]  ;;  %v1116_v9 = vmov 5   ;;  %v1117_v10 = vmov 4   ;;  %v1118_v11 = vmov 6  }
   0x2   :  { %71 = vperm.xlu1 %1089, %v1142_v1   ;;  %61 = vperm.xlu0 %1088, %v1147_v2   ;;  %v1159_v4 = vld [vmem:[%s2338_s1 + $0x8] sm:$0xff]  ;;  %v1166_v5 = vld [vmem:[%s2338_s1 + $0x20] sm:$0xf]  ;;  %v1119_v12 = vmov 7   ;;  %v1120_v13 = vmov 9   ;;  %v1121_v14 = vmov 8  }
   0x3   :  { %v1122_v15 = vmov 10   ;;  %v1123_v16 = vmov 11   ;;  %v1222_v17 = vld [vmem:[%s2339_s0] sm:$0xff]   ;;  %v1227_v18 = vld [vmem:[%s2339_s0 + $0x14] ss:$40 sps:$4 sm:$0xff]   ;;  %v1232_v19 = vld [vmem:[%s2339_s0 + $0x28] sm:$0xff]  }
   0x4   :  { %v1237_v22 = vld [vmem:[%s2339_s0 + $0x8] sm:$0xff]   ;;  %v1242_v23 = vld [vmem:[%s2339_s0 + $0x18] sm:$0xff]   ;;  %v1247_v24 = vld [vmem:[%s2339_s0 + $0x30] sm:$0xff]   ;;  %v2362_v25 = vunpack.c.l.bf16 %v1222_v17  ;;  %v2359_v26 = vunpack.c.l.bf16 %v1227_v18  ;;  %v2358_v27 = vunpack.c.l.bf16 %v1232_v19  ;;  %v2357_v28 = vunpack.c.h.bf16 %v1227_v18 }
   0x5   :  { %v2352_v31 = vunpack.c.l.bf16 %v1237_v22  ;;  %v2351_v32 = vunpack.c.h.bf16 %v1242_v23  ;;  %v2350_v33 = vunpack.c.l.bf16 %v1247_v24  ;;  %v1262_v34 = vld [vmem:[%s2339_s0 + $0x40] sm:$0xff]   ;;  %v2344_v35 = vunpack.c.h.bf16 %v1237_v22  ;;  %v1273_v37 = vld [vmem:[%s2339_s0 + $0x10] sm:$0x3]  ;;  %v1291_v43 = vld [vmem:[%s2339_s0 + $0x38] sm:$0x3] }
   0x6   :  { %76 = vperm.xlu1 %1089, %v1154_v3   ;;  %66 = vperm.xlu0 %1088, %v1159_v4   ;;  %v1268_v36 = vld [vmem:[%s2339_s0 + $0x20] ss:$40 sps:$4 sm:$0xff]   ;;  %v1286_v42 = vld [vmem:[%s2339_s0 + $0x24] sm:$0x3]  ;;  %v1296_v44 = vld [vmem:[%s2339_s0 + $0x4c] sm:$0x3]  ;;  %v2356_v45 = vunpack.c.h.bf16 %v1222_v17  ;;  %v2355_v46 = vunpack.c.l.bf16 %v1242_v23  ;;  %v2354_v47 = vunpack.c.h.bf16 %v1232_v19  ;;  %v2353_v48 = vunpack.c.l.bf16 %v1262_v34 }
   0x7   :  { %v2349_v49 = vunpack.c.h.bf16 %v1262_v34  ;;  %v2343_v50 = vunpack.c.l.bf16 %v1268_v36  ;;  %v2341_v51 = vunpack.c.h.bf16 %v1247_v24  ;;  %v2342_v52 = vunpack.c.h.bf16 %v1268_v36 }
   0x8   :  { %v2348_v55 = vunpack.c.l.bf16 %v1273_v37  ;;  %v2347_v56 = vunpack.c.l.bf16 %v1286_v42  ;;  %v2346_v57 = vunpack.c.l.bf16 %v1291_v43  ;;  %v2345_v58 = vunpack.c.l.bf16 %v1296_v44 }
   0x9   :  { %vm871_vm0 = vcmask 146432   ;;  %vm876_vm1 = vcmask 142336  }
   0xa   :  { %1090 = vset.pattern.permute.xlu1 %v1113_v6  ;;  %81 = vperm.xlu0 %1088, %v1166_v5  }
   0xb   :  { %90 = vperm.xlu1 %1090, %v1147_v2  }
   0xe   :  { %1091 = vset.pattern.permute.xlu0 %v1113_v6 }
   0xf   :  { %98 = vperm.xlu1 %1090, %v1142_v1   ;;  %94 = vperm.xlu0 %1091, %v1159_v4  }
  0x13   :  { %102 = vperm.xlu1 %1090, %v1154_v3   ;;  %106 = vperm.xlu0 %1091, %v1166_v5  }
  0x17   :  { %1092 = vset.pattern.permute.xlu1 %v1114_v7  ;;  %1093 = vset.pattern.permute.xlu0 %v1114_v7 }
  0x18   :  { %115 = vperm.xlu1 %1092, %v1147_v2   ;;  %119 = vperm.xlu0 %1093, %v1159_v4  }
  0x1c   :  { %123 = vperm.xlu1 %1092, %v1142_v1   ;;  %131 = vperm.xlu0 %1093, %v1166_v5  }
  0x20   :  { %127 = vperm.xlu1 %1092, %v1154_v3   ;;  %1095 = vset.pattern.permute.xlu0 %v1115_v8 }
  0x21   :  { %154 = vperm.xlu0 %1095, %v1159_v4  }
  0x24   :  { %1094 = vset.pattern.permute.xlu1 %v1115_v8 }
  0x25   :  { %150 = vperm.xlu1 %1094, %v1147_v2   ;;  %166 = vperm.xlu0 %1095, %v1166_v5  }
  0x29   :  { %158 = vperm.xlu1 %1094, %v1142_v1   ;;  %1097 = vset.pattern.permute.xlu0 %v1116_v9 }
  0x2a   :  { %184 = vperm.xlu0 %1097, %v1159_v4  }
  0x2d   :  { %162 = vperm.xlu1 %1094, %v1154_v3  }
  0x2e   :  { %196 = vperm.xlu0 %1097, %v1166_v5  }
  0x31   :  { %1096 = vset.pattern.permute.xlu1 %v1116_v9 }
  0x32   :  { %180 = vperm.xlu1 %1096, %v1147_v2   ;;  %1099 = vset.pattern.permute.xlu0 %v1117_v10 }
  0x33   :  { %209 = vperm.xlu0 %1099, %v1159_v4  }
  0x36   :  { %188 = vperm.xlu1 %1096, %v1142_v1  }
  0x37   :  { %221 = vperm.xlu0 %1099, %v1166_v5  }
  0x3a   :  { %192 = vperm.xlu1 %1096, %v1154_v3  }
  0x3b   :  { %1101 = vset.pattern.permute.xlu0 %v1118_v11 }
  0x3c   :  { %234 = vperm.xlu0 %1101, %v1159_v4  }
  0x3e   :  { %1098 = vset.pattern.permute.xlu1 %v1117_v10 }
  0x3f   :  { %205 = vperm.xlu1 %1098, %v1147_v2  }
  0x40   :  { %246 = vperm.xlu0 %1101, %v1166_v5  }
  0x43   :  { %213 = vperm.xlu1 %1098, %v1142_v1  }
  0x44   :  { %1103 = vset.pattern.permute.xlu0 %v1119_v12 }
  0x45   :  { %269 = vperm.xlu0 %1103, %v1159_v4  }
  0x47   :  { %217 = vperm.xlu1 %1098, %v1154_v3  }
  0x49   :  { %281 = vperm.xlu0 %1103, %v1166_v5  }
  0x4b   :  { %1100 = vset.pattern.permute.xlu1 %v1118_v11 }
  0x4c   :  { %230 = vperm.xlu1 %1100, %v1147_v2  }
  0x4d   :  { %1105 = vset.pattern.permute.xlu0 %v1120_v13 }
  0x4e   :  { %299 = vperm.xlu0 %1105, %v1159_v4  }
  0x50   :  { %238 = vperm.xlu1 %1100, %v1142_v1  }
  0x52   :  { %311 = vperm.xlu0 %1105, %v1166_v5  }
  0x54   :  { %242 = vperm.xlu1 %1100, %v1154_v3  }
  0x56   :  { %1107 = vset.pattern.permute.xlu0 %v1121_v14 }
  0x57   :  { %324 = vperm.xlu0 %1107, %v1159_v4  }
  0x58   :  { %1102 = vset.pattern.permute.xlu1 %v1119_v12 }
  0x59   :  { %265 = vperm.xlu1 %1102, %v1147_v2  }
  0x5b   :  { %336 = vperm.xlu0 %1107, %v1166_v5  }
  0x5d   :  { %273 = vperm.xlu1 %1102, %v1142_v1  }
  0x5f   :  { %1109 = vset.pattern.permute.xlu0 %v1122_v15 }
  0x60   :  { %349 = vperm.xlu0 %1109, %v1159_v4  }
  0x61   :  { %277 = vperm.xlu1 %1102, %v1154_v3  }
  0x64   :  { %361 = vperm.xlu0 %1109, %v1166_v5  }
  0x65   :  { %1104 = vset.pattern.permute.xlu1 %v1120_v13 }
  0x66   :  { %295 = vperm.xlu1 %1104, %v1147_v2  }
  0x68   :  { %1111 = vset.pattern.permute.xlu0 %v1123_v16 }
  0x69   :  { %384 = vperm.xlu0 %1111, %v1159_v4  }
  0x6a   :  { %303 = vperm.xlu1 %1104, %v1142_v1  }
  0x6d   :  { %396 = vperm.xlu0 %1111, %v1166_v5  }
  0x6e   :  { %307 = vperm.xlu1 %1104, %v1154_v3  }
  0x72   :  { %1106 = vset.pattern.permute.xlu1 %v1121_v14 }
  0x73   :  { %320 = vperm.xlu1 %1106, %v1147_v2  }
  0x77   :  { %328 = vperm.xlu1 %1106, %v1142_v1  }
  0x7b   :  { %332 = vperm.xlu1 %1106, %v1154_v3  }
  0x7f   :  { %1108 = vset.pattern.permute.xlu1 %v1122_v15 }
  0x80   :  { %345 = vperm.xlu1 %1108, %v1147_v2  }
  0x81   :  { %v72_v20 = vpop.permute.xlu1 %71  ;;  %v62_v21 = vpop.permute.xlu0 %61 }
  0x82   :  { %v84_v38 = vmul.f32 %v2362_v25, %v62_v21  ;;  %v453_v39 = vmul.f32 %v2359_v26, %v62_v21  ;;  %v607_v40 = vmul.f32 %v2358_v27, %v62_v21  ;;  %v761_v41 = vmul.f32 %v2357_v28, %v62_v21  ;;  %v1457_v26 = vld [vmem:[%s2339_s0 + $0x60] sm:$0x3] }
  0x83   :  { %v86_v6 = vmul.f32 %v2352_v31, %v72_v20  ;;  %v455_v7 = vmul.f32 %v2351_v32, %v72_v20  ;;  %v609_v8 = vmul.f32 %v2350_v33, %v72_v20  ;;  %v763_v9 = vmul.f32 %v2349_v49, %v72_v20  ;;  %v1442_v33 = vld [vmem:[%s2339_s0 + $0x9c] sm:$0x3] }
  0x84   :  { %353 = vperm.xlu1 %1108, %v1142_v1  }
  0x85   :  { %v1254_v29 = vpop.permute.xlu1 %76  ;;  %v67_v30 = vpop.permute.xlu0 %66 }
  0x86   :  { %v85_v63 = vmul.f32 %v2356_v45, %v67_v30  ;;  %v454_v0 = vmul.f32 %v2355_v46, %v67_v30  ;;  %v608_v4 = vmul.f32 %v2354_v47, %v67_v30  ;;  %v762_v5 = vmul.f32 %v2353_v48, %v67_v30  ;;  %v1355_v30 = vld [vmem:[%s2339_s0 + $0x50] sm:$0xff]  }
  0x87   :  { %v1462_v47 = vld [vmem:[%s2339_s0 + $0x74] sm:$0x3] }
  0x88   :  { %357 = vperm.xlu1 %1108, %v1154_v3  }
  0x89   :  { %v82_v53 = vpop.permute.xlu0 %81 }
  0x8a   :  { %v91_v54 = vpop.permute.xlu1 %90  ;;  %v88_v11 = vmul.f32 %v82_v53, %v2348_v55  ;;  %v457_v12 = vmul.f32 %v2347_v56, %v82_v53  ;;  %v611_v13 = vmul.f32 %v2346_v57, %v82_v53  ;;  %v765_v14 = vmul.f32 %v2345_v58, %v82_v53  ;;  %v1409_v58 = vld [vmem:[%s2339_s0 + $0x80] sm:$0xff]   ;;  %v1414_v57 = vld [vmem:[%s2339_s0 + $0x90] sm:$0xff]  }
  0x8b   :  { %v1311_v59 = vadd.f32 %v91_v54, %v84_v38  ;;  %v1313_v60 = vadd.f32 %v453_v39, %v91_v54  ;;  %v1315_v61 = vadd.f32 %v607_v40, %v91_v54  ;;  %v1317_v62 = vadd.f32 %v761_v41, %v91_v54  ;;  %v1360_v38 = vld [vmem:[%s2339_s0 + $0x64] ss:$40 sps:$4 sm:$0xff]   ;;  %v1365_v39 = vld [vmem:[%s2339_s0 + $0x78] sm:$0xff]  }
  0x8c   :  { %1110 = vset.pattern.permute.xlu1 %v1123_v16  ;;  %v1016_v49 = vunpack.c.h.bf16 %v1365_v39 }
  0x8d   :  { %380 = vperm.xlu1 %1110, %v1147_v2  }
  0x8e   :  { %v99_v10 = vpop.permute.xlu1 %98  ;;  %v95_v15 = vpop.permute.xlu0 %94 }
  0x8f   :  { %v1344_v16 = vadd.f32 %v99_v10, %v86_v6  ;;  %v1346_v21 = vadd.f32 %v455_v7, %v99_v10  ;;  %v1348_v20 = vadd.f32 %v609_v8, %v99_v10  ;;  %v1350_v2 = vadd.f32 %v763_v9, %v99_v10 }
  0x90   :  { %v1367_v40 = vadd.f32 %v95_v15, %v85_v63  ;;  %v1369_v41 = vadd.f32 %v454_v0, %v95_v15  ;;  %v613_v53 = vadd.f32 %v608_v4, %v95_v15  ;;  %v767_v54 = vadd.f32 %v762_v5, %v95_v15 }
  0x91   :  { %v87_v6 = vmul.f32 %v2344_v35, %v1254_v29  ;;  %v456_v7 = vmul.f32 %v2343_v50, %v1254_v29  ;;  %v610_v8 = vmul.f32 %v2341_v51, %v1254_v29  ;;  %v764_v63 = vmul.f32 %v2342_v52, %v1254_v29  ;;  %388 = vperm.xlu1 %1110, %v1142_v1   ;;  %v1391_v51 = vld [vmem:[%s2339_s0 + $0x58] sm:$0xff]   ;;  %v1396_v29 = vld [vmem:[%s2339_s0 + $0x68] sm:$0xff]  }
  0x92   :  { %v103_v0 = vpop.permute.xlu1 %102  ;;  %v967_v4 = vunpack.c.l.bf16 %v1355_v30  ;;  %v426_v5 = vunpack.c.l.bf16 %v1360_v38  ;;  %v2360_v9 = vunpack.c.l.bf16 %v1365_v39  ;;  %v2361_v10 = vunpack.c.h.bf16 %v1360_v38  ;;  %v107_v15 = vpop.permute.xlu0 %106 }
  0x93   :  { %v1398_v1 = vadd.f32 %v103_v0, %v87_v6  ;;  %v1400_v52 = vadd.f32 %v456_v7, %v103_v0  ;;  %v1402_v50 = vadd.f32 %v610_v8, %v103_v0  ;;  %v1404_v35 = vadd.f32 %v764_v63, %v103_v0  ;;  %v1423_v8 = vld [vmem:[%s2339_s0 + $0x70] ss:$40 sps:$4 sm:$0xff]  }
  0x94   :  { %v1416_v56 = vadd.f32 %v107_v15, %v88_v11  ;;  %v1418_v6 = vadd.f32 %v457_v12, %v107_v15  ;;  %v616_v7 = vadd.f32 %v611_v13, %v107_v15  ;;  %v770_v55 = vadd.f32 %v765_v14, %v107_v15 }
  0x95   :  { %392 = vperm.xlu1 %1110, %v1154_v3   ;;  %v1043_v11 = vunpack.c.l.bf16 %v1414_v57  ;;  %v1437_v3 = vld [vmem:[%s2339_s0 + $0x88] sm:$0x3] }
  0x96   :  { %2383 = vst [vmem:[#allocation2_spill] sm:$0xff] %v1418_v6  ;;  %v584_v48 = vunpack.c.l.bf16 %v1437_v3 }
  0x97   :  { %v116_v32 = vpop.permute.xlu1 %115  ;;  %v1444_v31 = vpop.permute.xlu0 %119 }
  0x98   :  { %v134_v14 = vmul.f32 %v967_v4, %v116_v32  ;;  %v463_v45 = vmul.f32 %v426_v5, %v116_v32  ;;  %v617_v28 = vmul.f32 %v2360_v9, %v116_v32  ;;  %v771_v27 = vmul.f32 %v2361_v10, %v116_v32 }
  0x99   :  { %v618_v15 = vmul.f32 %v1016_v49, %v1444_v31  ;;  %v772_v46 = vmul.f32 %v1043_v11, %v1444_v31  ;;  %v738_v9 = vunpack.c.l.bf16 %v1442_v33 }
  0x9a   :  { %v1469_v32 = vadd.f32 %v134_v14, %v1311_v59  ;;  %v1472_v10 = vadd.f32 %v463_v45, %v1313_v60  ;;  %v1475_v25 = vadd.f32 %v617_v28, %v1315_v61  ;;  %v1478_v13 = vadd.f32 %v771_v27, %v1317_v62 }
  0x9b   :  { %v124_v12 = vpop.permute.xlu1 %123  ;;  %v1480_v0 = vadd.f32 %v618_v15, %v613_v53  ;;  %v1482_v63 = vadd.f32 %v772_v46, %v767_v54  ;;  %v1484_v3 = vpop.permute.xlu0 %131  ;;  %v2386_v45 = vunpack.c.l.bf16 %v1391_v51  ;;  %v2387_v28 = vunpack.c.h.bf16 %v1396_v29 }
  0x9c   :  { %v2388_v27 = vunpack.c.l.bf16 %v1409_v58  ;;  %v2389_v53 = vunpack.c.h.bf16 %v1414_v57  ;;  %v621_v46 = vmul.f32 %v584_v48, %v1484_v3  ;;  %v775_v54 = vmul.f32 %v738_v9, %v1484_v3 }
  0x9d   :  { %2384 = vst [vmem:[#allocation3_spill] sm:$0xff] %v1480_v0  ;;  %2385 = vst [vmem:[#allocation4_spill] sm:$0xff] %v1482_v63  ;;  %v136_v60 = vmul.f32 %v2386_v45, %v124_v12  ;;  %v465_v61 = vmul.f32 %v2387_v28, %v124_v12  ;;  %v2390_v15 = vunpack.c.l.bf16 %v1222_v17  ;;  %v2391_v59 = vunpack.c.l.bf16 %v1227_v18 }
  0x9e   :  { %v619_v62 = vmul.f32 %v2388_v27, %v124_v12  ;;  %v773_v14 = vmul.f32 %v2389_v53, %v124_v12  ;;  %v1514_v0 = vadd.f32 %v621_v46, %v616_v7  ;;  %v1516_v6 = vadd.f32 %v775_v54, %v770_v55 }
  0x9f   :  { %v144_v33 = vmul.f32 %v967_v4, %v2390_v15  ;;  %v473_v63 = vmul.f32 %v426_v5, %v2391_v59  ;;  %v1503_v45 = vadd.f32 %v136_v60, %v1344_v16  ;;  %v1506_v28 = vadd.f32 %v465_v61, %v1346_v21  ;;  %v128_v53 = vpop.permute.xlu1 %127 }
  0xa0   :  { %v1509_v27 = vadd.f32 %v619_v62, %v1348_v20  ;;  %v1512_v12 = vadd.f32 %v773_v14, %v1350_v2  ;;  %2392 = vst [vmem:[#allocation5_spill] sm:$0xff] %v1514_v0  ;;  %2393 = vst [vmem:[#allocation6_spill] sm:$0xff] %v1516_v6  ;;  %v2394_v4 = vunpack.c.l.bf16 %v1232_v19  ;;  %v2395_v5 = vunpack.c.l.bf16 %v1365_v39  ;;  %v1534_v54 = vpop.permute.xlu0 %154 }
  0xa1   :  { %v2396_v59 = vunpack.c.h.bf16 %v1227_v18  ;;  %v2397_v21 = vunpack.c.h.bf16 %v1360_v38  ;;  %v2398_v20 = vunpack.c.h.bf16 %v1391_v51  ;;  %v2399_v2 = vunpack.c.l.bf16 %v1423_v8 }
  0xa2   :  { %v627_v16 = vmul.f32 %v2395_v5, %v2394_v4  ;;  %v2400_v7 = vunpack.c.h.bf16 %v1409_v58  ;;  %v2401_v14 = vunpack.c.h.bf16 %v1423_v8  ;;  %v2402_v39 = vunpack.c.h.bf16 %v1222_v17 }
  0xa3   :  { %v781_v60 = vmul.f32 %v2397_v21, %v2396_v59  ;;  %v137_v61 = vmul.f32 %v2398_v20, %v128_v53  ;;  %v466_v62 = vmul.f32 %v2399_v2, %v128_v53  ;;  %v2403_v18 = vunpack.c.h.bf16 %v1355_v30 }
  0xa4   :  { %v620_v55 = vmul.f32 %v2400_v7, %v128_v53  ;;  %v774_v46 = vmul.f32 %v2401_v14, %v128_v53  ;;  %v2404_v15 = vunpack.c.l.bf16 %v1242_v23  ;;  %v2405_v4 = vunpack.c.l.bf16 %v1396_v29 }
  0xa5   :  { %v1540_v38 = vmul.f32 %v2403_v18, %v2402_v39  ;;  %v2406_v59 = vunpack.c.h.bf16 %v1232_v19  ;;  %v2407_v53 = vunpack.c.l.bf16 %v1262_v34  ;;  %v1557_v17 = vadd.f32 %v137_v61, %v1398_v1 }
  0xa6   :  { %v1546_v5 = vmul.f32 %v2405_v4, %v2404_v15  ;;  %v1560_v2 = vadd.f32 %v466_v62, %v1400_v52  ;;  %v1563_v7 = vadd.f32 %v620_v55, %v1402_v50  ;;  %v1566_v14 = vadd.f32 %v774_v46, %v1404_v35  ;;  %v151_v46 = vpop.permute.xlu1 %150  ;;  %v1584_v15 = vpop.permute.xlu0 %166 }
  0xa7   :  { %v1550_v21 = vmul.f32 %v1016_v49, %v2406_v59  ;;  %v1554_v20 = vmul.f32 %v1043_v11, %v2407_v53  ;;  %v2408_v19 = vunpack.c.l.bf16 %v1237_v22  ;;  %v2409_v49 = vunpack.c.l.bf16 %v1391_v51  ;;  %2416 = vst [vmem:[#allocation7_spill] sm:$0xff] %v1584_v15 }
  0xa8   :  { %v2410_v11 = vunpack.c.h.bf16 %v1242_v23  ;;  %v2411_v18 = vunpack.c.h.bf16 %v1396_v29  ;;  %v2412_v61 = vunpack.c.l.bf16 %v1247_v24  ;;  %v2413_v52 = vunpack.c.l.bf16 %v1409_v58 }
  0xa9   :  { %v146_v39 = vmul.f32 %v2409_v49, %v2408_v19  ;;  %v2414_v50 = vunpack.c.h.bf16 %v1262_v34  ;;  %v2415_v35 = vunpack.c.h.bf16 %v1414_v57  ;;  %v2417_v4 = vunpack.c.l.bf16 %v1273_v37 }
  0xaa   :  { %v475_v1 = vmul.f32 %v2411_v18, %v2410_v11  ;;  %v629_v62 = vmul.f32 %v2413_v52, %v2412_v61  ;;  %v2418_v23 = vunpack.c.l.bf16 %v1457_v26  ;;  %v2420_v53 = vunpack.c.l.bf16 %v1286_v42  ;;  %v1609_v42 = vld [vmem:[%s2339_s0 + $0xa0] sm:$0xff]  }
  0xab   :  { %v783_v55 = vmul.f32 %v2415_v35, %v2414_v50  ;;  %v2421_v19 = vunpack.c.l.bf16 %v1462_v47  ;;  %v2423_v34 = vunpack.c.l.bf16 %v1291_v43  ;;  %v2425_v57 = vunpack.c.l.bf16 %v1296_v44  ;;  %v1614_v35 = vld [vmem:[%s2339_s0 + $0xb8] sm:$0xff]  }
  0xac   :  { %v1590_v59 = vmul.f32 %v2418_v23, %v2417_v4  ;;  %v169_v61 = vmul.f32 %v151_v46, %v144_v33  ;;  %v478_v37 = vmul.f32 %v473_v63, %v151_v46  ;;  %v632_v52 = vmul.f32 %v627_v16, %v151_v46 }
  0xad   :  { %v1596_v49 = vmul.f32 %v2421_v19, %v2420_v53  ;;  %v1600_v11 = vmul.f32 %v584_v48, %v2423_v34  ;;  %v1604_v18 = vmul.f32 %v738_v9, %v2425_v57  ;;  %v786_v50 = vmul.f32 %v781_v60, %v151_v46 }
  0xae   :  { %2419 = vst [vmem:[#allocation8_spill] sm:$0xff] %v1590_v59  ;;  %v2427_v43 = vunpack.c.h.bf16 %v1237_v22  ;;  %v2428_v44 = vunpack.c.h.bf16 %v1391_v51  ;;  %v2429_v9 = vunpack.c.l.bf16 %v1268_v36  ;;  %v2430_v63 = vunpack.c.l.bf16 %v1423_v8  ;;  %v1635_v22 = vld [vmem:[%s2339_s0 + $0xc8] sm:$0xff]   ;;  %v1640_v51 = vld [vmem:[%s2339_s0 + $0xe0] sm:$0xff]  }
  0xaf   :  { %2422 = vst [vmem:[#allocation9_spill] sm:$0xff] %v1596_v49  ;;  %2424 = vst [vmem:[#allocation10_spill] sm:$0xff] %v1600_v11  ;;  %v2431_v16 = vunpack.c.h.bf16 %v1247_v24  ;;  %v2432_v60 = vunpack.c.h.bf16 %v1409_v58  ;;  %v2433_v4 = vunpack.c.h.bf16 %v1268_v36  ;;  %v2434_v23 = vunpack.c.h.bf16 %v1423_v8  ;;  %v1645_v24 = vld [vmem:[%s2339_s0 + $0xb0] sm:$0x3]  ;;  %v1650_v36 = vld [vmem:[%s2339_s0 + $0xc4] sm:$0x3] }
  0xb0   :  { %2426 = vst [vmem:[#allocation11_spill] sm:$0xff] %v1604_v18  ;;  %v147_v48 = vmul.f32 %v2428_v44, %v2427_v43  ;;  %v476_v33 = vmul.f32 %v2430_v63, %v2429_v9  ;;  %v1655_v58 = vld [vmem:[%s2339_s0 + $0xd8] sm:$0x3]  ;;  %v1660_v8 = vld [vmem:[%s2339_s0 + $0xec] sm:$0x3]  ;;  %v1663_v19 = vadd.f32 %v169_v61, %v1469_v32  ;;  %v1666_v34 = vadd.f32 %v478_v37, %v1472_v10  ;;  %v159_v44 = vpop.permute.xlu1 %158  ;;  %v1678_v37 = vpop.permute.xlu0 %184 }
  0xb1   :  { %v630_v46 = vmul.f32 %v2432_v60, %v2431_v16  ;;  %v784_v53 = vmul.f32 %v2434_v23, %v2433_v4  ;;  %v1669_v57 = vadd.f32 %v632_v52, %v1475_v25  ;;  %v1672_v43 = vadd.f32 %v786_v50, %v1478_v13  ;;  %v1683_v25 = vld [vmem:[%s2339_s0 + $0xb4] ss:$40 sps:$4 sm:$0xff]   ;;  %v1764_v16 = vld [vmem:[%s2339_s0 + $0xc0] ss:$40 sps:$4 sm:$0xff]  }
  0xb2   :  { %2435 = vst [vmem:[#allocation12_spill] sm:$0xff] %v1663_v19  ;;  %2436 = vst [vmem:[#allocation13_spill] sm:$0xff] %v1666_v34  ;;  %v171_v32 = vmul.f32 %v159_v44, %v146_v39  ;;  %v480_v61 = vmul.f32 %v475_v1, %v159_v44  ;;  %v634_v4 = vmul.f32 %v629_v62, %v159_v44  ;;  %v1692_v39 = vld [vmem:[%s2339_s0 + $0xf0] sm:$0xff]   ;;  %v1697_v1 = vld [vmem:[%s2339_s0 + $0x108] sm:$0xff]   ;;  %v2467_v6 = vunpack.c.l.bf16 %v1609_v42 }
  0xb3   :  { %2437 = vst [vmem:[#allocation14_spill] sm:$0xff] %v1669_v57  ;;  %2438 = vst [vmem:[#allocation15_spill] sm:$0xff] %v1672_v43  ;;  %v788_v10 = vmul.f32 %v783_v55, %v159_v44  ;;  %v1702_v62 = vld [vmem:[%s2339_s0 + $0x118] sm:$0xff]   ;;  %v1707_v55 = vld [vmem:[%s2339_s0 + $0x130] sm:$0xff]   ;;  %v2463_v57 = vunpack.c.l.bf16 %v1660_v8  ;;  %v2473_v11 = vunpack.c.l.bf16 %v1635_v22 }
  0xb4   :  { %v1710_v44 = vadd.f32 %v171_v32, %v1503_v45  ;;  %v1713_v23 = vadd.f32 %v480_v61, %v1506_v28  ;;  %v1716_v50 = vadd.f32 %v634_v4, %v1509_v27  ;;  %v163_v13 = vpop.permute.xlu1 %162  ;;  %v1728_v45 = vld [vmem:[%s2339_s0 + $0x100] sm:$0x3]  ;;  %v1735_v4 = vld [vmem:[%s2339_s0 + $0x114] sm:$0x3]  ;;  %v1745_v9 = vld [vmem:[%s2339_s0 + $0x13c] sm:$0x3]  ;;  %v2474_v49 = vunpack.c.l.bf16 %v1702_v62 }
  0xb5   :  { %v1719_v52 = vadd.f32 %v788_v10, %v1512_v12  ;;  %v172_v28 = vmul.f32 %v163_v13, %v147_v48  ;;  %v481_v27 = vmul.f32 %v476_v33, %v163_v13  ;;  %v635_v32 = vmul.f32 %v630_v46, %v163_v13  ;;  %v1730_v12 = vpop.permute.xlu0 %196  ;;  %v1740_v10 = vld [vmem:[%s2339_s0 + $0x128] sm:$0x3]  ;;  %v1755_v33 = vld [vmem:[%s2339_s0 + $0xd0] sm:$0xff]  }
  0xb6   :  { %2439 = vst [vmem:[#allocation16_spill] sm:$0xff] %v1710_v44  ;;  %2440 = vst [vmem:[#allocation17_spill] sm:$0xff] %v1713_v23  ;;  %v789_v61 = vmul.f32 %v784_v53, %v163_v13  ;;  %v1750_v48 = vld [vmem:[%s2339_s0 + $0xa8] sm:$0xff]   ;;  %v2449_v23 = vunpack.c.l.bf16 %v1614_v35  ;;  %v2452_v46 = vunpack.c.h.bf16 %v1702_v62  ;;  %v2453_v13 = vunpack.c.l.bf16 %v1640_v51 }
  0xb7   :  { %2441 = vst [vmem:[#allocation18_spill] sm:$0xff] %v1716_v50  ;;  %2442 = vst [vmem:[#allocation19_spill] sm:$0xff] %v1719_v52  ;;  %v1767_v60 = vadd.f32 %v172_v28, %v1557_v17  ;;  %v1770_v52 = vadd.f32 %v481_v27, %v1560_v2  ;;  %v1773_v50 = vadd.f32 %v635_v32, %v1563_v7  ;;  %v1795_v17 = vld [vmem:[%s2339_s0 + $0x104] ss:$40 sps:$4 sm:$0xff]   ;;  %v2447_v2 = vunpack.c.h.bf16 %v1609_v42 }
  0xb8   :  { %v1776_v53 = vadd.f32 %v789_v61, %v1566_v14  ;;  %v181_v44 = vpop.permute.xlu1 %180  ;;  %v2448_v28 = vunpack.c.h.bf16 %v1692_v39  ;;  %v2450_v14 = vunpack.c.l.bf16 %v1697_v1  ;;  %v2451_v61 = vunpack.c.h.bf16 %v1635_v22 }
  0xb9   :  { %2443 = vst [vmem:[#allocation20_spill] sm:$0xff] %v1767_v60  ;;  %2444 = vst [vmem:[#allocation21_spill] sm:$0xff] %v1770_v52  ;;  %v1786_v27 = vpop.permute.xlu0 %209  ;;  %v2461_v52 = vunpack.c.l.bf16 %v1655_v58  ;;  %v2462_v60 = vunpack.c.l.bf16 %v1740_v10  ;;  %v2464_v34 = vunpack.c.l.bf16 %v1745_v9  ;;  %v1888_v18 = vmul.f32 %v2474_v49, %v2473_v11 }
  0xba   :  { %2445 = vst [vmem:[#allocation22_spill] sm:$0xff] %v1773_v50  ;;  %2446 = vst [vmem:[#allocation23_spill] sm:$0xff] %v1776_v53  ;;  %v1801_v7 = vmul.f32 %v2448_v28, %v2447_v2  ;;  %v1807_v32 = vmul.f32 %v2450_v14, %v2449_v23  ;;  %v1813_v63 = vmul.f32 %v2452_v46, %v2451_v61  ;;  %v2454_v53 = vunpack.c.l.bf16 %v1707_v55  ;;  %v1824_v2 = vld [vmem:[%s2339_s0 + $0xf8] sm:$0xff]   ;;  %v1829_v23 = vld [vmem:[%s2339_s0 + $0x120] sm:$0xff]  }
  0xbb   :  { %2455 = vst [vmem:[#allocation24_spill] sm:$0xff] %v1824_v2  ;;  %2456 = vst [vmem:[#allocation25_spill] sm:$0xff] %v1829_v23  ;;  %v2457_v28 = vunpack.c.l.bf16 %v1645_v24  ;;  %v2458_v46 = vunpack.c.l.bf16 %v1728_v45  ;;  %v2459_v61 = vunpack.c.l.bf16 %v1650_v36  ;;  %v1847_v43 = vmul.f32 %v2462_v60, %v2461_v52 }
  0xbc   :  { %v1819_v50 = vmul.f32 %v2454_v53, %v2453_v13  ;;  %v2460_v53 = vunpack.c.l.bf16 %v1735_v4  ;;  %v1853_v19 = vmul.f32 %v2464_v34, %v2463_v57  ;;  %v2468_v60 = vunpack.c.l.bf16 %v1692_v39  ;;  %2475 = vst [vmem:[#allocation30_spill] sm:$0xff] %v1888_v18 }
  0xbd   :  { %v1835_v14 = vmul.f32 %v2458_v46, %v2457_v28  ;;  %v1858_v28 = vld [vmem:[%s2339_s0 + $0x110] ss:$40 sps:$4 sm:$0xff]   ;;  %v189_v46 = vpop.permute.xlu1 %188  ;;  %v222_v52 = vpop.permute.xlu0 %221  ;;  %v2470_v34 = vunpack.c.l.bf16 %v1683_v25  ;;  %v2471_v57 = vunpack.c.l.bf16 %v1795_v17  ;;  %v2485_v49 = vunpack.c.l.bf16 %v1755_v33 }
  0xbe   :  { %v1841_v13 = vmul.f32 %v2460_v53, %v2459_v61  ;;  %2465 = vst [vmem:[#allocation26_spill] sm:$0xff] %v1853_v19  ;;  %2466 = vst [vmem:[#allocation27_spill] sm:$0xff] %v1858_v28  ;;  %v1876_v15 = vmul.f32 %v2468_v60, %v2467_v6  ;;  %v2476_v53 = vunpack.c.h.bf16 %v1683_v25  ;;  %v2477_v61 = vunpack.c.h.bf16 %v1795_v17 }
  0xbf   :  { %v1882_v0 = vmul.f32 %v2471_v57, %v2470_v34  ;;  %v2479_v60 = vunpack.c.l.bf16 %v1750_v48  ;;  %v2482_v34 = vunpack.c.h.bf16 %v1614_v35  ;;  %v2483_v57 = vunpack.c.h.bf16 %v1697_v1 }
  0xc0   :  { %2469 = vst [vmem:[#allocation28_spill] sm:$0xff] %v1876_v15  ;;  %v1894_v59 = vmul.f32 %v2477_v61, %v2476_v53  ;;  %v2480_v15 = vunpack.c.l.bf16 %v1824_v2  ;;  %v2486_v11 = vunpack.c.l.bf16 %v1829_v23  ;;  %v2488_v61 = vunpack.c.h.bf16 %v1640_v51 }
  0xc1   :  { %2472 = vst [vmem:[#allocation29_spill] sm:$0xff] %v1882_v0  ;;  %v193_v6 = vpop.permute.xlu1 %192  ;;  %v1906_v0 = vmul.f32 %v2483_v57, %v2482_v34  ;;  %v2489_v53 = vunpack.c.h.bf16 %v1707_v55  ;;  %v2494_v34 = vunpack.c.l.bf16 %v1764_v16  ;;  %v2495_v57 = vunpack.c.l.bf16 %v1858_v28 }
  0xc2   :  { %2478 = vst [vmem:[#allocation31_spill] sm:$0xff] %v1894_v59  ;;  %v1900_v19 = vmul.f32 %v2480_v15, %v2479_v60  ;;  %v1912_v18 = vmul.f32 %v2486_v11, %v2485_v49  ;;  %v2491_v15 = vunpack.c.h.bf16 %v1750_v48  ;;  %v2492_v60 = vunpack.c.h.bf16 %v1824_v2 }
  0xc3   :  { %2484 = vst [vmem:[#allocation33_spill] sm:$0xff] %v1906_v0  ;;  %v1918_v59 = vmul.f32 %v2489_v53, %v2488_v61  ;;  %v1930_v0 = vmul.f32 %v2495_v57, %v2494_v34  ;;  %v2497_v49 = vunpack.c.h.bf16 %v1755_v33  ;;  %v2498_v11 = vunpack.c.h.bf16 %v1829_v23 }
  0xc4   :  { %2481 = vst [vmem:[#allocation32_spill] sm:$0xff] %v1900_v19  ;;  %2487 = vst [vmem:[#allocation34_spill] sm:$0xff] %v1912_v18  ;;  %v1924_v19 = vmul.f32 %v2492_v60, %v2491_v15  ;;  %v2500_v61 = vunpack.c.h.bf16 %v1764_v16  ;;  %v2501_v53 = vunpack.c.h.bf16 %v1858_v28  ;;  %v2503_v15 = vunpack.c.h.bf16 %v1355_v30 }
  0xc5   :  { %2490 = vst [vmem:[#allocation35_spill] sm:$0xff] %v1918_v59  ;;  %2496 = vst [vmem:[#allocation37_spill] sm:$0xff] %v1930_v0  ;;  %v1936_v18 = vmul.f32 %v2498_v11, %v2497_v49  ;;  %v2504_v34 = vunpack.c.l.bf16 %v1396_v29  ;;  %v2505_v0 = vunpack.c.l.bf16 %v1457_v26  ;;  %v2506_v49 = vunpack.c.l.bf16 %v1462_v47 }
  0xc6   :  { %2493 = vst [vmem:[#allocation36_spill] sm:$0xff] %v1924_v19  ;;  %v1942_v59 = vmul.f32 %v2501_v53, %v2500_v61  ;;  %v135_v60 = vmul.f32 %v2503_v15, %v1444_v31  ;;  %v2507_v61 = vunpack.c.h.bf16 %v1609_v42  ;;  %v2508_v30 = vunpack.c.l.bf16 %v1614_v35 }
  0xc7   :  { %2499 = vst [vmem:[#allocation38_spill] sm:$0xff] %v1936_v18  ;;  %v464_v57 = vmul.f32 %v2504_v34, %v1444_v31  ;;  %v138_v19 = vmul.f32 %v1484_v3, %v2505_v0  ;;  %v467_v11 = vmul.f32 %v2506_v49, %v1484_v3  ;;  %v235_v18 = vpop.permute.xlu0 %234  ;;  %v2509_v31 = vunpack.c.h.bf16 %v1635_v22 }
  0xc8   :  { %2502 = vst [vmem:[#allocation39_spill] sm:$0xff] %v1942_v59  ;;  %v200_v53 = vmul.f32 %v2507_v61, %v1678_v37  ;;  %v489_v15 = vmul.f32 %v2508_v30, %v1678_v37  ;;  %v2510_v26 = vunpack.c.l.bf16 %v1640_v51  ;;  %v2511_v47 = vunpack.c.l.bf16 %v1609_v42 }
  0xc9   :  { %v643_v29 = vmul.f32 %v2509_v31, %v1678_v37  ;;  %v2512_v34 = vunpack.c.l.bf16 %v1683_v25  ;;  %v2513_v61 = vunpack.c.l.bf16 %v1635_v22  ;;  %v2514_v28 = vunpack.c.h.bf16 %v1683_v25 }
  0xca   :  { %v797_v0 = vmul.f32 %v2510_v26, %v1678_v37  ;;  %v199_v3 = vmul.f32 %v2511_v47, %v181_v44  ;;  %v2515_v23 = vunpack.c.l.bf16 %v1645_v24  ;;  %v2516_v2 = vunpack.c.l.bf16 %v1650_v36 }
  0xcb   :  { %v488_v49 = vmul.f32 %v2512_v34, %v181_v44  ;;  %v642_v59 = vmul.f32 %v2513_v61, %v181_v44  ;;  %v796_v30 = vmul.f32 %v2514_v28, %v181_v44  ;;  %v2517_v42 = vunpack.c.l.bf16 %v1655_v58  ;;  %v206_v34 = vpop.permute.xlu1 %205 }
  0xcc   :  { %v203_v31 = vmul.f32 %v1730_v12, %v2515_v23  ;;  %v492_v37 = vmul.f32 %v2516_v2, %v1730_v12  ;;  %v2518_v47 = vunpack.c.l.bf16 %v1660_v8  ;;  %v1988_v61 = vadd.f32 %v206_v34, %v199_v3  ;;  %v247_v23 = vpop.permute.xlu0 %246 }
  0xcd   :  { %v646_v26 = vmul.f32 %v2517_v42, %v1730_v12  ;;  %v1990_v25 = vadd.f32 %v488_v49, %v206_v34  ;;  %v1992_v24 = vadd.f32 %v642_v59, %v206_v34  ;;  %v1994_v44 = vadd.f32 %v796_v30, %v206_v34 }
  0xce   :  { %v800_v22 = vmul.f32 %v2518_v47, %v1730_v12  ;;  %v225_v36 = vadd.f32 %v1786_v27, %v200_v53  ;;  %v494_v2 = vadd.f32 %v489_v15, %v1786_v27  ;;  %v648_v58 = vadd.f32 %v643_v29, %v1786_v27 }
  0xcf   :  { %2519 = vst [vmem:[#allocation40_spill] sm:$0xff] %v1992_v24  ;;  %2520 = vst [vmem:[#allocation41_spill] sm:$0xff] %v1994_v44  ;;  %v802_v28 = vadd.f32 %v797_v0, %v1786_v27  ;;  %v2521_v8 = vunpack.c.l.bf16 %v1750_v48  ;;  %v2522_v3 = vunpack.c.h.bf16 %v1614_v35  ;;  %v2523_v59 = vunpack.c.l.bf16 %v1755_v33  ;;  %v214_v24 = vpop.permute.xlu1 %213 }
  0xd0   :  { %v2524_v30 = vunpack.c.h.bf16 %v1640_v51  ;;  %v228_v34 = vadd.f32 %v222_v52, %v203_v31  ;;  %v497_v53 = vadd.f32 %v492_v37, %v222_v52  ;;  %v651_v44 = vadd.f32 %v646_v26, %v222_v52  ;;  %v270_v26 = vpop.permute.xlu0 %269 }
  0xd1   :  { %v201_v12 = vmul.f32 %v2521_v8, %v189_v46  ;;  %v490_v49 = vmul.f32 %v2522_v3, %v189_v46  ;;  %v644_v42 = vmul.f32 %v2523_v59, %v189_v46  ;;  %v805_v15 = vadd.f32 %v800_v22, %v222_v52 }
  0xd2   :  { %v798_v47 = vmul.f32 %v2524_v30, %v189_v46  ;;  %v2527_v35 = vunpack.c.h.bf16 %v1750_v48  ;;  %v2528_v59 = vunpack.c.l.bf16 %v1764_v16  ;;  %v2529_v46 = vunpack.c.h.bf16 %v1755_v33 }
  0xd3   :  { %v2008_v29 = vadd.f32 %v214_v24, %v201_v12  ;;  %v2010_v27 = vadd.f32 %v490_v49, %v214_v24  ;;  %v2012_v0 = vadd.f32 %v644_v42, %v214_v24  ;;  %v2530_v52 = vunpack.c.h.bf16 %v1764_v16 }
  0xd4   :  { %v2014_v8 = vadd.f32 %v798_v47, %v214_v24  ;;  %v202_v3 = vmul.f32 %v2527_v35, %v193_v6  ;;  %v491_v51 = vmul.f32 %v2528_v59, %v193_v6  ;;  %v645_v31 = vmul.f32 %v2529_v46, %v193_v6 }
  0xd5   :  { %2525 = vst [vmem:[#allocation42_spill] sm:$0xff] %v2012_v0  ;;  %v799_v37 = vmul.f32 %v2530_v52, %v193_v6  ;;  %v2531_v22 = vunpack.c.h.bf16 %v1692_v39  ;;  %v2532_v49 = vunpack.c.l.bf16 %v1697_v1  ;;  %v2533_v42 = vunpack.c.h.bf16 %v1702_v62 }
  0xd6   :  { %2526 = vst [vmem:[#allocation43_spill] sm:$0xff] %v2014_v8  ;;  %v2534_v30 = vunpack.c.l.bf16 %v1707_v55  ;;  %v2535_v35 = vunpack.c.l.bf16 %v1728_v45  ;;  %v2536_v59 = vunpack.c.l.bf16 %v1735_v4  ;;  %v2537_v6 = vunpack.c.l.bf16 %v1740_v10  ;;  %v218_v8 = vpop.permute.xlu1 %217  ;;  %v2539_v10 = vld [vmem:[#allocation2_spill] sm:$0xff] }
  0xd7   :  { %v250_v12 = vmul.f32 %v2531_v22, %v235_v18  ;;  %v499_v24 = vmul.f32 %v2532_v49, %v235_v18  ;;  %v653_v48 = vmul.f32 %v2533_v42, %v235_v18  ;;  %v2538_v52 = vunpack.c.l.bf16 %v1745_v9 }
  0xd8   :  { %v807_v47 = vmul.f32 %v2534_v30, %v235_v18  ;;  %v253_v33 = vmul.f32 %v247_v23, %v2535_v35  ;;  %v502_v16 = vmul.f32 %v2536_v59, %v247_v23  ;;  %v656_v46 = vmul.f32 %v2537_v6, %v247_v23  ;;  %v282_v59 = vpop.permute.xlu0 %281 }
  0xd9   :  { %v810_v22 = vmul.f32 %v2538_v52, %v247_v23  ;;  %v2040_v49 = vadd.f32 %v218_v8, %v202_v3  ;;  %v2042_v0 = vadd.f32 %v491_v51, %v218_v8  ;;  %v2044_v42 = vadd.f32 %v645_v31, %v218_v8 }
  0xda   :  { %v2046_v18 = vadd.f32 %v799_v37, %v218_v8  ;;  %v140_v45 = vadd.f32 %v135_v60, %v1367_v40  ;;  %v469_v4 = vadd.f32 %v464_v57, %v1369_v41  ;;  %v143_v30 = vadd.f32 %v138_v19, %v1416_v56  ;;  %v231_v31 = vpop.permute.xlu1 %230 }
  0xdb   :  { %v472_v35 = vadd.f32 %v467_v11, %v2539_v10  ;;  %v170_v9 = vmul.f32 %v1534_v54, %v1540_v38  ;;  %v479_v23 = vmul.f32 %v1546_v5, %v1534_v54  ;;  %v633_v3 = vmul.f32 %v1550_v21, %v1534_v54 }
  0xdc   :  { %v787_v8 = vmul.f32 %v1554_v20, %v1534_v54  ;;  %v255_v40 = vadd.f32 %v250_v12, %v225_v36  ;;  %v504_v60 = vadd.f32 %v499_v24, %v494_v2  ;;  %v658_v41 = vadd.f32 %v653_v48, %v648_v58  ;;  %v2540_v36 = vld [vmem:[#allocation26_spill] sm:$0xff]  ;;  %v300_v58 = vpop.permute.xlu0 %299 }
  0xdd   :  { %v812_v57 = vadd.f32 %v807_v47, %v802_v28  ;;  %v258_v56 = vadd.f32 %v253_v33, %v228_v34  ;;  %v507_v19 = vadd.f32 %v502_v16, %v497_v53  ;;  %v661_v11 = vadd.f32 %v656_v46, %v651_v44  ;;  %v2541_v44 = vld [vmem:[#allocation8_spill] sm:$0xff]  ;;  %v2542_v28 = vld [vmem:[#allocation7_spill] sm:$0xff] }
  0xde   :  { %v815_v51 = vadd.f32 %v810_v22, %v805_v15  ;;  %v285_v38 = vmul.f32 %v270_v26, %v1801_v7  ;;  %v514_v37 = vmul.f32 %v1807_v32, %v270_v26  ;;  %v668_v5 = vmul.f32 %v1813_v63, %v270_v26  ;;  %v2543_v7 = vld [vmem:[#allocation9_spill] sm:$0xff]  ;;  %v2544_v32 = vld [vmem:[#allocation10_spill] sm:$0xff]  ;;  %v239_v48 = vpop.permute.xlu1 %238 }
  0xdf   :  { %v822_v21 = vmul.f32 %v1819_v50, %v270_v26  ;;  %v288_v6 = vmul.f32 %v282_v59, %v1835_v14  ;;  %v517_v54 = vmul.f32 %v1841_v13, %v282_v59  ;;  %v671_v20 = vmul.f32 %v1847_v43, %v282_v59  ;;  %v2545_v50 = vld [vmem:[#allocation11_spill] sm:$0xff]  ;;  %v2547_v43 = vld [vmem:[#allocation4_spill] sm:$0xff] }
  0xe0   :  { %v825_v2 = vmul.f32 %v2540_v36, %v282_v59  ;;  %v173_v34 = vmul.f32 %v2542_v28, %v2541_v44  ;;  %v482_v53 = vmul.f32 %v2543_v7, %v2542_v28  ;;  %v636_v63 = vmul.f32 %v2544_v32, %v2542_v28  ;;  %v2546_v13 = vld [vmem:[#allocation3_spill] sm:$0xff]  ;;  %v2086_v52 = vpop.permute.xlu0 %311  ;;  %v2558_v44 = vld [vmem:[#allocation25_spill] sm:$0xff] }
  0xe1   :  { %v790_v15 = vmul.f32 %v2545_v50, %v2542_v28  ;;  %v175_v14 = vadd.f32 %v170_v9, %v140_v45  ;;  %v484_v26 = vadd.f32 %v479_v23, %v469_v4  ;;  %v638_v12 = vadd.f32 %v633_v3, %v2546_v13  ;;  %v2548_v23 = vld [vmem:[#allocation5_spill] sm:$0xff] }
  0xe2   :  { %v792_v24 = vadd.f32 %v787_v8, %v2547_v43  ;;  %v2078_v47 = vadd.f32 %v285_v38, %v255_v40  ;;  %v2080_v33 = vadd.f32 %v514_v37, %v504_v60  ;;  %v2082_v16 = vadd.f32 %v668_v5, %v658_v41  ;;  %v2549_v8 = vld [vmem:[#allocation6_spill] sm:$0xff]  ;;  %v2562_v43 = vld [vmem:[#allocation41_spill] sm:$0xff] }
  0xe3   :  { %v2084_v46 = vadd.f32 %v822_v21, %v812_v57  ;;  %v2088_v22 = vadd.f32 %v288_v6, %v258_v56  ;;  %v2090_v10 = vadd.f32 %v517_v54, %v507_v19  ;;  %v2092_v45 = vadd.f32 %v671_v20, %v661_v11  ;;  %v2555_v6 = vld [vmem:[#allocation24_spill] sm:$0xff] }
  0xe4   :  { %v2094_v4 = vadd.f32 %v825_v2, %v815_v51  ;;  %v178_v59 = vadd.f32 %v173_v34, %v143_v30  ;;  %v487_v9 = vadd.f32 %v482_v53, %v472_v35  ;;  %v641_v3 = vadd.f32 %v636_v63, %v2548_v23  ;;  %v243_v51 = vpop.permute.xlu1 %242  ;;  %v2138_v32 = vpop.permute.xlu0 %324 }
  0xe5   :  { %v795_v40 = vadd.f32 %v790_v15, %v2549_v8  ;;  %v2550_v60 = vunpack.c.l.bf16 %v1692_v39  ;;  %v2551_v57 = vunpack.c.l.bf16 %v1795_v17  ;;  %v2552_v56 = vunpack.c.l.bf16 %v1702_v62  ;;  %v2561_v15 = vld [vmem:[#allocation40_spill] sm:$0xff] }
  0xe6   :  { %v2553_v11 = vunpack.c.h.bf16 %v1795_v17  ;;  %v2107_v30 = vmul.f32 %v2078_v47, %v175_v14  ;;  %v2110_v35 = vmul.f32 %v2080_v33, %v484_v26  ;;  %v2113_v5 = vmul.f32 %v2082_v16, %v638_v12 }
  0xe7   :  { %v249_v41 = vmul.f32 %v2550_v60, %v231_v31  ;;  %v498_v38 = vmul.f32 %v2551_v57, %v231_v31  ;;  %v652_v19 = vmul.f32 %v2552_v56, %v231_v31  ;;  %v2116_v39 = vmul.f32 %v2084_v46, %v792_v24 }
  0xe8   :  { %v806_v37 = vmul.f32 %v2553_v11, %v231_v31  ;;  %v2119_v21 = vmul.f32 %v2088_v22, %v178_v59  ;;  %v2122_v62 = vmul.f32 %v2090_v10, %v487_v9  ;;  %v2125_v17 = vmul.f32 %v2092_v45, %v641_v3  ;;  %v266_v56 = vpop.permute.xlu1 %265  ;;  %v2563_v11 = vld [vmem:[#allocation28_spill] sm:$0xff] }
  0xe9   :  { %v2128_v31 = vmul.f32 %v2094_v4, %v795_v40  ;;  %v2556_v54 = vunpack.c.l.bf16 %v2555_v6  ;;  %v2557_v36 = vunpack.c.h.bf16 %v1697_v1  ;;  %v2559_v28 = vunpack.c.l.bf16 %v2558_v44 }
  0xea   :  { %v2560_v7 = vunpack.c.h.bf16 %v1707_v55  ;;  %v254_v63 = vadd.f32 %v249_v41, %v1988_v61  ;;  %v503_v50 = vadd.f32 %v498_v38, %v1990_v25  ;;  %v657_v13 = vadd.f32 %v652_v19, %v2561_v15  ;;  %v2567_v41 = vld [vmem:[#allocation42_spill] sm:$0xff]  ;;  %v2568_v19 = vld [vmem:[#allocation43_spill] sm:$0xff] }
  0xeb   :  { %2554 = vst [vmem:[#allocation2_spill] sm:$0xff] %v2128_v31  ;;  %v251_v20 = vmul.f32 %v2556_v54, %v239_v48  ;;  %v500_v2 = vmul.f32 %v2557_v36, %v239_v48  ;;  %v654_v34 = vmul.f32 %v2559_v28, %v239_v48  ;;  %v811_v23 = vadd.f32 %v806_v37, %v2562_v43  ;;  %v2564_v36 = vld [vmem:[#allocation29_spill] sm:$0xff] }
  0xec   :  { %v808_v53 = vmul.f32 %v2560_v7, %v239_v48  ;;  %v315_v8 = vmul.f32 %v300_v58, %v175_v14  ;;  %v524_v60 = vmul.f32 %v484_v26, %v300_v58  ;;  %v678_v1 = vmul.f32 %v638_v12, %v300_v58  ;;  %v2565_v48 = vld [vmem:[#allocation30_spill] sm:$0xff]  ;;  %v2566_v7 = vld [vmem:[#allocation31_spill] sm:$0xff]  ;;  %v2152_v26 = vpop.permute.xlu0 %336 }
  0xed   :  { %v832_v57 = vmul.f32 %v792_v24, %v300_v58  ;;  %v284_v54 = vmul.f32 %v266_v56, %v2563_v11  ;;  %v513_v55 = vmul.f32 %v2564_v36, %v266_v56  ;;  %v667_v28 = vmul.f32 %v2565_v48, %v266_v56  ;;  %v2570_v24 = vld [vmem:[#allocation27_spill] sm:$0xff]  ;;  %v2576_v48 = vld [vmem:[#allocation33_spill] sm:$0xff] }
  0xee   :  { %v821_v31 = vmul.f32 %v2566_v7, %v266_v56  ;;  %v256_v61 = vadd.f32 %v251_v20, %v2008_v29  ;;  %v505_v25 = vadd.f32 %v500_v2, %v2010_v27  ;;  %v659_v38 = vadd.f32 %v654_v34, %v2567_v41  ;;  %v274_v20 = vpop.permute.xlu1 %273  ;;  %v2577_v41 = vld [vmem:[#allocation34_spill] sm:$0xff] }
  0xef   :  { %v813_v14 = vadd.f32 %v808_v53, %v2568_v19  ;;  %v2569_v58 = vunpack.c.h.bf16 %v2555_v6  ;;  %v2571_v37 = vunpack.c.l.bf16 %v2570_v24  ;;  %v2572_v43 = vunpack.c.h.bf16 %v2558_v44  ;;  %v2575_v6 = vld [vmem:[#allocation32_spill] sm:$0xff]  ;;  %v2578_v44 = vld [vmem:[#allocation35_spill] sm:$0xff] }
  0xf0   :  { %v2573_v56 = vunpack.c.h.bf16 %v2570_v24  ;;  %v2162_v27 = vadd.f32 %v284_v54, %v254_v63  ;;  %v2164_v2 = vadd.f32 %v513_v55, %v503_v50  ;;  %v2166_v34 = vadd.f32 %v667_v28, %v657_v13  ;;  %v2581_v63 = vld [vmem:[#allocation13_spill] sm:$0xff]  ;;  %v2583_v13 = vld [vmem:[#allocation14_spill] sm:$0xff] }
  0xf1   :  { %v252_v12 = vmul.f32 %v2569_v58, %v243_v51  ;;  %v501_v15 = vmul.f32 %v2571_v37, %v243_v51  ;;  %v655_v11 = vmul.f32 %v2572_v43, %v243_v51  ;;  %v2168_v53 = vadd.f32 %v821_v31, %v811_v23  ;;  %v2579_v37 = vld [vmem:[#allocation12_spill] sm:$0xff]  ;;  %v2585_v23 = vld [vmem:[#allocation15_spill] sm:$0xff] }
  0xf2   :  { %v809_v29 = vmul.f32 %v2573_v56, %v243_v51  ;;  %v286_v36 = vmul.f32 %v274_v20, %v2575_v6  ;;  %v515_v7 = vmul.f32 %v2576_v48, %v274_v20  ;;  %v669_v19 = vmul.f32 %v2577_v41, %v274_v20  ;;  %v350_v56 = vpop.permute.xlu0 %349 }
  0xf3   :  { %2574 = vst [vmem:[#allocation26_spill] sm:$0xff] %v2168_v53  ;;  %v823_v58 = vmul.f32 %v2578_v44, %v274_v20  ;;  %v2176_v51 = vmul.f32 %v2162_v27, %v2579_v37  ;;  %v2180_v50 = vmul.f32 %v2164_v2, %v2581_v63  ;;  %v2184_v31 = vmul.f32 %v2166_v34, %v2583_v13  ;;  %v278_v20 = vpop.permute.xlu1 %277 }
  0xf4   :  { %v2188_v54 = vmul.f32 %v2168_v53, %v2585_v23  ;;  %v318_v55 = vmul.f32 %v2086_v52, %v178_v59  ;;  %v527_v28 = vmul.f32 %v487_v9, %v2086_v52  ;;  %v681_v24 = vmul.f32 %v641_v3, %v2086_v52  ;;  %v2588_v59 = vld [vmem:[#allocation37_spill] sm:$0xff]  ;;  %v2589_v9 = vld [vmem:[#allocation38_spill] sm:$0xff]  ;;  %v2590_v3 = vld [vmem:[#allocation39_spill] sm:$0xff] }
  0xf5   :  { %2580 = vst [vmem:[#allocation8_spill] sm:$0xff] %v2176_v51  ;;  %2582 = vst [vmem:[#allocation7_spill] sm:$0xff] %v2180_v50  ;;  %v2194_v43 = vmul.f32 %v795_v40, %v2086_v52  ;;  %v2196_v6 = vadd.f32 %v286_v36, %v256_v61  ;;  %v2198_v48 = vadd.f32 %v515_v7, %v505_v25 }
  0xf6   :  { %2584 = vst [vmem:[#allocation9_spill] sm:$0xff] %v2184_v31  ;;  %2586 = vst [vmem:[#allocation10_spill] sm:$0xff] %v2188_v54  ;;  %v2200_v41 = vadd.f32 %v669_v19, %v659_v38  ;;  %v2202_v44 = vadd.f32 %v823_v58, %v813_v14  ;;  %v2587_v54 = vld [vmem:[#allocation36_spill] sm:$0xff]  ;;  %v516_v50 = vmul.f32 %v2588_v59, %v278_v20  ;;  %v362_v19 = vpop.permute.xlu0 %361 }
  0xf7   :  { %v287_v31 = vmul.f32 %v278_v20, %v2587_v54  ;;  %v670_v51 = vmul.f32 %v2589_v9, %v278_v20  ;;  %v824_v53 = vmul.f32 %v2590_v3, %v278_v20  ;;  %v257_v52 = vadd.f32 %v252_v12, %v2040_v49 }
  0xf8   :  { %v506_v40 = vadd.f32 %v501_v15, %v2042_v0  ;;  %v660_v61 = vadd.f32 %v655_v11, %v2044_v42  ;;  %v814_v25 = vadd.f32 %v809_v29, %v2046_v18  ;;  %v340_v38 = vadd.f32 %v2138_v32, %v315_v8  ;;  %v2224_v42 = vpop.permute.xlu1 %295  ;;  %v2591_v18 = vld [vmem:[#allocation16_spill] sm:$0xff]  ;;  %v2597_v15 = vld [vmem:[#allocation19_spill] sm:$0xff] }
  0xf9   :  { %v529_v14 = vadd.f32 %v524_v60, %v2138_v32  ;;  %v365_v36 = vmul.f32 %v350_v56, %v2078_v47  ;;  %v534_v7 = vmul.f32 %v2080_v33, %v350_v56  ;;  %v2216_v58 = vadd.f32 %v287_v31, %v257_v52  ;;  %v2593_v60 = vld [vmem:[#allocation17_spill] sm:$0xff]  ;;  %v2595_v33 = vld [vmem:[#allocation18_spill] sm:$0xff]  ;;  %v2599_v52 = vld [vmem:[#allocation20_spill] sm:$0xff] }
  0xfa   :  { %v2218_v54 = vadd.f32 %v516_v50, %v506_v40  ;;  %v2220_v49 = vadd.f32 %v670_v51, %v660_v61  ;;  %v2222_v0 = vadd.f32 %v824_v53, %v814_v25  ;;  %v2228_v8 = vmul.f32 %v2196_v6, %v2591_v18  ;;  %v385_v3 = vpop.permute.xlu0 %384  ;;  %v2601_v61 = vld [vmem:[#allocation21_spill] sm:$0xff] }
  0xfb   :  { %v2232_v47 = vmul.f32 %v2198_v48, %v2593_v60  ;;  %v2236_v12 = vmul.f32 %v2200_v41, %v2595_v33  ;;  %v2240_v11 = vmul.f32 %v2202_v44, %v2597_v15  ;;  %v683_v29 = vadd.f32 %v678_v1, %v2138_v32 }
  0xfc   :  { %2592 = vst [vmem:[#allocation11_spill] sm:$0xff] %v2228_v8  ;;  %v837_v53 = vadd.f32 %v832_v57, %v2138_v32  ;;  %v343_v51 = vadd.f32 %v2152_v26, %v318_v55  ;;  %v688_v50 = vmul.f32 %v2082_v16, %v350_v56  ;;  %v370_v31 = vadd.f32 %v365_v36, %v340_v38  ;;  %v2603_v32 = vld [vmem:[#allocation22_spill] sm:$0xff]  ;;  %v2605_v16 = vld [vmem:[#allocation23_spill] sm:$0xff]  ;;  %v304_v25 = vpop.permute.xlu1 %303 }
  0xfd   :  { %2594 = vst [vmem:[#allocation3_spill] sm:$0xff] %v2232_v47  ;;  %2596 = vst [vmem:[#allocation4_spill] sm:$0xff] %v2236_v12  ;;  %v842_v20 = vmul.f32 %v2084_v46, %v350_v56  ;;  %v368_v59 = vmul.f32 %v362_v19, %v2088_v22  ;;  %v537_v9 = vmul.f32 %v2090_v10, %v362_v19 }
  0xfe   :  { %2598 = vst [vmem:[#allocation5_spill] sm:$0xff] %v2240_v11  ;;  %v2251_v40 = vmul.f32 %v2216_v58, %v2599_v52  ;;  %v2255_v1 = vmul.f32 %v2218_v54, %v2601_v61  ;;  %v2259_v57 = vmul.f32 %v2220_v49, %v2603_v32  ;;  %v2263_v46 = vmul.f32 %v2222_v0, %v2605_v16 }
  0xff   :  { %v539_v22 = vadd.f32 %v534_v7, %v529_v14  ;;  %v400_v10 = vmul.f32 %v385_v3, %v2107_v30  ;;  %v549_v55 = vmul.f32 %v2110_v35, %v385_v3  ;;  %v703_v56 = vmul.f32 %v2113_v5, %v385_v3  ;;  %v397_v7 = vpop.permute.xlu0 %396 }
 0x100   :  { %2600 = vst [vmem:[#allocation6_spill] sm:$0xff] %v2251_v40  ;;  %2602 = vst [vmem:[#allocation24_spill] sm:$0xff] %v2255_v1  ;;  %v532_v38 = vadd.f32 %v527_v28, %v2152_v26  ;;  %v693_v36 = vadd.f32 %v688_v50, %v683_v29  ;;  %v691_v1 = vmul.f32 %v2092_v45, %v362_v19  ;;  %v308_v29 = vpop.permute.xlu1 %307 }
 0x101   :  { %2604 = vst [vmem:[#allocation25_spill] sm:$0xff] %v2259_v57  ;;  %2606 = vst [vmem:[#allocation40_spill] sm:$0xff] %v2263_v46  ;;  %v857_v40 = vmul.f32 %v2116_v39, %v385_v3  ;;  %v686_v57 = vadd.f32 %v681_v24, %v2152_v26  ;;  %v847_v11 = vadd.f32 %v842_v20, %v837_v53 }
 0x102   :  { %v405_v12 = vadd.f32 %v400_v10, %v370_v31  ;;  %v554_v46 = vadd.f32 %v549_v55, %v539_v22  ;;  %v845_v14 = vmul.f32 %v2094_v4, %v362_v19  ;;  %v708_v30 = vadd.f32 %v703_v56, %v693_v36  ;;  %v2607_v19 = vld [vmem:[#allocation2_spill] sm:$0xff] }
 0x103   :  { %v373_v35 = vadd.f32 %v368_v59, %v343_v51  ;;  %v542_v47 = vadd.f32 %v537_v9, %v532_v38  ;;  %v403_v8 = vmul.f32 %v397_v7, %v2119_v21  ;;  %v552_v28 = vmul.f32 %v2122_v62, %v397_v7  ;;  %v2608_v38 = vld [vmem:[#allocation26_spill] sm:$0xff] }
 0x104   :  { %v559_v5 = vmax.f32 %v405_v12, %v554_v46  ;;  %v706_v45 = vmul.f32 %v2125_v17, %v397_v7  ;;  %v840_v39 = vadd.f32 %v2194_v43, %v2152_v26  ;;  %v862_v24 = vadd.f32 %v857_v40, %v847_v11  ;;  %v321_v9 = vpop.permute.xlu1 %320 }
 0x105   :  { %v696_v53 = vadd.f32 %v691_v1, %v686_v57  ;;  %v408_v31 = vadd.f32 %v403_v8, %v373_v35  ;;  %v557_v4 = vadd.f32 %v552_v28, %v542_v47  ;;  %v860_v20 = vmul.f32 %v2607_v19, %v397_v7 }
 0x106   :  { %v713_v50 = vmax.f32 %v559_v5, %v708_v30  ;;  %v850_v21 = vadd.f32 %v845_v14, %v840_v39  ;;  %v314_v47 = vmul.f32 %v2224_v42, %v2579_v37  ;;  %v523_v11 = vmul.f32 %v2581_v63, %v2224_v42 }
 0x107   :  { %v562_v12 = vmax.f32 %v408_v31, %v557_v4  ;;  %v711_v59 = vadd.f32 %v706_v45, %v696_v53  ;;  %v677_v3 = vmul.f32 %v2583_v13, %v2224_v42  ;;  %v831_v40 = vmul.f32 %v2585_v23, %v2224_v42 }
 0x108   :  { %v867_v51 = vmax.f32 %v713_v50, %v862_v24  ;;  %v865_v17 = vadd.f32 %v860_v20, %v850_v21  ;;  %v329_v43 = vpop.permute.xlu1 %328  ;;  %v339_v1 = vadd.f32 %v321_v9, %v314_v47  ;;  %v528_v57 = vadd.f32 %v523_v11, %v321_v9  ;;  %v2609_v21 = vld [vmem:[#allocation8_spill] sm:$0xff] }
 0x109   :  { %v716_v62 = vmax.f32 %v562_v12, %v711_v59  ;;  %v682_v46 = vadd.f32 %v677_v3, %v321_v9  ;;  %v836_v22 = vadd.f32 %v831_v40, %v321_v9  ;;  %v316_v63 = vmul.f32 %v304_v25, %v2591_v18 }
 0x10a   :  { %873 = vst.msk [vmem:[%s2340_s2 + $0x8] sm:$0xff] %vm871_vm0, %v867_v51  ;;  %v525_v13 = vmul.f32 %v2593_v60, %v304_v25  ;;  %v679_v14 = vmul.f32 %v2595_v33, %v304_v25  ;;  %v833_v23 = vmul.f32 %v2597_v15, %v304_v25  ;;  %v317_v33 = vmul.f32 %v308_v29, %v2599_v52 }
 0x10b   :  { %v870_v26 = vmax.f32 %v716_v62, %v865_v17  ;;  %v341_v5 = vadd.f32 %v329_v43, %v316_v63  ;;  %v526_v15 = vmul.f32 %v2601_v61, %v308_v29  ;;  %v680_v25 = vmul.f32 %v2603_v32, %v308_v29  ;;  %v2610_v62 = vld [vmem:[#allocation7_spill] sm:$0xff] }
 0x10c   :  { %v333_v8 = vpop.permute.xlu1 %332  ;;  %v684_v28 = vadd.f32 %v679_v14, %v329_v43  ;;  %v834_v24 = vmul.f32 %v2605_v16, %v308_v29 }
 0x10d   :  { %877 = vst.msk [vmem:[%s2340_s2 + $0x20] sm:$0xf] %vm876_vm1, %v870_v26  ;;  %v342_v19 = vadd.f32 %v333_v8, %v317_v33  ;;  %v685_v20 = vadd.f32 %v680_v25, %v333_v8  ;;  %v2611_v26 = vld [vmem:[#allocation9_spill] sm:$0xff] }
 0x110   :  { %v346_v10 = vpop.permute.xlu1 %345 }
 0x111   :  { %v364_v55 = vmul.f32 %v346_v10, %v2162_v27  ;;  %v533_v56 = vmul.f32 %v2164_v2, %v346_v10  ;;  %v687_v37 = vmul.f32 %v2166_v34, %v346_v10  ;;  %v841_v36 = vmul.f32 %v2608_v38, %v346_v10 }
 0x112   :  { %v530_v27 = vadd.f32 %v525_v13, %v329_v43  ;;  %v838_v2 = vadd.f32 %v833_v23, %v329_v43 }
 0x113   :  { %v369_v42 = vadd.f32 %v364_v55, %v339_v1  ;;  %v538_v30 = vadd.f32 %v533_v56, %v528_v57  ;;  %v692_v7 = vadd.f32 %v687_v37, %v682_v46  ;;  %v846_v35 = vadd.f32 %v841_v36, %v836_v22  ;;  %v2614_v57 = vld [vmem:[#allocation3_spill] sm:$0xff]  ;;  %v2615_v22 = vld [vmem:[#allocation4_spill] sm:$0xff]  ;;  %v2616_v55 = vld [vmem:[#allocation5_spill] sm:$0xff] }
 0x114   :  { %v354_v45 = vpop.permute.xlu1 %353 }
 0x115   :  { %v366_v34 = vmul.f32 %v354_v45, %v2196_v6  ;;  %v535_v39 = vmul.f32 %v2198_v48, %v354_v45  ;;  %v689_v18 = vmul.f32 %v2200_v41, %v354_v45  ;;  %v843_v60 = vmul.f32 %v2202_v44, %v354_v45 }
 0x116   :  { %v531_v6 = vadd.f32 %v526_v15, %v333_v8  ;;  %v839_v48 = vadd.f32 %v834_v24, %v333_v8  ;;  %v2612_v8 = vld [vmem:[#allocation10_spill] sm:$0xff] }
 0x117   :  { %v371_v53 = vadd.f32 %v366_v34, %v341_v5  ;;  %v540_v50 = vadd.f32 %v535_v39, %v530_v27  ;;  %v694_v31 = vadd.f32 %v689_v18, %v684_v28  ;;  %v848_v4 = vadd.f32 %v843_v60, %v838_v2  ;;  %v2619_v27 = vld [vmem:[#allocation25_spill] sm:$0xff]  ;;  %v2620_v2 = vld [vmem:[#allocation40_spill] sm:$0xff] }
 0x118   :  { %v358_v51 = vpop.permute.xlu1 %357 }
 0x119   :  { %v367_v41 = vmul.f32 %v358_v51, %v2216_v58  ;;  %v536_v44 = vmul.f32 %v2218_v54, %v358_v51  ;;  %v690_v52 = vmul.f32 %v2220_v49, %v358_v51  ;;  %v844_v61 = vmul.f32 %v2222_v0, %v358_v51  ;;  %v2613_v0 = vld [vmem:[#allocation11_spill] sm:$0xff] }
 0x11b   :  { %v372_v32 = vadd.f32 %v367_v41, %v342_v19  ;;  %v541_v12 = vadd.f32 %v536_v44, %v531_v6  ;;  %v695_v16 = vadd.f32 %v690_v52, %v685_v20  ;;  %v849_v29 = vadd.f32 %v844_v61, %v839_v48 }
 0x11c   :  { %v381_v59 = vpop.permute.xlu1 %380 }
 0x11d   :  { %v399_v9 = vmul.f32 %v381_v59, %v2609_v21  ;;  %v548_v17 = vmul.f32 %v2610_v62, %v381_v59  ;;  %v702_v43 = vmul.f32 %v2611_v26, %v381_v59  ;;  %v856_v47 = vmul.f32 %v2612_v8, %v381_v59 }
 0x11f   :  { %v404_v58 = vadd.f32 %v399_v9, %v369_v42  ;;  %v553_v11 = vadd.f32 %v548_v17, %v538_v30  ;;  %v707_v54 = vadd.f32 %v702_v43, %v692_v7  ;;  %v861_v3 = vadd.f32 %v856_v47, %v846_v35  ;;  %v2617_v30 = vld [vmem:[#allocation6_spill] sm:$0xff]  ;;  %v2618_v35 = vld [vmem:[#allocation24_spill] sm:$0xff] }
 0x120   :  { %v389_v49 = vpop.permute.xlu1 %388 }
 0x121   :  { %v558_v40 = vmax.f32 %v404_v58, %v553_v11  ;;  %v401_v1 = vmul.f32 %v389_v49, %v2613_v0  ;;  %v550_v46 = vmul.f32 %v2614_v57, %v389_v49  ;;  %v704_v10 = vmul.f32 %v2615_v22, %v389_v49 }
 0x122   :  { %v858_v56 = vmul.f32 %v2616_v55, %v389_v49 }
 0x123   :  { %v712_v37 = vmax.f32 %v558_v40, %v707_v54  ;;  %v406_v38 = vadd.f32 %v401_v1, %v371_v53  ;;  %v555_v36 = vadd.f32 %v550_v46, %v540_v50  ;;  %v709_v63 = vadd.f32 %v704_v10, %v694_v31 }
 0x124   :  { %v863_v13 = vadd.f32 %v858_v56, %v848_v4  ;;  %v393_v14 = vpop.permute.xlu1 %392 }
 0x125   :  { %v866_v23 = vmax.f32 %v712_v37, %v861_v3  ;;  %v560_v42 = vmax.f32 %v406_v38, %v555_v36  ;;  %v402_v7 = vmul.f32 %v393_v14, %v2617_v30  ;;  %v551_v5 = vmul.f32 %v2618_v35, %v393_v14 }
 0x126   :  { %v705_v28 = vmul.f32 %v2619_v27, %v393_v14  ;;  %v859_v45 = vmul.f32 %v2620_v2, %v393_v14 }
 0x127   :  { %872 = vst.msk [vmem:[%s2340_s2] sm:$0xff] %vm871_vm0, %v866_v23  ;;  %v714_v34 = vmax.f32 %v560_v42, %v709_v63  ;;  %v407_v39 = vadd.f32 %v402_v7, %v372_v32  ;;  %v556_v18 = vadd.f32 %v551_v5, %v541_v12 }
 0x128   :  { %v710_v60 = vadd.f32 %v705_v28, %v695_v16  ;;  %v864_v33 = vadd.f32 %v859_v45, %v849_v29 }
 0x129   :  { %v868_v15 = vmax.f32 %v714_v34, %v863_v13  ;;  %v561_v25 = vmax.f32 %v407_v39, %v556_v18 }
 0x12b   :  { %874 = vst.msk [vmem:[%s2340_s2 + $0x10] sm:$0xff] %vm871_vm0, %v868_v15  ;;  %v715_v24 = vmax.f32 %v561_v25, %v710_v60 }
 0x12d   :  { %v869_v53 = vmax.f32 %v715_v24, %v864_v33 }
 0x12f   :  { %875 = vst.msk [vmem:[%s2340_s2 + $0x18] sm:$0xff] %vm871_vm0, %v869_v53 }

// kernel: conv_logic_mnist_model.9
= control target key start
LH: loop header
LB: loop body
LE: loop exit
PB: predicated region body
PF: predicated region fallthrough
CT: control target
= control target key end

     0   :  { %s1659_s12 = smov 0   ;;  %s2194_s0 = inlined_call_operand.vmem [shape: bf16[2,5120], index: 0, kind: input, shape index: {}]   ;;  %s2195_s1 = inlined_call_operand.vmem [shape: bf16[2,5120], index: 1, kind: input, shape index: {}]   ;;  %s2196_s2 = inlined_call_operand.vmem [shape: f32[4,5120], index: 2, kind: input, shape index: {}]   ;;  %s2197_s3 = inlined_call_operand.vmem [shape: f32[2,5120], index: 3, kind: output, shape index: {}]  }
   0x1 LB: > { %s1612_s13 = sadd.s32 4294967295, %s1636_s12   ;;  %p1616_p0 = scmp.ge.s32.totalorder %s1636_s12, 1  ;;  %s1636_s12 = sphi %s1659_s12, %s13_s12  }
   0x2   : > { %p158_p1 = scmp.lt.s32.totalorder %s1636_s12, 3 }
   0x4   : > { %p159_p2 = pnand %p1616_p0, %p158_p1 }
   0x6   : > { %162 = sbr.rel (%p159_p2) target bundleno = 129 (0x81), region = 32 }
   0xd   : > { %s190_s14 = smul.u32 20, %s1612_s13  ;;  %v248_v0 = vlaneseq  ;;  %v1638_v1 = vmov 1983009808  }
   0xe   : > { %v435_v2 = vunpack.c.l.s4 %v1638_v1 }
   0xf   : > { %p191_p3 = scmp.lt.s32.totalorder %s190_s14, 39  ;;  %v249_v3 = vshrl.u32 %v248_v0, 7 }
  0x10   : > { %v436_v4 = vunpack.c.0.s8 %v435_v2 }
  0x11   : > { %s2359_s14 = smov (!%p191_p3, %s190_s14), 39  ;;  %v1669_v5 = vsub.s32 1, %v249_v3  ;;  %v1671_v6 = vsub.s32 5, %v249_v3  ;;  %v1673_v7 = vsub.s32 0, %v249_v3  ;;  %v1683_v8 = vsub.s32 4, %v249_v3 }
  0x12   : > { %s193_s17 = scalar_lea.vmem %s2194_s0, %s2359_s14  ;;  %s198_s20 = scalar_lea.vmem %s2195_s1, %s2359_s14  ;;  %v1685_v9 = vsub.s32 2, %v249_v3  ;;  %v1687_v10 = vsub.s32 6, %v249_v3  ;;  %v1689_v11 = vsub.s32 3, %v249_v3  ;;  %v1692_v15 = vsub.s32 %v436_v4, %v249_v3 }
  0x13   : > { %s1617_s21 = sshll.u32 %s2359_s14, 2  ;;  %v212_v12 = vld [vmem:[%s193_s17] sm:$0xff]  ;;  %v213_v13 = vld [vmem:[%s193_s17 + $0x8] sm:$0xff]  ;;  %v214_v14 = vld [vmem:[%s193_s17 + $0x10] sm:$0xf]  ;;  %v1694_v16 = vsub.s32 7, %v249_v3 }
  0x14   : > { %2242 = vst [vmem:[#allocation2_spill] sm:$0xff] %v1685_v9  ;;  %2243 = vst [vmem:[#allocation3_spill] sm:$0xff] %v1687_v10  ;;  %s204_s24 = scalar_lea.vmem %s2196_s2, %s1617_s21  ;;  %v1699_v17 = vunpack.c.l.bf16 %v212_v12  ;;  %v1701_v18 = vunpack.c.h.bf16 %v212_v12  ;;  %v1703_v19 = vunpack.c.l.bf16 %v213_v13  ;;  %v1705_v20 = vunpack.c.h.bf16 %v213_v13  ;;  %v220_v21 = vld [vmem:[%s198_s20] sm:$0xff]  ;;  %v221_v22 = vld [vmem:[%s198_s20 + $0x8] sm:$0xff]  ;;  %s1618_s25 = sshll.u32 %s2359_s14, 1 }
  0x15   : > { %2244 = vst [vmem:[#allocation4_spill] sm:$0xff] %v1689_v11  ;;  %2245 = vst [vmem:[#allocation5_spill] sm:$0xff] %v1694_v16  ;;  %v222_v23 = vld [vmem:[%s198_s20 + $0x10] sm:$0xf]  ;;  %v1707_v24 = vunpack.c.l.bf16 %v214_v14  ;;  %v1709_v25 = vunpack.c.l.bf16 %v220_v21  ;;  %v1711_v26 = vunpack.c.h.bf16 %v220_v21  ;;  %v1713_v27 = vunpack.c.l.bf16 %v221_v22  ;;  %v1715_v28 = vld [vmem:[%s204_s24] sm:$0xff]  ;;  %s210_s28 = scalar_lea.vmem %s2197_s3, %s1618_s25 }
  0x16   : > { %2246 = vst [vmem:[#allocation6_spill] sm:$0xff] %v1699_v17  ;;  %2247 = vst [vmem:[#allocation7_spill] sm:$0xff] %v1701_v18  ;;  %v1717_v29 = vld [vmem:[%s204_s24 + $0x8] sm:$0xff]  ;;  %v1719_v30 = vld [vmem:[%s204_s24 + $0x10] sm:$0xff]  ;;  %v1721_v31 = vunpack.c.h.bf16 %v221_v22  ;;  %v1723_v32 = vunpack.c.l.bf16 %v222_v23  ;;  %v251_v36 = vrot.slane %v1715_v28, %v1669_v5  ;;  %v255_v37 = vrot.slane %v1715_v28, %v1671_v6 }
  0x17   : > { %2248 = vst [vmem:[#allocation8_spill] sm:$0xff] %v1703_v19  ;;  %2249 = vst [vmem:[#allocation9_spill] sm:$0xff] %v1705_v20  ;;  %v1725_v33 = vld [vmem:[%s204_s24 + $0x18] sm:$0xff]  ;;  %v1727_v34 = vld [vmem:[%s204_s24 + $0x20] sm:$0xff]  ;;  %v259_v41 = vrot.slane %v1717_v29, %v1669_v5  ;;  %v263_v42 = vrot.slane %v1717_v29, %v1671_v6  ;;  %v267_v43 = vrot.slane %v1719_v30, %v1669_v5 }
  0x18   : > { %2250 = vst [vmem:[#allocation10_spill] sm:$0xff] %v1707_v24  ;;  %2251 = vst [vmem:[#allocation11_spill] sm:$0xff] %v1709_v25  ;;  %v1729_v35 = vld [vmem:[%s204_s24 + $0x28] sm:$0xff]  ;;  %v1735_v38 = vld [vmem:[%s204_s24 + $0x30] sm:$0xff]  ;;  %v271_v44 = vrot.slane %v1719_v30, %v1671_v6  ;;  %v275_v46 = vrot.slane %v1725_v33, %v1669_v5  ;;  %v279_v47 = vrot.slane %v1725_v33, %v1671_v6 }
  0x19   : > { %2252 = vst [vmem:[#allocation12_spill] sm:$0xff] %v1711_v26  ;;  %2253 = vst [vmem:[#allocation13_spill] sm:$0xff] %v1713_v27  ;;  %v1737_v39 = vld [vmem:[%s204_s24 + $0x38] sm:$0xff]  ;;  %v1739_v40 = vld [vmem:[%s204_s24 + $0x40] sm:$0xff]  ;;  %v283_v48 = vrot.slane %v1727_v34, %v1669_v5  ;;  %v287_v49 = vrot.slane %v1727_v34, %v1671_v6  ;;  %v291_v50 = vrot.slane %v1729_v35, %v1669_v5 }
  0x1a   : > { %2254 = vst [vmem:[#allocation14_spill] sm:$0xff] %v1715_v28  ;;  %2255 = vst [vmem:[#allocation15_spill] sm:$0xff] %v1717_v29  ;;  %v1749_v45 = vld [vmem:[%s204_s24 + $0x48] sm:$0xff]  ;;  %v295_v51 = vrot.slane %v1729_v35, %v1671_v6  ;;  %v299_v52 = vrot.slane %v1735_v38, %v1669_v5  ;;  %v303_v53 = vrot.slane %v1735_v38, %v1671_v6 }
  0x1b   : > { %2256 = vst [vmem:[#allocation16_spill] sm:$0xff] %v1719_v30  ;;  %2257 = vst [vmem:[#allocation17_spill] sm:$0xff] %v1721_v31  ;;  %v307_v54 = vrot.slane %v1737_v39, %v1669_v5  ;;  %v311_v55 = vrot.slane %v1737_v39, %v1671_v6  ;;  %v315_v56 = vrot.slane %v1739_v40, %v1669_v5 }
  0x1c   : > { %2258 = vst [vmem:[#allocation18_spill] sm:$0xff] %v1723_v32  ;;  %2259 = vst [vmem:[#allocation19_spill] sm:$0xff] %v1725_v33  ;;  %v319_v57 = vrot.slane %v1739_v40, %v1671_v6  ;;  %v323_v58 = vrot.slane %v1749_v45, %v1669_v5  ;;  %v327_v59 = vrot.slane %v1749_v45, %v1671_v6 }
  0x1d   : > { %2260 = vst [vmem:[#allocation20_spill] sm:$0xff] %v1727_v34  ;;  %2261 = vst [vmem:[#allocation21_spill] sm:$0xff] %v1729_v35  ;;  %v351_v60 = vrot.slane %v251_v36, %v1669_v5  ;;  %v355_v61 = vrot.slane %v255_v37, %v1669_v5  ;;  %v359_v62 = vrot.slane %v259_v41, %v1669_v5 }
  0x1e   : > { %2262 = vst [vmem:[#allocation22_spill] sm:$0xff] %v1735_v38  ;;  %2263 = vst [vmem:[#allocation23_spill] sm:$0xff] %v1737_v39  ;;  %v363_v63 = vrot.slane %v263_v42, %v1669_v5  ;;  %v367_v0 = vrot.slane %v267_v43, %v1669_v5  ;;  %v371_v1 = vrot.slane %v271_v44, %v1669_v5 }
  0x1f   : > { %2264 = vst [vmem:[#allocation24_spill] sm:$0xff] %v1739_v40  ;;  %2265 = vst [vmem:[#allocation25_spill] sm:$0xff] %v1749_v45  ;;  %v375_v2 = vrot.slane %v275_v46, %v1669_v5  ;;  %v379_v3 = vrot.slane %v279_v47, %v1669_v5  ;;  %v383_v4 = vrot.slane %v283_v48, %v1669_v5 }
  0x20   : > { %v387_v6 = vrot.slane %v287_v49, %v1669_v5  ;;  %v391_v12 = vrot.slane %v291_v50, %v1669_v5  ;;  %v395_v13 = vrot.slane %v295_v51, %v1669_v5  ;;  %v399_v14 = vrot.slane %v299_v52, %v1669_v5 }
  0x21   : > { %v403_v21 = vrot.slane %v303_v53, %v1669_v5  ;;  %v407_v22 = vrot.slane %v307_v54, %v1669_v5  ;;  %v411_v23 = vrot.slane %v311_v55, %v1669_v5  ;;  %v415_v36 = vrot.slane %v315_v56, %v1669_v5 }
  0x22   : > { %v419_v37 = vrot.slane %v319_v57, %v1669_v5  ;;  %v423_v41 = vrot.slane %v323_v58, %v1669_v5  ;;  %v427_v42 = vrot.slane %v327_v59, %v1669_v5  ;;  %v433_v43 = vcombine.high %v1699_v17, %v1699_v17 }
  0x23   : > { %v440_v44 = vrot.slane %v1699_v17, %v1692_v15  ;;  %v450_v46 = vcombine.high %v1701_v18, %v1701_v18  ;;  %v457_v47 = vrot.slane %v1701_v18, %v1692_v15  ;;  %v467_v48 = vcombine.high %v1703_v19, %v1703_v19 }
  0x24   : > { %v474_v49 = vrot.slane %v1703_v19, %v1692_v15  ;;  %v447_v5 = vrot.slane %v433_v43, %v1692_v15  ;;  %v484_v51 = vcombine.high %v1705_v20, %v1705_v20  ;;  %v491_v52 = vrot.slane %v1705_v20, %v1692_v15 }
  0x25   : > { %v448_v50 = vcombine.high %v440_v44, %v440_v44  ;;  %v464_v53 = vrot.slane %v450_v46, %v1692_v15  ;;  %v465_v54 = vcombine.high %v457_v47, %v457_v47  ;;  %v481_v55 = vrot.slane %v467_v48, %v1692_v15 }
  0x26   : > { %v482_v56 = vcombine.high %v474_v49, %v474_v49  ;;  %v449_v57 = vcombine.high %v447_v5, %v447_v5  ;;  %v498_v58 = vrot.slane %v484_v51, %v1692_v15  ;;  %v499_v59 = vcombine.high %v491_v52, %v491_v52 }
  0x27   : > { %v501_v43 = vcombine.high %v1707_v24, %v1707_v24  ;;  %v466_v16 = vcombine.high %v464_v53, %v464_v53  ;;  %v483_v11 = vcombine.high %v481_v55, %v481_v55  ;;  %v508_v19 = vrot.slane %v1707_v24, %v1692_v15 }
  0x28   : > { %v1823_v18 = vmul.f32 %v440_v44, %v351_v60  ;;  %v500_v20 = vcombine.high %v498_v58, %v498_v58  ;;  %v539_v17 = vmul.f32 %v448_v50, %v355_v61  ;;  %v540_v48 = vmul.f32 %v447_v5, %v359_v62 }
  0x29   : > { %v515_v46 = vrot.slane %v501_v43, %v1692_v15  ;;  %v516_v32 = vcombine.high %v508_v19, %v508_v19  ;;  %v541_v31 = vmul.f32 %v449_v57, %v363_v63  ;;  %v542_v27 = vmul.f32 %v457_v47, %v367_v0 }
  0x2a   : > { %2266 = vst [vmem:[#allocation26_spill] sm:$0xff] %v1823_v18  ;;  %v543_v51 = vmul.f32 %v465_v54, %v371_v1  ;;  %v544_v25 = vmul.f32 %v464_v53, %v375_v2  ;;  %v545_v10 = vmul.f32 %v466_v16, %v379_v3  ;;  %v546_v9 = vmul.f32 %v474_v49, %v383_v4  ;;  %v2267_v2 = vld [vmem:[#allocation21_spill] sm:$0xff] }
  0x2b   : > { %v517_v26 = vcombine.high %v515_v46, %v515_v46  ;;  %v547_v45 = vmul.f32 %v482_v56, %v387_v6  ;;  %v548_v40 = vmul.f32 %v481_v55, %v391_v12  ;;  %v549_v39 = vmul.f32 %v483_v11, %v395_v13  ;;  %v2268_v6 = vld [vmem:[#allocation22_spill] sm:$0xff] }
  0x2c   : > { %v550_v38 = vmul.f32 %v491_v52, %v399_v14  ;;  %v551_v24 = vmul.f32 %v499_v59, %v403_v21  ;;  %v552_v60 = vmul.f32 %v498_v58, %v407_v22  ;;  %v553_v44 = vmul.f32 %v500_v20, %v411_v23  ;;  %v2269_v14 = vld [vmem:[#allocation23_spill] sm:$0xff]  ;;  %v2270_v23 = vld [vmem:[#allocation24_spill] sm:$0xff] }
  0x2d   : > { %v554_v18 = vmul.f32 %v508_v19, %v415_v36  ;;  %v555_v35 = vmul.f32 %v516_v32, %v419_v37  ;;  %v556_v43 = vmul.f32 %v515_v46, %v423_v41  ;;  %v557_v61 = vmul.f32 %v517_v26, %v427_v42  ;;  %v2271_v41 = vld [vmem:[#allocation25_spill] sm:$0xff] }
  0x2e   : > { %v561_v62 = vrot.slane %v1715_v28, %v1673_v7  ;;  %v565_v63 = vrot.slane %v1715_v28, %v1683_v8  ;;  %v569_v16 = vrot.slane %v1717_v29, %v1673_v7  ;;  %v573_v11 = vrot.slane %v1717_v29, %v1683_v8 }
  0x2f   : > { %v577_v0 = vrot.slane %v1719_v30, %v1673_v7  ;;  %v581_v19 = vrot.slane %v1719_v30, %v1683_v8  ;;  %v585_v20 = vrot.slane %v1725_v33, %v1673_v7  ;;  %v589_v26 = vrot.slane %v1725_v33, %v1683_v8 }
  0x30   : > { %v593_v32 = vrot.slane %v1727_v34, %v1673_v7  ;;  %v597_v1 = vrot.slane %v1727_v34, %v1683_v8  ;;  %v601_v3 = vrot.slane %v2267_v2, %v1673_v7  ;;  %v605_v4 = vrot.slane %v2267_v2, %v1683_v8 }
  0x31   : > { %v609_v12 = vrot.slane %v2268_v6, %v1673_v7  ;;  %v613_v13 = vrot.slane %v2268_v6, %v1683_v8  ;;  %v617_v21 = vrot.slane %v2269_v14, %v1673_v7  ;;  %v621_v22 = vrot.slane %v2269_v14, %v1683_v8 }
  0x32   : > { %v625_v36 = vrot.slane %v2270_v23, %v1673_v7  ;;  %v629_v37 = vrot.slane %v2270_v23, %v1683_v8  ;;  %v633_v42 = vrot.slane %v2271_v41, %v1673_v7  ;;  %v637_v47 = vrot.slane %v2271_v41, %v1683_v8 }
  0x33   : > { %v661_v49 = vrot.slane %v561_v62, %v1673_v7  ;;  %v665_v5 = vrot.slane %v565_v63, %v1673_v7  ;;  %v669_v50 = vrot.slane %v569_v16, %v1673_v7  ;;  %v673_v52 = vrot.slane %v573_v11, %v1673_v7 }
  0x34   : > { %v677_v53 = vrot.slane %v577_v0, %v1673_v7  ;;  %v681_v54 = vrot.slane %v581_v19, %v1673_v7  ;;  %v685_v55 = vrot.slane %v585_v20, %v1673_v7  ;;  %v689_v56 = vrot.slane %v589_v26, %v1673_v7  ;;  %v2272_v26 = vld [vmem:[#allocation26_spill] sm:$0xff] }
  0x35   : > { %v693_v57 = vrot.slane %v593_v32, %v1673_v7  ;;  %v697_v8 = vrot.slane %v597_v1, %v1673_v7  ;;  %v701_v58 = vrot.slane %v601_v3, %v1673_v7  ;;  %v705_v59 = vrot.slane %v605_v4, %v1673_v7 }
  0x36   : > { %v709_v46 = vrot.slane %v609_v12, %v1673_v7  ;;  %v713_v62 = vrot.slane %v613_v13, %v1673_v7  ;;  %v717_v63 = vrot.slane %v617_v21, %v1673_v7  ;;  %v721_v16 = vrot.slane %v621_v22, %v1673_v7 }
  0x37   : > { %v725_v11 = vrot.slane %v625_v36, %v1673_v7  ;;  %v729_v0 = vrot.slane %v629_v37, %v1673_v7  ;;  %v733_v19 = vrot.slane %v633_v42, %v1673_v7  ;;  %v737_v20 = vrot.slane %v637_v47, %v1673_v7  ;;  %v2288_v42 = vld [vmem:[#allocation3_spill] sm:$0xff] }
  0x38   : > { %v1887_v32 = vadd.f32 %v661_v49, %v2272_v26  ;;  %v1889_v1 = vadd.f32 %v665_v5, %v539_v17  ;;  %v1891_v3 = vadd.f32 %v669_v50, %v540_v48  ;;  %v1893_v4 = vadd.f32 %v673_v52, %v541_v31 }
  0x39   : > { %v1895_v12 = vadd.f32 %v677_v53, %v542_v27  ;;  %v1897_v13 = vadd.f32 %v681_v54, %v543_v51  ;;  %v1899_v21 = vadd.f32 %v685_v55, %v544_v25  ;;  %v1901_v22 = vadd.f32 %v689_v56, %v545_v10 }
  0x3a   : > { %v1903_v36 = vadd.f32 %v693_v57, %v546_v9  ;;  %v1905_v7 = vadd.f32 %v697_v8, %v547_v45  ;;  %v1907_v37 = vadd.f32 %v701_v58, %v548_v40  ;;  %v1909_v17 = vadd.f32 %v705_v59, %v549_v39  ;;  %v2287_v40 = vld [vmem:[#allocation2_spill] sm:$0xff] }
  0x3b   : > { %2273 = vst [vmem:[#allocation26_spill] sm:$0xff] %v1899_v21  ;;  %2274 = vst [vmem:[#allocation27_spill] sm:$0xff] %v1901_v22  ;;  %v1911_v48 = vadd.f32 %v709_v46, %v550_v38  ;;  %v1913_v31 = vadd.f32 %v713_v62, %v551_v24  ;;  %v1915_v27 = vadd.f32 %v717_v63, %v552_v60 }
  0x3c   : > { %2275 = vst [vmem:[#allocation28_spill] sm:$0xff] %v1903_v36  ;;  %2276 = vst [vmem:[#allocation29_spill] sm:$0xff] %v1905_v7  ;;  %v1917_v51 = vadd.f32 %v721_v16, %v553_v44  ;;  %v1919_v25 = vadd.f32 %v725_v11, %v554_v18  ;;  %v1921_v10 = vadd.f32 %v729_v0, %v555_v35 }
  0x3d   : > { %2277 = vst [vmem:[#allocation30_spill] sm:$0xff] %v1907_v37  ;;  %2278 = vst [vmem:[#allocation31_spill] sm:$0xff] %v1909_v17  ;;  %v1923_v9 = vadd.f32 %v733_v19, %v556_v43  ;;  %v1925_v45 = vadd.f32 %v737_v20, %v557_v61  ;;  %v761_v39 = vrot.slane %v1715_v28, %v2287_v40 }
  0x3e   : > { %2279 = vst [vmem:[#allocation32_spill] sm:$0xff] %v1911_v48  ;;  %2280 = vst [vmem:[#allocation33_spill] sm:$0xff] %v1913_v31  ;;  %v765_v38 = vrot.slane %v1715_v28, %v2288_v42  ;;  %v769_v24 = vrot.slane %v1717_v29, %v2287_v40  ;;  %v773_v60 = vrot.slane %v1717_v29, %v2288_v42  ;;  %v2293_v28 = vld [vmem:[#allocation18_spill] sm:$0xff] }
  0x3f   : > { %2281 = vst [vmem:[#allocation34_spill] sm:$0xff] %v1915_v27  ;;  %2282 = vst [vmem:[#allocation35_spill] sm:$0xff] %v1917_v51  ;;  %v777_v18 = vrot.slane %v1719_v30, %v2287_v40  ;;  %v781_v35 = vrot.slane %v1719_v30, %v2288_v42  ;;  %v785_v44 = vrot.slane %v1725_v33, %v2287_v40 }
  0x40   : > { %2283 = vst [vmem:[#allocation36_spill] sm:$0xff] %v1919_v25  ;;  %2284 = vst [vmem:[#allocation37_spill] sm:$0xff] %v1921_v10  ;;  %v789_v43 = vrot.slane %v1725_v33, %v2288_v42  ;;  %v793_v61 = vrot.slane %v1727_v34, %v2287_v40  ;;  %v797_v47 = vrot.slane %v1727_v34, %v2288_v42 }
  0x41   : > { %2285 = vst [vmem:[#allocation38_spill] sm:$0xff] %v1923_v9  ;;  %2286 = vst [vmem:[#allocation39_spill] sm:$0xff] %v1925_v45  ;;  %v801_v49 = vrot.slane %v2267_v2, %v2287_v40  ;;  %v805_v5 = vrot.slane %v2267_v2, %v2288_v42  ;;  %v809_v50 = vrot.slane %v2268_v6, %v2287_v40 }
  0x42   : > { %v813_v52 = vrot.slane %v2268_v6, %v2288_v42  ;;  %v817_v53 = vrot.slane %v2269_v14, %v2287_v40  ;;  %v821_v54 = vrot.slane %v2269_v14, %v2288_v42  ;;  %v825_v55 = vrot.slane %v2270_v23, %v2287_v40 }
  0x43   : > { %v829_v56 = vrot.slane %v2270_v23, %v2288_v42  ;;  %v833_v57 = vrot.slane %v2271_v41, %v2287_v40  ;;  %v837_v8 = vrot.slane %v2271_v41, %v2288_v42  ;;  %v861_v58 = vrot.slane %v761_v39, %v2287_v40 }
  0x44   : > { %v865_v59 = vrot.slane %v765_v38, %v2287_v40  ;;  %v869_v46 = vrot.slane %v769_v24, %v2287_v40  ;;  %v873_v62 = vrot.slane %v773_v60, %v2287_v40  ;;  %v877_v63 = vrot.slane %v777_v18, %v2287_v40 }
  0x45   : > { %v881_v16 = vrot.slane %v781_v35, %v2287_v40  ;;  %v885_v11 = vrot.slane %v785_v44, %v2287_v40  ;;  %v889_v0 = vrot.slane %v789_v43, %v2287_v40  ;;  %v893_v19 = vrot.slane %v793_v61, %v2287_v40  ;;  %v2289_v61 = vld [vmem:[#allocation11_spill] sm:$0xff] }
  0x46   : > { %v897_v20 = vrot.slane %v797_v47, %v2287_v40  ;;  %v901_v26 = vrot.slane %v801_v49, %v2287_v40  ;;  %v905_v39 = vrot.slane %v805_v5, %v2287_v40  ;;  %v909_v42 = vrot.slane %v809_v50, %v2287_v40  ;;  %v2290_v5 = vld [vmem:[#allocation12_spill] sm:$0xff] }
  0x47   : > { %v913_v38 = vrot.slane %v813_v52, %v2287_v40  ;;  %v917_v24 = vrot.slane %v817_v53, %v2287_v40  ;;  %v921_v60 = vrot.slane %v821_v54, %v2287_v40  ;;  %v925_v18 = vrot.slane %v825_v55, %v2287_v40  ;;  %v2291_v53 = vld [vmem:[#allocation13_spill] sm:$0xff] }
  0x48   : > { %v929_v35 = vrot.slane %v829_v56, %v2287_v40  ;;  %v933_v44 = vrot.slane %v833_v57, %v2287_v40  ;;  %v937_v43 = vrot.slane %v837_v8, %v2287_v40  ;;  %v943_v47 = vcombine.high %v2289_v61, %v2289_v61  ;;  %v2292_v56 = vld [vmem:[#allocation17_spill] sm:$0xff] }
  0x49   : > { %v950_v49 = vrot.slane %v2289_v61, %v1692_v15  ;;  %v960_v50 = vcombine.high %v2290_v5, %v2290_v5  ;;  %v967_v52 = vrot.slane %v2290_v5, %v1692_v15  ;;  %v977_v54 = vcombine.high %v2291_v53, %v2291_v53 }
  0x4a   : > { %v957_v55 = vrot.slane %v943_v47, %v1692_v15  ;;  %v984_v40 = vrot.slane %v2291_v53, %v1692_v15  ;;  %v994_v57 = vcombine.high %v2292_v56, %v2292_v56  ;;  %v1001_v8 = vrot.slane %v2292_v56, %v1692_v15 }
  0x4b   : > { %v958_v41 = vcombine.high %v950_v49, %v950_v49  ;;  %v974_v23 = vrot.slane %v960_v50, %v1692_v15  ;;  %v975_v14 = vcombine.high %v967_v52, %v967_v52  ;;  %v991_v6 = vrot.slane %v977_v54, %v1692_v15 }
  0x4c   : > { %v959_v2 = vcombine.high %v957_v55, %v957_v55  ;;  %v992_v34 = vcombine.high %v984_v40, %v984_v40  ;;  %v1008_v33 = vrot.slane %v994_v57, %v1692_v15  ;;  %v1009_v47 = vcombine.high %v1001_v8, %v1001_v8 }
  0x4d   : > { %v976_v30 = vcombine.high %v974_v23, %v974_v23  ;;  %v993_v29 = vcombine.high %v991_v6, %v991_v6  ;;  %v1011_v53 = vcombine.high %v2293_v28, %v2293_v28  ;;  %v1018_v5 = vrot.slane %v2293_v28, %v1692_v15 }
  0x4e   : > { %v1010_v56 = vcombine.high %v1008_v33, %v1008_v33  ;;  %v1048_v61 = vmul.f32 %v950_v49, %v861_v58  ;;  %v1049_v45 = vmul.f32 %v958_v41, %v865_v59  ;;  %v1050_v50 = vmul.f32 %v957_v55, %v869_v46 }
  0x4f   : > { %v1025_v9 = vrot.slane %v1011_v53, %v1692_v15  ;;  %v1026_v54 = vcombine.high %v1018_v5, %v1018_v5  ;;  %v1051_v10 = vmul.f32 %v959_v2, %v873_v62  ;;  %v1052_v25 = vmul.f32 %v967_v52, %v877_v63  ;;  %v2332_v52 = vld [vmem:[#allocation4_spill] sm:$0xff]  ;;  %v2333_v53 = vld [vmem:[#allocation14_spill] sm:$0xff] }
  0x50   : > { %v1053_v51 = vmul.f32 %v975_v14, %v881_v16  ;;  %v1054_v57 = vmul.f32 %v974_v23, %v885_v11  ;;  %v1055_v27 = vmul.f32 %v976_v30, %v889_v0  ;;  %v1056_v31 = vmul.f32 %v984_v40, %v893_v19  ;;  %v2296_v23 = vld [vmem:[#allocation27_spill] sm:$0xff]  ;;  %v2334_v40 = vld [vmem:[#allocation5_spill] sm:$0xff] }
  0x51   : > { %v1027_v48 = vcombine.high %v1025_v9, %v1025_v9  ;;  %v1057_v17 = vmul.f32 %v992_v34, %v897_v20  ;;  %v1058_v37 = vmul.f32 %v991_v6, %v901_v26  ;;  %v1059_v7 = vmul.f32 %v993_v29, %v905_v39  ;;  %v2294_v6 = vld [vmem:[#allocation26_spill] sm:$0xff]  ;;  %v2323_v26 = vld [vmem:[#allocation11_spill] sm:$0xff] }
  0x52   : > { %v1060_v36 = vmul.f32 %v1001_v8, %v909_v42  ;;  %v1061_v22 = vmul.f32 %v1009_v47, %v913_v38  ;;  %v1062_v28 = vmul.f32 %v1008_v33, %v917_v24  ;;  %v1063_v21 = vmul.f32 %v1010_v56, %v921_v60  ;;  %v2325_v42 = vld [vmem:[#allocation12_spill] sm:$0xff]  ;;  %v2327_v24 = vld [vmem:[#allocation13_spill] sm:$0xff]  ;;  %v2335_v8 = vld [vmem:[#allocation15_spill] sm:$0xff] }
  0x53   : > { %v1064_v58 = vmul.f32 %v1018_v5, %v925_v18  ;;  %v1065_v41 = vmul.f32 %v1026_v54, %v929_v35  ;;  %v1066_v59 = vmul.f32 %v1025_v9, %v933_v44  ;;  %v1067_v46 = vmul.f32 %v1027_v48, %v937_v43  ;;  %v2328_v18 = vld [vmem:[#allocation9_spill] sm:$0xff]  ;;  %v2330_v43 = vld [vmem:[#allocation10_spill] sm:$0xff]  ;;  %v2336_v54 = vld [vmem:[#allocation16_spill] sm:$0xff] }
  0x54   : > { %v2013_v49 = vadd.f32 %v1048_v61, %v1887_v32  ;;  %v2016_v2 = vadd.f32 %v1049_v45, %v1889_v1  ;;  %v2019_v30 = vadd.f32 %v1050_v50, %v1891_v3  ;;  %v2022_v34 = vadd.f32 %v1051_v10, %v1893_v4  ;;  %v2298_v1 = vld [vmem:[#allocation28_spill] sm:$0xff]  ;;  %v2300_v3 = vld [vmem:[#allocation29_spill] sm:$0xff]  ;;  %v2302_v4 = vld [vmem:[#allocation30_spill] sm:$0xff] }
  0x55   : > { %v2025_v29 = vadd.f32 %v1052_v25, %v1895_v12  ;;  %v2028_v33 = vadd.f32 %v1053_v51, %v1897_v13  ;;  %v2031_v14 = vadd.f32 %v1054_v57, %v2294_v6  ;;  %v2034_v32 = vadd.f32 %v1055_v27, %v2296_v23  ;;  %v2304_v12 = vld [vmem:[#allocation31_spill] sm:$0xff]  ;;  %v2306_v13 = vld [vmem:[#allocation32_spill] sm:$0xff]  ;;  %v2308_v45 = vld [vmem:[#allocation33_spill] sm:$0xff] }
  0x56   : > { %v2037_v48 = vadd.f32 %v1056_v31, %v2298_v1  ;;  %v2040_v9 = vadd.f32 %v1057_v17, %v2300_v3  ;;  %v2043_v10 = vadd.f32 %v1058_v37, %v2302_v4  ;;  %v2046_v25 = vadd.f32 %v1059_v7, %v2304_v12  ;;  %v2310_v27 = vld [vmem:[#allocation34_spill] sm:$0xff]  ;;  %v2312_v31 = vld [vmem:[#allocation35_spill] sm:$0xff]  ;;  %v2314_v17 = vld [vmem:[#allocation36_spill] sm:$0xff] }
  0x57   : > { %2295 = vst [vmem:[#allocation2_spill] sm:$0xff] %v2031_v14  ;;  %2297 = vst [vmem:[#allocation3_spill] sm:$0xff] %v2034_v32  ;;  %v2049_v51 = vadd.f32 %v1060_v36, %v2306_v13  ;;  %v2052_v62 = vadd.f32 %v1061_v22, %v2308_v45  ;;  %v2055_v63 = vadd.f32 %v1062_v28, %v2310_v27  ;;  %v2316_v37 = vld [vmem:[#allocation37_spill] sm:$0xff]  ;;  %v2318_v7 = vld [vmem:[#allocation38_spill] sm:$0xff] }
  0x58   : > { %2299 = vst [vmem:[#allocation26_spill] sm:$0xff] %v2037_v48  ;;  %2301 = vst [vmem:[#allocation27_spill] sm:$0xff] %v2040_v9  ;;  %v2058_v16 = vadd.f32 %v1063_v21, %v2312_v31  ;;  %v2061_v11 = vadd.f32 %v1064_v58, %v2314_v17  ;;  %v2064_v0 = vadd.f32 %v1065_v41, %v2316_v37  ;;  %v2320_v36 = vld [vmem:[#allocation39_spill] sm:$0xff]  ;;  %v2322_v22 = vld [vmem:[#allocation6_spill] sm:$0xff] }
  0x59   : > { %2303 = vst [vmem:[#allocation28_spill] sm:$0xff] %v2043_v10  ;;  %2305 = vst [vmem:[#allocation29_spill] sm:$0xff] %v2046_v25  ;;  %v2067_v19 = vadd.f32 %v1066_v59, %v2318_v7  ;;  %v2070_v20 = vadd.f32 %v1067_v46, %v2320_v36  ;;  %v1088_v39 = vmul.f32 %v2323_v26, %v2322_v22  ;;  %v2324_v28 = vld [vmem:[#allocation7_spill] sm:$0xff]  ;;  %v2326_v21 = vld [vmem:[#allocation8_spill] sm:$0xff] }
  0x5a   : > { %2307 = vst [vmem:[#allocation30_spill] sm:$0xff] %v2049_v51  ;;  %2309 = vst [vmem:[#allocation31_spill] sm:$0xff] %v2052_v62  ;;  %v1089_v38 = vmul.f32 %v2325_v42, %v2324_v28  ;;  %v1090_v60 = vmul.f32 %v2327_v24, %v2326_v21  ;;  %v2329_v35 = vld [vmem:[#allocation17_spill] sm:$0xff]  ;;  %v2331_v61 = vld [vmem:[#allocation18_spill] sm:$0xff]  ;;  %v1096_v55 = vrot.slane %v2333_v53, %v2332_v52 }
  0x5b   : > { %2311 = vst [vmem:[#allocation32_spill] sm:$0xff] %v2055_v63  ;;  %2313 = vst [vmem:[#allocation33_spill] sm:$0xff] %v2058_v16  ;;  %v1091_v44 = vmul.f32 %v2329_v35, %v2328_v18  ;;  %v2082_v5 = vmul.f32 %v2331_v61, %v2330_v43  ;;  %v1100_v56 = vrot.slane %v2333_v53, %v2334_v40  ;;  %v2337_v41 = vld [vmem:[#allocation19_spill] sm:$0xff]  ;;  %v2338_v6 = vld [vmem:[#allocation20_spill] sm:$0xff] }
  0x5c   : > { %2315 = vst [vmem:[#allocation34_spill] sm:$0xff] %v2061_v11  ;;  %2317 = vst [vmem:[#allocation35_spill] sm:$0xff] %v2064_v0  ;;  %v1104_v47 = vrot.slane %v2335_v8, %v2332_v52  ;;  %v1108_v50 = vrot.slane %v2335_v8, %v2334_v40  ;;  %v1112_v57 = vrot.slane %v2336_v54, %v2332_v52  ;;  %v2339_v3 = vld [vmem:[#allocation21_spill] sm:$0xff]  ;;  %v2340_v13 = vld [vmem:[#allocation22_spill] sm:$0xff] }
  0x5d   : > { %2319 = vst [vmem:[#allocation36_spill] sm:$0xff] %v2067_v19  ;;  %2321 = vst [vmem:[#allocation37_spill] sm:$0xff] %v2070_v20  ;;  %v1116_v58 = vrot.slane %v2336_v54, %v2334_v40  ;;  %v1120_v59 = vrot.slane %v2337_v41, %v2332_v52  ;;  %v1124_v46 = vrot.slane %v2337_v41, %v2334_v40  ;;  %v2341_v31 = vld [vmem:[#allocation23_spill] sm:$0xff]  ;;  %v2342_v7 = vld [vmem:[#allocation24_spill] sm:$0xff] }
  0x5e   : > { %v1128_v23 = vrot.slane %v2338_v6, %v2332_v52  ;;  %v1132_v1 = vrot.slane %v2338_v6, %v2334_v40  ;;  %v1136_v4 = vrot.slane %v2339_v3, %v2332_v52  ;;  %v1140_v12 = vrot.slane %v2339_v3, %v2334_v40  ;;  %v2343_v26 = vld [vmem:[#allocation25_spill] sm:$0xff] }
  0x5f   : > { %v1144_v45 = vrot.slane %v2340_v13, %v2332_v52  ;;  %v1148_v27 = vrot.slane %v2340_v13, %v2334_v40  ;;  %v1152_v17 = vrot.slane %v2341_v31, %v2332_v52  ;;  %v1156_v37 = vrot.slane %v2341_v31, %v2334_v40 }
  0x60   : > { %v1160_v36 = vrot.slane %v2342_v7, %v2332_v52  ;;  %v1164_v22 = vrot.slane %v2342_v7, %v2334_v40  ;;  %v1168_v28 = vrot.slane %v2343_v26, %v2332_v52  ;;  %v1172_v42 = vrot.slane %v2343_v26, %v2334_v40 }
  0x61   : > { %v1196_v21 = vrot.slane %v1096_v55, %v2332_v52  ;;  %v1200_v24 = vrot.slane %v1100_v56, %v2332_v52  ;;  %v1204_v18 = vrot.slane %v1104_v47, %v2332_v52  ;;  %v1208_v35 = vrot.slane %v1108_v50, %v2332_v52 }
  0x62   : > { %v1212_v43 = vrot.slane %v1112_v57, %v2332_v52  ;;  %v1216_v61 = vrot.slane %v1116_v58, %v2332_v52  ;;  %v1220_v53 = vrot.slane %v1120_v59, %v2332_v52  ;;  %v1224_v8 = vrot.slane %v1124_v46, %v2332_v52 }
  0x63   : > { %v1228_v54 = vrot.slane %v1128_v23, %v2332_v52  ;;  %v1232_v40 = vrot.slane %v1132_v1, %v2332_v52  ;;  %v1236_v55 = vrot.slane %v1136_v4, %v2332_v52  ;;  %v1240_v56 = vrot.slane %v1140_v12, %v2332_v52 }
  0x64   : > { %v1244_v47 = vrot.slane %v1144_v45, %v2332_v52  ;;  %v1248_v50 = vrot.slane %v1148_v27, %v2332_v52  ;;  %v1252_v57 = vrot.slane %v1152_v17, %v2332_v52  ;;  %v1256_v58 = vrot.slane %v1156_v37, %v2332_v52 }
  0x65   : > { %v1260_v41 = vrot.slane %v1160_v36, %v2332_v52  ;;  %v1264_v59 = vrot.slane %v1164_v22, %v2332_v52  ;;  %v1268_v46 = vrot.slane %v1168_v28, %v2332_v52  ;;  %v1272_v6 = vrot.slane %v1172_v42, %v2332_v52 }
  0x66   : > { %v1278_v23 = vcombine.high %v1088_v39, %v1088_v39  ;;  %v1285_v1 = vrot.slane %v1088_v39, %v1692_v15  ;;  %v1295_v3 = vcombine.high %v1089_v38, %v1089_v38  ;;  %v1302_v4 = vrot.slane %v1089_v38, %v1692_v15 }
  0x67   : > { %v1312_v12 = vcombine.high %v1090_v60, %v1090_v60  ;;  %v1319_v13 = vrot.slane %v1090_v60, %v1692_v15  ;;  %v1329_v45 = vcombine.high %v1091_v44, %v1091_v44  ;;  %v1336_v37 = vrot.slane %v1091_v44, %v1692_v15 }
  0x68   : > { %v1292_v27 = vrot.slane %v1278_v23, %v1692_v15  ;;  %v1293_v31 = vcombine.high %v1285_v1, %v1285_v1  ;;  %v1309_v17 = vrot.slane %v1295_v3, %v1692_v15  ;;  %v1310_v7 = vcombine.high %v1302_v4, %v1302_v4 }
  0x69   : > { %v1326_v52 = vrot.slane %v1312_v12, %v1692_v15  ;;  %v1327_v36 = vcombine.high %v1319_v13, %v1319_v13  ;;  %v1343_v39 = vrot.slane %v1329_v45, %v1692_v15  ;;  %v1344_v38 = vcombine.high %v1336_v37, %v1336_v37 }
  0x6a   : > { %v1294_v22 = vcombine.high %v1292_v27, %v1292_v27  ;;  %v1311_v26 = vcombine.high %v1309_v17, %v1309_v17  ;;  %v1346_v60 = vcombine.high %v2082_v5, %v2082_v5  ;;  %v1353_v23 = vrot.slane %v2082_v5, %v1692_v15 }
  0x6b   : > { %v1328_v28 = vcombine.high %v1326_v52, %v1326_v52  ;;  %v1345_v42 = vcombine.high %v1343_v39, %v1343_v39  ;;  %v1383_v3 = vmul.f32 %v1285_v1, %v1196_v21  ;;  %v1384_v20 = vmul.f32 %v1293_v31, %v1200_v24 }
  0x6c   : > { %v1360_v44 = vrot.slane %v1346_v60, %v1692_v15  ;;  %v1385_v19 = vmul.f32 %v1292_v27, %v1204_v18  ;;  %v1386_v12 = vmul.f32 %v1294_v22, %v1208_v35  ;;  %v1361_v0 = vcombine.high %v1353_v23, %v1353_v23 }
  0x6d   : > { %v1387_v11 = vmul.f32 %v1302_v4, %v1212_v43  ;;  %v1388_v45 = vmul.f32 %v1310_v7, %v1216_v61  ;;  %v1389_v16 = vmul.f32 %v1309_v17, %v1220_v53  ;;  %v1390_v62 = vmul.f32 %v1311_v26, %v1224_v8 }
  0x6e   : > { %v1362_v63 = vcombine.high %v1360_v44, %v1360_v44  ;;  %v1391_v51 = vmul.f32 %v1319_v13, %v1228_v54  ;;  %v1392_v25 = vmul.f32 %v1327_v36, %v1232_v40  ;;  %v1393_v10 = vmul.f32 %v1326_v52, %v1236_v55  ;;  %v2344_v54 = vld [vmem:[#allocation2_spill] sm:$0xff]  ;;  %v2345_v55 = vld [vmem:[#allocation3_spill] sm:$0xff] }
  0x6f   : > { %v1394_v9 = vmul.f32 %v1328_v28, %v1240_v56  ;;  %v1395_v48 = vmul.f32 %v1336_v37, %v1244_v47  ;;  %v1396_v32 = vmul.f32 %v1344_v38, %v1248_v50  ;;  %v1397_v14 = vmul.f32 %v1343_v39, %v1252_v57 }
  0x70   : > { %v1398_v5 = vmul.f32 %v1345_v42, %v1256_v58  ;;  %v1399_v21 = vmul.f32 %v1353_v23, %v1260_v41  ;;  %v1400_v1 = vmul.f32 %v1361_v0, %v1264_v59  ;;  %v1401_v60 = vmul.f32 %v1360_v44, %v1268_v46  ;;  %v2346_v0 = vld [vmem:[#allocation26_spill] sm:$0xff]  ;;  %v2351_v58 = vld [vmem:[#allocation31_spill] sm:$0xff]  ;;  %v2352_v41 = vld [vmem:[#allocation32_spill] sm:$0xff] }
  0x71   : > { %v1402_v24 = vmul.f32 %v1362_v63, %v1272_v6  ;;  %v1403_v18 = vadd.f32 %v1383_v3, %v2013_v49  ;;  %v1404_v35 = vadd.f32 %v1384_v20, %v2016_v2  ;;  %v1405_v43 = vadd.f32 %v1385_v19, %v2019_v30  ;;  %v2347_v63 = vld [vmem:[#allocation27_spill] sm:$0xff]  ;;  %v2348_v49 = vld [vmem:[#allocation28_spill] sm:$0xff]  ;;  %v2349_v2 = vld [vmem:[#allocation29_spill] sm:$0xff] }
  0x72   : > { %v1406_v61 = vadd.f32 %v1386_v12, %v2022_v34  ;;  %v1407_v53 = vadd.f32 %v1387_v11, %v2025_v29  ;;  %v1408_v8 = vadd.f32 %v1388_v45, %v2028_v33  ;;  %v1409_v40 = vadd.f32 %v1389_v16, %v2344_v54  ;;  %v2350_v30 = vld [vmem:[#allocation30_spill] sm:$0xff]  ;;  %v2353_v11 = vld [vmem:[#allocation33_spill] sm:$0xff]  ;;  %v2355_v46 = vld [vmem:[#allocation35_spill] sm:$0xff] }
  0x73   : > { %v1410_v56 = vadd.f32 %v1390_v62, %v2345_v55  ;;  %v1411_v47 = vadd.f32 %v1391_v51, %v2346_v0  ;;  %v1412_v50 = vadd.f32 %v1392_v25, %v2347_v63  ;;  %v1413_v57 = vadd.f32 %v1393_v10, %v2348_v49  ;;  %v2354_v59 = vld [vmem:[#allocation34_spill] sm:$0xff]  ;;  %v2356_v51 = vld [vmem:[#allocation36_spill] sm:$0xff]  ;;  %v2357_v25 = vld [vmem:[#allocation37_spill] sm:$0xff] }
  0x74   : > { %v1414_v20 = vadd.f32 %v1394_v9, %v2349_v2  ;;  %v1415_v19 = vadd.f32 %v1395_v48, %v2350_v30  ;;  %v1416_v34 = vadd.f32 %v1396_v32, %v2351_v58  ;;  %v1417_v29 = vadd.f32 %v1397_v14, %v2352_v41 }
  0x75   : > { %v1418_v33 = vadd.f32 %v1398_v5, %v2353_v11  ;;  %v1419_v16 = vadd.f32 %v1399_v21, %v2354_v59  ;;  %v1420_v62 = vadd.f32 %v1400_v1, %v2355_v46  ;;  %v1421_v6 = vadd.f32 %v1401_v60, %v2356_v51 }
  0x76   : > { %v1422_v4 = vadd.f32 %v1402_v24, %v2357_v25  ;;  %v1443_v10 = vcombine.low %v1403_v18, %v1404_v35  ;;  %v1444_v13 = vcombine.low %v1405_v43, %v1406_v61  ;;  %v1460_v9 = vcombine.low %v1407_v53, %v1408_v8 }
  0x77   : > { %v1461_v27 = vcombine.low %v1409_v40, %v1410_v56  ;;  %v1477_v48 = vcombine.low %v1411_v47, %v1412_v50  ;;  %v1478_v31 = vcombine.low %v1413_v57, %v1414_v20  ;;  %v1494_v17 = vcombine.low %v1415_v19, %v1416_v34 }
  0x78   : > { %v1451_v32 = vrot.slane %v1443_v10, %v1692_v15  ;;  %v1458_v14 = vrot.slane %v1444_v13, %v1692_v15  ;;  %v1495_v37 = vcombine.low %v1417_v29, %v1418_v33  ;;  %v1468_v7 = vrot.slane %v1460_v9, %v1692_v15 }
  0x79   : > { %v1475_v52 = vrot.slane %v1461_v27, %v1692_v15  ;;  %v1485_v36 = vrot.slane %v1477_v48, %v1692_v15  ;;  %v1492_v39 = vrot.slane %v1478_v31, %v1692_v15  ;;  %v1502_v26 = vrot.slane %v1494_v17, %v1692_v15 }
  0x7a   : > { %v1459_v22 = vcombine.low %v1451_v32, %v1458_v14  ;;  %v1509_v38 = vrot.slane %v1495_v37, %v1692_v15  ;;  %v1511_v28 = vcombine.low %v1419_v16, %v1420_v62  ;;  %v1512_v3 = vcombine.low %v1421_v6, %v1422_v4 }
  0x7b   : > { %v1476_v42 = vcombine.low %v1468_v7, %v1475_v52  ;;  %v1493_v23 = vcombine.low %v1485_v36, %v1492_v39 }
  0x7c   : > { %v1510_v44 = vcombine.low %v1502_v26, %v1509_v38  ;;  %v1519_v12 = vrot.slane %v1511_v28, %v1692_v15  ;;  %1533 = vst [vmem:[%s210_s28] sm:$0xff] %v1459_v22  ;;  %v1526_v45 = vrot.slane %v1512_v3, %v1692_v15 }
  0x7d   : > { %1534 = vst [vmem:[%s210_s28 + $0x8] sm:$0xff] %v1476_v42  ;;  %1535 = vst [vmem:[%s210_s28 + $0x10] sm:$0xff] %v1493_v23 }
  0x7e   : > { %1536 = vst [vmem:[%s210_s28 + $0x18] sm:$0xff] %v1510_v44  ;;  %v1527_v5 = vcombine.low %v1519_v12, %v1526_v45 }
  0x80   : > { %1537 = vst [vmem:[%s210_s28 + $0x20] sm:$0xff] %v1527_v5 }
  0x81 PF: > { %s13_s12 = sadd.s32 1, %s1636_s12  }
  0x82   : > { %p10_p4 = scmp.ge.s32.totalorder %s13_s12, 4  }
  0x84   :  { %12 = sbr.rel (!%p10_p4) target bundleno = 1 (0x1), region = 68 }

// kernel: conv_logic_mnist_model.10
= control target key start
LH: loop header
LB: loop body
LE: loop exit
PB: predicated region body
PF: predicated region fallthrough
CT: control target
= control target key end

     0   :  { %s1000_s12 = smov 0   ;;  %s1213_s0 = inlined_call_operand.vmem [shape: bf16[2,2560], index: 0, kind: input, shape index: {}]   ;;  %s1214_s1 = inlined_call_operand.vmem [shape: bf16[2,2560], index: 1, kind: input, shape index: {}]   ;;  %s1215_s2 = inlined_call_operand.vmem [shape: f32[4,2560], index: 2, kind: input, shape index: {}]   ;;  %s1216_s3 = inlined_call_operand.vmem [shape: f32[2,2560], index: 3, kind: output, shape index: {}]  }
   0x1 LB: > { %s952_s13 = sadd.s32 4294967295, %s977_s12   ;;  %p956_p0 = scmp.ge.s32.totalorder %s977_s12, 1  ;;  %s977_s12 = sphi %s1000_s12, %s13_s12  }
   0x2   : > { %p158_p1 = scmp.lt.s32.totalorder %s977_s12, 3 }
   0x4   : > { %p159_p2 = pnand %p956_p0, %p158_p1 }
   0x5   : > { %s190_s14 = smul.u32 (!%p159_p2), 10, %s952_s13  ;;  %v232_v0 = vlaneseq (!%p159_p2)  ;;  %v979_v1 = vmov (!%p159_p2), 1983009808  }
   0x6   : > { %162 = sbr.rel (%p159_p2) target bundleno = 71 (0x47), region = 32  ;;  %v327_v2 = vunpack.c.l.s4 (!%p159_p2), %v979_v1 }
   0x7   : > { %p191_p3 = scmp.lt.s32.totalorder (!%p159_p2), %s190_s14, 19  ;;  %v233_v3 = vshrl.u32 (!%p159_p2), %v232_v0, 7 }
   0x8   : > { %v328_v4 = vunpack.c.0.s8 (!%p159_p2), %v327_v2 }
   0x9   : > { %v234_v5 = vsub.s32 (!%p159_p2), 1, %v233_v3  ;;  %v238_v6 = vsub.s32 (!%p159_p2), 5, %v233_v3  ;;  %v1021_v9 = vsub.s32 (!%p159_p2), 0, %v233_v3  ;;  %v1023_v10 = vsub.s32 (!%p159_p2), 4, %v233_v3 }
   0xa   : > { %v1028_v12 = vsub.s32 (!%p159_p2), %v328_v4, %v233_v3  ;;  %v1030_v13 = vsub.s32 (!%p159_p2), 2, %v233_v3  ;;  %v1032_v14 = vsub.s32 (!%p159_p2), 6, %v233_v3  ;;  %v1034_v15 = vsub.s32 (!%p159_p2), 3, %v233_v3 }
   0xb   : > { %v1047_v22 = vsub.s32 (!%p159_p2), 7, %v233_v3 }
   0xd   : > { %s1218_s14 = smov (!%p191_p3, %s190_s14), 19 }
   0xe   : > { %s193_s17 = scalar_lea.vmem %s1213_s0, %s1218_s14  ;;  %s198_s20 = scalar_lea.vmem %s1214_s1, %s1218_s14 }
   0xf   : > { %s957_s21 = sshll.u32 %s1218_s14, 2  ;;  %v212_v7 = vld [vmem:[%s193_s17] sm:$0xff]  ;;  %v1019_v8 = vld [vmem:[%s193_s17 + $0x8] sm:$0x3]  ;;  %s958_s25 = sshll.u32 %s1218_s14, 1 }
  0x10   : > { %s204_s24 = scalar_lea.vmem %s1215_s2, %s957_s21  ;;  %v217_v11 = vld [vmem:[%s198_s20] sm:$0xff]  ;;  %v1036_v16 = vunpack.c.l.bf16 %v212_v7  ;;  %v1038_v17 = vunpack.c.h.bf16 %v212_v7  ;;  %v216_v18 = vunpack.c.l.bf16 %v1019_v8  ;;  %v1049_v23 = vld [vmem:[%s198_s20 + $0x8] sm:$0x3]  ;;  %s210_s28 = scalar_lea.vmem %s1216_s3, %s958_s25 }
  0x11   : > { %v1041_v19 = vld [vmem:[%s204_s24] sm:$0xff]  ;;  %v1043_v20 = vld [vmem:[%s204_s24 + $0x8] sm:$0xff]  ;;  %v1045_v21 = vld [vmem:[%s204_s24 + $0x10] sm:$0xff]  ;;  %v1059_v30 = vunpack.c.l.bf16 %v217_v11  ;;  %v1064_v34 = vunpack.c.h.bf16 %v217_v11  ;;  %v221_v38 = vunpack.c.l.bf16 %v1049_v23 }
  0x12   : > { %v1051_v24 = vld [vmem:[%s204_s24 + $0x18] sm:$0xff]  ;;  %v1053_v25 = vld [vmem:[%s204_s24 + $0x20] sm:$0xff]  ;;  %v235_v26 = vrot.slane %v1041_v19, %v234_v5  ;;  %v239_v27 = vrot.slane %v1041_v19, %v238_v6  ;;  %v243_v28 = vrot.slane %v1043_v20, %v234_v5  ;;  %v247_v29 = vrot.slane %v1043_v20, %v238_v6 }
  0x13   : > { %v251_v31 = vrot.slane %v1045_v21, %v234_v5  ;;  %v255_v32 = vrot.slane %v1045_v21, %v238_v6  ;;  %v259_v33 = vrot.slane %v1051_v24, %v234_v5  ;;  %v263_v35 = vrot.slane %v1051_v24, %v238_v6 }
  0x14   : > { %v267_v36 = vrot.slane %v1053_v25, %v234_v5  ;;  %v271_v37 = vrot.slane %v1053_v25, %v238_v6  ;;  %v285_v39 = vrot.slane %v235_v26, %v234_v5  ;;  %v289_v40 = vrot.slane %v239_v27, %v234_v5 }
  0x15   : > { %v293_v41 = vrot.slane %v243_v28, %v234_v5  ;;  %v297_v42 = vrot.slane %v247_v29, %v234_v5  ;;  %v301_v43 = vrot.slane %v251_v31, %v234_v5  ;;  %v305_v44 = vrot.slane %v255_v32, %v234_v5 }
  0x16   : > { %v309_v45 = vrot.slane %v259_v33, %v234_v5  ;;  %v325_v46 = vcombine.high %v1036_v16, %v1036_v16  ;;  %v332_v47 = vrot.slane %v1036_v16, %v1028_v12  ;;  %v342_v48 = vcombine.high %v1038_v17, %v1038_v17 }
  0x17   : > { %v349_v49 = vrot.slane %v1038_v17, %v1028_v12  ;;  %v313_v50 = vrot.slane %v263_v35, %v234_v5  ;;  %v317_v51 = vrot.slane %v267_v36, %v234_v5  ;;  %v321_v52 = vrot.slane %v271_v37, %v234_v5 }
  0x18   : > { %v365_v53 = vrot.slane %v216_v18, %v1028_v12  ;;  %v339_v54 = vrot.slane %v325_v46, %v1028_v12  ;;  %v340_v55 = vcombine.high %v332_v47, %v332_v47  ;;  %v356_v56 = vrot.slane %v342_v48, %v1028_v12 }
  0x19   : > { %v357_v57 = vcombine.high %v349_v49, %v349_v49  ;;  %v390_v59 = vrot.slane %v1041_v19, %v1021_v9  ;;  %v394_v60 = vrot.slane %v1041_v19, %v1023_v10  ;;  %v398_v61 = vrot.slane %v1043_v20, %v1021_v9 }
  0x1a   : > { %v366_v58 = vcombine.high %v365_v53, %v365_v53  ;;  %v341_v62 = vcombine.high %v339_v54, %v339_v54  ;;  %v358_v63 = vcombine.high %v356_v56, %v356_v56  ;;  %v377_v0 = vmul.f32 %v332_v47, %v285_v39 }
  0x1b   : > { %v381_v1 = vmul.f32 %v349_v49, %v301_v43  ;;  %v378_v2 = vmul.f32 %v340_v55, %v289_v40  ;;  %v379_v3 = vmul.f32 %v339_v54, %v293_v41  ;;  %v382_v4 = vmul.f32 %v357_v57, %v305_v44 }
  0x1c   : > { %v402_v5 = vrot.slane %v1043_v20, %v1023_v10  ;;  %v380_v6 = vmul.f32 %v341_v62, %v297_v42  ;;  %v383_v7 = vmul.f32 %v356_v56, %v309_v45  ;;  %v406_v11 = vrot.slane %v1045_v21, %v1021_v9 }
  0x1d   : > { %v410_v26 = vrot.slane %v1045_v21, %v1023_v10  ;;  %v414_v27 = vrot.slane %v1051_v24, %v1021_v9  ;;  %v418_v28 = vrot.slane %v1051_v24, %v1023_v10  ;;  %v422_v29 = vrot.slane %v1053_v25, %v1021_v9 }
  0x1e   : > { %v426_v31 = vrot.slane %v1053_v25, %v1023_v10  ;;  %v440_v32 = vrot.slane %v390_v59, %v1021_v9  ;;  %v444_v33 = vrot.slane %v394_v60, %v1021_v9  ;;  %v448_v35 = vrot.slane %v398_v61, %v1021_v9 }
  0x1f   : > { %v452_v36 = vrot.slane %v402_v5, %v1021_v9  ;;  %v385_v37 = vmul.f32 %v365_v53, %v317_v51  ;;  %v456_v39 = vrot.slane %v406_v11, %v1021_v9  ;;  %v460_v40 = vrot.slane %v410_v26, %v1021_v9 }
  0x20   : > { %v464_v41 = vrot.slane %v414_v27, %v1021_v9  ;;  %v384_v42 = vmul.f32 %v358_v63, %v313_v50  ;;  %v386_v43 = vmul.f32 %v366_v58, %v321_v52  ;;  %v468_v44 = vrot.slane %v418_v28, %v1021_v9 }
  0x21   : > { %v472_v10 = vrot.slane %v422_v29, %v1021_v9  ;;  %v476_v45 = vrot.slane %v426_v31, %v1021_v9  ;;  %v477_v46 = vadd.f32 %v440_v32, %v377_v0  ;;  %v478_v47 = vadd.f32 %v444_v33, %v378_v2 }
  0x22   : > { %v479_v48 = vadd.f32 %v448_v35, %v379_v3  ;;  %v1113_v49 = vadd.f32 %v452_v36, %v380_v6  ;;  %v481_v51 = vadd.f32 %v456_v39, %v381_v1  ;;  %v482_v53 = vadd.f32 %v460_v40, %v382_v4 }
  0x23   : > { %v483_v54 = vadd.f32 %v464_v41, %v383_v7  ;;  %v490_v55 = vrot.slane %v1041_v19, %v1030_v13  ;;  %v494_v50 = vrot.slane %v1041_v19, %v1032_v14  ;;  %v498_v52 = vrot.slane %v1043_v20, %v1030_v13 }
  0x24   : > { %v502_v9 = vrot.slane %v1043_v20, %v1032_v14  ;;  %v484_v56 = vadd.f32 %v468_v44, %v384_v42  ;;  %v485_v57 = vadd.f32 %v472_v10, %v385_v37  ;;  %v506_v58 = vrot.slane %v1045_v21, %v1030_v13 }
  0x25   : > { %v510_v59 = vrot.slane %v1045_v21, %v1032_v14  ;;  %v514_v60 = vrot.slane %v1051_v24, %v1030_v13  ;;  %v518_v61 = vrot.slane %v1051_v24, %v1032_v14  ;;  %v522_v62 = vrot.slane %v1053_v25, %v1030_v13 }
  0x26   : > { %v526_v63 = vrot.slane %v1053_v25, %v1032_v14  ;;  %v486_v0 = vadd.f32 %v476_v45, %v386_v43  ;;  %v540_v1 = vrot.slane %v490_v55, %v1030_v13  ;;  %v544_v2 = vrot.slane %v494_v50, %v1030_v13 }
  0x27   : > { %v548_v3 = vrot.slane %v498_v52, %v1030_v13  ;;  %v552_v4 = vrot.slane %v502_v9, %v1030_v13  ;;  %v556_v5 = vrot.slane %v506_v58, %v1030_v13  ;;  %v560_v6 = vrot.slane %v510_v59, %v1030_v13 }
  0x28   : > { %v572_v7 = vrot.slane %v522_v62, %v1030_v13  ;;  %v580_v11 = vcombine.high %v1059_v30, %v1059_v30  ;;  %v587_v14 = vrot.slane %v1059_v30, %v1028_v12  ;;  %v597_v26 = vcombine.high %v1064_v34, %v1064_v34 }
  0x29   : > { %v604_v27 = vrot.slane %v1064_v34, %v1028_v12  ;;  %v564_v28 = vrot.slane %v514_v60, %v1030_v13  ;;  %v568_v29 = vrot.slane %v518_v61, %v1030_v13  ;;  %v576_v31 = vrot.slane %v526_v63, %v1030_v13 }
  0x2a   : > { %v620_v32 = vrot.slane %v221_v38, %v1028_v12  ;;  %v594_v33 = vrot.slane %v580_v11, %v1028_v12  ;;  %v595_v35 = vcombine.high %v587_v14, %v587_v14  ;;  %v611_v36 = vrot.slane %v597_v26, %v1028_v12 }
  0x2b   : > { %v612_v37 = vcombine.high %v604_v27, %v604_v27  ;;  %v632_v40 = vmul.f32 %v587_v14, %v540_v1  ;;  %v636_v41 = vmul.f32 %v604_v27, %v556_v5  ;;  %v652_v50 = vmul.f32 %v1059_v30, %v1036_v16 }
  0x2c   : > { %v621_v39 = vcombine.high %v620_v32, %v620_v32  ;;  %v640_v42 = vmul.f32 %v620_v32, %v572_v7  ;;  %v596_v43 = vcombine.high %v594_v33, %v594_v33  ;;  %v613_v44 = vcombine.high %v611_v36, %v611_v36 }
  0x2d   : > { %v633_v10 = vmul.f32 %v595_v35, %v544_v2  ;;  %v634_v45 = vmul.f32 %v594_v33, %v548_v3  ;;  %v637_v55 = vmul.f32 %v612_v37, %v560_v6  ;;  %v638_v13 = vmul.f32 %v611_v36, %v564_v28 }
  0x2e   : > { %v653_v52 = vmul.f32 %v1064_v34, %v1038_v17  ;;  %v635_v9 = vmul.f32 %v596_v43, %v552_v4  ;;  %v639_v58 = vmul.f32 %v613_v44, %v568_v29  ;;  %v641_v59 = vmul.f32 %v621_v39, %v576_v31 }
  0x2f   : > { %v654_v60 = vmul.f32 %v221_v38, %v216_v18  ;;  %v642_v61 = vadd.f32 %v632_v40, %v477_v46  ;;  %v643_v62 = vadd.f32 %v633_v10, %v478_v47  ;;  %v644_v63 = vadd.f32 %v634_v45, %v479_v48 }
  0x30   : > { %v646_v1 = vadd.f32 %v636_v41, %v481_v51  ;;  %v647_v2 = vadd.f32 %v637_v55, %v482_v53  ;;  %v648_v3 = vadd.f32 %v638_v13, %v483_v54  ;;  %v650_v5 = vadd.f32 %v640_v42, %v485_v57 }
  0x31   : > { %v658_v16 = vrot.slane %v1041_v19, %v1034_v15  ;;  %v662_v17 = vrot.slane %v1041_v19, %v1047_v22  ;;  %v666_v30 = vrot.slane %v1043_v20, %v1034_v15  ;;  %v670_v8 = vrot.slane %v1043_v20, %v1047_v22 }
  0x32   : > { %v674_v18 = vrot.slane %v1045_v21, %v1034_v15  ;;  %v645_v23 = vadd.f32 %v635_v9, %v1113_v49  ;;  %v649_v34 = vadd.f32 %v639_v58, %v484_v56  ;;  %v678_v38 = vrot.slane %v1045_v21, %v1047_v22 }
  0x33   : > { %v682_v46 = vrot.slane %v1051_v24, %v1034_v15  ;;  %v651_v47 = vadd.f32 %v641_v59, %v486_v0  ;;  %v686_v19 = vrot.slane %v1051_v24, %v1047_v22  ;;  %v690_v48 = vrot.slane %v1053_v25, %v1034_v15 }
  0x34   : > { %v694_v20 = vrot.slane %v1053_v25, %v1047_v22  ;;  %v708_v51 = vrot.slane %v658_v16, %v1034_v15  ;;  %v712_v49 = vrot.slane %v662_v17, %v1034_v15  ;;  %v716_v53 = vrot.slane %v666_v30, %v1034_v15 }
  0x35   : > { %v720_v21 = vrot.slane %v670_v8, %v1034_v15  ;;  %v724_v54 = vrot.slane %v674_v18, %v1034_v15  ;;  %v728_v56 = vrot.slane %v678_v38, %v1034_v15  ;;  %v732_v24 = vrot.slane %v682_v46, %v1034_v15 }
  0x36   : > { %v748_v57 = vcombine.high %v652_v50, %v652_v50  ;;  %v755_v0 = vrot.slane %v652_v50, %v1028_v12  ;;  %v765_v4 = vcombine.high %v653_v52, %v653_v52  ;;  %v772_v22 = vrot.slane %v653_v52, %v1028_v12 }
  0x37   : > { %v788_v25 = vrot.slane %v654_v60, %v1028_v12  ;;  %v736_v6 = vrot.slane %v686_v19, %v1034_v15  ;;  %v740_v7 = vrot.slane %v690_v48, %v1034_v15  ;;  %v744_v11 = vrot.slane %v694_v20, %v1034_v15 }
  0x38   : > { %v762_v14 = vrot.slane %v748_v57, %v1028_v12  ;;  %v763_v26 = vcombine.high %v755_v0, %v755_v0  ;;  %v779_v27 = vrot.slane %v765_v4, %v1028_v12  ;;  %v780_v28 = vcombine.high %v772_v22, %v772_v22 }
  0x39   : > { %v789_v29 = vcombine.high %v788_v25, %v788_v25  ;;  %v800_v32 = vmul.f32 %v755_v0, %v708_v51  ;;  %v804_v35 = vmul.f32 %v772_v22, %v724_v54  ;;  %v808_v42 = vmul.f32 %v788_v25, %v740_v7 }
  0x3a   : > { %v764_v31 = vcombine.high %v762_v14, %v762_v14  ;;  %v802_v33 = vmul.f32 %v762_v14, %v716_v53  ;;  %v781_v36 = vcombine.high %v779_v27, %v779_v27  ;;  %v801_v37 = vmul.f32 %v763_v26, %v712_v49 }
  0x3b   : > { %v805_v39 = vmul.f32 %v780_v28, %v728_v56  ;;  %v806_v40 = vmul.f32 %v779_v27, %v732_v24  ;;  %v809_v43 = vmul.f32 %v789_v29, %v744_v11  ;;  %v810_v15 = vadd.f32 %v800_v32, %v642_v61 }
  0x3c   : > { %v803_v41 = vmul.f32 %v764_v31, %v720_v21  ;;  %v807_v44 = vmul.f32 %v781_v36, %v736_v6  ;;  %v811_v10 = vadd.f32 %v801_v37, %v643_v62  ;;  %v812_v45 = vadd.f32 %v802_v33, %v644_v63 }
  0x3d   : > { %v814_v55 = vadd.f32 %v804_v35, %v646_v1  ;;  %v815_v50 = vadd.f32 %v805_v39, %v647_v2  ;;  %v816_v52 = vadd.f32 %v806_v40, %v648_v3  ;;  %v818_v9 = vadd.f32 %v808_v42, %v650_v5 }
  0x3e   : > { %v813_v13 = vadd.f32 %v803_v41, %v645_v23  ;;  %v817_v58 = vadd.f32 %v807_v44, %v649_v34  ;;  %v819_v59 = vadd.f32 %v809_v43, %v651_v47  ;;  %v830_v60 = vcombine.low %v810_v15, %v811_v10 }
  0x3f   : > { %v847_v17 = vcombine.low %v814_v55, %v815_v50 }
  0x40   : > { %v831_v16 = vcombine.low %v812_v45, %v813_v13  ;;  %v838_v61 = vrot.slane %v830_v60, %v1028_v12  ;;  %v848_v30 = vcombine.low %v816_v52, %v817_v58  ;;  %v864_v8 = vcombine.low %v818_v9, %v819_v59 }
  0x41   : > { %v855_v63 = vrot.slane %v847_v17, %v1028_v12 }
  0x42   : > { %v845_v62 = vrot.slane %v831_v16, %v1028_v12  ;;  %v862_v1 = vrot.slane %v848_v30, %v1028_v12  ;;  %959 = vst.sshfl [vmem:[%s210_s28 + $0x10] sm:$0x33 pattern:$0x76325410] %v864_v8 }
  0x44   : > { %v846_v2 = vcombine.low %v838_v61, %v845_v62  ;;  %v863_v3 = vcombine.low %v855_v63, %v862_v1 }
  0x46   : > { %875 = vst [vmem:[%s210_s28] sm:$0xff] %v846_v2  ;;  %876 = vst [vmem:[%s210_s28 + $0x8] sm:$0xff] %v863_v3 }
  0x47 PF: > { %s13_s12 = sadd.s32 1, %s977_s12  }
  0x48   : > { %p10_p4 = scmp.ge.s32.totalorder %s13_s12, 4  }
  0x4a   :  { %12 = sbr.rel (!%p10_p4) target bundleno = 1 (0x1), region = 68 }

// kernel: conv_logic_mnist_model.11
= control target key start
LH: loop header
LB: loop body
LE: loop exit
PB: predicated region body
PF: predicated region fallthrough
CT: control target
= control target key end

     0   :  { %v57_v43 = vlaneseq  ;;  %vm998_vm0 = vcmask 80896   ;;  %s2339_s3 = inlined_call_operand.vmem [shape: f32[1280,10], index: 3, kind: input, shape index: {}]   ;;  %s2340_s0 = inlined_call_operand.vmem [shape: bf16[8,1280], index: 0, kind: input, shape index: {}]   ;;  %s2341_s1 = inlined_call_operand.vmem [shape: bf16[8,1280], index: 1, kind: input, shape index: {}]   ;;  %s2342_s2 = inlined_call_operand.vmem [shape: f32[4,1280], index: 2, kind: input, shape index: {}]   ;;  %s2343_s4 = inlined_call_operand.vmem [shape: f32[8,10], index: 4, kind: output, shape index: {}]  }
   0x1   :  { %v503_v0 = vld [vmem:[%s2339_s3 + $0x80] sm:$0xff]  ;;  %v504_v1 = vld [vmem:[%s2339_s3 + $0x88] sm:$0xff]  ;;  %v505_v11 = vld [vmem:[%s2339_s3 + $0x90] sm:$0xff] }
   0x2   :  { %v535_v2 = vld [vmem:[%s2339_s3 + $0x180] sm:$0xff]  ;;  %v1179_v3 = vpack.c.bf16 %v504_v1, %v503_v0  ;;  %v536_v4 = vld [vmem:[%s2339_s3 + $0x188] sm:$0xff]  ;;  %v506_v13 = vld [vmem:[%s2339_s3 + $0x98] sm:$0xff]  ;;  %v58_v60 = vshrl.u32 %v57_v43, 7 }
   0x3   :  { %v487_v5 = vld [vmem:[%s2339_s3] sm:$0xff]  ;;  %v488_v6 = vld [vmem:[%s2339_s3 + $0x8] sm:$0xff]  ;;  %v1211_v7 = vpack.c.bf16 %v536_v4, %v535_v2  ;;  %v537_v14 = vld [vmem:[%s2339_s3 + $0x190] sm:$0xff]  ;;  %v1183_v16 = vpack.c.bf16 %v506_v13, %v505_v11 }
   0x4   :  { %v1181_v8 = vpack.c.bf16 %v488_v6, %v487_v5  ;;  %v519_v9 = vld [vmem:[%s2339_s3 + $0x100] sm:$0xff]  ;;  %v520_v10 = vld [vmem:[%s2339_s3 + $0x108] sm:$0xff]  ;;  %1180 = vmatprep.subr.bf16.mxu0 %v1179_v3  ;;  %v538_v15 = vld [vmem:[%s2339_s3 + $0x198] sm:$0xff]  ;;  %v1546_v13 = vsub.s32 1, %v58_v60 }
   0x5   :  { %v1213_v12 = vpack.c.bf16 %v520_v10, %v519_v9  ;;  %1212 = vmatprep.subr.bf16.mxu1 %v1211_v7  ;;  %v1215_v17 = vpack.c.bf16 %v538_v15, %v537_v14  ;;  %v489_v18 = vld [vmem:[%s2339_s3 + $0x10] sm:$0xff]  ;;  %v490_v19 = vld [vmem:[%s2339_s3 + $0x18] sm:$0xff]  ;;  %v507_v23 = vld [vmem:[%s2339_s3 + $0xa0] sm:$0xff] }
   0x6   :  { %1182 = vmatpush3.bf16.msra.mxu0 %v1181_v8  ;;  %v521_v20 = vld [vmem:[%s2339_s3 + $0x110] sm:$0xff]  ;;  %v1185_v21 = vpack.c.bf16 %v490_v19, %v489_v18  ;;  %v522_v22 = vld [vmem:[%s2339_s3 + $0x118] sm:$0xff]  ;;  %v508_v24 = vld [vmem:[%s2339_s3 + $0xa8] sm:$0xff]  ;;  %v1563_v18 = vsub.s32 5, %v58_v60  ;;  %v1565_v19 = vsub.s32 0, %v58_v60 }
   0x7   :  { %1214 = vmatpush3.bf16.msra.mxu1 %v1213_v12  ;;  %1184 = vmatprep.subr.bf16.mxu0 %v1183_v16  ;;  %v1217_v25 = vpack.c.bf16 %v522_v22, %v521_v20  ;;  %v1187_v26 = vpack.c.bf16 %v508_v24, %v507_v23  ;;  %v539_v27 = vld [vmem:[%s2339_s3 + $0x1a0] sm:$0xff]  ;;  %v540_v28 = vld [vmem:[%s2339_s3 + $0x1a8] sm:$0xff]  ;;  %v509_v35 = vld [vmem:[%s2339_s3 + $0xb0] sm:$0xff]  ;;  %v1567_v20 = vsub.s32 4, %v58_v60 }
   0x8   :  { %1216 = vmatprep.subr.bf16.mxu1 %v1215_v17  ;;  %v491_v29 = vld [vmem:[%s2339_s3 + $0x20] sm:$0xff]  ;;  %v1219_v30 = vpack.c.bf16 %v540_v28, %v539_v27  ;;  %v492_v31 = vld [vmem:[%s2339_s3 + $0x28] sm:$0xff]  ;;  %v510_v36 = vld [vmem:[%s2339_s3 + $0xb8] sm:$0xff]  ;;  %v1590_v27 = vsub.s32 7, %v58_v60 }
   0x9   :  { %v523_v32 = vld [vmem:[%s2339_s3 + $0x120] sm:$0xff]  ;;  %v524_v33 = vld [vmem:[%s2339_s3 + $0x128] sm:$0xff]  ;;  %v1189_v34 = vpack.c.bf16 %v492_v31, %v491_v29  ;;  %v541_v37 = vld [vmem:[%s2339_s3 + $0x1b0] sm:$0xff]  ;;  %v1191_v39 = vpack.c.bf16 %v510_v36, %v509_v35 }
   0xa   :  { %1186 = vmatpush3.bf16.msra.mxu0 %v1185_v21  ;;  %v1221_v38 = vpack.c.bf16 %v524_v33, %v523_v32  ;;  %v542_v40 = vld [vmem:[%s2339_s3 + $0x1b8] sm:$0xff]  ;;  %v493_v41 = vld [vmem:[%s2339_s3 + $0x30] sm:$0xff]  ;;  %v511_v47 = vld [vmem:[%s2339_s3 + $0xc0] sm:$0xff] }
   0xb   :  { %1218 = vmatpush3.bf16.msra.mxu1 %v1217_v25  ;;  %1188 = vmatprep.subr.bf16.mxu0 %v1187_v26  ;;  %v494_v42 = vld [vmem:[%s2339_s3 + $0x38] sm:$0xff]  ;;  %v1223_v44 = vpack.c.bf16 %v542_v40, %v541_v37  ;;  %v525_v45 = vld [vmem:[%s2339_s3 + $0x130] sm:$0xff]  ;;  %v512_v48 = vld [vmem:[%s2339_s3 + $0xc8] sm:$0xff]  ;;  %v1586_v25 = vsub.s32 2, %v58_v60  ;;  %v1588_v26 = vsub.s32 6, %v58_v60 }
   0xc   :  { %1220 = vmatprep.subr.bf16.mxu1 %v1219_v30  ;;  %v526_v46 = vld [vmem:[%s2339_s3 + $0x138] sm:$0xff]  ;;  %v543_v49 = vld [vmem:[%s2339_s3 + $0x1c0] sm:$0xff]  ;;  %v544_v50 = vld [vmem:[%s2339_s3 + $0x1c8] sm:$0xff]  ;;  %v1193_v51 = vpack.c.bf16 %v494_v42, %v493_v41  ;;  %v1195_v56 = vpack.c.bf16 %v512_v48, %v511_v47  ;;  %v1634_v41 = vsub.s32 3, %v58_v60 }
   0xd   :  { %v495_v52 = vld [vmem:[%s2339_s3 + $0x40] sm:$0xff]  ;;  %v496_v53 = vld [vmem:[%s2339_s3 + $0x48] sm:$0xff]  ;;  %v1225_v55 = vpack.c.bf16 %v526_v46, %v525_v45  ;;  %v513_v58 = vld [vmem:[%s2339_s3 + $0xd0] sm:$0xff]  ;;  %v1227_v61 = vpack.c.bf16 %v544_v50, %v543_v49 }
   0xe   :  { %1190 = vmatpush3.bf16.msra.mxu0 %v1189_v34  ;;  %v527_v54 = vld [vmem:[%s2339_s3 + $0x140] sm:$0xff]  ;;  %v528_v57 = vld [vmem:[%s2339_s3 + $0x148] sm:$0xff]  ;;  %v514_v59 = vld [vmem:[%s2339_s3 + $0xd8] sm:$0xff]  ;;  %v1197_v4 = vpack.c.bf16 %v496_v53, %v495_v52 }
   0xf   :  { %1222 = vmatpush3.bf16.msra.mxu1 %v1221_v38  ;;  %1192 = vmatprep.subr.bf16.mxu0 %v1191_v39  ;;  %v545_v62 = vld [vmem:[%s2339_s3 + $0x1d0] sm:$0xff]  ;;  %v546_v63 = vld [vmem:[%s2339_s3 + $0x1d8] sm:$0xff]  ;;  %v1519_v5 = vld [vmem:[%s2339_s3 + $0xe0] sm:$0xff]  ;;  %v1229_v8 = vpack.c.bf16 %v528_v57, %v527_v54  ;;  %v1199_v9 = vpack.c.bf16 %v514_v59, %v513_v58 }
  0x10   :  { %1224 = vmatprep.subr.bf16.mxu1 %v1223_v44  ;;  %v1499_v0 = vld [vmem:[%s2339_s3 + $0x50] sm:$0xff]  ;;  %v1504_v1 = vld [vmem:[%s2339_s3 + $0x58] sm:$0xff]  ;;  %v1524_v6 = vld [vmem:[%s2339_s3 + $0xe8] sm:$0xff]  ;;  %v1231_v14 = vpack.c.bf16 %v546_v63, %v545_v62 }
  0x11   :  { %v1509_v2 = vld [vmem:[%s2339_s3 + $0x150] sm:$0xff]  ;;  %v1514_v3 = vld [vmem:[%s2339_s3 + $0x158] sm:$0xff]  ;;  %v1529_v7 = vld [vmem:[%s2339_s3 + $0x1e0] sm:$0xff]  ;;  %v1201_v21 = vpack.c.bf16 %v1504_v1, %v1499_v0  ;;  %v1203_v29 = vpack.c.bf16 %v1524_v6, %v1519_v5 }
  0x12   :  { %1194 = vmatpush3.bf16.msra.mxu0 %v1193_v51  ;;  %v1534_v10 = vld [vmem:[%s2339_s3 + $0x1e8] sm:$0xff]  ;;  %v1539_v11 = vld [vmem:[%s2339_s3 + $0x60] sm:$0xff]  ;;  %v1561_v17 = vld [vmem:[%s2339_s3 + $0xf0] sm:$0xff]  ;;  %v1233_v28 = vpack.c.bf16 %v1514_v3, %v1509_v2 }
  0x13   :  { %1226 = vmatpush3.bf16.msra.mxu1 %v1225_v55  ;;  %1196 = vmatprep.subr.bf16.mxu0 %v1195_v56  ;;  %v1544_v12 = vld [vmem:[%s2339_s3 + $0x68] sm:$0xff]  ;;  %v1551_v15 = vld [vmem:[%s2339_s3 + $0x160] sm:$0xff]  ;;  %v1574_v22 = vld [vmem:[%s2339_s3 + $0xf8] sm:$0xff]  ;;  %v1235_v30 = vpack.c.bf16 %v1534_v10, %v1529_v7 }
  0x14   :  { %1228 = vmatprep.subr.bf16.mxu1 %v1227_v61  ;;  %v1556_v16 = vld [vmem:[%s2339_s3 + $0x168] sm:$0xff]  ;;  %v1579_v23 = vld [vmem:[%s2339_s3 + $0x1f0] sm:$0xff]  ;;  %v1584_v24 = vld [vmem:[%s2339_s3 + $0x1f8] sm:$0xff]  ;;  %v1205_v31 = vpack.c.bf16 %v1544_v12, %v1539_v11  ;;  %v1207_v36 = vpack.c.bf16 %v1574_v22, %v1561_v17 }
  0x15   :  { %v1603_v32 = vld [vmem:[%s2339_s3 + $0x70] sm:$0xff]  ;;  %v1608_v33 = vld [vmem:[%s2339_s3 + $0x78] sm:$0xff]  ;;  %v1237_v35 = vpack.c.bf16 %v1556_v16, %v1551_v15  ;;  %v1239_v37 = vpack.c.bf16 %v1584_v24, %v1579_v23  ;;  %v1627_v39 = vld [vmem:[%s2340_s0] sm:$0xff] }
  0x16   :  { %1198 = vmatpush3.bf16.msra.mxu0 %v1197_v4  ;;  %v1613_v34 = vld [vmem:[%s2339_s3 + $0x170] sm:$0xff]  ;;  %v534_v38 = vld [vmem:[%s2339_s3 + $0x178] sm:$0xff]  ;;  %v1632_v40 = vld [vmem:[%s2341_s1] sm:$0xff]  ;;  %v1209_v42 = vpack.c.bf16 %v1608_v33, %v1603_v32  ;;  %v22_v44 = vunpack.c.l.bf16 %v1627_v39  ;;  %v23_v45 = vunpack.c.h.bf16 %v1627_v39 }
  0x17   :  { %1230 = vmatpush3.bf16.msra.mxu1 %v1229_v8  ;;  %1200 = vmatprep.subr.bf16.mxu0 %v1199_v9  ;;  %v1241_v43 = vpack.c.bf16 %v534_v38, %v1613_v34  ;;  %v1644_v46 = vld [vmem:[%s2342_s2] sm:$0xff]  ;;  %v1649_v47 = vld [vmem:[%s2340_s0 + $0x8] sm:$0xff]  ;;  %v38_v49 = vunpack.c.h.bf16 %v1632_v40  ;;  %v37_v54 = vunpack.c.l.bf16 %v1632_v40 }
  0x18   :  { %1232 = vmatprep.subr.bf16.mxu1 %v1231_v14  ;;  %v1654_v48 = vld [vmem:[%s2341_s1 + $0x8] sm:$0xff]  ;;  %v64_v50 = vrot.slane %v1644_v46, %v1563_v18  ;;  %v164_v51 = vrot.slane %v1644_v46, %v1567_v20  ;;  %v264_v52 = vrot.slane %v1644_v46, %v1588_v26  ;;  %v384_v55 = vrot.slane %v1644_v46, %v1590_v27 }
  0x19   :  { %v1666_v53 = vld [vmem:[%s2342_s2 + $0x8] sm:$0xff]  ;;  %v24_v56 = vunpack.c.l.bf16 %v1649_v47  ;;  %v25_v57 = vunpack.c.h.bf16 %v1649_v47  ;;  %v40_v61 = vunpack.c.h.bf16 %v1654_v48  ;;  %v368_v62 = vmul.f32 %v38_v49, %v23_v45  ;;  %v1762_v47 = vld [vmem:[%s2339_s3 + $0x218] sm:$0xff] }
  0x1a   :  { %1202 = vmatpush3.bf16.msra.mxu0 %v1201_v21  ;;  %v114_v58 = vrot.slane %v64_v50, %v1546_v13  ;;  %v214_v59 = vrot.slane %v164_v51, %v1565_v19  ;;  %v314_v60 = vrot.slane %v264_v52, %v1586_v25  ;;  %v434_v63 = vrot.slane %v384_v55, %v1634_v41  ;;  %v552_v50 = vld [vmem:[%s2339_s3 + $0x208] sm:$0xff]  ;;  %v599_v51 = vld [vmem:[%s2339_s3 + $0x380] sm:$0xff] }
  0x1b   :  { %1234 = vmatpush3.bf16.msra.mxu1 %v1233_v28  ;;  %1204 = vmatprep.subr.bf16.mxu0 %v1203_v29  ;;  %v72_v0 = vrot.slane %v1666_v53, %v1563_v18  ;;  %v172_v1 = vrot.slane %v1666_v53, %v1567_v20  ;;  %v272_v4 = vrot.slane %v1666_v53, %v1588_v26  ;;  %v39_v11 = vunpack.c.l.bf16 %v1654_v48  ;;  %v600_v52 = vld [vmem:[%s2339_s3 + $0x388] sm:$0xff] }
  0x1c   :  { %1236 = vmatprep.subr.bf16.mxu1 %v1235_v30  ;;  %v148_v2 = vmul.f32 %v114_v58, %v23_v45  ;;  %v348_v3 = vmul.f32 %v314_v60, %v38_v49  ;;  %v370_v5 = vmul.f32 %v40_v61, %v25_v57  ;;  %v468_v6 = vmul.f32 %v434_v63, %v368_v62  ;;  %v570_v60 = vld [vmem:[%s2339_s3 + $0x298] sm:$0xff] }
  0x1d   :  { %v122_v7 = vrot.slane %v72_v0, %v1546_v13  ;;  %v222_v8 = vrot.slane %v172_v1, %v1565_v19  ;;  %v392_v9 = vrot.slane %v1666_v53, %v1590_v27  ;;  %v322_v12 = vrot.slane %v272_v4, %v1586_v25  ;;  %v1747_v1 = vld [vmem:[%s2339_s3 + $0x300] sm:$0xff] }
  0x1e   :  { %1206 = vmatpush3.bf16.msra.mxu0 %v1205_v31  ;;  %v248_v10 = vadd.f32 %v214_v59, %v148_v2  ;;  %v60_v14 = vrot.slane %v1644_v46, %v1546_v13  ;;  %v160_v17 = vrot.slane %v1644_v46, %v1565_v19  ;;  %v260_v21 = vrot.slane %v1644_v46, %v1586_v25  ;;  %v569_v59 = vld [vmem:[%s2339_s3 + $0x290] sm:$0xff] }
  0x1f   :  { %1238 = vmatpush3.bf16.msra.mxu1 %v1237_v35  ;;  %1208 = vmatprep.subr.bf16.mxu0 %v1207_v36  ;;  %v150_v15 = vmul.f32 %v122_v7, %v25_v57  ;;  %v442_v16 = vrot.slane %v392_v9, %v1634_v41  ;;  %v350_v23 = vmul.f32 %v322_v12, %v40_v61  ;;  %v1757_v2 = vld [vmem:[%s2339_s3 + $0x210] sm:$0xff]  ;;  %v1784_v9 = vld [vmem:[%s2339_s3 + $0x318] sm:$0xff]  ;;  %v1799_v12 = vld [vmem:[%s2339_s3 + $0x220] sm:$0xff] }
  0x20   :  { %1240 = vmatprep.subr.bf16.mxu1 %v1239_v37  ;;  %v358_v22 = vadd.f32 %v348_v3, %v248_v10  ;;  %v110_v24 = vrot.slane %v60_v14, %v1546_v13  ;;  %v367_v28 = vmul.f32 %v37_v54, %v22_v44  ;;  %v210_v31 = vrot.slane %v160_v17, %v1565_v19  ;;  %v1772_v3 = vld [vmem:[%s2339_s3 + $0x398] sm:$0xff]  ;;  %v1789_v10 = vld [vmem:[%s2339_s3 + $0x2a0] sm:$0xff]  ;;  %v1804_v14 = vld [vmem:[%s2339_s3 + $0x228] sm:$0xff] }
  0x21   :  { %v250_v29 = vadd.f32 %v222_v8, %v150_v15  ;;  %v470_v30 = vmul.f32 %v442_v16, %v370_v5  ;;  %v310_v32 = vrot.slane %v260_v21, %v1586_v25  ;;  %v380_v35 = vrot.slane %v1644_v46, %v1634_v41  ;;  %v1779_v8 = vld [vmem:[%s2339_s3 + $0x310] sm:$0xff]  ;;  %v1809_v21 = vld [vmem:[%s2339_s3 + $0x3a0] sm:$0xff] }
  0x22   :  { %1210 = vmatpush3.bf16.msra.mxu0 %v1209_v42  ;;  %v478_v33 = vadd.f32 %v468_v6, %v358_v22  ;;  %v147_v34 = vmul.f32 %v110_v24, %v22_v44  ;;  %v68_v36 = vrot.slane %v1666_v53, %v1546_v13  ;;  %v168_v39 = vrot.slane %v1666_v53, %v1565_v19  ;;  %v567_v42 = vld [vmem:[%s2339_s3 + $0x280] sm:$0xff]  ;;  %v1814_v22 = vld [vmem:[%s2339_s3 + $0x3a8] sm:$0xff] }
  0x23   :  { %1242 = vmatpush3.bf16.msra.mxu1 %v1241_v43  ;;  %v360_v37 = vadd.f32 %v350_v23, %v250_v29  ;;  %v347_v38 = vmul.f32 %v310_v32, %v37_v54  ;;  %v268_v40 = vrot.slane %v1666_v53, %v1586_v25  ;;  %v568_v43 = vld [vmem:[%s2339_s3 + $0x288] sm:$0xff]  ;;  %v1717_v44 = vld [vmem:[%s2339_s3 + $0x200] sm:$0xff]  ;;  %v430_v46 = vrot.slane %v380_v35, %v1634_v41  ;;  %v1834_v29 = vld [vmem:[%s2339_s3 + $0x2b8] sm:$0xff] }
  0x24   :  { %711 = vmatprep.mubr.f32.mxu0 %v478_v33  ;;  %v247_v45 = vadd.f32 %v210_v31, %v147_v34  ;;  %v118_v48 = vrot.slane %v68_v36, %v1546_v13  ;;  %v369_v49 = vmul.f32 %v39_v11, %v24_v56  ;;  %v218_v55 = vrot.slane %v168_v39, %v1565_v19  ;;  %v1819_v23 = vld [vmem:[%s2339_s3 + $0x320] sm:$0xff]  ;;  %v1824_v24 = vld [vmem:[%s2339_s3 + $0x328] sm:$0xff]  ;;  %v1844_v31 = vld [vmem:[%s2339_s3 + $0x238] sm:$0xff] }
  0x25   :  { %v480_v54 = vadd.f32 %v470_v30, %v360_v37  ;;  %v318_v57 = vrot.slane %v268_v40, %v1586_v25  ;;  %v388_v58 = vrot.slane %v1666_v53, %v1634_v41  ;;  %v467_v62 = vmul.f32 %v430_v46, %v367_v28  ;;  %v1752_v53 = vld [vmem:[%s2339_s3 + $0x308] sm:$0xff]  ;;  %v1829_v28 = vld [vmem:[%s2339_s3 + $0x2b0] sm:$0xff]  ;;  %v1854_v34 = vld [vmem:[%s2339_s3 + $0x3b8] sm:$0xff] }
  0x26   :  { %v357_v61 = vadd.f32 %v347_v38, %v247_v45  ;;  %v149_v63 = vmul.f32 %v118_v48, %v24_v56  ;;  %v1243_v0 = vpack.c.bf16 %v568_v43, %v567_v42  ;;  %v1767_v56 = vld [vmem:[%s2339_s3 + $0x390] sm:$0xff]  ;;  %v1245_v6 = vpack.c.bf16 %v552_v50, %v1717_v44  ;;  %v1864_v36 = vld [vmem:[%s2339_s3 + $0x338] sm:$0xff]  ;;  %v1869_v37 = vld [vmem:[%s2339_s3 + $0x2c0] sm:$0xff] }
  0x27   :  { %781 = vmatprep.mubr.f32.mxu1 %v480_v54  ;;  %v349_v4 = vmul.f32 %v318_v57, %v39_v11  ;;  %v438_v5 = vrot.slane %v388_v58, %v1634_v41  ;;  %v1275_v7 = vpack.c.bf16 %v600_v52, %v599_v51  ;;  %v1794_v11 = vld [vmem:[%s2339_s3 + $0x2a8] sm:$0xff]  ;;  %v1247_v17 = vpack.c.bf16 %v570_v60, %v569_v59  ;;  %v1839_v30 = vld [vmem:[%s2339_s3 + $0x230] sm:$0xff]  ;;  %v1879_v39 = vld [vmem:[%s2339_s3 + $0x240] sm:$0xff] }
  0x28   :  { %v477_v15 = vadd.f32 %v467_v62, %v357_v61  ;;  %v249_v16 = vadd.f32 %v218_v55, %v149_v63  ;;  %1244 = vmatprep.subr.bf16.mxu0 %v1243_v0  ;;  %v1849_v33 = vld [vmem:[%s2339_s3 + $0x3b0] sm:$0xff]  ;;  %v1874_v38 = vld [vmem:[%s2339_s3 + $0x2c8] sm:$0xff]  ;;  %v1889_v43 = vld [vmem:[%s2339_s3 + $0x3c0] sm:$0xff]  ;;  %v1277_v48 = vpack.c.bf16 %v1752_v53, %v1747_v1  ;;  %v1279_v50 = vpack.c.bf16 %v1772_v3, %v1767_v56 }
  0x29   :  { %v469_v32 = vmul.f32 %v438_v5, %v369_v49  ;;  %1276 = vmatprep.subr.bf16.mxu1 %v1275_v7  ;;  %v1859_v35 = vld [vmem:[%s2339_s3 + $0x330] sm:$0xff]  ;;  %v1884_v40 = vld [vmem:[%s2339_s3 + $0x248] sm:$0xff]  ;;  %v1899_v45 = vld [vmem:[%s2339_s3 + $0x340] sm:$0xff]  ;;  %v1249_v49 = vpack.c.bf16 %v1762_v47, %v1757_v2  ;;  %v1281_v57 = vpack.c.bf16 %v1784_v9, %v1779_v8  ;;  %v1251_v58 = vpack.c.bf16 %v1794_v11, %v1789_v10 }
  0x2a   :  { %712 = vmatmul.mubr.f32.vlgmr.msra.gmra.mrb[0].mxu0 %v477_v15  ;;  %v359_v42 = vadd.f32 %v349_v4, %v249_v16  ;;  %v1894_v44 = vld [vmem:[%s2339_s3 + $0x3c8] sm:$0xff]  ;;  %v1915_v51 = vld [vmem:[%s2339_s3 + $0x2d0] sm:$0xff]  ;;  %v1920_v52 = vld [vmem:[%s2339_s3 + $0x2d8] sm:$0xff]  ;;  %v1253_v59 = vpack.c.bf16 %v1804_v14, %v1799_v12  ;;  %v1283_v63 = vpack.c.bf16 %v1814_v22, %v1809_v21  ;;  %v1285_v0 = vpack.c.bf16 %v1824_v24, %v1819_v23 }
  0x2b   :  { %v1904_v46 = vld [vmem:[%s2339_s3 + $0x348] sm:$0xff]  ;;  %1246 = vmatpush3.bf16.msra.mxu0 %v1245_v6  ;;  %v1925_v54 = vld [vmem:[%s2339_s3 + $0x250] sm:$0xff]  ;;  %v1936_v60 = vld [vmem:[%s2339_s3 + $0x258] sm:$0xff]  ;;  %v1255_v1 = vpack.c.bf16 %v1834_v29, %v1829_v28  ;;  %v1257_v53 = vpack.c.bf16 %v1844_v31, %v1839_v30  ;;  %v1287_v3 = vpack.c.bf16 %v1854_v34, %v1849_v33  ;;  %v1289_v4 = vpack.c.bf16 %v1864_v36, %v1859_v35 }
  0x2c   :  { %v479_v55 = vadd.f32 %v469_v32, %v359_v42  ;;  %1248 = vmatprep.subr.bf16.mxu0 %v1247_v17  ;;  %v1941_v61 = vld [vmem:[%s2339_s3 + $0x3d0] sm:$0xff]  ;;  %v1946_v62 = vld [vmem:[%s2339_s3 + $0x3d8] sm:$0xff]  ;;  %v1259_v5 = vpack.c.bf16 %v1874_v38, %v1869_v37  ;;  %v1261_v6 = vpack.c.bf16 %v1884_v40, %v1879_v39  ;;  %v1291_v9 = vpack.c.bf16 %v1894_v44, %v1889_v43  ;;  %v1998_v12 = vld [vmem:[%s2339_s3 + $0x2e0] sm:$0xff] }
  0x2d   :  { %v1959_v2 = vld [vmem:[%s2339_s3 + $0x350] sm:$0xff]  ;;  %v1964_v47 = vld [vmem:[%s2339_s3 + $0x358] sm:$0xff]  ;;  %v1293_v10 = vpack.c.bf16 %v1904_v46, %v1899_v45  ;;  %v1263_v11 = vpack.c.bf16 %v1920_v52, %v1915_v51  ;;  %v2003_v14 = vld [vmem:[%s2339_s3 + $0x2e8] sm:$0xff] }
  0x2e   :  { %v1969_v56 = vld [vmem:[%s2340_s0 + $0x10] sm:$0xff]  ;;  %782 = vmatmul.mubr.f32.vlgmr.msra.gmra.mrb[0].mxu1 %v479_v55  ;;  %v2024_v30 = vld [vmem:[%s2339_s3 + $0x260] sm:$0xff]  ;;  %v2029_v31 = vld [vmem:[%s2339_s3 + $0x268] sm:$0xff] }
  0x2f   :  { %v1982_v7 = vld [vmem:[%s2341_s1 + $0x10] sm:$0xff]  ;;  %1278 = vmatpush3.bf16.msra.mxu1 %v1277_v48  ;;  %1250 = vmatpush3.bf16.msra.mxu0 %v1249_v49  ;;  %v27_v21 = vunpack.c.h.bf16 %v1969_v56  ;;  %v2034_v32 = vld [vmem:[%s2339_s3 + $0x3e0] sm:$0xff]  ;;  %v2045_v38 = vld [vmem:[%s2339_s3 + $0x3e8] sm:$0xff]  ;;  %v26_v49 = vunpack.c.l.bf16 %v1969_v56 }
  0x30   :  { %v1987_v8 = vld [vmem:[%s2342_s2 + $0x10] sm:$0xff]  ;;  %1280 = vmatprep.subr.bf16.mxu1 %v1279_v50  ;;  %1252 = vmatprep.subr.bf16.mxu0 %v1251_v58  ;;  %v42_v22 = vunpack.c.h.bf16 %v1982_v7  ;;  %v2055_v48 = vld [vmem:[%s2339_s3 + $0x2f8] sm:$0xff]  ;;  %v2127_v43 = vld [vmem:[%s2339_s3 + $0x368] sm:$0xff] }
  0x31   :  { %v80_v23 = vrot.slane %v1987_v8, %v1563_v18  ;;  %v180_v24 = vrot.slane %v1987_v8, %v1567_v20  ;;  %v280_v28 = vrot.slane %v1987_v8, %v1588_v26  ;;  %v400_v33 = vrot.slane %v1987_v8, %v1590_v27  ;;  %v2050_v42 = vld [vmem:[%s2339_s3 + $0x2f0] sm:$0xff] }
  0x32   :  { %v76_v34 = vrot.slane %v1987_v8, %v1546_v13  ;;  %v176_v37 = vrot.slane %v1987_v8, %v1565_v19  ;;  %v372_v58 = vmul.f32 %v42_v22, %v27_v21  ;;  %v276_v56 = vrot.slane %v1987_v8, %v1586_v25  ;;  %v2132_v44 = vld [vmem:[%s2339_s3 + $0x270] sm:$0xff] }
  0x33   :  { %1282 = vmatpush3.bf16.msra.mxu1 %v1281_v57  ;;  %1254 = vmatpush3.bf16.msra.mxu0 %v1253_v59  ;;  %v130_v50 = vrot.slane %v80_v23, %v1546_v13  ;;  %v230_v55 = vrot.slane %v180_v24, %v1565_v19  ;;  %v330_v57 = vrot.slane %v280_v28, %v1586_v25  ;;  %v2070_v23 = vld [vmem:[%s2340_s0 + $0x18] sm:$0xff]  ;;  %v41_v24 = vunpack.c.l.bf16 %v1982_v7 }
  0x34   :  { %1284 = vmatprep.subr.bf16.mxu1 %v1283_v63  ;;  %1256 = vmatprep.subr.bf16.mxu0 %v1255_v1  ;;  %v450_v59 = vrot.slane %v400_v33, %v1634_v41  ;;  %v126_v17 = vrot.slane %v76_v34, %v1546_v13  ;;  %v2075_v63 = vld [vmem:[%s2341_s1 + $0x18] sm:$0xff]  ;;  %v226_v28 = vrot.slane %v176_v37, %v1565_v19  ;;  %v29_v29 = vunpack.c.h.bf16 %v2070_v23 }
  0x35   :  { %v152_v16 = vmul.f32 %v130_v50, %v27_v21  ;;  %v352_v15 = vmul.f32 %v330_v57, %v42_v22  ;;  %v2080_v1 = vld [vmem:[%s2342_s2 + $0x18] sm:$0xff]  ;;  %v396_v57 = vrot.slane %v1987_v8, %v1634_v41  ;;  %v44_v21 = vunpack.c.h.bf16 %v2075_v63 }
  0x36   :  { %v472_v34 = vmul.f32 %v450_v59, %v372_v58  ;;  %v151_v50 = vmul.f32 %v126_v17, %v26_v49  ;;  %v88_v22 = vrot.slane %v2080_v1, %v1563_v18  ;;  %v326_v37 = vrot.slane %v276_v56, %v1586_v25  ;;  %v2150_v58 = vld [vmem:[%s2339_s3 + $0x3f8] sm:$0xff] }
  0x37   :  { %1286 = vmatpush3.bf16.msra.mxu1 %v1285_v0  ;;  %1258 = vmatpush3.bf16.msra.mxu0 %v1257_v53  ;;  %v252_v33 = vadd.f32 %v230_v55, %v152_v16  ;;  %v188_v0 = vrot.slane %v2080_v1, %v1567_v20  ;;  %v288_v53 = vrot.slane %v2080_v1, %v1588_v26  ;;  %v43_v55 = vunpack.c.l.bf16 %v2075_v63 }
  0x38   :  { %1288 = vmatprep.subr.bf16.mxu1 %v1287_v3  ;;  %1260 = vmatprep.subr.bf16.mxu0 %v1259_v5  ;;  %v371_v3 = vmul.f32 %v41_v24, %v26_v49  ;;  %v138_v5 = vrot.slane %v88_v22, %v1546_v13  ;;  %v374_v8 = vmul.f32 %v44_v21, %v29_v29  ;;  %v28_v35 = vunpack.c.l.bf16 %v2070_v23 }
  0x39   :  { %v362_v7 = vadd.f32 %v352_v15, %v252_v33  ;;  %v408_v16 = vrot.slane %v2080_v1, %v1590_v27  ;;  %v251_v17 = vadd.f32 %v226_v28, %v151_v50  ;;  %v238_v49 = vrot.slane %v188_v0, %v1565_v19  ;;  %v631_v28 = vld [vmem:[%s2339_s3 + $0x480] sm:$0xff]  ;;  %v632_v33 = vld [vmem:[%s2339_s3 + $0x488] sm:$0xff]  ;;  %v633_v0 = vld [vmem:[%s2339_s3 + $0x490] sm:$0xff] }
  0x3a   :  { %v154_v36 = vmul.f32 %v138_v5, %v29_v29  ;;  %v338_v39 = vrot.slane %v288_v53, %v1586_v25  ;;  %v351_v51 = vmul.f32 %v326_v37, %v41_v24  ;;  %v446_v52 = vrot.slane %v396_v57, %v1634_v41  ;;  %v2145_v29 = vld [vmem:[%s2339_s3 + $0x3f0] sm:$0xff]  ;;  %v615_v50 = vld [vmem:[%s2339_s3 + $0x400] sm:$0xff]  ;;  %v616_v57 = vld [vmem:[%s2339_s3 + $0x408] sm:$0xff] }
  0x3b   :  { %1290 = vmatpush3.bf16.msra.mxu1 %v1289_v4  ;;  %1262 = vmatpush3.bf16.msra.mxu0 %v1261_v6  ;;  %v482_v15 = vadd.f32 %v472_v34, %v362_v7  ;;  %v458_v40 = vrot.slane %v408_v16, %v1634_v41  ;;  %v2122_v4 = vld [vmem:[%s2339_s3 + $0x360] sm:$0xff]  ;;  %v84_v6 = vrot.slane %v2080_v1, %v1546_v13  ;;  %v2163_v24 = vld [vmem:[%s2339_s3 + $0x370] sm:$0xff] }
  0x3c   :  { %1292 = vmatprep.subr.bf16.mxu1 %v1291_v9  ;;  %1264 = vmatprep.subr.bf16.mxu0 %v1263_v11  ;;  %v184_v9 = vrot.slane %v2080_v1, %v1565_v19  ;;  %v566_v11 = vld [vmem:[%s2339_s3 + $0x278] sm:$0xff]  ;;  %v254_v59 = vadd.f32 %v238_v49, %v154_v36  ;;  %v354_v56 = vmul.f32 %v338_v39, %v44_v21  ;;  %v2201_v53 = vld [vmem:[%s2340_s0 + $0x20] sm:$0xff] }
  0x3d   :  { %851 = vmatprep.mubr.f32.mxu0 %v482_v15  ;;  %v474_v23 = vmul.f32 %v458_v40, %v374_v8  ;;  %v284_v63 = vrot.slane %v2080_v1, %v1586_v25  ;;  %v2344_v22 = vpack.c.bf16 %v1936_v60, %v1925_v54  ;;  %v2168_v21 = vld [vmem:[%s2339_s3 + $0x378] sm:$0xff]  ;;  %v134_v45 = vrot.slane %v84_v6, %v1546_v13  ;;  %v2206_v5 = vld [vmem:[%s2341_s1 + $0x20] sm:$0xff] }
  0x3e   :  { %v234_v46 = vrot.slane %v184_v9, %v1565_v19  ;;  %v373_v54 = vmul.f32 %v43_v55, %v28_v35  ;;  %v2345_v60 = vpack.c.bf16 %v1946_v62, %v1941_v61  ;;  %v364_v34 = vadd.f32 %v354_v56, %v254_v59  ;;  %v634_v15 = vld [vmem:[%s2339_s3 + $0x498] sm:$0xff] }
  0x3f   :  { %1294 = vmatpush3.bf16.msra.mxu1 %v1293_v10  ;;  %1266 = vmatpush3.bf16.msra.mxu0 %v2344_v22  ;;  %v2346_v10 = vpack.c.bf16 %v2003_v14, %v1998_v12  ;;  %v334_v61 = vrot.slane %v284_v63, %v1586_v25  ;;  %v404_v62 = vrot.slane %v2080_v1, %v1634_v41  ;;  %v2221_v49 = vld [vmem:[%s2339_s3 + $0x418] sm:$0xff] }
  0x40   :  { %1296 = vmatprep.subr.bf16.mxu1 %v2345_v60  ;;  %v1301_v12 = vpack.c.bf16 %v2127_v43, %v2122_v4  ;;  %v361_v14 = vadd.f32 %v351_v51, %v251_v17  ;;  %v471_v7 = vmul.f32 %v446_v52, %v371_v3  ;;  %v153_v37 = vmul.f32 %v134_v45, %v28_v35  ;;  %v2216_v17 = vld [vmem:[%s2339_s3 + $0x410] sm:$0xff]  ;;  %v635_v4 = vld [vmem:[%s2339_s3 + $0x4a0] sm:$0xff] }
  0x41   :  { %1268 = vmatprep.subr.bf16.mxu0 %v2346_v10  ;;  %v1273_v1 = vpack.c.bf16 %v566_v11, %v2132_v44  ;;  %v484_v8 = vadd.f32 %v474_v23, %v364_v34  ;;  %v353_v16 = vmul.f32 %v334_v61, %v43_v55  ;;  %v454_v3 = vrot.slane %v404_v62, %v1634_v41  ;;  %v620_v34 = vld [vmem:[%s2339_s3 + $0x428] sm:$0xff] }
  0x42   :  { %v2347_v35 = vpack.c.bf16 %v1964_v47, %v1959_v2  ;;  %v2348_v55 = vpack.c.bf16 %v2029_v31, %v2024_v30  ;;  %v1303_v36 = vpack.c.bf16 %v2150_v58, %v2145_v29  ;;  %v1305_v39 = vpack.c.bf16 %v2168_v21, %v2163_v24  ;;  %v636_v2 = vld [vmem:[%s2339_s3 + $0x4a8] sm:$0xff]  ;;  %v51_v47 = vld [vmem:[%s2342_s2 + $0x20] sm:$0xff] }
  0x43   :  { %v253_v40 = vadd.f32 %v234_v46, %v153_v37  ;;  %v2349_v30 = vpack.c.bf16 %v2045_v38, %v2034_v32  ;;  %v2350_v31 = vpack.c.bf16 %v2055_v48, %v2050_v42  ;;  %v1307_v43 = vpack.c.bf16 %v632_v33, %v631_v28  ;;  %921 = vmatprep.mubr.f32.mxu1 %v484_v8  ;;  %v619_v33 = vld [vmem:[%s2339_s3 + $0x420] sm:$0xff] }
  0x44   :  { %1298 = vmatpush3.bf16.msra.mxu1 %v2347_v35  ;;  %1270 = vmatpush3.bf16.msra.mxu0 %v2348_v55  ;;  %v473_v44 = vmul.f32 %v454_v3, %v373_v54  ;;  %v31_v51 = vunpack.c.h.bf16 %v2201_v53  ;;  %v46_v52 = vunpack.c.h.bf16 %v2206_v5  ;;  %v481_v6 = vadd.f32 %v471_v7, %v361_v14  ;;  %v639_v3 = vld [vmem:[%s2339_s3 + $0x4c0] sm:$0xff] }
  0x45   :  { %1300 = vmatprep.subr.bf16.mxu1 %v2349_v30  ;;  %1272 = vmatprep.subr.bf16.mxu0 %v2350_v31  ;;  %v1309_v9 = vpack.c.bf16 %v616_v57, %v615_v50  ;;  %v363_v11 = vadd.f32 %v353_v16, %v253_v40  ;;  %v45_v29 = vunpack.c.l.bf16 %v2206_v5  ;;  %v1311_v58 = vpack.c.bf16 %v634_v15, %v633_v0  ;;  %v621_v5 = vld [vmem:[%s2339_s3 + $0x430] sm:$0xff]  ;;  %v623_v55 = vld [vmem:[%s2339_s3 + $0x440] sm:$0xff]  ;;  %v642_v40 = vld [vmem:[%s2339_s3 + $0x4d8] sm:$0xff] }
  0x46   :  { %v1313_v32 = vpack.c.bf16 %v2221_v49, %v2216_v17  ;;  %v1315_v38 = vpack.c.bf16 %v636_v2, %v635_v4  ;;  %v96_v42 = vrot.slane %v51_v47, %v1563_v18  ;;  %v196_v59 = vrot.slane %v51_v47, %v1567_v20  ;;  %v626_v30 = vld [vmem:[%s2339_s3 + $0x458] sm:$0xff]  ;;  %v643_v31 = vld [vmem:[%s2339_s3 + $0x4e0] sm:$0xff] }
  0x47   :  { %v483_v48 = vadd.f32 %v473_v44, %v363_v11  ;;  %v296_v56 = vrot.slane %v51_v47, %v1588_v26  ;;  %v30_v23 = vunpack.c.l.bf16 %v2201_v53  ;;  %v376_v22 = vmul.f32 %v46_v52, %v31_v51  ;;  %v646_v11 = vld [vmem:[%s2339_s3 + $0x4f8] sm:$0xff] }
  0x48   :  { %1302 = vmatpush3.bf16.msra.mxu1 %v1301_v12  ;;  %1274 = vmatpush3.bf16.msra.mxu0 %v1273_v1  ;;  %v146_v63 = vrot.slane %v96_v42, %v1546_v13  ;;  %v416_v24 = vrot.slane %v51_v47, %v1590_v27  ;;  %v246_v21 = vrot.slane %v196_v59, %v1565_v19  ;;  %v622_v1 = vld [vmem:[%s2339_s3 + $0x438] sm:$0xff] }
  0x49   :  { %1304 = vmatprep.subr.bf16.mxu1 %v1303_v36  ;;  %1308 = vmatprep.subr.bf16.mxu0 %v1307_v43  ;;  %v346_v18 = vrot.slane %v296_v56, %v1586_v25  ;;  %v92_v28 = vrot.slane %v51_v47, %v1546_v13  ;;  %v192_v45 = vrot.slane %v51_v47, %v1565_v19  ;;  %v624_v36 = vld [vmem:[%s2339_s3 + $0x448] sm:$0xff] }
  0x4a   :  { %v156_v20 = vmul.f32 %v146_v63, %v31_v51  ;;  %v466_v26 = vrot.slane %v416_v24, %v1634_v41  ;;  %v292_v46 = vrot.slane %v51_v47, %v1586_v25  ;;  %v375_v54 = vmul.f32 %v45_v29, %v30_v23  ;;  %v644_v43 = vld [vmem:[%s2339_s3 + $0x4e8] sm:$0xff] }
  0x4b   :  { %852 = vmatmul.mubr.f32.vlgmr.msra.gmra.mrb[2].mxu0 %v481_v6  ;;  %v356_v60 = vmul.f32 %v346_v18, %v46_v52  ;;  %v142_v27 = vrot.slane %v92_v28, %v1546_v13  ;;  %v242_v10 = vrot.slane %v192_v45, %v1565_v19  ;;  %v412_v62 = vrot.slane %v51_v47, %v1634_v41  ;;  %v637_v13 = vld [vmem:[%s2339_s3 + $0x4b0] sm:$0xff]  ;;  %v638_v19 = vld [vmem:[%s2339_s3 + $0x4b8] sm:$0xff]  ;;  %v627_v52 = vld [vmem:[%s2339_s3 + $0x460] sm:$0xff] }
  0x4c   :  { %1306 = vmatpush3.bf16.msra.mxu1 %v1305_v39  ;;  %1310 = vmatpush3.bf16.msra.mxu0 %v1309_v9  ;;  %v256_v50 = vadd.f32 %v246_v21, %v156_v20  ;;  %v476_v57 = vmul.f32 %v466_v26, %v376_v22  ;;  %v342_v61 = vrot.slane %v292_v46, %v1586_v25  ;;  %v641_v39 = vld [vmem:[%s2339_s3 + $0x4d0] sm:$0xff]  ;;  %v628_v6 = vld [vmem:[%s2339_s3 + $0x468] sm:$0xff] }
  0x4d   :  { %1312 = vmatprep.subr.bf16.mxu0 %v1311_v58  ;;  %v155_v12 = vmul.f32 %v142_v27, %v30_v23  ;;  %v462_v37 = vrot.slane %v412_v62, %v1634_v41  ;;  %v1317_v0 = vpack.c.bf16 %v620_v34, %v619_v33  ;;  %v1319_v25 = vpack.c.bf16 %v638_v19, %v637_v13  ;;  %v640_v41 = vld [vmem:[%s2339_s3 + $0x4c8] sm:$0xff]  ;;  %v625_v47 = vld [vmem:[%s2339_s3 + $0x450] sm:$0xff] }
  0x4e   :  { %v366_v14 = vadd.f32 %v356_v60, %v256_v50  ;;  %v355_v7 = vmul.f32 %v342_v61, %v45_v29  ;;  %v1321_v17 = vpack.c.bf16 %v622_v1, %v621_v5  ;;  %v1323_v35 = vpack.c.bf16 %v640_v41, %v639_v3  ;;  %v645_v9 = vld [vmem:[%s2339_s3 + $0x4f0] sm:$0xff] }
  0x4f   :  { %922 = vmatmul.mubr.f32.vlgmr.msra.gmra.mrb[2].mxu1 %v483_v48  ;;  %v255_v53 = vadd.f32 %v242_v10, %v155_v12  ;;  %v475_v16 = vmul.f32 %v462_v37, %v375_v54  ;;  %v1325_v4 = vpack.c.bf16 %v624_v36, %v623_v55  ;;  %v1327_v2 = vpack.c.bf16 %v642_v40, %v641_v39 }
  0x50   :  { %1314 = vmatpush3.bf16.msra.mxu0 %v1313_v32  ;;  %v486_v8 = vadd.f32 %v476_v57, %v366_v14  ;;  %v1329_v44 = vpack.c.bf16 %v626_v30, %v625_v47  ;;  %v1331_v51 = vpack.c.bf16 %v644_v43, %v643_v31  ;;  %v1333_v29 = vpack.c.bf16 %v628_v6, %v627_v52  ;;  %v629_v32 = vld [vmem:[%s2339_s3 + $0x470] sm:$0xff] }
  0x51   :  { %1316 = vmatprep.subr.bf16.mxu0 %v1315_v38  ;;  %v365_v15 = vadd.f32 %v355_v7, %v255_v53  ;;  %v1335_v58 = vpack.c.bf16 %v646_v11, %v645_v9  ;;  %v630_v38 = vld [vmem:[%s2339_s3 + $0x478] sm:$0xff] }
  0x52   :  { %991 = vmatprep.mubr.f32.mxu0 %v486_v8  ;;  %v1337_v42 = vpack.c.bf16 %v630_v38, %v629_v32 }
  0x53   :  { %v485_v49 = vadd.f32 %v475_v16, %v365_v15 }
  0x54   :  { %1318 = vmatpush3.bf16.msra.mxu0 %v1317_v0 }
  0x55   :  { %1320 = vmatprep.subr.bf16.mxu0 %v1319_v25 }
  0x58   :  { %1322 = vmatpush3.bf16.msra.mxu0 %v1321_v17 }
  0x59   :  { %1324 = vmatprep.subr.bf16.mxu0 %v1323_v35 }
  0x5c   :  { %1326 = vmatpush3.bf16.msra.mxu0 %v1325_v4 }
  0x5d   :  { %1328 = vmatprep.subr.bf16.mxu0 %v1327_v2 }
  0x60   :  { %1330 = vmatpush3.bf16.msra.mxu0 %v1329_v44 }
  0x61   :  { %1332 = vmatprep.subr.bf16.mxu0 %v1331_v51 }
  0x64   :  { %1334 = vmatpush3.bf16.msra.mxu0 %v1333_v29 }
  0x65   :  { %1336 = vmatprep.subr.bf16.mxu0 %v1335_v58 }
  0x68   :  { %1338 = vmatpush3.bf16.msra.mxu0 %v1337_v42 }
  0x6b   :  { %992 = vmatmul.mubr.f32.vlgmr.msra.gmra.mrb[4].mxu0 %v485_v49 }
  0xfd   :  { %v1036_v48 = vpop.f32.mrb[0].mxu0 }
  0xfe   :  { %v1037_v59 = vpop.f32.mrb[1].mxu0 }
  0xff   :  { %v1038_v56 = vadd.f32 %v1037_v59, %v1036_v48 }
 0x101   :  { %v1071_v23 = vpop.f32.mrb[0].mxu1 }
 0x102   :  { %v1072_v63 = vpop.f32.mrb[1].mxu1 }
 0x103   :  { %v1073_v22 = vadd.f32 %v1072_v63, %v1071_v23 }
 0x105   :  { %v784_v24 = vadd.f32 %v1073_v22, %v1038_v56 }
 0x11e   :  { %v1106_v21 = vpop.f32.mrb[2].mxu0 }
 0x11f   :  { %v1107_v18 = vpop.f32.mrb[3].mxu0 }
 0x120   :  { %v1108_v28 = vadd.f32 %v1107_v18, %v1106_v21 }
 0x122   :  { %v854_v45 = vadd.f32 %v1108_v28, %v784_v24  ;;  %v1141_v20 = vpop.f32.mrb[2].mxu1 }
 0x123   :  { %v1142_v26 = vpop.f32.mrb[3].mxu1 }
 0x124   :  { %v1143_v46 = vadd.f32 %v1142_v26, %v1141_v20 }
 0x126   :  { %v924_v54 = vadd.f32 %v1143_v46, %v854_v45 }
 0x13e   :  { %v1176_v60 = vpop.f32.mrb[4].mxu0 }
 0x13f   :  { %v1177_v27 = vpop.f32.mrb[5].mxu0 }
 0x140   :  { %v1178_v10 = vadd.f32 %v1177_v27, %v1176_v60 }
 0x142   :  { %v994_v33 = vadd.f32 %v1178_v10, %v924_v54 }
 0x144   :  { %v997_v34 = vmul.f32 0.15384616, %v994_v33 }
 0x146   :  { %999 = vst.msk [vmem:[%s2343_s4] sm:$0xff] %vm998_vm0, %v997_v34 }

</bundles_post_ra>
